<compile_context>
chip_gen: v5e
topology: v5e:2x2
jax: 0.10.0
libtpu: 0.0.40
codegen_flags: <defaults>
</compile_context>

<pallas_src>
import jax
import jax.numpy as jnp
from jax import lax
from jax.experimental import pallas as pl
from jax.experimental.pallas import tpu as pltpu


def _round_up(x, m):
    return (x + m - 1) // m * m


# ---------------------------------------------------------------------------
# Kernel 1: transposed conv matmul   out[O, TM] = W[O, K] @ colT[K, TM] (+b, ReLU)
# ---------------------------------------------------------------------------
def _conv_matmul_kernel(w_ref, x_ref, b_ref, o_ref):
    acc = jnp.dot(w_ref[...], x_ref[...], preferred_element_type=jnp.float32)
    acc = acc + b_ref[...]              # (O, 1) broadcast along lanes, f32
    acc = jnp.maximum(acc, 0.0)
    o_ref[...] = acc.astype(o_ref.dtype)


def conv_matmul_T(w2d, colT, b, *, tm=512, out_dtype=jnp.bfloat16):
    """relu(w2d[O,K] @ colT[K,M] + b[:,None]); grid tiled over the M lane axis."""
    O, K = w2d.shape
    K2, M = colT.shape
    assert K == K2
    tm = min(tm, _round_up(M, 128))
    Mp = _round_up(M, tm)
    if Mp != M:
        colT = jnp.pad(colT, ((0, 0), (0, Mp - M)))
    out = pl.pallas_call(
        _conv_matmul_kernel,
        grid=(Mp // tm,),
        out_shape=jax.ShapeDtypeStruct((O, Mp), out_dtype),
        in_specs=[
            pl.BlockSpec((O, K), lambda i: (0, 0)),    # weight: VMEM-resident
            pl.BlockSpec((K, tm), lambda i: (0, i)),   # streamed im2col tiles
            pl.BlockSpec((O, 1), lambda i: (0, 0)),    # bias: VMEM-resident
        ],
        out_specs=pl.BlockSpec((O, tm), lambda i: (0, i)),
        compiler_params=pltpu.CompilerParams(
            dimension_semantics=("parallel",)),
    )(w2d, colT, b.reshape(O, 1))
    return out[:, :M]


def _im2col_T(x_cnhw, k, s):
    """(C,B,H,W) -> (C*k*k, B*Ho*Wo); feature order (c,kh,kw) == OIHW flatten."""
    C, B, H, W = x_cnhw.shape
    Ho = (H - k) // s + 1
    Wo = (W - k) // s + 1
    cols = []
    for kh in range(k):
        for kw in range(k):
            cols.append(
                x_cnhw[:, :, kh:kh + s * Ho:s, kw:kw + s * Wo:s])  # (C,B,Ho,Wo)
    colT = jnp.stack(cols, axis=1).reshape(C * k * k, B * Ho * Wo)
    return colT, Ho, Wo


def conv2d_relu(x_cnhw, w, b, stride):
    """PyTorch Conv2d (no padding) + ReLU, channel-major (CNHW) in/out."""
    # TODO(synk): pull the im2col patch gather into the Pallas pipeline
    # (Element/ds index_map or manual make_async_copy) so the expanded colT
    # matrix never materializes in HBM.
    C, B, H, W = x_cnhw.shape
    O, Cw, k, _ = w.shape
    assert C == Cw
    colT, Ho, Wo = _im2col_T(x_cnhw, k, stride)
    w2d = w.reshape(O, C * k * k).astype(jnp.bfloat16)   # OIHW flatten, as stored
    out = conv_matmul_T(w2d, colT, b)                    # (O, B*Ho*Wo) bf16
    return out.reshape(O, B, Ho, Wo)


# ---------------------------------------------------------------------------
# Kernel 2: fused MLP head   q = relu(x @ w1^T + b1) @ w2^T + b2
# ---------------------------------------------------------------------------
def _mlp_kernel(x_ref, w1_ref, b1_ref, w2_ref, b2_ref, o_ref):
    h = lax.dot_general(
        x_ref[...], w1_ref[...],
        dimension_numbers=(((1,), (1,)), ((), ())),
        preferred_element_type=jnp.float32)
    h = jnp.maximum(h + b1_ref[...], 0.0)
    q = lax.dot_general(
        h.astype(w2_ref.dtype), w2_ref[...],
        dimension_numbers=(((1,), (1,)), ((), ())),
        preferred_element_type=jnp.float32)
    o_ref[...] = (q + b2_ref[...]).astype(o_ref.dtype)


def mlp_head(x, w1, b1, w2, b2, *, tm=256):
    """Fused Linear(3136,512)+ReLU+Linear(512,out); weights read as stored."""
    B, K1 = x.shape
    N1, K1b = w1.shape
    assert K1 == K1b
    N2, N1b = w2.shape
    assert N1 == N1b
    N2p = _round_up(N2, 128)                     # lane-dense output, slice after
    w2p = jnp.pad(w2, ((0, N2p - N2), (0, 0))).astype(jnp.bfloat16)
    b2p = jnp.pad(b2, (0, N2p - N2)).reshape(1, N2p)
    tm = min(tm, _round_up(B, 8))
    Bp = _round_up(B, tm)
    xp = jnp.pad(x, ((0, Bp - B), (0, 0))).astype(jnp.bfloat16)
    out = pl.pallas_call(
        _mlp_kernel,
        grid=(Bp // tm,),
        out_shape=jax.ShapeDtypeStruct((Bp, N2p), jnp.float32),
        in_specs=[
            pl.BlockSpec((tm, K1), lambda i: (i, 0)),    # batch-row tiles
            pl.BlockSpec((N1, K1), lambda i: (0, 0)),    # fc1 weight: resident
            pl.BlockSpec((1, N1), lambda i: (0, 0)),
            pl.BlockSpec((N2p, N1), lambda i: (0, 0)),   # fc2 weight: resident
            pl.BlockSpec((1, N2p), lambda i: (0, 0)),
        ],
        out_specs=pl.BlockSpec((tm, N2p), lambda i: (i, 0)),
        compiler_params=pltpu.CompilerParams(
            dimension_semantics=("parallel",)),
    )(xp, w1.astype(jnp.bfloat16), b1.reshape(1, N1), w2p, b2p)
    return out[:B, :N2]


# ---------------------------------------------------------------------------
# Model
# ---------------------------------------------------------------------------
def dqn_forward(params, x):
    # x: (B, input_dim, 84, 84) float32, NCHW (PyTorch convention)
    B = x.shape[0]
    h = x.astype(jnp.bfloat16).transpose(1, 0, 2, 3)                    # CNHW
    h = conv2d_relu(h, params["conv1_w"], params["conv1_b"], stride=4)  # (32,B,20,20)
    h = conv2d_relu(h, params["conv2_w"], params["conv2_b"], stride=2)  # (64,B,9,9)
    h = conv2d_relu(h, params["conv3_w"], params["conv3_b"], stride=1)  # (64,B,7,7)
    feat = h.transpose(1, 0, 2, 3).reshape(B, -1)    # (B,3136) in (c,h,w) order
    q = mlp_head(feat, params["fc1_w"], params["fc1_b"],
                 params["fc2_w"], params["fc2_b"])
    return q


def _uniform_init(key, shape, fan_in):
    bound = 1.0 / jnp.sqrt(jnp.float32(fan_in))
    return jax.random.uniform(key, shape, jnp.float32, -bound, bound)


def init_dqn_params(key, input_dim, output_dim):
    ks = jax.random.split(key, 10)
    p = {}
    p["conv1_w"] = _uniform_init(ks[0], (32, input_dim, 8, 8), input_dim * 64)
    p["conv1_b"] = _uniform_init(ks[1], (32,), input_dim * 64)
    p["conv2_w"] = _uniform_init(ks[2], (64, 32, 4, 4), 32 * 16)
    p["conv2_b"] = _uniform_init(ks[3], (64,), 32 * 16)
    p["conv3_w"] = _uniform_init(ks[4], (64, 64, 3, 3), 64 * 9)
    p["conv3_b"] = _uniform_init(ks[5], (64,), 64 * 9)
    p["fc1_w"] = _uniform_init(ks[6], (512, 3136), 3136)
    p["fc1_b"] = _uniform_init(ks[7], (512,), 3136)
    p["fc2_w"] = _uniform_init(ks[8], (output_dim, 512), 512)
    p["fc2_b"] = _uniform_init(ks[9], (output_dim,), 512)
    return p


def dqn_reference(params, x):
    """Pure-JAX f32 reference with PyTorch semantics (for sanity check)."""
    def conv(h, w, b, s):
        y = lax.conv_general_dilated(
            h, w, (s, s), "VALID",
            dimension_numbers=("NCHW", "OIHW", "NCHW"))
        return jnp.maximum(y + b[None, :, None, None], 0.0)
    h = conv(x, params["conv1_w"], params["conv1_b"], 4)
    h = conv(h, params["conv2_w"], params["conv2_b"], 2)
    h = conv(h, params["conv3_w"], params["conv3_b"], 1)
    h = h.reshape(h.shape[0], -1)
    h = jnp.maximum(h @ params["fc1_w"].T + params["fc1_b"], 0.0)
    return h @ params["fc2_w"].T + params["fc2_b"]


if __name__ == "__main__":
    input_dim, output_dim, batch = 4, 6, 2
    key = jax.random.PRNGKey(0)
    kx, kp = jax.random.split(key)
    # 84x84 spatial is forced by the module: Linear(3136, 512) == 64 * 7 * 7.
    x = jax.random.normal(kx, (batch, input_dim, 84, 84), dtype=jnp.float32)
    params = init_dqn_params(kp, input_dim, output_dim)

    fwd = jax.jit(dqn_forward)
    q = jax.block_until_ready(fwd(params, x))
    assert q.shape == (batch, output_dim)
    assert q.dtype == jnp.float32

    # bf16-tolerant sanity check against the f32 reference.
    q_ref = dqn_reference(params, x)
    max_err = float(jnp.max(jnp.abs(q - q_ref)))
    assert max_err < 5e-2, f"max abs error {max_err}"

    print("KERNEL_OK")
</pallas_src>

<mosaic_0001>
module attributes {stable_mosaic.version = 11 : i64} {
  func.func @_conv_matmul_kernel(%arg0: i32, %arg1: memref<32x256xbf16, #tpu.memory_space<vmem>>, %arg2: memref<256x512xbf16, #tpu.memory_space<vmem>>, %arg3: memref<32x1xf32, #tpu.memory_space<vmem>>, %arg4: memref<32x512xbf16, #tpu.memory_space<vmem>>) attributes {dimension_semantics = [#tpu.dimension_semantics<parallel>], iteration_bounds = array<i64: 2>, scalar_prefetch = 0 : i64, scratch_operands = 0 : i64, tpu.core_type = #tpu.core_type<tc>, window_params = [{pipeline_mode = #tpu.pipeline_mode<synchronous>, transform_indices = @transform_0, window_bounds = array<i64: 32, 256>}, {transform_indices = @transform_1, window_bounds = array<i64: 256, 512>}, {pipeline_mode = #tpu.pipeline_mode<synchronous>, transform_indices = @transform_2, window_bounds = array<i64: 32, 1>}, {transform_indices = @transform_3, window_bounds = array<i64: 32, 512>}]} {
    %c0 = arith.constant 0 : index
    %c0_0 = arith.constant 0 : index
    %0 = vector.load %arg1[%c0, %c0_0] : memref<32x256xbf16, #tpu.memory_space<vmem>>, vector<32x256xbf16>
    %c0_1 = arith.constant 0 : index
    %c0_2 = arith.constant 0 : index
    %1 = vector.load %arg2[%c0_1, %c0_2] : memref<256x512xbf16, #tpu.memory_space<vmem>>, vector<256x512xbf16>
    %cst = arith.constant dense<0.000000e+00> : vector<32x512xf32>
    %2 = tpu.matmul %0, %1, %cst {dimension_numbers = #tpu.dot_dimension_numbers<[1], [0], [0], [1], [0, 0, 1, 1], [], []>} : vector<32x256xbf16>, vector<256x512xbf16>, vector<32x512xf32> -> vector<32x512xf32>
    %c0_3 = arith.constant 0 : index
    %c0_4 = arith.constant 0 : index
    %3 = vector.load %arg3[%c0_3, %c0_4] : memref<32x1xf32, #tpu.memory_space<vmem>>, vector<32x1xf32>
    %4 = vector.broadcast %3 : vector<32x1xf32> to vector<32x512xf32>
    %5 = arith.addf %2, %4 : vector<32x512xf32>
    %cst_5 = arith.constant 0.000000e+00 : f32
    %6 = vector.broadcast %cst_5 : f32 to vector<32x512xf32>
    %7 = arith.maximumf %5, %6 : vector<32x512xf32>
    %8 = arith.truncf %7 : vector<32x512xf32> to vector<32x512xbf16>
    %c0_6 = arith.constant 0 : index
    %c0_7 = arith.constant 0 : index
    %9 = vector.load %arg4[%c0_6, %c0_7] : memref<32x512xbf16, #tpu.memory_space<vmem>>, vector<32x512xbf16>
    tpu.vector_store %arg4[%c0_6, %c0_7], %8 {strides = array<i32>} : memref<32x512xbf16, #tpu.memory_space<vmem>>, vector<32x512xbf16>,
    return
  }
  func.func @transform_0(%arg0: i32) -> (i32, i32) {
    %c0_i32 = arith.constant 0 : i32
    %c0_i32_0 = arith.constant 0 : i32
    %c0_i32_1 = arith.constant 0 : i32
    return %c0_i32, %c0_i32_0 : i32, i32
  }
  func.func @transform_1(%arg0: i32) -> (i32, i32) {
    %c0_i32 = arith.constant 0 : i32
    %c0_i32_0 = arith.constant 0 : i32
    return %c0_i32, %arg0 : i32, i32
  }
  func.func @transform_2(%arg0: i32) -> (i32, i32) {
    %c0_i32 = arith.constant 0 : i32
    %c0_i32_0 = arith.constant 0 : i32
    %c0_i32_1 = arith.constant 0 : i32
    return %c0_i32, %c0_i32_0 : i32, i32
  }
  func.func @transform_3(%arg0: i32) -> (i32, i32) {
    %c0_i32 = arith.constant 0 : i32
    %c0_i32_0 = arith.constant 0 : i32
    return %c0_i32, %arg0 : i32, i32
  }
}

module attributes {stable_mosaic.version = 11 : i64} {
  func.func @_conv_matmul_kernel(%arg0: i32, %arg1: memref<64x512xbf16, #tpu.memory_space<vmem>>, %arg2: memref<512x256xbf16, #tpu.memory_space<vmem>>, %arg3: memref<64x1xf32, #tpu.memory_space<vmem>>, %arg4: memref<64x256xbf16, #tpu.memory_space<vmem>>) attributes {dimension_semantics = [#tpu.dimension_semantics<parallel>], iteration_bounds = array<i64: 1>, scalar_prefetch = 0 : i64, scratch_operands = 0 : i64, tpu.core_type = #tpu.core_type<tc>, window_params = [{pipeline_mode = #tpu.pipeline_mode<synchronous>, transform_indices = @transform_0, window_bounds = array<i64: 64, 512>}, {transform_indices = @transform_1, window_bounds = array<i64: 512, 256>}, {pipeline_mode = #tpu.pipeline_mode<synchronous>, transform_indices = @transform_2, window_bounds = array<i64: 64, 1>}, {transform_indices = @transform_3, window_bounds = array<i64: 64, 256>}]} {
    %c0 = arith.constant 0 : index
    %c0_0 = arith.constant 0 : index
    %0 = vector.load %arg1[%c0, %c0_0] : memref<64x512xbf16, #tpu.memory_space<vmem>>, vector<64x512xbf16>
    %c0_1 = arith.constant 0 : index
    %c0_2 = arith.constant 0 : index
    %1 = vector.load %arg2[%c0_1, %c0_2] : memref<512x256xbf16, #tpu.memory_space<vmem>>, vector<512x256xbf16>
    %cst = arith.constant dense<0.000000e+00> : vector<64x256xf32>
    %2 = tpu.matmul %0, %1, %cst {dimension_numbers = #tpu.dot_dimension_numbers<[1], [0], [0], [1], [0, 0, 1, 1], [], []>} : vector<64x512xbf16>, vector<512x256xbf16>, vector<64x256xf32> -> vector<64x256xf32>
    %c0_3 = arith.constant 0 : index
    %c0_4 = arith.constant 0 : index
    %3 = vector.load %arg3[%c0_3, %c0_4] : memref<64x1xf32, #tpu.memory_space<vmem>>, vector<64x1xf32>
    %4 = vector.broadcast %3 : vector<64x1xf32> to vector<64x256xf32>
    %5 = arith.addf %2, %4 : vector<64x256xf32>
    %cst_5 = arith.constant 0.000000e+00 : f32
    %6 = vector.broadcast %cst_5 : f32 to vector<64x256xf32>
    %7 = arith.maximumf %5, %6 : vector<64x256xf32>
    %8 = arith.truncf %7 : vector<64x256xf32> to vector<64x256xbf16>
    %c0_6 = arith.constant 0 : index
    %c0_7 = arith.constant 0 : index
    %9 = vector.load %arg4[%c0_6, %c0_7] : memref<64x256xbf16, #tpu.memory_space<vmem>>, vector<64x256xbf16>
    tpu.vector_store %arg4[%c0_6, %c0_7], %8 {strides = array<i32>} : memref<64x256xbf16, #tpu.memory_space<vmem>>, vector<64x256xbf16>,
    return
  }
  func.func @transform_0(%arg0: i32) -> (i32, i32) {
    %c0_i32 = arith.constant 0 : i32
    %c0_i32_0 = arith.constant 0 : i32
    %c0_i32_1 = arith.constant 0 : i32
    return %c0_i32, %c0_i32_0 : i32, i32
  }
  func.func @transform_1(%arg0: i32) -> (i32, i32) {
    %c0_i32 = arith.constant 0 : i32
    %c0_i32_0 = arith.constant 0 : i32
    return %c0_i32, %arg0 : i32, i32
  }
  func.func @transform_2(%arg0: i32) -> (i32, i32) {
    %c0_i32 = arith.constant 0 : i32
    %c0_i32_0 = arith.constant 0 : i32
    %c0_i32_1 = arith.constant 0 : i32
    return %c0_i32, %c0_i32_0 : i32, i32
  }
  func.func @transform_3(%arg0: i32) -> (i32, i32) {
    %c0_i32 = arith.constant 0 : i32
    %c0_i32_0 = arith.constant 0 : i32
    return %c0_i32, %arg0 : i32, i32
  }
}

module attributes {stable_mosaic.version = 11 : i64} {
  func.func @_conv_matmul_kernel(%arg0: i32, %arg1: memref<64x576xbf16, #tpu.memory_space<vmem>>, %arg2: memref<576x128xbf16, #tpu.memory_space<vmem>>, %arg3: memref<64x1xf32, #tpu.memory_space<vmem>>, %arg4: memref<64x128xbf16, #tpu.memory_space<vmem>>) attributes {dimension_semantics = [#tpu.dimension_semantics<parallel>], iteration_bounds = array<i64: 1>, scalar_prefetch = 0 : i64, scratch_operands = 0 : i64, tpu.core_type = #tpu.core_type<tc>, window_params = [{pipeline_mode = #tpu.pipeline_mode<synchronous>, transform_indices = @transform_0, window_bounds = array<i64: 64, 576>}, {transform_indices = @transform_1, window_bounds = array<i64: 576, 128>}, {pipeline_mode = #tpu.pipeline_mode<synchronous>, transform_indices = @transform_2, window_bounds = array<i64: 64, 1>}, {transform_indices = @transform_3, window_bounds = array<i64: 64, 128>}]} {
    %c0 = arith.constant 0 : index
    %c0_0 = arith.constant 0 : index
    %0 = vector.load %arg1[%c0, %c0_0] : memref<64x576xbf16, #tpu.memory_space<vmem>>, vector<64x576xbf16>
    %c0_1 = arith.constant 0 : index
    %c0_2 = arith.constant 0 : index
    %1 = vector.load %arg2[%c0_1, %c0_2] : memref<576x128xbf16, #tpu.memory_space<vmem>>, vector<576x128xbf16>
    %cst = arith.constant dense<0.000000e+00> : vector<64x128xf32>
    %2 = tpu.matmul %0, %1, %cst {dimension_numbers = #tpu.dot_dimension_numbers<[1], [0], [0], [1], [0, 0, 1, 1], [], []>} : vector<64x576xbf16>, vector<576x128xbf16>, vector<64x128xf32> -> vector<64x128xf32>
    %c0_3 = arith.constant 0 : index
    %c0_4 = arith.constant 0 : index
    %3 = vector.load %arg3[%c0_3, %c0_4] : memref<64x1xf32, #tpu.memory_space<vmem>>, vector<64x1xf32>
    %4 = vector.broadcast %3 : vector<64x1xf32> to vector<64x128xf32>
    %5 = arith.addf %2, %4 : vector<64x128xf32>
    %cst_5 = arith.constant 0.000000e+00 : f32
    %6 = vector.broadcast %cst_5 : f32 to vector<64x128xf32>
    %7 = arith.maximumf %5, %6 : vector<64x128xf32>
    %8 = arith.truncf %7 : vector<64x128xf32> to vector<64x128xbf16>
    %c0_6 = arith.constant 0 : index
    %c0_7 = arith.constant 0 : index
    %9 = vector.load %arg4[%c0_6, %c0_7] : memref<64x128xbf16, #tpu.memory_space<vmem>>, vector<64x128xbf16>
    tpu.vector_store %arg4[%c0_6, %c0_7], %8 {strides = array<i32>} : memref<64x128xbf16, #tpu.memory_space<vmem>>, vector<64x128xbf16>,
    return
  }
  func.func @transform_0(%arg0: i32) -> (i32, i32) {
    %c0_i32 = arith.constant 0 : i32
    %c0_i32_0 = arith.constant 0 : i32
    %c0_i32_1 = arith.constant 0 : i32
    return %c0_i32, %c0_i32_0 : i32, i32
  }
  func.func @transform_1(%arg0: i32) -> (i32, i32) {
    %c0_i32 = arith.constant 0 : i32
    %c0_i32_0 = arith.constant 0 : i32
    return %c0_i32, %arg0 : i32, i32
  }
  func.func @transform_2(%arg0: i32) -> (i32, i32) {
    %c0_i32 = arith.constant 0 : i32
    %c0_i32_0 = arith.constant 0 : i32
    %c0_i32_1 = arith.constant 0 : i32
    return %c0_i32, %c0_i32_0 : i32, i32
  }
  func.func @transform_3(%arg0: i32) -> (i32, i32) {
    %c0_i32 = arith.constant 0 : i32
    %c0_i32_0 = arith.constant 0 : i32
    return %c0_i32, %arg0 : i32, i32
  }
}

module attributes {stable_mosaic.version = 11 : i64} {
  func.func @_mlp_kernel(%arg0: i32, %arg1: memref<8x3136xbf16, #tpu.memory_space<vmem>>, %arg2: memref<512x3136xbf16, #tpu.memory_space<vmem>>, %arg3: memref<1x512xf32, #tpu.memory_space<vmem>>, %arg4: memref<128x512xbf16, #tpu.memory_space<vmem>>, %arg5: memref<1x128xf32, #tpu.memory_space<vmem>>, %arg6: memref<8x128xf32, #tpu.memory_space<vmem>>) attributes {dimension_semantics = [#tpu.dimension_semantics<parallel>], iteration_bounds = array<i64: 1>, scalar_prefetch = 0 : i64, scratch_operands = 0 : i64, tpu.core_type = #tpu.core_type<tc>, window_params = [{transform_indices = @transform_0, window_bounds = array<i64: 8, 3136>}, {pipeline_mode = #tpu.pipeline_mode<synchronous>, transform_indices = @transform_1, window_bounds = array<i64: 512, 3136>}, {pipeline_mode = #tpu.pipeline_mode<synchronous>, transform_indices = @transform_2, window_bounds = array<i64: 1, 512>}, {pipeline_mode = #tpu.pipeline_mode<synchronous>, transform_indices = @transform_3, window_bounds = array<i64: 128, 512>}, {pipeline_mode = #tpu.pipeline_mode<synchronous>, transform_indices = @transform_4, window_bounds = array<i64: 1, 128>}, {transform_indices = @transform_5, window_bounds = array<i64: 8, 128>}]} {
    %c0 = arith.constant 0 : index
    %c0_0 = arith.constant 0 : index
    %0 = vector.load %arg1[%c0, %c0_0] : memref<8x3136xbf16, #tpu.memory_space<vmem>>, vector<8x3136xbf16>
    %c0_1 = arith.constant 0 : index
    %c0_2 = arith.constant 0 : index
    %1 = vector.load %arg2[%c0_1, %c0_2] : memref<512x3136xbf16, #tpu.memory_space<vmem>>, vector<512x3136xbf16>
    %cst = arith.constant dense<0.000000e+00> : vector<8x512xf32>
    %2 = tpu.matmul %0, %1, %cst {dimension_numbers = #tpu.dot_dimension_numbers<[1], [1], [0], [0], [0, 0, 1, 0], [], []>} : vector<8x3136xbf16>, vector<512x3136xbf16>, vector<8x512xf32> -> vector<8x512xf32>
    %c0_3 = arith.constant 0 : index
    %c0_4 = arith.constant 0 : index
    %3 = vector.load %arg3[%c0_3, %c0_4] : memref<1x512xf32, #tpu.memory_space<vmem>>, vector<1x512xf32>
    %4 = vector.broadcast %3 : vector<1x512xf32> to vector<8x512xf32>
    %5 = arith.addf %2, %4 : vector<8x512xf32>
    %cst_5 = arith.constant 0.000000e+00 : f32
    %6 = vector.broadcast %cst_5 : f32 to vector<8x512xf32>
    %7 = arith.maximumf %5, %6 : vector<8x512xf32>
    %8 = arith.truncf %7 : vector<8x512xf32> to vector<8x512xbf16>
    %c0_6 = arith.constant 0 : index
    %c0_7 = arith.constant 0 : index
    %9 = vector.load %arg4[%c0_6, %c0_7] : memref<128x512xbf16, #tpu.memory_space<vmem>>, vector<128x512xbf16>
    %cst_8 = arith.constant dense<0.000000e+00> : vector<8x128xf32>
    %10 = tpu.matmul %8, %9, %cst_8 {dimension_numbers = #tpu.dot_dimension_numbers<[1], [1], [0], [0], [0, 0, 1, 0], [], []>} : vector<8x512xbf16>, vector<128x512xbf16>, vector<8x128xf32> -> vector<8x128xf32>
    %c0_9 = arith.constant 0 : index
    %c0_10 = arith.constant 0 : index
    %11 = vector.load %arg5[%c0_9, %c0_10] : memref<1x128xf32, #tpu.memory_space<vmem>>, vector<1x128xf32>
    %12 = vector.broadcast %11 : vector<1x128xf32> to vector<8x128xf32>
    %13 = arith.addf %10, %12 : vector<8x128xf32>
    %c0_11 = arith.constant 0 : index
    %c0_12 = arith.constant 0 : index
    %14 = vector.load %arg6[%c0_11, %c0_12] : memref<8x128xf32, #tpu.memory_space<vmem>>, vector<8x128xf32>
    tpu.vector_store %arg6[%c0_11, %c0_12], %13 {strides = array<i32>} : memref<8x128xf32, #tpu.memory_space<vmem>>, vector<8x128xf32>,
    return
  }
  func.func @transform_0(%arg0: i32) -> (i32, i32) {
    %c0_i32 = arith.constant 0 : i32
    %c0_i32_0 = arith.constant 0 : i32
    return %arg0, %c0_i32 : i32, i32
  }
  func.func @transform_1(%arg0: i32) -> (i32, i32) {
    %c0_i32 = arith.constant 0 : i32
    %c0_i32_0 = arith.constant 0 : i32
    %c0_i32_1 = arith.constant 0 : i32
    return %c0_i32, %c0_i32_0 : i32, i32
  }
  func.func @transform_2(%arg0: i32) -> (i32, i32) {
    %c0_i32 = arith.constant 0 : i32
    %c0_i32_0 = arith.constant 0 : i32
    %c0_i32_1 = arith.constant 0 : i32
    return %c0_i32, %c0_i32_0 : i32, i32
  }
  func.func @transform_3(%arg0: i32) -> (i32, i32) {
    %c0_i32 = arith.constant 0 : i32
    %c0_i32_0 = arith.constant 0 : i32
    %c0_i32_1 = arith.constant 0 : i32
    return %c0_i32, %c0_i32_0 : i32, i32
  }
  func.func @transform_4(%arg0: i32) -> (i32, i32) {
    %c0_i32 = arith.constant 0 : i32
    %c0_i32_0 = arith.constant 0 : i32
    %c0_i32_1 = arith.constant 0 : i32
    return %c0_i32, %c0_i32_0 : i32, i32
  }
  func.func @transform_5(%arg0: i32) -> (i32, i32) {
    %c0_i32 = arith.constant 0 : i32
    %c0_i32_0 = arith.constant 0 : i32
    return %arg0, %c0_i32 : i32, i32
  }
}

</mosaic_0001>

<bundles_post_ra>
// kernel: dqn_forward.4
= control target key start
LH: loop header
LB: loop body
LE: loop exit
PB: predicated region body
PF: predicated region fallthrough
CT: control target
= control target key end

     0   :  { %s1455_s12 = smov 0   ;;  %s1457_s13 = smov 0   ;;  %s1871_s0 = inlined_call_operand.vmem [shape: bf16[32,256], index: 0, kind: input, shape index: {}]   ;;  %s1872_s1 = inlined_call_operand.vmem [shape: bf16[256,1024], index: 1, kind: input, shape index: {}]   ;;  %s1873_s2 = inlined_call_operand.vmem [shape: f32[32,1], index: 2, kind: input, shape index: {}]   ;;  %s1874_s3 = inlined_call_operand.vmem [shape: bf16[32,1024], index: 3, kind: output, shape index: {}]  }
   0x1   :  { %s1459_s14 = smov 0  }
   0x2 LB: > { %s1026_s15 = sadd.s32 4294967295, %s1432_s14   ;;  %s1472_s16 = sadd.s32 1, %s1432_s14   ;;  %s1432_s14 = sphi %s1459_s14, %s1878_s14   ;;  %s1428_s13 = sphi %s1457_s13, %s1877_s13   ;;  %s1424_s12 = sphi %s1455_s12, %s1876_s12  }
   0x3   : > { %s38_s17 = ssub.s32 %s1432_s14, %s1472_s16  ;;  %s41_s18 = sadd.s32 1, %s1428_s13 }
   0x4   : > { %p39_p0 = scmp.eq.s32.totalorder %s38_s17, 0  ;;  %p48_p1 = scmp.ne.s32.totalorder %s1428_s13, %s1424_s12 }
   0x5   : > { %p49_p2 = scmp.eq.s32.totalorder %s1432_s14, 0  ;;  %p99_p3 = scmp.eq.s32.totalorder %s1026_s15, 1 }
   0x6   : > { %s1483_s19 = scalar_select %p39_p0, %s1428_s13, %s41_s18  }
   0x7   : > { %p50_p4 = por %p49_p2, %p48_p1  ;;  %p1485_p5 = por %p99_p3, %p48_p1 }
   0x8   : > { %p1029_p6 = scmp.ge.s32.totalorder %s1432_s14, 2 }
   0xa   : > { %127 = sbr.rel (%p1029_p6) target bundleno = 83 (0x53), region = 24 }
   0xf   : > { %130 = sbr.rel (!%p50_p4) target bundleno = 83 (0x53), region = 28  ;;  %s132_s21 = sand.u32 (%p50_p4), 1, %s1428_s13  }
  0x10   : > { %s1313_s22 = sshll.u32 (%p50_p4), %s1432_s14, 4  ;;  %s1030_s23 = sshll.u32 (%p50_p4), %s132_s21, 9 }
  0x11   : > { %s1495_s26 = scalar_lea.vmem (%p50_p4), %s1872_s1, %s1313_s22  ;;  %s1500_s27 = scalar_lea.vmem (%p50_p4), [#allocation2], %s1030_s23 }
  0x12   : > { %v150_v0 = vld [vmem:[%s1495_s26] sm:$0xff] (%p50_p4)  ;;  %v152_v1 = vld [vmem:[%s1495_s26 + $0x8] sm:$0xff] (%p50_p4) }
  0x13   : > { %v154_v2 = vld [vmem:[%s1495_s26 + $0x20] sm:$0xff] (%p50_p4)  ;;  %151 = vst [vmem:[%s1500_s27] sm:$0xff] (%p50_p4), %v150_v0  ;;  %v156_v3 = vld [vmem:[%s1495_s26 + $0x28] sm:$0xff] (%p50_p4) }
  0x14   : > { %153 = vst [vmem:[%s1500_s27 + $0x8] sm:$0xff] %v152_v1  ;;  %v158_v4 = vld [vmem:[%s1495_s26 + $0x40] sm:$0xff]  ;;  %v160_v5 = vld [vmem:[%s1495_s26 + $0x48] sm:$0xff] }
  0x15   : > { %155 = vst [vmem:[%s1500_s27 + $0x10] sm:$0xff] %v154_v2  ;;  %v162_v6 = vld [vmem:[%s1495_s26 + $0x60] sm:$0xff]  ;;  %v164_v7 = vld [vmem:[%s1495_s26 + $0x68] sm:$0xff] }
  0x16   : > { %157 = vst [vmem:[%s1500_s27 + $0x18] sm:$0xff] %v156_v3  ;;  %v166_v8 = vld [vmem:[%s1495_s26 + $0x80] sm:$0xff]  ;;  %v168_v9 = vld [vmem:[%s1495_s26 + $0x88] sm:$0xff] }
  0x17   : > { %159 = vst [vmem:[%s1500_s27 + $0x20] sm:$0xff] %v158_v4  ;;  %v170_v10 = vld [vmem:[%s1495_s26 + $0xa0] sm:$0xff]  ;;  %v172_v11 = vld [vmem:[%s1495_s26 + $0xa8] sm:$0xff] }
  0x18   : > { %161 = vst [vmem:[%s1500_s27 + $0x28] sm:$0xff] %v160_v5  ;;  %v174_v12 = vld [vmem:[%s1495_s26 + $0xc0] sm:$0xff]  ;;  %v176_v13 = vld [vmem:[%s1495_s26 + $0xc8] sm:$0xff] }
  0x19   : > { %163 = vst [vmem:[%s1500_s27 + $0x30] sm:$0xff] %v162_v6  ;;  %v178_v14 = vld [vmem:[%s1495_s26 + $0xe0] sm:$0xff]  ;;  %v180_v15 = vld [vmem:[%s1495_s26 + $0xe8] sm:$0xff] }
  0x1a   : > { %165 = vst [vmem:[%s1500_s27 + $0x38] sm:$0xff] %v164_v7  ;;  %v182_v16 = vld [vmem:[%s1495_s26 + $0x100] sm:$0xff]  ;;  %v184_v17 = vld [vmem:[%s1495_s26 + $0x108] sm:$0xff] }
  0x1b   : > { %167 = vst [vmem:[%s1500_s27 + $0x40] sm:$0xff] %v166_v8  ;;  %v186_v18 = vld [vmem:[%s1495_s26 + $0x120] sm:$0xff]  ;;  %v188_v19 = vld [vmem:[%s1495_s26 + $0x128] sm:$0xff] }
  0x1c   : > { %169 = vst [vmem:[%s1500_s27 + $0x48] sm:$0xff] %v168_v9  ;;  %v190_v20 = vld [vmem:[%s1495_s26 + $0x140] sm:$0xff]  ;;  %v192_v21 = vld [vmem:[%s1495_s26 + $0x148] sm:$0xff] }
  0x1d   : > { %171 = vst [vmem:[%s1500_s27 + $0x50] sm:$0xff] %v170_v10  ;;  %v194_v22 = vld [vmem:[%s1495_s26 + $0x160] sm:$0xff]  ;;  %v196_v23 = vld [vmem:[%s1495_s26 + $0x168] sm:$0xff] }
  0x1e   : > { %173 = vst [vmem:[%s1500_s27 + $0x58] sm:$0xff] %v172_v11  ;;  %v198_v24 = vld [vmem:[%s1495_s26 + $0x180] sm:$0xff]  ;;  %v200_v25 = vld [vmem:[%s1495_s26 + $0x188] sm:$0xff] }
  0x1f   : > { %175 = vst [vmem:[%s1500_s27 + $0x60] sm:$0xff] %v174_v12  ;;  %v202_v26 = vld [vmem:[%s1495_s26 + $0x1a0] sm:$0xff]  ;;  %v204_v27 = vld [vmem:[%s1495_s26 + $0x1a8] sm:$0xff] }
  0x20   : > { %177 = vst [vmem:[%s1500_s27 + $0x68] sm:$0xff] %v176_v13  ;;  %v206_v28 = vld [vmem:[%s1495_s26 + $0x1c0] sm:$0xff]  ;;  %v208_v29 = vld [vmem:[%s1495_s26 + $0x1c8] sm:$0xff] }
  0x21   : > { %179 = vst [vmem:[%s1500_s27 + $0x70] sm:$0xff] %v178_v14  ;;  %v210_v30 = vld [vmem:[%s1495_s26 + $0x1e0] sm:$0xff]  ;;  %v212_v31 = vld [vmem:[%s1495_s26 + $0x1e8] sm:$0xff] }
  0x22   : > { %181 = vst [vmem:[%s1500_s27 + $0x78] sm:$0xff] %v180_v15  ;;  %v214_v32 = vld [vmem:[%s1495_s26 + $0x200] sm:$0xff]  ;;  %v216_v33 = vld [vmem:[%s1495_s26 + $0x208] sm:$0xff] }
  0x23   : > { %183 = vst [vmem:[%s1500_s27 + $0x80] sm:$0xff] %v182_v16  ;;  %v218_v34 = vld [vmem:[%s1495_s26 + $0x220] sm:$0xff]  ;;  %v220_v35 = vld [vmem:[%s1495_s26 + $0x228] sm:$0xff] }
  0x24   : > { %185 = vst [vmem:[%s1500_s27 + $0x88] sm:$0xff] %v184_v17  ;;  %v222_v36 = vld [vmem:[%s1495_s26 + $0x240] sm:$0xff]  ;;  %v224_v37 = vld [vmem:[%s1495_s26 + $0x248] sm:$0xff] }
  0x25   : > { %187 = vst [vmem:[%s1500_s27 + $0x90] sm:$0xff] %v186_v18  ;;  %v226_v38 = vld [vmem:[%s1495_s26 + $0x260] sm:$0xff]  ;;  %v228_v39 = vld [vmem:[%s1495_s26 + $0x268] sm:$0xff] }
  0x26   : > { %189 = vst [vmem:[%s1500_s27 + $0x98] sm:$0xff] %v188_v19  ;;  %v230_v40 = vld [vmem:[%s1495_s26 + $0x280] sm:$0xff]  ;;  %v232_v41 = vld [vmem:[%s1495_s26 + $0x288] sm:$0xff] }
  0x27   : > { %191 = vst [vmem:[%s1500_s27 + $0xa0] sm:$0xff] %v190_v20  ;;  %v234_v42 = vld [vmem:[%s1495_s26 + $0x2a0] sm:$0xff]  ;;  %v236_v43 = vld [vmem:[%s1495_s26 + $0x2a8] sm:$0xff] }
  0x28   : > { %193 = vst [vmem:[%s1500_s27 + $0xa8] sm:$0xff] %v192_v21  ;;  %v238_v44 = vld [vmem:[%s1495_s26 + $0x2c0] sm:$0xff]  ;;  %v240_v45 = vld [vmem:[%s1495_s26 + $0x2c8] sm:$0xff] }
  0x29   : > { %195 = vst [vmem:[%s1500_s27 + $0xb0] sm:$0xff] %v194_v22  ;;  %v242_v46 = vld [vmem:[%s1495_s26 + $0x2e0] sm:$0xff]  ;;  %v244_v47 = vld [vmem:[%s1495_s26 + $0x2e8] sm:$0xff] }
  0x2a   : > { %197 = vst [vmem:[%s1500_s27 + $0xb8] sm:$0xff] %v196_v23  ;;  %v246_v48 = vld [vmem:[%s1495_s26 + $0x300] sm:$0xff]  ;;  %v248_v49 = vld [vmem:[%s1495_s26 + $0x308] sm:$0xff] }
  0x2b   : > { %199 = vst [vmem:[%s1500_s27 + $0xc0] sm:$0xff] %v198_v24  ;;  %v250_v50 = vld [vmem:[%s1495_s26 + $0x320] sm:$0xff]  ;;  %v252_v51 = vld [vmem:[%s1495_s26 + $0x328] sm:$0xff] }
  0x2c   : > { %201 = vst [vmem:[%s1500_s27 + $0xc8] sm:$0xff] %v200_v25  ;;  %v254_v52 = vld [vmem:[%s1495_s26 + $0x340] sm:$0xff]  ;;  %v256_v53 = vld [vmem:[%s1495_s26 + $0x348] sm:$0xff] }
  0x2d   : > { %203 = vst [vmem:[%s1500_s27 + $0xd0] sm:$0xff] %v202_v26  ;;  %v258_v54 = vld [vmem:[%s1495_s26 + $0x360] sm:$0xff]  ;;  %v260_v55 = vld [vmem:[%s1495_s26 + $0x368] sm:$0xff] }
  0x2e   : > { %205 = vst [vmem:[%s1500_s27 + $0xd8] sm:$0xff] %v204_v27  ;;  %v262_v56 = vld [vmem:[%s1495_s26 + $0x380] sm:$0xff]  ;;  %v264_v57 = vld [vmem:[%s1495_s26 + $0x388] sm:$0xff] }
  0x2f   : > { %207 = vst [vmem:[%s1500_s27 + $0xe0] sm:$0xff] %v206_v28  ;;  %v266_v58 = vld [vmem:[%s1495_s26 + $0x3a0] sm:$0xff]  ;;  %v268_v59 = vld [vmem:[%s1495_s26 + $0x3a8] sm:$0xff] }
  0x30   : > { %209 = vst [vmem:[%s1500_s27 + $0xe8] sm:$0xff] %v208_v29  ;;  %v270_v60 = vld [vmem:[%s1495_s26 + $0x3c0] sm:$0xff]  ;;  %v272_v61 = vld [vmem:[%s1495_s26 + $0x3c8] sm:$0xff] }
  0x31   : > { %211 = vst [vmem:[%s1500_s27 + $0xf0] sm:$0xff] %v210_v30  ;;  %v274_v62 = vld [vmem:[%s1495_s26 + $0x3e0] sm:$0xff]  ;;  %v276_v63 = vld [vmem:[%s1495_s26 + $0x3e8] sm:$0xff] }
  0x32   : > { %213 = vst [vmem:[%s1500_s27 + $0xf8] sm:$0xff] %v212_v31 }
  0x33   : > { %215 = vst [vmem:[%s1500_s27 + $0x100] sm:$0xff] %v214_v32 }
  0x34   : > { %217 = vst [vmem:[%s1500_s27 + $0x108] sm:$0xff] %v216_v33 }
  0x35   : > { %219 = vst [vmem:[%s1500_s27 + $0x110] sm:$0xff] %v218_v34 }
  0x36   : > { %221 = vst [vmem:[%s1500_s27 + $0x118] sm:$0xff] %v220_v35 }
  0x37   : > { %223 = vst [vmem:[%s1500_s27 + $0x120] sm:$0xff] %v222_v36 }
  0x38   : > { %225 = vst [vmem:[%s1500_s27 + $0x128] sm:$0xff] %v224_v37 }
  0x39   : > { %227 = vst [vmem:[%s1500_s27 + $0x130] sm:$0xff] %v226_v38 }
  0x3a   : > { %229 = vst [vmem:[%s1500_s27 + $0x138] sm:$0xff] %v228_v39 }
  0x3b   : > { %231 = vst [vmem:[%s1500_s27 + $0x140] sm:$0xff] %v230_v40 }
  0x3c   : > { %233 = vst [vmem:[%s1500_s27 + $0x148] sm:$0xff] %v232_v41 }
  0x3d   : > { %235 = vst [vmem:[%s1500_s27 + $0x150] sm:$0xff] %v234_v42 }
  0x3e   : > { %237 = vst [vmem:[%s1500_s27 + $0x158] sm:$0xff] %v236_v43 }
  0x3f   : > { %239 = vst [vmem:[%s1500_s27 + $0x160] sm:$0xff] %v238_v44 }
  0x40   : > { %241 = vst [vmem:[%s1500_s27 + $0x168] sm:$0xff] %v240_v45 }
  0x41   : > { %243 = vst [vmem:[%s1500_s27 + $0x170] sm:$0xff] %v242_v46 }
  0x42   : > { %245 = vst [vmem:[%s1500_s27 + $0x178] sm:$0xff] %v244_v47 }
  0x43   : > { %247 = vst [vmem:[%s1500_s27 + $0x180] sm:$0xff] %v246_v48 }
  0x44   : > { %249 = vst [vmem:[%s1500_s27 + $0x188] sm:$0xff] %v248_v49 }
  0x45   : > { %251 = vst [vmem:[%s1500_s27 + $0x190] sm:$0xff] %v250_v50 }
  0x46   : > { %253 = vst [vmem:[%s1500_s27 + $0x198] sm:$0xff] %v252_v51 }
  0x47   : > { %255 = vst [vmem:[%s1500_s27 + $0x1a0] sm:$0xff] %v254_v52 }
  0x48   : > { %257 = vst [vmem:[%s1500_s27 + $0x1a8] sm:$0xff] %v256_v53 }
  0x49   : > { %259 = vst [vmem:[%s1500_s27 + $0x1b0] sm:$0xff] %v258_v54 }
  0x4a   : > { %261 = vst [vmem:[%s1500_s27 + $0x1b8] sm:$0xff] %v260_v55 }
  0x4b   : > { %263 = vst [vmem:[%s1500_s27 + $0x1c0] sm:$0xff] %v262_v56 }
  0x4c   : > { %265 = vst [vmem:[%s1500_s27 + $0x1c8] sm:$0xff] %v264_v57 }
  0x4d   : > { %267 = vst [vmem:[%s1500_s27 + $0x1d0] sm:$0xff] %v266_v58 }
  0x4e   : > { %269 = vst [vmem:[%s1500_s27 + $0x1d8] sm:$0xff] %v268_v59 }
  0x4f   : > { %271 = vst [vmem:[%s1500_s27 + $0x1e0] sm:$0xff] %v270_v60 }
  0x50   : > { %273 = vst [vmem:[%s1500_s27 + $0x1e8] sm:$0xff] %v272_v61 }
  0x51   : > { %275 = vst [vmem:[%s1500_s27 + $0x1f0] sm:$0xff] %v274_v62 }
  0x52   : > { %277 = vst [vmem:[%s1500_s27 + $0x1f8] sm:$0xff] %v276_v63 }
  0x53 PF: > { %p1033_p7 = scmp.ge.s32.totalorder %s1432_s14, 1  ;;  %p282_p8 = scmp.lt.s32.totalorder %s1432_s14, 3 }
  0x55   : > { %p283_p9 = pnand %p1033_p7, %p282_p8 }
  0x56   : > { %s289_s28 = sand.u32 (!%p283_p9), 1, %s1424_s12  }
  0x57   : > { %286 = sbr.rel (%p283_p9) target bundleno = 332 (0x14c), region = 51  ;;  %s1034_s29 = sshll.u32 (!%p283_p9), %s289_s28, 9 }
  0x58   : > { %s1632_s30 = scalar_lea.vmem (!%p283_p9), [#allocation2], %s1034_s29 }
  0x5c   : > { %v1166_v0 = vld [vmem:[%s1632_s30 + $0xe0] sm:$0xf]  ;;  %v1348_v1 = vld [vmem:[%s1632_s30 + $0xec] sm:$0xf0]  ;;  %v1346_v5 = vld [vmem:[%s1632_s30 + $0xe4] sm:$0xf] }
  0x5d   : > { %v1294_v2 = vld [vmem:[%s1632_s30 + $0x1e0] sm:$0xf]  ;;  %v1167_v3 = vor.u32 %v1348_v1, %v1166_v0  ;;  %v1380_v4 = vld [vmem:[%s1632_s30 + $0x1ec] sm:$0xf0]  ;;  %v1168_v6 = vld [vmem:[%s1632_s30 + $0xf0] sm:$0xf0] }
  0x5e   : > { %v1295_v7 = vor.u32 %v1380_v4, %v1294_v2  ;;  %v1171_v8 = vor.u32 %v1346_v5, %v1168_v6  ;;  %v1378_v9 = vld [vmem:[%s1632_s30 + $0x1e4] sm:$0xf]  ;;  %v1296_v10 = vld [vmem:[%s1632_s30 + $0x1f0] sm:$0xf0]  ;;  %v1150_v11 = vld [vmem:[%s1632_s30 + $0xc0] sm:$0xf] }
  0x5f   : > { %745 = vmatpush.bf16.msra.mxu0 %v1167_v3  ;;  %v1299_v12 = vor.u32 %v1378_v9, %v1296_v10  ;;  %v1344_v13 = vld [vmem:[%s1632_s30 + $0xcc] sm:$0xf0]  ;;  %v1278_v14 = vld [vmem:[%s1632_s30 + $0x1c0] sm:$0xf]  ;;  %v1342_v18 = vld [vmem:[%s1632_s30 + $0xc4] sm:$0xf] }
  0x60   : > { %v1376_v15 = vld [vmem:[%s1632_s30 + $0x1cc] sm:$0xf0]  ;;  %764 = vmatpush.bf16.msra.mxu1 %v1295_v7  ;;  %783 = vmatpush.bf16.msra.mxu2 %v1171_v8  ;;  %v1151_v16 = vor.u32 %v1344_v13, %v1150_v11  ;;  %v1152_v19 = vld [vmem:[%s1632_s30 + $0xd0] sm:$0xf0]  ;;  %v1374_v20 = vld [vmem:[%s1632_s30 + $0x1c4] sm:$0xf] }
  0x61   : > { %v1279_v17 = vor.u32 %v1376_v15, %v1278_v14  ;;  %802 = vmatpush.bf16.msra.mxu3 %v1299_v12  ;;  %v1155_v21 = vor.u32 %v1342_v18, %v1152_v19  ;;  %v1280_v22 = vld [vmem:[%s1632_s30 + $0x1d0] sm:$0xf0]  ;;  %v1134_v23 = vld [vmem:[%s1632_s30 + $0xa0] sm:$0xf]  ;;  %v1340_v24 = vld [vmem:[%s1632_s30 + $0xac] sm:$0xf0] }
  0x62   : > { %v1283_v25 = vor.u32 %v1374_v20, %v1280_v22  ;;  %v1262_v26 = vld [vmem:[%s1632_s30 + $0x1a0] sm:$0xf]  ;;  %v1372_v27 = vld [vmem:[%s1632_s30 + $0x1ac] sm:$0xf0]  ;;  %v1338_v28 = vld [vmem:[%s1632_s30 + $0xa4] sm:$0xf]  ;;  %v1135_v29 = vor.u32 %v1340_v24, %v1134_v23 }
  0x63   : > { %746 = vmatpush.bf16.msra.mxu0 %v1151_v16  ;;  %v1136_v30 = vld [vmem:[%s1632_s30 + $0xb0] sm:$0xf0]  ;;  %v1370_v31 = vld [vmem:[%s1632_s30 + $0x1a4] sm:$0xf]  ;;  %v1263_v33 = vor.u32 %v1372_v27, %v1262_v26  ;;  %v1118_v35 = vld [vmem:[%s1632_s30 + $0x80] sm:$0xf] }
  0x64   : > { %v1264_v32 = vld [vmem:[%s1632_s30 + $0x1b0] sm:$0xf0]  ;;  %765 = vmatpush.bf16.msra.mxu1 %v1279_v17  ;;  %784 = vmatpush.bf16.msra.mxu2 %v1155_v21  ;;  %v1139_v34 = vor.u32 %v1338_v28, %v1136_v30  ;;  %v1336_v36 = vld [vmem:[%s1632_s30 + $0x8c] sm:$0xf0]  ;;  %v1246_v37 = vld [vmem:[%s1632_s30 + $0x180] sm:$0xf] }
  0x65   : > { %803 = vmatpush.bf16.msra.mxu3 %v1283_v25  ;;  %v1267_v38 = vor.u32 %v1370_v31, %v1264_v32  ;;  %v1368_v39 = vld [vmem:[%s1632_s30 + $0x18c] sm:$0xf0]  ;;  %v1334_v40 = vld [vmem:[%s1632_s30 + $0x84] sm:$0xf]  ;;  %v1120_v41 = vld [vmem:[%s1632_s30 + $0x90] sm:$0xf0]  ;;  %v1119_v44 = vor.u32 %v1336_v36, %v1118_v35 }
  0x66   : > { %v1366_v42 = vld [vmem:[%s1632_s30 + $0x184] sm:$0xf]  ;;  %v1248_v43 = vld [vmem:[%s1632_s30 + $0x190] sm:$0xf0]  ;;  %v1247_v45 = vor.u32 %v1368_v39, %v1246_v37  ;;  %v1123_v46 = vor.u32 %v1334_v40, %v1120_v41  ;;  %v1102_v47 = vld [vmem:[%s1632_s30 + $0x60] sm:$0xf] }
  0x67   : > { %747 = vmatpush.bf16.msra.mxu0 %v1135_v29  ;;  %v1332_v48 = vld [vmem:[%s1632_s30 + $0x6c] sm:$0xf0]  ;;  %v1230_v49 = vld [vmem:[%s1632_s30 + $0x160] sm:$0xf]  ;;  %v1251_v50 = vor.u32 %v1366_v42, %v1248_v43  ;;  %v1330_v52 = vld [vmem:[%s1632_s30 + $0x64] sm:$0xf] }
  0x68   : > { %766 = vmatpush.bf16.msra.mxu1 %v1263_v33  ;;  %785 = vmatpush.bf16.msra.mxu2 %v1139_v34  ;;  %v1364_v51 = vld [vmem:[%s1632_s30 + $0x16c] sm:$0xf0]  ;;  %v1104_v53 = vld [vmem:[%s1632_s30 + $0x70] sm:$0xf0]  ;;  %v1362_v54 = vld [vmem:[%s1632_s30 + $0x164] sm:$0xf]  ;;  %v1103_v56 = vor.u32 %v1332_v48, %v1102_v47 }
  0x69   : > { %804 = vmatpush.bf16.msra.mxu3 %v1267_v38  ;;  %v1232_v55 = vld [vmem:[%s1632_s30 + $0x170] sm:$0xf0]  ;;  %v1231_v57 = vor.u32 %v1364_v51, %v1230_v49  ;;  %v1107_v58 = vor.u32 %v1330_v52, %v1104_v53  ;;  %v1086_v59 = vld [vmem:[%s1632_s30 + $0x40] sm:$0xf]  ;;  %v1328_v60 = vld [vmem:[%s1632_s30 + $0x4c] sm:$0xf0] }
  0x6a   : > { %v1214_v61 = vld [vmem:[%s1632_s30 + $0x140] sm:$0xf]  ;;  %v1235_v62 = vor.u32 %v1362_v54, %v1232_v55  ;;  %v1360_v63 = vld [vmem:[%s1632_s30 + $0x14c] sm:$0xf0]  ;;  %v1326_v0 = vld [vmem:[%s1632_s30 + $0x44] sm:$0xf]  ;;  %v1087_v4 = vor.u32 %v1328_v60, %v1086_v59 }
  0x6b   : > { %748 = vmatpush.bf16.msra.mxu0 %v1119_v44  ;;  %v1088_v1 = vld [vmem:[%s1632_s30 + $0x50] sm:$0xf0]  ;;  %v1358_v2 = vld [vmem:[%s1632_s30 + $0x144] sm:$0xf]  ;;  %v1215_v5 = vor.u32 %v1360_v63, %v1214_v61  ;;  %v1070_v7 = vld [vmem:[%s1632_s30 + $0x20] sm:$0xf] }
  0x6c   : > { %767 = vmatpush.bf16.msra.mxu1 %v1247_v45  ;;  %786 = vmatpush.bf16.msra.mxu2 %v1123_v46  ;;  %v1216_v3 = vld [vmem:[%s1632_s30 + $0x150] sm:$0xf0]  ;;  %v1091_v6 = vor.u32 %v1326_v0, %v1088_v1  ;;  %v1324_v8 = vld [vmem:[%s1632_s30 + $0x2c] sm:$0xf0]  ;;  %v1198_v9 = vld [vmem:[%s1632_s30 + $0x120] sm:$0xf] }
  0x6d   : > { %805 = vmatpush.bf16.msra.mxu3 %v1251_v50  ;;  %v1219_v10 = vor.u32 %v1358_v2, %v1216_v3  ;;  %v1356_v11 = vld [vmem:[%s1632_s30 + $0x12c] sm:$0xf0]  ;;  %v1322_v12 = vld [vmem:[%s1632_s30 + $0x24] sm:$0xf]  ;;  %v1072_v13 = vld [vmem:[%s1632_s30 + $0x30] sm:$0xf0]  ;;  %v1071_v16 = vor.u32 %v1324_v8, %v1070_v7 }
  0x6e   : > { %v1354_v14 = vld [vmem:[%s1632_s30 + $0x124] sm:$0xf]  ;;  %v1200_v15 = vld [vmem:[%s1632_s30 + $0x130] sm:$0xf0]  ;;  %v1054_v17 = vld [vmem:[%s1632_s30] sm:$0xf]  ;;  %v1199_v19 = vor.u32 %v1356_v11, %v1198_v9  ;;  %v1075_v20 = vor.u32 %v1322_v12, %v1072_v13 }
  0x6f   : > { %749 = vmatpush.bf16.msra.mxu0 %v1103_v56  ;;  %v1320_v18 = vld [vmem:[%s1632_s30 + $0xc] sm:$0xf0]  ;;  %v1182_v21 = vld [vmem:[%s1632_s30 + $0x100] sm:$0xf]  ;;  %v1318_v23 = vld [vmem:[%s1632_s30 + $0x4] sm:$0xf]  ;;  %v1203_v24 = vor.u32 %v1354_v14, %v1200_v15 }
  0x70   : > { %768 = vmatpush.bf16.msra.mxu1 %v1231_v57  ;;  %787 = vmatpush.bf16.msra.mxu2 %v1107_v58  ;;  %v1352_v22 = vld [vmem:[%s1632_s30 + $0x10c] sm:$0xf0]  ;;  %v1056_v25 = vld [vmem:[%s1632_s30 + $0x10] sm:$0xf0]  ;;  %v1350_v26 = vld [vmem:[%s1632_s30 + $0x104] sm:$0xf]  ;;  %v1055_v31 = vor.u32 %v1320_v18, %v1054_v17 }
  0x71   : > { %806 = vmatpush.bf16.msra.mxu3 %v1235_v62  ;;  %v1184_v27 = vld [vmem:[%s1632_s30 + $0x110] sm:$0xf0]  ;;  %v1038_v28 = vld [vmem:[%s1871_s0] sm:$0xf]  ;;  %v1347_v29 = vld [vmem:[%s1632_s30 + $0xec] sm:$0xf]  ;;  %v1183_v35 = vor.u32 %v1352_v22, %v1182_v21  ;;  %v1059_v36 = vor.u32 %v1318_v23, %v1056_v25 }
  0x72   : > { %v1176_v30 = vld [vmem:[%s1632_s30 + $0xf8] sm:$0xf0]  ;;  %v1315_v32 = vld [vmem:[%s1871_s0 + $0x4] sm:$0xf0]  ;;  %v1381_v34 = vld [vmem:[%s1632_s30 + $0x1f4] sm:$0xf0]  ;;  %v1187_v40 = vor.u32 %v1350_v26, %v1184_v27 }
  0x73   : > { %750 = vmatpush.bf16.msra.mxu0 %v1087_v4  ;;  %v1302_v33 = vld [vmem:[%s1632_s30 + $0x1e8] sm:$0xf]  ;;  %v1314_v37 = vld [vmem:[%s1871_s0 + $0x4] sm:$0xf]  ;;  %v1040_v38 = vld [vmem:[%s1871_s0 + $0x8] sm:$0xf0]  ;;  %v1179_v41 = vor.u32 %v1347_v29, %v1176_v30  ;;  %v1718_v45 = vor.u32 %v1315_v32, %v1038_v28 }
  0x74   : > { %769 = vmatpush.bf16.msra.mxu1 %v1215_v5  ;;  %788 = vmatpush.bf16.msra.mxu2 %v1091_v6  ;;  %v1174_v39 = vld [vmem:[%s1632_s30 + $0xe8] sm:$0xf]  ;;  %v1349_v42 = vld [vmem:[%s1632_s30 + $0xf4] sm:$0xf0]  ;;  %v1379_v43 = vld [vmem:[%s1632_s30 + $0x1ec] sm:$0xf]  ;;  %v1303_v46 = vor.u32 %v1381_v34, %v1302_v33  ;;  %v1722_v49 = vor.u32 %v1314_v37, %v1040_v38 }
  0x75   : > { %807 = vmatpush.bf16.msra.mxu3 %v1219_v10  ;;  %v1304_v44 = vld [vmem:[%s1632_s30 + $0x1f8] sm:$0xf0]  ;;  %v1343_v47 = vld [vmem:[%s1632_s30 + $0xcc] sm:$0xf]  ;;  %v1286_v50 = vld [vmem:[%s1632_s30 + $0x1c8] sm:$0xf]  ;;  %v1175_v53 = vor.u32 %v1349_v42, %v1174_v39 }
  0x76   : > { %v1160_v48 = vld [vmem:[%s1632_s30 + $0xd8] sm:$0xf0]  ;;  %v1377_v51 = vld [vmem:[%s1632_s30 + $0x1d4] sm:$0xf0]  ;;  %v1434_v52 = vmov 0   ;;  %v1307_v54 = vor.u32 %v1379_v43, %v1304_v44  ;;  %v381_v1 = vld [vmem:[%s1873_s2] sm:$0xff] }
  0x77   : > { %751 = vmatpush.bf16.msra.mxu0 %v1071_v16  ;;  %1408 = vset.pattern.permute.xlu0 %v1434_v52  ;;  %v1163_v55 = vor.u32 %v1343_v47, %v1160_v48  ;;  %v1158_v56 = vld [vmem:[%s1632_s30 + $0xc8] sm:$0xf]  ;;  %v1345_v57 = vld [vmem:[%s1632_s30 + $0xd4] sm:$0xf0]  ;;  %v1375_v58 = vld [vmem:[%s1632_s30 + $0x1cc] sm:$0xf]  ;;  %v1287_v59 = vor.u32 %v1377_v51, %v1286_v50 }
  0x78   : > { %770 = vmatpush.bf16.msra.mxu1 %v1199_v19  ;;  %789 = vmatpush.bf16.msra.mxu2 %v1075_v20  ;;  %v1288_v60 = vld [vmem:[%s1632_s30 + $0x1d8] sm:$0xf0]  ;;  %v1339_v61 = vld [vmem:[%s1632_s30 + $0xac] sm:$0xf]  ;;  %v1270_v63 = vld [vmem:[%s1632_s30 + $0x1a8] sm:$0xf]  ;;  %v1159_v2 = vor.u32 %v1345_v57, %v1158_v56 }
  0x79   : > { %808 = vmatpush.bf16.msra.mxu3 %v1203_v24  ;;  %v1144_v62 = vld [vmem:[%s1632_s30 + $0xb8] sm:$0xf0]  ;;  %v1373_v0 = vld [vmem:[%s1632_s30 + $0x1b4] sm:$0xf0]  ;;  %v1291_v3 = vor.u32 %v1375_v58, %v1288_v60  ;;  %v1142_v5 = vld [vmem:[%s1632_s30 + $0xa8] sm:$0xf]  ;;  %387 = vperm.xlu0 %1408, %v381_v1  }
  0x7a   : > { %v1147_v4 = vor.u32 %v1339_v61, %v1144_v62  ;;  %v1341_v6 = vld [vmem:[%s1632_s30 + $0xb4] sm:$0xf0]  ;;  %v1371_v7 = vld [vmem:[%s1632_s30 + $0x1ac] sm:$0xf]  ;;  %v1271_v8 = vor.u32 %v1373_v0, %v1270_v63  ;;  %v1272_v9 = vld [vmem:[%s1632_s30 + $0x1b8] sm:$0xf0]  ;;  %1409 = vset.pattern.permute.xlu1 %v1434_v52 }
  0x7b   : > { %752 = vmatpush.bf16.msra.mxu0 %v1055_v31  ;;  %v1335_v10 = vld [vmem:[%s1632_s30 + $0x8c] sm:$0xf]  ;;  %v1128_v11 = vld [vmem:[%s1632_s30 + $0x98] sm:$0xf0]  ;;  %v1254_v12 = vld [vmem:[%s1632_s30 + $0x188] sm:$0xf]  ;;  %v1143_v14 = vor.u32 %v1341_v6, %v1142_v5  ;;  %v1275_v18 = vor.u32 %v1371_v7, %v1272_v9 }
  0x7c   : > { %771 = vmatpush.bf16.msra.mxu1 %v1183_v35  ;;  %790 = vmatpush.bf16.msra.mxu2 %v1059_v36  ;;  %v1369_v13 = vld [vmem:[%s1632_s30 + $0x194] sm:$0xf0]  ;;  %v1126_v15 = vld [vmem:[%s1632_s30 + $0x88] sm:$0xf]  ;;  %v1367_v17 = vld [vmem:[%s1632_s30 + $0x18c] sm:$0xf]  ;;  %v1131_v19 = vor.u32 %v1335_v10, %v1128_v11 }
  0x7d   : > { %809 = vmatpush.bf16.msra.mxu3 %v1187_v40  ;;  %v1337_v16 = vld [vmem:[%s1632_s30 + $0x94] sm:$0xf0]  ;;  %v1256_v20 = vld [vmem:[%s1632_s30 + $0x198] sm:$0xf0]  ;;  %v1046_v21 = vld [vmem:[%s1871_s0 + $0x10] sm:$0xf]  ;;  %v1255_v23 = vor.u32 %v1369_v13, %v1254_v12 }
  0x7e   : > { %753 = vmatmul.bf16.vlgmr.msra.gmra.mxu0 %v1718_v45  ;;  %v1317_v22 = vld [vmem:[%s1871_s0 + $0x14] sm:$0xf0]  ;;  %v1331_v24 = vld [vmem:[%s1632_s30 + $0x6c] sm:$0xf]  ;;  %v1112_v25 = vld [vmem:[%s1632_s30 + $0x78] sm:$0xf0]  ;;  %v1127_v30 = vor.u32 %v1337_v16, %v1126_v15  ;;  %v1259_v33 = vor.u32 %v1367_v17, %v1256_v20 }
  0x7f   : > { %772 = vmatmul.bf16.vlgmr.msra.gmra.mxu1 %v1722_v49  ;;  %791 = vmatmul.bf16.vlgmr.msra.gmra.mxu2 %v1718_v45  ;;  %v1238_v26 = vld [vmem:[%s1632_s30 + $0x168] sm:$0xf]  ;;  %v1365_v27 = vld [vmem:[%s1632_s30 + $0x174] sm:$0xf0]  ;;  %v383_v29 = vld [vmem:[%s1873_s2 + $0x10] sm:$0xff]  ;;  %v1115_v34 = vor.u32 %v1331_v24, %v1112_v25  ;;  %v1778_v38 = vor.u32 %v1317_v22, %v1046_v21  ;;  %s1382_s12 = sshll.u32 (%p1485_p5), %s1026_s15, 4 }
  0x80   : > { %859 = vmatpush.bf16.msrb.mxu2 %v1179_v41  ;;  %840 = vmatpush.bf16.msrb.mxu1 %v1303_v46  ;;  %v382_v28 = vld [vmem:[%s1873_s2 + $0x8] sm:$0xff]  ;;  %v1316_v31 = vld [vmem:[%s1871_s0 + $0x14] sm:$0xf]  ;;  %v1048_v32 = vld [vmem:[%s1871_s0 + $0x18] sm:$0xf0]  ;;  %v1239_v39 = vor.u32 %v1365_v27, %v1238_v26  ;;  %s938_s17 = scalar_lea.vmem (%p1485_p5), %s1874_s3, %s1382_s12 }
  0x81   : > { %810 = vmatmul.bf16.vlgmr.msra.gmra.mxu3 %v1722_v49  ;;  %821 = vmatpush.bf16.msrb.mxu0 %v1175_v53  ;;  %v1110_v35 = vld [vmem:[%s1632_s30 + $0x68] sm:$0xf]  ;;  %v1333_v36 = vld [vmem:[%s1632_s30 + $0x74] sm:$0xf0]  ;;  %v1363_v37 = vld [vmem:[%s1632_s30 + $0x16c] sm:$0xf]  ;;  %v1783_v43 = vor.u32 %v1316_v31, %v1048_v32 }
  0x82   : > { %878 = vmatpush.bf16.msrb.mxu3 %v1307_v54  ;;  %397 = vperm.xlu1 %1409, %v383_v29   ;;  %v1240_v40 = vld [vmem:[%s1632_s30 + $0x178] sm:$0xf0]  ;;  %v1327_v41 = vld [vmem:[%s1632_s30 + $0x4c] sm:$0xf]  ;;  %v1222_v44 = vld [vmem:[%s1632_s30 + $0x148] sm:$0xf]  ;;  %v1111_v47 = vor.u32 %v1333_v36, %v1110_v35 }
  0x83   : > { %392 = vperm.xlu0 %1408, %v382_v28   ;;  %v1096_v42 = vld [vmem:[%s1632_s30 + $0x58] sm:$0xf0]  ;;  %v1361_v46 = vld [vmem:[%s1632_s30 + $0x154] sm:$0xf0]  ;;  %v1243_v48 = vor.u32 %v1363_v37, %v1240_v40  ;;  %v1094_v51 = vld [vmem:[%s1632_s30 + $0x48] sm:$0xf] }
  0x84   : > { %860 = vmatpush.bf16.msrb.mxu2 %v1163_v55  ;;  %841 = vmatpush.bf16.msrb.mxu1 %v1287_v59  ;;  %v1099_v50 = vor.u32 %v1327_v41, %v1096_v42  ;;  %v1329_v52 = vld [vmem:[%s1632_s30 + $0x54] sm:$0xf0]  ;;  %v1359_v53 = vld [vmem:[%s1632_s30 + $0x14c] sm:$0xf]  ;;  %v1223_v54 = vor.u32 %v1361_v46, %v1222_v44  ;;  %v1224_v55 = vld [vmem:[%s1632_s30 + $0x158] sm:$0xf0] }
  0x85   : > { %822 = vmatpush.bf16.msrb.mxu0 %v1159_v2  ;;  %v1323_v56 = vld [vmem:[%s1632_s30 + $0x2c] sm:$0xf]  ;;  %v1080_v57 = vld [vmem:[%s1632_s30 + $0x38] sm:$0xf0]  ;;  %v1206_v58 = vld [vmem:[%s1632_s30 + $0x128] sm:$0xf]  ;;  %v1095_v61 = vor.u32 %v1329_v52, %v1094_v51  ;;  %v1227_v62 = vor.u32 %v1359_v53, %v1224_v55 }
  0x86   : > { %879 = vmatpush.bf16.msrb.mxu3 %v1291_v3  ;;  %v1357_v59 = vld [vmem:[%s1632_s30 + $0x134] sm:$0xf0]  ;;  %v1083_v63 = vor.u32 %v1323_v56, %v1080_v57  ;;  %v1078_v0 = vld [vmem:[%s1632_s30 + $0x28] sm:$0xf]  ;;  %v1355_v2 = vld [vmem:[%s1632_s30 + $0x12c] sm:$0xf] }
  0x87   : > { %v384_v60 = vld [vmem:[%s1873_s2 + $0x18] sm:$0xff]  ;;  %v1207_v3 = vor.u32 %v1357_v59, %v1206_v58  ;;  %v1319_v5 = vld [vmem:[%s1632_s30 + $0xc] sm:$0xf]  ;;  %v1190_v7 = vld [vmem:[%s1632_s30 + $0x108] sm:$0xf] }
  0x88   : > { %861 = vmatpush.bf16.msrb.mxu2 %v1147_v4  ;;  %842 = vmatpush.bf16.msrb.mxu1 %v1271_v8  ;;  %v1325_v1 = vld [vmem:[%s1632_s30 + $0x34] sm:$0xf0]  ;;  %v1208_v4 = vld [vmem:[%s1632_s30 + $0x138] sm:$0xf0]  ;;  %v1062_v12 = vld [vmem:[%s1632_s30 + $0x8] sm:$0xf] }
  0x89   : > { %823 = vmatpush.bf16.msrb.mxu0 %v1143_v14  ;;  %v1064_v6 = vld [vmem:[%s1632_s30 + $0x18] sm:$0xf0]  ;;  %v1353_v8 = vld [vmem:[%s1632_s30 + $0x114] sm:$0xf0]  ;;  %v1079_v9 = vor.u32 %v1325_v1, %v1078_v0  ;;  %v1211_v10 = vor.u32 %v1355_v2, %v1208_v4  ;;  %v1351_v15 = vld [vmem:[%s1632_s30 + $0x10c] sm:$0xf] }
  0x8a   : > { %880 = vmatpush.bf16.msrb.mxu3 %v1275_v18  ;;  %402 = vperm.xlu1 %1409, %v384_v60   ;;  %v1067_v11 = vor.u32 %v1319_v5, %v1064_v6  ;;  %v1321_v13 = vld [vmem:[%s1632_s30 + $0x14] sm:$0xf0]  ;;  %v1191_v14 = vor.u32 %v1353_v8, %v1190_v7  ;;  %v1192_v16 = vld [vmem:[%s1632_s30 + $0x118] sm:$0xf0]  ;;  %s1035_s30 = sshll.u32 %s289_s28, 6 }
  0x8b   : > { %v1063_v17 = vor.u32 %v1321_v13, %v1062_v12  ;;  %v1195_v18 = vor.u32 %v1351_v15, %v1192_v16  ;;  %s1829_s10 = scalar_lea.vmem [#allocation3], %s1035_s30 }
  0x8c   : > { %862 = vmatpush.bf16.msrb.mxu2 %v1131_v19  ;;  %843 = vmatpush.bf16.msrb.mxu1 %v1255_v23 }
  0x8d   : > { %824 = vmatpush.bf16.msrb.mxu0 %v1127_v30 }
  0x8e   : > { %881 = vmatpush.bf16.msrb.mxu3 %v1259_v33  ;;  %758 = vmatmul.bf16.gmra.mxu0 %v1778_v38 }
  0x8f   : > { %777 = vmatmul.bf16.gmra.mxu1 %v1783_v43  ;;  %796 = vmatmul.bf16.gmra.mxu2 %v1778_v38 }
  0x90   : > { %863 = vmatpush.bf16.msrb.mxu2 %v1115_v34  ;;  %844 = vmatpush.bf16.msrb.mxu1 %v1239_v39 }
  0x91   : > { %815 = vmatmul.bf16.gmra.mxu3 %v1783_v43  ;;  %825 = vmatpush.bf16.msrb.mxu0 %v1111_v47 }
  0x92   : > { %882 = vmatpush.bf16.msrb.mxu3 %v1243_v48 }
  0x94   : > { %864 = vmatpush.bf16.msrb.mxu2 %v1099_v50  ;;  %845 = vmatpush.bf16.msrb.mxu1 %v1223_v54 }
  0x95   : > { %826 = vmatpush.bf16.msrb.mxu0 %v1095_v61 }
  0x96   : > { %883 = vmatpush.bf16.msrb.mxu3 %v1227_v62 }
  0x98   : > { %865 = vmatpush.bf16.msrb.mxu2 %v1083_v63  ;;  %846 = vmatpush.bf16.msrb.mxu1 %v1207_v3 }
  0x99   : > { %827 = vmatpush.bf16.msrb.mxu0 %v1079_v9 }
  0x9a   : > { %884 = vmatpush.bf16.msrb.mxu3 %v1211_v10 }
  0x9c   : > { %866 = vmatpush.bf16.msrb.mxu2 %v1067_v11  ;;  %847 = vmatpush.bf16.msrb.mxu1 %v1191_v14 }
  0x9d   : > { %828 = vmatpush.bf16.msrb.mxu0 %v1063_v17 }
  0x9e   : > { %885 = vmatpush.bf16.msrb.mxu3 %v1195_v18 }
  0x9f   : > { %848 = vmatmul.bf16.vlgmr.msrb.gmra.mxu1 %v1722_v49  ;;  %867 = vmatmul.bf16.vlgmr.msrb.gmra.mxu2 %v1718_v45 }
  0xa0   : > { %829 = vmatmul.bf16.vlgmr.msrb.gmra.mxu0 %v1718_v45 }
  0xa1   : > { %886 = vmatmul.bf16.vlgmr.msrb.gmra.mxu3 %v1722_v49 }
  0xaf   : > { %853 = vmatmul.bf16.gmra.mxu1 %v1783_v43  ;;  %872 = vmatmul.bf16.gmra.mxu2 %v1778_v38 }
  0xb0   : > { %834 = vmatmul.bf16.gmra.mxu0 %v1778_v38 }
  0xb1   : > { %891 = vmatmul.bf16.gmra.mxu3 %v1783_v43 }
  0xeb   : > { %v388_v19 = vpop.permute.xlu0 %387 }
  0xf4   : > { %v1827_v34 = vpop.permute.xlu1 %397 }
  0xf5   : > { %v1822_v27 = vpop.permute.xlu0 %392 }
  0xfb   : > { %v754_v20 = vpop.f32.mrf.mxu0 }
  0xfc   : > { %v773_v21 = vpop.f32.mrf.mxu1  ;;  %v755_v22 = vadd.f32 %v754_v20, %v388_v19  ;;  %v403_v52 = vpop.permute.xlu1 %402 }
  0xfe   : > { %v774_v23 = vadd.f32 %v773_v21, %v755_v22 }
 0x100   : > { %v897_v28 = vmax.f32 %v774_v23, 0.0 }
 0x102   : > { %v792_v24 = vpop.f32.mrf.mxu2 }
 0x103   : > { %v793_v25 = vadd.f32 %v792_v24, %v388_v19  ;;  %v756_v45 = vpop.f32.mrf.mxu0 }
 0x104   : > { %v811_v26 = vpop.f32.mrf.mxu3  ;;  %v775_v49 = vpop.f32.mrf.mxu1  ;;  %v757_v31 = vadd.f32 %v756_v45, %v1822_v27 }
 0x105   : > { %v812_v29 = vadd.f32 %v811_v26, %v793_v25 }
 0x106   : > { %v776_v35 = vadd.f32 %v775_v49, %v757_v31 }
 0x107   : > { %v898_v30 = vmax.f32 %v812_v29, 0.0 }
 0x108   : > { %v901_v42 = vmax.f32 %v776_v35, 0.0 }
 0x109   : > { %v913_v32 = vpack.c.bf16 %v898_v30, %v897_v28 }
 0x10a   : > { %v794_v33 = vpop.f32.mrf.mxu2 }
 0x10b   : > { %921 = vst [vmem:[%s1829_s10] sm:$0xff] %v913_v32  ;;  %v795_v36 = vadd.f32 %v794_v33, %v1822_v27  ;;  %v759_v38 = vpop.f32.mrf.mxu0 }
 0x10c   : > { %v813_v37 = vpop.f32.mrf.mxu3  ;;  %v778_v39 = vpop.f32.mrf.mxu1  ;;  %v760_v41 = vadd.f32 %v759_v38, %v1827_v34 }
 0x10d   : > { %v814_v40 = vadd.f32 %v813_v37, %v795_v36 }
 0x10e   : > { %v779_v46 = vadd.f32 %v778_v39, %v760_v41 }
 0x10f   : > { %v902_v43 = vmax.f32 %v814_v40, 0.0 }
 0x110   : > { %v905_v54 = vmax.f32 %v779_v46, 0.0 }
 0x111   : > { %v915_v44 = vpack.c.bf16 %v902_v43, %v901_v42 }
 0x112   : > { %v797_v47 = vpop.f32.mrf.mxu2 }
 0x113   : > { %923 = vst [vmem:[%s1829_s10 + $0x10] sm:$0xff] %v915_v44  ;;  %v798_v48 = vadd.f32 %v797_v47, %v1827_v34  ;;  %v761_v51 = vpop.f32.mrf.mxu0 }
 0x114   : > { %v816_v50 = vpop.f32.mrf.mxu3  ;;  %v780_v53 = vpop.f32.mrf.mxu1  ;;  %v762_v57 = vadd.f32 %v761_v51, %v403_v52 }
 0x115   : > { %v817_v55 = vadd.f32 %v816_v50, %v798_v48 }
 0x116   : > { %v781_v60 = vadd.f32 %v780_v53, %v762_v57 }
 0x117   : > { %v906_v56 = vmax.f32 %v817_v55, 0.0 }
 0x118   : > { %v909_v3 = vmax.f32 %v781_v60, 0.0 }
 0x119   : > { %v917_v58 = vpack.c.bf16 %v906_v56, %v905_v54 }
 0x11a   : > { %v799_v59 = vpop.f32.mrf.mxu2  ;;  %v955_v48 = vld [vmem:[%s1829_s10 + $0x10] sm:$0xff] (%p1485_p5) }
 0x11b   : > { %925 = vst [vmem:[%s1829_s10 + $0x20] sm:$0xff] %v917_v58  ;;  %v800_v61 = vadd.f32 %v799_v59, %v403_v52 }
 0x11c   : > { %v818_v62 = vpop.f32.mrf.mxu3  ;;  %v849_v1 = vpop.f32.mrf.mxu1  ;;  %956 = vst [vmem:[%s938_s17 + $0x20] sm:$0xff] (%p1485_p5), %v955_v48 }
 0x11d   : > { %v830_v63 = vpop.f32.mrf.mxu0  ;;  %v819_v0 = vadd.f32 %v818_v62, %v800_v61 }
 0x11e   : > { %v831_v2 = vadd.f32 %v830_v63, %v388_v19 }
 0x11f   : > { %v910_v4 = vmax.f32 %v819_v0, 0.0 }
 0x120   : > { %v850_v6 = vadd.f32 %v849_v1, %v831_v2 }
 0x121   : > { %v919_v5 = vpack.c.bf16 %v910_v4, %v909_v3 }
 0x122   : > { %v868_v7 = vpop.f32.mrf.mxu2  ;;  %v899_v11 = vmax.f32 %v850_v6, 0.0  ;;  %v959_v51 = vld [vmem:[%s1829_s10 + $0x20] sm:$0xff] (%p1485_p5) }
 0x123   : > { %927 = vst [vmem:[%s1829_s10 + $0x30] sm:$0xff] %v919_v5  ;;  %v869_v9 = vadd.f32 %v868_v7, %v388_v19 }
 0x124   : > { %v887_v8 = vpop.f32.mrf.mxu3  ;;  %v851_v13 = vpop.f32.mrf.mxu1  ;;  %960 = vst [vmem:[%s938_s17 + $0x40] sm:$0xff] (%p1485_p5), %v959_v51 }
 0x125   : > { %v832_v10 = vpop.f32.mrf.mxu0  ;;  %v888_v12 = vadd.f32 %v887_v8, %v869_v9 }
 0x126   : > { %v833_v15 = vadd.f32 %v832_v10, %v1822_v27 }
 0x127   : > { %v900_v14 = vmax.f32 %v888_v12, 0.0 }
 0x128   : > { %v852_v20 = vadd.f32 %v851_v13, %v833_v15 }
 0x129   : > { %v914_v16 = vpack.c.bf16 %v900_v14, %v899_v11 }
 0x12a   : > { %v870_v17 = vpop.f32.mrf.mxu2  ;;  %v903_v19 = vmax.f32 %v852_v20, 0.0  ;;  %v963_v53 = vld [vmem:[%s1829_s10 + $0x30] sm:$0xff] (%p1485_p5) }
 0x12b   : > { %922 = vst [vmem:[%s1829_s10 + $0x8] sm:$0xff] %v914_v16  ;;  %v871_v21 = vadd.f32 %v870_v17, %v1822_v27 }
 0x12c   : > { %v889_v18 = vpop.f32.mrf.mxu3  ;;  %v854_v26 = vpop.f32.mrf.mxu1  ;;  %964 = vst [vmem:[%s938_s17 + $0x60] sm:$0xff] (%p1485_p5), %v963_v53 }
 0x12d   : > { %v835_v22 = vpop.f32.mrf.mxu0  ;;  %v890_v23 = vadd.f32 %v889_v18, %v871_v21 }
 0x12e   : > { %v836_v24 = vadd.f32 %v835_v22, %v1827_v34 }
 0x12f   : > { %v904_v25 = vmax.f32 %v890_v23, 0.0 }
 0x130   : > { %v855_v49 = vadd.f32 %v854_v26, %v836_v24 }
 0x131   : > { %v916_v45 = vpack.c.bf16 %v904_v25, %v903_v19 }
 0x132   : > { %v873_v28 = vpop.f32.mrf.mxu2  ;;  %v907_v32 = vmax.f32 %v855_v49, 0.0  ;;  %v953_v47 = vld [vmem:[%s1829_s10 + $0x8] sm:$0xff] (%p1485_p5) }
 0x133   : > { %924 = vst [vmem:[%s1829_s10 + $0x18] sm:$0xff] %v916_v45  ;;  %v874_v30 = vadd.f32 %v873_v28, %v1827_v34  ;;  %v951_v34 = vld [vmem:[%s1829_s10] sm:$0xff] (%p1485_p5) }
 0x134   : > { %v892_v29 = vpop.f32.mrf.mxu3  ;;  %v856_v37 = vpop.f32.mrf.mxu1  ;;  %952 = vst [vmem:[%s938_s17] sm:$0xff] (%p1485_p5), %v951_v34 }
 0x135   : > { %v837_v31 = vpop.f32.mrf.mxu0  ;;  %v893_v33 = vadd.f32 %v892_v29, %v874_v30  ;;  %954 = vst [vmem:[%s938_s17 + $0x8] sm:$0xff] (%p1485_p5), %v953_v47 }
 0x136   : > { %v838_v35 = vadd.f32 %v837_v31, %v403_v52 }
 0x137   : > { %v908_v27 = vmax.f32 %v893_v33, 0.0 }
 0x138   : > { %v857_v39 = vadd.f32 %v856_v37, %v838_v35 }
 0x139   : > { %v918_v36 = vpack.c.bf16 %v908_v27, %v907_v32 }
 0x13a   : > { %v875_v38 = vpop.f32.mrf.mxu2  ;;  %v911_v43 = vmax.f32 %v857_v39, 0.0  ;;  %v957_v50 = vld [vmem:[%s1829_s10 + $0x18] sm:$0xff] (%p1485_p5) }
 0x13b   : > { %926 = vst [vmem:[%s1829_s10 + $0x28] sm:$0xff] %v918_v36  ;;  %v876_v40 = vadd.f32 %v875_v38, %v403_v52 }
 0x13c   : > { %v894_v41 = vpop.f32.mrf.mxu3  ;;  %958 = vst [vmem:[%s938_s17 + $0x28] sm:$0xff] (%p1485_p5), %v957_v50 }
 0x13d   : > { %v895_v42 = vadd.f32 %v894_v41, %v876_v40 }
 0x13f   : > { %v912_v44 = vmax.f32 %v895_v42, 0.0  ;;  %935 = sbr.rel (!%p1485_p5) target bundleno = 332 (0x14c), region = 59 }
 0x141   : > { %v920_v46 = vpack.c.bf16 %v912_v44, %v911_v43 }
 0x142   : > { %v961_v52 = vld [vmem:[%s1829_s10 + $0x28] sm:$0xff] (%p1485_p5) }
 0x143   : > { %928 = vst [vmem:[%s1829_s10 + $0x38] sm:$0xff] %v920_v46 }
 0x144   : > { %962 = vst [vmem:[%s938_s17 + $0x48] sm:$0xff] %v961_v52 }
 0x14a   : > { %v965_v54 = vld [vmem:[%s1829_s10 + $0x38] sm:$0xff] }
 0x14b   : > { %966 = vst [vmem:[%s938_s17 + $0x68] sm:$0xff] %v965_v54 }
 0x14c PF: > { %p10_p10 = scmp.ge.s32.totalorder %s1472_s16, 4   ;;  %s1876_s12 = smov %s1428_s13 }
 0x14d   : > { %s1877_s13 = smov %s1483_s19  ;;  %s1878_s14 = smov %s1472_s16 }
 0x14e   :  { %12 = sbr.rel (!%p10_p10) target bundleno = 2 (0x2), region = 113 }

// kernel: dqn_forward.5
= control target key start
LH: loop header
LB: loop body
LE: loop exit
PB: predicated region body
PF: predicated region fallthrough
CT: control target
= control target key end

     0   :  { %s1851_s1 = inlined_call_operand.vmem [shape: bf16[512,256], index: 1, kind: input, shape index: {}]   ;;  %s1852_s0 = inlined_call_operand.vmem [shape: bf16[64,512], index: 0, kind: input, shape index: {}]   ;;  %s1853_s2 = inlined_call_operand.vmem [shape: f32[64,1], index: 2, kind: input, shape index: {}]   ;;  %s1854_s3 = inlined_call_operand.vmem [shape: bf16[64,256], index: 3, kind: output, shape index: {}]  }
   0x1   :  { %v932_v0 = vld [vmem:[%s1851_s1 + $0x70] sm:$0xf]  ;;  %v1161_v1 = vld [vmem:[%s1851_s1 + $0x74] sm:$0xf0]  ;;  %v924_v11 = vld [vmem:[%s1851_s1 + $0x60] sm:$0xf] }
   0x2   :  { %v996_v2 = vld [vmem:[%s1851_s1 + $0xf0] sm:$0xf]  ;;  %v933_v3 = vor.u32 %v1161_v1, %v932_v0  ;;  %v1177_v4 = vld [vmem:[%s1851_s1 + $0xf4] sm:$0xf0]  ;;  %v1159_v13 = vld [vmem:[%s1851_s1 + $0x64] sm:$0xf0] }
   0x3   :  { %v1060_v5 = vld [vmem:[%s1851_s1 + $0x170] sm:$0xf]  ;;  %v1193_v6 = vld [vmem:[%s1851_s1 + $0x174] sm:$0xf0]  ;;  %v997_v7 = vor.u32 %v1177_v4, %v996_v2  ;;  %v988_v14 = vld [vmem:[%s1851_s1 + $0xe0] sm:$0xf]  ;;  %v925_v16 = vor.u32 %v1159_v13, %v924_v11 }
   0x4   :  { %v1061_v8 = vor.u32 %v1193_v6, %v1060_v5  ;;  %v1124_v9 = vld [vmem:[%s1851_s1 + $0x1f0] sm:$0xf]  ;;  %v1209_v10 = vld [vmem:[%s1851_s1 + $0x1f4] sm:$0xf0]  ;;  %542 = vmatpush.bf16.msra.mxu0 %v933_v3  ;;  %v1175_v15 = vld [vmem:[%s1851_s1 + $0xe4] sm:$0xf0] }
   0x5   :  { %v1125_v12 = vor.u32 %v1209_v10, %v1124_v9  ;;  %571 = vmatpush.bf16.msra.mxu1 %v997_v7  ;;  %v989_v17 = vor.u32 %v1175_v15, %v988_v14  ;;  %v1052_v18 = vld [vmem:[%s1851_s1 + $0x160] sm:$0xf]  ;;  %v1191_v19 = vld [vmem:[%s1851_s1 + $0x164] sm:$0xf0]  ;;  %v916_v23 = vld [vmem:[%s1851_s1 + $0x50] sm:$0xf] }
   0x6   :  { %600 = vmatpush.bf16.msra.mxu2 %v1061_v8  ;;  %v1116_v20 = vld [vmem:[%s1851_s1 + $0x1e0] sm:$0xf]  ;;  %v1053_v21 = vor.u32 %v1191_v19, %v1052_v18  ;;  %v1207_v22 = vld [vmem:[%s1851_s1 + $0x1e4] sm:$0xf0]  ;;  %v1157_v24 = vld [vmem:[%s1851_s1 + $0x54] sm:$0xf0] }
   0x7   :  { %629 = vmatpush.bf16.msra.mxu3 %v1125_v12  ;;  %v1117_v25 = vor.u32 %v1207_v22, %v1116_v20  ;;  %v980_v26 = vld [vmem:[%s1851_s1 + $0xd0] sm:$0xf]  ;;  %v1173_v27 = vld [vmem:[%s1851_s1 + $0xd4] sm:$0xf0]  ;;  %v917_v29 = vor.u32 %v1157_v24, %v916_v23  ;;  %v908_v35 = vld [vmem:[%s1851_s1 + $0x40] sm:$0xf] }
   0x8   :  { %v1044_v28 = vld [vmem:[%s1851_s1 + $0x150] sm:$0xf]  ;;  %543 = vmatpush.bf16.msra.mxu0 %v925_v16  ;;  %v1189_v30 = vld [vmem:[%s1851_s1 + $0x154] sm:$0xf0]  ;;  %v981_v33 = vor.u32 %v1173_v27, %v980_v26  ;;  %v1155_v36 = vld [vmem:[%s1851_s1 + $0x44] sm:$0xf0] }
   0x9   :  { %v1108_v31 = vld [vmem:[%s1851_s1 + $0x1d0] sm:$0xf]  ;;  %v1205_v32 = vld [vmem:[%s1851_s1 + $0x1d4] sm:$0xf0]  ;;  %572 = vmatpush.bf16.msra.mxu1 %v989_v17  ;;  %v1045_v34 = vor.u32 %v1189_v30, %v1044_v28  ;;  %v972_v37 = vld [vmem:[%s1851_s1 + $0xc0] sm:$0xf]  ;;  %v909_v44 = vor.u32 %v1155_v36, %v908_v35 }
   0xa   :  { %601 = vmatpush.bf16.msra.mxu2 %v1053_v21  ;;  %v1109_v38 = vor.u32 %v1205_v32, %v1108_v31  ;;  %v1171_v39 = vld [vmem:[%s1851_s1 + $0xc4] sm:$0xf0]  ;;  %v1036_v40 = vld [vmem:[%s1851_s1 + $0x140] sm:$0xf]  ;;  %v900_v47 = vld [vmem:[%s1851_s1 + $0x30] sm:$0xf] }
   0xb   :  { %630 = vmatpush.bf16.msra.mxu3 %v1117_v25  ;;  %v1187_v41 = vld [vmem:[%s1851_s1 + $0x144] sm:$0xf0]  ;;  %v1100_v42 = vld [vmem:[%s1851_s1 + $0x1c0] sm:$0xf]  ;;  %v973_v45 = vor.u32 %v1171_v39, %v972_v37  ;;  %v1153_v48 = vld [vmem:[%s1851_s1 + $0x34] sm:$0xf0] }
   0xc   :  { %v1203_v43 = vld [vmem:[%s1851_s1 + $0x1c4] sm:$0xf0]  ;;  %544 = vmatpush.bf16.msra.mxu0 %v917_v29  ;;  %v1037_v46 = vor.u32 %v1187_v41, %v1036_v40  ;;  %v964_v49 = vld [vmem:[%s1851_s1 + $0xb0] sm:$0xf]  ;;  %v1169_v51 = vld [vmem:[%s1851_s1 + $0xb4] sm:$0xf0]  ;;  %v901_v56 = vor.u32 %v1153_v48, %v900_v47 }
   0xd   :  { %573 = vmatpush.bf16.msra.mxu1 %v981_v33  ;;  %v1101_v50 = vor.u32 %v1203_v43, %v1100_v42  ;;  %v1028_v52 = vld [vmem:[%s1851_s1 + $0x130] sm:$0xf]  ;;  %v1185_v53 = vld [vmem:[%s1851_s1 + $0x134] sm:$0xf0]  ;;  %v965_v57 = vor.u32 %v1169_v51, %v964_v49  ;;  %v892_v59 = vld [vmem:[%s1851_s1 + $0x20] sm:$0xf] }
   0xe   :  { %602 = vmatpush.bf16.msra.mxu2 %v1045_v34  ;;  %v1092_v54 = vld [vmem:[%s1851_s1 + $0x1b0] sm:$0xf]  ;;  %v1201_v55 = vld [vmem:[%s1851_s1 + $0x1b4] sm:$0xf0]  ;;  %v1029_v58 = vor.u32 %v1185_v53, %v1028_v52  ;;  %v1151_v60 = vld [vmem:[%s1851_s1 + $0x24] sm:$0xf0] }
   0xf   :  { %631 = vmatpush.bf16.msra.mxu3 %v1109_v38  ;;  %v956_v61 = vld [vmem:[%s1851_s1 + $0xa0] sm:$0xf]  ;;  %v1093_v62 = vor.u32 %v1201_v55, %v1092_v54  ;;  %v1167_v63 = vld [vmem:[%s1851_s1 + $0xa4] sm:$0xf0]  ;;  %v893_v4 = vor.u32 %v1151_v60, %v892_v59  ;;  %v884_v7 = vld [vmem:[%s1851_s1 + $0x10] sm:$0xf] }
  0x10   :  { %545 = vmatpush.bf16.msra.mxu0 %v909_v44  ;;  %v1020_v0 = vld [vmem:[%s1851_s1 + $0x120] sm:$0xf]  ;;  %v1183_v1 = vld [vmem:[%s1851_s1 + $0x124] sm:$0xf0]  ;;  %v957_v5 = vor.u32 %v1167_v63, %v956_v61  ;;  %v1149_v8 = vld [vmem:[%s1851_s1 + $0x14] sm:$0xf0] }
  0x11   :  { %574 = vmatpush.bf16.msra.mxu1 %v973_v45  ;;  %v1084_v2 = vld [vmem:[%s1851_s1 + $0x1a0] sm:$0xf]  ;;  %v1199_v3 = vld [vmem:[%s1851_s1 + $0x1a4] sm:$0xf0]  ;;  %v1021_v6 = vor.u32 %v1183_v1, %v1020_v0  ;;  %v948_v9 = vld [vmem:[%s1851_s1 + $0x90] sm:$0xf]  ;;  %v885_v17 = vor.u32 %v1149_v8, %v884_v7 }
  0x12   :  { %603 = vmatpush.bf16.msra.mxu2 %v1037_v46  ;;  %v1085_v10 = vor.u32 %v1199_v3, %v1084_v2  ;;  %v1165_v11 = vld [vmem:[%s1851_s1 + $0x94] sm:$0xf0]  ;;  %v1012_v12 = vld [vmem:[%s1851_s1 + $0x110] sm:$0xf]  ;;  %v876_v16 = vld [vmem:[%s1851_s1] sm:$0xf] }
  0x13   :  { %632 = vmatpush.bf16.msra.mxu3 %v1101_v50  ;;  %v1181_v13 = vld [vmem:[%s1851_s1 + $0x114] sm:$0xf0]  ;;  %v1076_v14 = vld [vmem:[%s1851_s1 + $0x190] sm:$0xf]  ;;  %v1147_v18 = vld [vmem:[%s1851_s1 + $0x4] sm:$0xf0]  ;;  %v949_v21 = vor.u32 %v1165_v11, %v948_v9 }
  0x14   :  { %546 = vmatpush.bf16.msra.mxu0 %v901_v56  ;;  %v1197_v15 = vld [vmem:[%s1851_s1 + $0x194] sm:$0xf0]  ;;  %v940_v19 = vld [vmem:[%s1851_s1 + $0x80] sm:$0xf]  ;;  %v1163_v20 = vld [vmem:[%s1851_s1 + $0x84] sm:$0xf0]  ;;  %v1013_v22 = vor.u32 %v1181_v13, %v1012_v12  ;;  %v877_v35 = vor.u32 %v1147_v18, %v876_v16 }
  0x15   :  { %575 = vmatpush.bf16.msra.mxu1 %v965_v57  ;;  %v1004_v23 = vld [vmem:[%s1851_s1 + $0x100] sm:$0xf]  ;;  %v1179_v24 = vld [vmem:[%s1851_s1 + $0x104] sm:$0xf0]  ;;  %v1077_v26 = vor.u32 %v1197_v15, %v1076_v14  ;;  %v1132_v29 = vld [vmem:[%s1852_s0 + $0xc] sm:$0xf0]  ;;  %v941_v39 = vor.u32 %v1163_v20, %v940_v19 }
  0x16   :  { %604 = vmatpush.bf16.msra.mxu2 %v1029_v58  ;;  %v1068_v25 = vld [vmem:[%s1851_s1 + $0x180] sm:$0xf]  ;;  %v1195_v27 = vld [vmem:[%s1851_s1 + $0x184] sm:$0xf0]  ;;  %v1130_v30 = vld [vmem:[%s1852_s0 + $0x4] sm:$0xf]  ;;  %v1005_v40 = vor.u32 %v1179_v24, %v1004_v23 }
  0x17   :  { %633 = vmatpush.bf16.msra.mxu3 %v1093_v62  ;;  %v812_v28 = vld [vmem:[%s1852_s0] sm:$0xf]  ;;  %v814_v31 = vld [vmem:[%s1852_s0 + $0x10] sm:$0xf0]  ;;  %v820_v32 = vld [vmem:[%s1852_s0 + $0x8] sm:$0xf]  ;;  %v1069_v44 = vor.u32 %v1195_v27, %v1068_v25 }
  0x18   :  { %547 = vmatpush.bf16.msra.mxu0 %v893_v4  ;;  %v1192_v33 = vld [vmem:[%s1851_s1 + $0x174] sm:$0xf]  ;;  %v1062_v34 = vld [vmem:[%s1851_s1 + $0x178] sm:$0xf0]  ;;  %v94_v38 = vld [vmem:[%s1853_s2] sm:$0xff]  ;;  %v1214_v49 = vmov 0   ;;  %v1475_v50 = vor.u32 %v1132_v29, %v812_v28  ;;  %v1486_v55 = vor.u32 %v1130_v30, %v814_v31 }
  0x19   :  { %576 = vmatpush.bf16.msra.mxu1 %v957_v5  ;;  %v1208_v36 = vld [vmem:[%s1851_s1 + $0x1f4] sm:$0xf]  ;;  %v1126_v37 = vld [vmem:[%s1851_s1 + $0x1f8] sm:$0xf0]  ;;  %v1133_v41 = vld [vmem:[%s1852_s0 + $0x14] sm:$0xf0]  ;;  %v1065_v45 = vor.u32 %v1192_v33, %v1062_v34  ;;  %1211 = vset.pattern.permute.xlu0 %v1214_v49 }
  0x1a   :  { %605 = vmatpush.bf16.msra.mxu2 %v1021_v6  ;;  %v1131_v42 = vld [vmem:[%s1852_s0 + $0xc] sm:$0xf]  ;;  %v822_v43 = vld [vmem:[%s1852_s0 + $0x18] sm:$0xf0]  ;;  %v1160_v46 = vld [vmem:[%s1851_s1 + $0x74] sm:$0xf]  ;;  %v1129_v51 = vor.u32 %v1208_v36, %v1126_v37  ;;  %104 = vperm.xlu0 %1211, %v94_v38   ;;  %v1488_v56 = vor.u32 %v1133_v41, %v820_v32 }
  0x1b   :  { %634 = vmatpush.bf16.msra.mxu3 %v1085_v10  ;;  %v934_v47 = vld [vmem:[%s1851_s1 + $0x78] sm:$0xf0]  ;;  %v1176_v48 = vld [vmem:[%s1851_s1 + $0xf4] sm:$0xf]  ;;  %v1190_v53 = vld [vmem:[%s1851_s1 + $0x164] sm:$0xf]  ;;  %1212 = vset.pattern.permute.xlu1 %v1214_v49  ;;  %v1496_v59 = vor.u32 %v1131_v42, %v822_v43 }
  0x1c   :  { %548 = vmatpush.bf16.msra.mxu0 %v885_v17  ;;  %v998_v52 = vld [vmem:[%s1851_s1 + $0xf8] sm:$0xf0]  ;;  %v1054_v54 = vld [vmem:[%s1851_s1 + $0x168] sm:$0xf0]  ;;  %v1206_v57 = vld [vmem:[%s1851_s1 + $0x1e4] sm:$0xf]  ;;  %1213 = vset.pattern.permute.xlu2 %v1214_v49  ;;  %v937_v60 = vor.u32 %v1160_v46, %v934_v47 }
  0x1d   :  { %577 = vmatpush.bf16.msra.mxu1 %v949_v21  ;;  %v1118_v58 = vld [vmem:[%s1851_s1 + $0x1e8] sm:$0xf0]  ;;  %v1001_v61 = vor.u32 %v1176_v48, %v998_v52  ;;  %v1057_v62 = vor.u32 %v1190_v53, %v1054_v54  ;;  %v1158_v63 = vld [vmem:[%s1851_s1 + $0x64] sm:$0xf]  ;;  %v1188_v4 = vld [vmem:[%s1851_s1 + $0x154] sm:$0xf] }
  0x1e   :  { %606 = vmatpush.bf16.msra.mxu2 %v1013_v22  ;;  %v926_v0 = vld [vmem:[%s1851_s1 + $0x68] sm:$0xf0]  ;;  %v1174_v1 = vld [vmem:[%s1851_s1 + $0xe4] sm:$0xf]  ;;  %v1121_v2 = vor.u32 %v1206_v57, %v1118_v58  ;;  %v1046_v5 = vld [vmem:[%s1851_s1 + $0x158] sm:$0xf0] }
  0x1f   :  { %635 = vmatpush.bf16.msra.mxu3 %v1077_v26  ;;  %v990_v3 = vld [vmem:[%s1851_s1 + $0xe8] sm:$0xf0]  ;;  %v1204_v6 = vld [vmem:[%s1851_s1 + $0x1d4] sm:$0xf]  ;;  %v1110_v7 = vld [vmem:[%s1851_s1 + $0x1d8] sm:$0xf0]  ;;  %v929_v9 = vor.u32 %v1158_v63, %v926_v0  ;;  %v1049_v12 = vor.u32 %v1188_v4, %v1046_v5 }
  0x20   :  { %549 = vmatpush.bf16.msra.mxu0 %v877_v35  ;;  %v95_v8 = vld [vmem:[%s1853_s2 + $0x8] sm:$0xff]  ;;  %v1156_v10 = vld [vmem:[%s1851_s1 + $0x54] sm:$0xf]  ;;  %v993_v11 = vor.u32 %v1174_v1, %v990_v3  ;;  %v918_v13 = vld [vmem:[%s1851_s1 + $0x58] sm:$0xf0]  ;;  %v1113_v16 = vor.u32 %v1204_v6, %v1110_v7 }
  0x21   :  { %578 = vmatpush.bf16.msra.mxu1 %v941_v39  ;;  %v1172_v14 = vld [vmem:[%s1851_s1 + $0xd4] sm:$0xf]  ;;  %v982_v17 = vld [vmem:[%s1851_s1 + $0xd8] sm:$0xf0]  ;;  %v1186_v18 = vld [vmem:[%s1851_s1 + $0x144] sm:$0xf]  ;;  %v921_v22 = vor.u32 %v1156_v10, %v918_v13 }
  0x22   :  { %607 = vmatpush.bf16.msra.mxu2 %v1005_v40  ;;  %v96_v15 = vld [vmem:[%s1853_s2 + $0x10] sm:$0xff]  ;;  %109 = vperm.xlu0 %1211, %v95_v8   ;;  %v1038_v19 = vld [vmem:[%s1851_s1 + $0x148] sm:$0xf0]  ;;  %v1202_v20 = vld [vmem:[%s1851_s1 + $0x1c4] sm:$0xf]  ;;  %v985_v25 = vor.u32 %v1172_v14, %v982_v17 }
  0x23   :  { %636 = vmatpush.bf16.msra.mxu3 %v1069_v44  ;;  %550 = vmatmul.bf16.vlgmr.msra.gmra.mxu0 %v1475_v50  ;;  %v1102_v21 = vld [vmem:[%s1851_s1 + $0x1c8] sm:$0xf0]  ;;  %v828_v23 = vld [vmem:[%s1852_s0 + $0x20] sm:$0xf]  ;;  %v1136_v24 = vld [vmem:[%s1852_s0 + $0x2c] sm:$0xf0]  ;;  %v1041_v26 = vor.u32 %v1186_v18, %v1038_v19 }
  0x24   :  { %579 = vmatmul.bf16.vlgmr.msra.gmra.mxu1 %v1486_v55  ;;  %658 = vmatpush.bf16.msrb.mxu0 %v937_v60  ;;  %v1154_v27 = vld [vmem:[%s1851_s1 + $0x44] sm:$0xf]  ;;  %v910_v28 = vld [vmem:[%s1851_s1 + $0x48] sm:$0xf0]  ;;  %v830_v31 = vld [vmem:[%s1852_s0 + $0x30] sm:$0xf0]  ;;  %v1105_v33 = vor.u32 %v1202_v20, %v1102_v21  ;;  %v1616_v49 = vor.u32 %v1136_v24, %v828_v23 }
  0x25   :  { %608 = vmatmul.bf16.vlgmr.msra.gmra.mxu2 %v1488_v56  ;;  %687 = vmatpush.bf16.msrb.mxu1 %v1001_v61  ;;  %v1170_v29 = vld [vmem:[%s1851_s1 + $0xc4] sm:$0xf]  ;;  %v836_v32 = vld [vmem:[%s1852_s0 + $0x28] sm:$0xf]  ;;  %v974_v34 = vld [vmem:[%s1851_s1 + $0xc8] sm:$0xf0]  ;;  %v913_v42 = vor.u32 %v1154_v27, %v910_v28 }
  0x26   :  { %716 = vmatpush.bf16.msrb.mxu2 %v1065_v45  ;;  %637 = vmatmul.bf16.vlgmr.msra.gmra.mxu3 %v1496_v59  ;;  %v1134_v30 = vld [vmem:[%s1852_s0 + $0x24] sm:$0xf]  ;;  %v1184_v35 = vld [vmem:[%s1851_s1 + $0x134] sm:$0xf]  ;;  %v1030_v36 = vld [vmem:[%s1851_s1 + $0x138] sm:$0xf0]  ;;  %v977_v44 = vor.u32 %v1170_v29, %v974_v34 }
  0x27   :  { %745 = vmatpush.bf16.msrb.mxu3 %v1129_v51  ;;  %114 = vperm.xlu1 %1212, %v96_v15   ;;  %v1137_v37 = vld [vmem:[%s1852_s0 + $0x34] sm:$0xf0]  ;;  %v1200_v38 = vld [vmem:[%s1851_s1 + $0x1b4] sm:$0xf]  ;;  %v1094_v39 = vld [vmem:[%s1851_s1 + $0x1b8] sm:$0xf0]  ;;  %v1033_v45 = vor.u32 %v1184_v35, %v1030_v36  ;;  %v1627_v57 = vor.u32 %v1134_v30, %v830_v31 }
  0x28   :  { %659 = vmatpush.bf16.msrb.mxu0 %v929_v9  ;;  %v1135_v40 = vld [vmem:[%s1852_s0 + $0x2c] sm:$0xf]  ;;  %v838_v41 = vld [vmem:[%s1852_s0 + $0x38] sm:$0xf0]  ;;  %v1152_v46 = vld [vmem:[%s1851_s1 + $0x34] sm:$0xf]  ;;  %v1097_v51 = vor.u32 %v1200_v38, %v1094_v39  ;;  %v1629_v58 = vor.u32 %v1137_v37, %v836_v32 }
  0x29   :  { %688 = vmatpush.bf16.msrb.mxu1 %v993_v11  ;;  %v97_v43 = vld [vmem:[%s1853_s2 + $0x18] sm:$0xff]  ;;  %v1168_v48 = vld [vmem:[%s1851_s1 + $0xb4] sm:$0xf]  ;;  %v1182_v53 = vld [vmem:[%s1851_s1 + $0x124] sm:$0xf] }
  0x2a   :  { %717 = vmatpush.bf16.msrb.mxu2 %v1057_v62  ;;  %v902_v47 = vld [vmem:[%s1851_s1 + $0x38] sm:$0xf0]  ;;  %v1022_v54 = vld [vmem:[%s1851_s1 + $0x128] sm:$0xf0]  ;;  %v1198_v60 = vld [vmem:[%s1851_s1 + $0x1a4] sm:$0xf]  ;;  %v1637_v62 = vor.u32 %v1135_v40, %v838_v41 }
  0x2b   :  { %746 = vmatpush.bf16.msrb.mxu3 %v1121_v2  ;;  %v966_v52 = vld [vmem:[%s1851_s1 + $0xb8] sm:$0xf0]  ;;  %v1086_v61 = vld [vmem:[%s1851_s1 + $0x1a8] sm:$0xf0]  ;;  %v905_v63 = vor.u32 %v1152_v46, %v902_v47  ;;  %v1025_v1 = vor.u32 %v1182_v53, %v1022_v54  ;;  %v1150_v2 = vld [vmem:[%s1851_s1 + $0x24] sm:$0xf] }
  0x2c   :  { %660 = vmatpush.bf16.msrb.mxu0 %v921_v22  ;;  %v969_v0 = vor.u32 %v1168_v48, %v966_v52  ;;  %v894_v3 = vld [vmem:[%s1851_s1 + $0x28] sm:$0xf0]  ;;  %v1089_v4 = vor.u32 %v1198_v60, %v1086_v61  ;;  %v1166_v5 = vld [vmem:[%s1851_s1 + $0xa4] sm:$0xf]  ;;  %v1180_v8 = vld [vmem:[%s1851_s1 + $0x114] sm:$0xf] }
  0x2d   :  { %689 = vmatpush.bf16.msrb.mxu1 %v985_v25  ;;  %v958_v6 = vld [vmem:[%s1851_s1 + $0xa8] sm:$0xf0]  ;;  %v897_v7 = vor.u32 %v1150_v2, %v894_v3  ;;  %v1014_v9 = vld [vmem:[%s1851_s1 + $0x118] sm:$0xf0]  ;;  %v1148_v10 = vld [vmem:[%s1851_s1 + $0x14] sm:$0xf] }
  0x2e   :  { %718 = vmatpush.bf16.msrb.mxu2 %v1049_v12  ;;  %v961_v11 = vor.u32 %v1166_v5, %v958_v6  ;;  %v1017_v12 = vor.u32 %v1180_v8, %v1014_v9  ;;  %v886_v13 = vld [vmem:[%s1851_s1 + $0x18] sm:$0xf0]  ;;  %v1196_v14 = vld [vmem:[%s1851_s1 + $0x194] sm:$0xf]  ;;  %v1178_v19 = vld [vmem:[%s1851_s1 + $0x104] sm:$0xf] }
  0x2f   :  { %747 = vmatpush.bf16.msrb.mxu3 %v1113_v16  ;;  %119 = vperm.xlu1 %1212, %v97_v43   ;;  %v1078_v15 = vld [vmem:[%s1851_s1 + $0x198] sm:$0xf0]  ;;  %v1164_v17 = vld [vmem:[%s1851_s1 + $0x94] sm:$0xf]  ;;  %v1006_v20 = vld [vmem:[%s1851_s1 + $0x108] sm:$0xf0]  ;;  %v889_v21 = vor.u32 %v1148_v10, %v886_v13 }
  0x30   :  { %661 = vmatpush.bf16.msrb.mxu0 %v913_v42  ;;  %v1081_v16 = vor.u32 %v1196_v14, %v1078_v15  ;;  %v950_v18 = vld [vmem:[%s1851_s1 + $0x98] sm:$0xf0]  ;;  %v1194_v22 = vld [vmem:[%s1851_s1 + $0x184] sm:$0xf]  ;;  %v1070_v23 = vld [vmem:[%s1851_s1 + $0x188] sm:$0xf0]  ;;  %v1009_v25 = vor.u32 %v1178_v19, %v1006_v20 }
  0x31   :  { %690 = vmatpush.bf16.msrb.mxu1 %v977_v44  ;;  %v953_v24 = vor.u32 %v1164_v17, %v950_v18  ;;  %v878_v27 = vld [vmem:[%s1851_s1 + $0x8] sm:$0xf0]  ;;  %v100_v28 = vld [vmem:[%s1853_s2 + $0x30] sm:$0xff]  ;;  %v1073_v29 = vor.u32 %v1194_v22, %v1070_v23  ;;  %v1162_v30 = vld [vmem:[%s1851_s1 + $0x84] sm:$0xf] }
  0x32   :  { %719 = vmatpush.bf16.msrb.mxu2 %v1041_v26  ;;  %v1146_v26 = vld [vmem:[%s1851_s1 + $0x4] sm:$0xf]  ;;  %v942_v31 = vld [vmem:[%s1851_s1 + $0x88] sm:$0xf0]  ;;  %134 = vperm.xlu0 %1211, %v100_v28   ;;  %v844_v32 = vld [vmem:[%s1852_s0 + $0x40] sm:$0xf] }
  0x33   :  { %748 = vmatpush.bf16.msrb.mxu3 %v1105_v33  ;;  %555 = vmatmul.bf16.gmra.mxu0 %v1616_v49  ;;  %v1140_v33 = vld [vmem:[%s1852_s0 + $0x4c] sm:$0xf0]  ;;  %v1138_v34 = vld [vmem:[%s1852_s0 + $0x44] sm:$0xf]  ;;  %v846_v35 = vld [vmem:[%s1852_s0 + $0x50] sm:$0xf0]  ;;  %v881_v38 = vor.u32 %v1146_v26, %v878_v27  ;;  %v945_v41 = vor.u32 %v1162_v30, %v942_v31 }
  0x34   :  { %584 = vmatmul.bf16.gmra.mxu1 %v1627_v57  ;;  %662 = vmatpush.bf16.msrb.mxu0 %v905_v63  ;;  %v852_v36 = vld [vmem:[%s1852_s0 + $0x48] sm:$0xf]  ;;  %v1141_v37 = vld [vmem:[%s1852_s0 + $0x54] sm:$0xf0]  ;;  %v1139_v39 = vld [vmem:[%s1852_s0 + $0x4c] sm:$0xf]  ;;  %v845_v42 = vor.u32 %v1140_v33, %v844_v32  ;;  %v849_v43 = vor.u32 %v1138_v34, %v846_v35 }
  0x35   :  { %613 = vmatmul.bf16.gmra.mxu2 %v1629_v58  ;;  %691 = vmatpush.bf16.msrb.mxu1 %v969_v0  ;;  %v854_v40 = vld [vmem:[%s1852_s0 + $0x58] sm:$0xf0]  ;;  %v853_v44 = vor.u32 %v1141_v37, %v852_v36  ;;  %v98_v46 = vld [vmem:[%s1853_s2 + $0x20] sm:$0xff]  ;;  %v99_v48 = vld [vmem:[%s1853_s2 + $0x28] sm:$0xff] }
  0x36   :  { %720 = vmatpush.bf16.msrb.mxu2 %v1033_v45  ;;  %642 = vmatmul.bf16.gmra.mxu3 %v1637_v62  ;;  %v857_v45 = vor.u32 %v1139_v39, %v854_v40  ;;  %v101_v47 = vld [vmem:[%s1853_s2 + $0x38] sm:$0xff]  ;;  %v1144_v52 = vld [vmem:[%s1852_s0 + $0x6c] sm:$0xf0]  ;;  %v1142_v53 = vld [vmem:[%s1852_s0 + $0x64] sm:$0xf] }
  0x37   :  { %749 = vmatpush.bf16.msrb.mxu3 %v1097_v51  ;;  %124 = vperm.xlu2 %1213, %v98_v46   ;;  %v860_v51 = vld [vmem:[%s1852_s0 + $0x60] sm:$0xf]  ;;  %v862_v54 = vld [vmem:[%s1852_s0 + $0x70] sm:$0xf0]  ;;  %v868_v60 = vld [vmem:[%s1852_s0 + $0x68] sm:$0xf] }
  0x38   :  { %663 = vmatpush.bf16.msrb.mxu0 %v897_v7  ;;  %139 = vperm.xlu1 %1212, %v101_v47   ;;  %v1145_v61 = vld [vmem:[%s1852_s0 + $0x74] sm:$0xf0]  ;;  %v1143_v63 = vld [vmem:[%s1852_s0 + $0x6c] sm:$0xf]  ;;  %v870_v0 = vld [vmem:[%s1852_s0 + $0x78] sm:$0xf0]  ;;  %v865_v2 = vor.u32 %v1142_v53, %v862_v54 }
  0x39   :  { %692 = vmatpush.bf16.msrb.mxu1 %v961_v11  ;;  %v869_v3 = vor.u32 %v1145_v61, %v868_v60 }
  0x3a   :  { %721 = vmatpush.bf16.msrb.mxu2 %v1025_v1  ;;  %v861_v1 = vor.u32 %v1144_v52, %v860_v51 }
  0x3b   :  { %750 = vmatpush.bf16.msrb.mxu3 %v1089_v4  ;;  %v873_v4 = vor.u32 %v1143_v63, %v870_v0 }
  0x3c   :  { %664 = vmatpush.bf16.msrb.mxu0 %v889_v21 }
  0x3d   :  { %693 = vmatpush.bf16.msrb.mxu1 %v953_v24 }
  0x3e   :  { %722 = vmatpush.bf16.msrb.mxu2 %v1017_v12 }
  0x3f   :  { %751 = vmatpush.bf16.msrb.mxu3 %v1081_v16  ;;  %129 = vperm.xlu2 %1213, %v99_v48  }
  0x40   :  { %665 = vmatpush.bf16.msrb.mxu0 %v881_v38 }
  0x41   :  { %694 = vmatpush.bf16.msrb.mxu1 %v945_v41 }
  0x42   :  { %723 = vmatpush.bf16.msrb.mxu2 %v1009_v25 }
  0x43   :  { %752 = vmatpush.bf16.msrb.mxu3 %v1073_v29  ;;  %560 = vmatmul.bf16.gmra.mxu0 %v845_v42 }
  0x44   :  { %589 = vmatmul.bf16.gmra.mxu1 %v849_v43 }
  0x45   :  { %618 = vmatmul.bf16.gmra.mxu2 %v853_v44 }
  0x46   :  { %647 = vmatmul.bf16.gmra.mxu3 %v857_v45 }
  0x53   :  { %565 = vmatmul.bf16.gmra.mxu0 %v861_v1 }
  0x54   :  { %594 = vmatmul.bf16.gmra.mxu1 %v865_v2 }
  0x55   :  { %623 = vmatmul.bf16.gmra.mxu2 %v869_v3 }
  0x56   :  { %652 = vmatmul.bf16.gmra.mxu3 %v873_v4 }
  0x63   :  { %666 = vmatmul.bf16.vlgmr.msrb.gmra.mxu0 %v1475_v50 }
  0x64   :  { %695 = vmatmul.bf16.vlgmr.msrb.gmra.mxu1 %v1486_v55 }
  0x65   :  { %724 = vmatmul.bf16.vlgmr.msrb.gmra.mxu2 %v1488_v56 }
  0x66   :  { %753 = vmatmul.bf16.vlgmr.msrb.gmra.mxu3 %v1496_v59 }
  0x73   :  { %671 = vmatmul.bf16.gmra.mxu0 %v1616_v49 }
  0x74   :  { %700 = vmatmul.bf16.gmra.mxu1 %v1627_v57 }
  0x75   :  { %729 = vmatmul.bf16.gmra.mxu2 %v1629_v58 }
  0x76   :  { %758 = vmatmul.bf16.gmra.mxu3 %v1637_v62 }
  0x83   :  { %676 = vmatmul.bf16.gmra.mxu0 %v845_v42 }
  0x84   :  { %705 = vmatmul.bf16.gmra.mxu1 %v849_v43 }
  0x85   :  { %734 = vmatmul.bf16.gmra.mxu2 %v853_v44 }
  0x86   :  { %763 = vmatmul.bf16.gmra.mxu3 %v857_v45 }
  0x8c   :  { %v1771_v50 = vpop.permute.xlu0 %104 }
  0x91   :  { %v1789_v29 = vpop.permute.xlu2 %124 }
  0x93   :  { %681 = vmatmul.bf16.gmra.mxu0 %v861_v1 }
  0x94   :  { %710 = vmatmul.bf16.gmra.mxu1 %v865_v2  ;;  %v1774_v57 = vpop.permute.xlu0 %109 }
  0x95   :  { %739 = vmatmul.bf16.gmra.mxu2 %v869_v3 }
  0x96   :  { %768 = vmatmul.bf16.gmra.mxu3 %v873_v4 }
  0x99   :  { %v1779_v11 = vpop.permute.xlu1 %114  ;;  %v1794_v38 = vpop.permute.xlu2 %129 }
  0xa0   :  { %v551_v55 = vpop.f32.mrf.mxu0 }
  0xa1   :  { %v552_v56 = vadd.f32 %v551_v55, %v1771_v50  ;;  %v580_v59 = vpop.f32.mrf.mxu1  ;;  %v1784_v20 = vpop.permute.xlu1 %119 }
  0xa3   :  { %v581_v49 = vadd.f32 %v580_v59, %v552_v56 }
  0xa4   :  { %v1799_v47 = vpop.permute.xlu0 %134 }
  0xa8   :  { %v609_v58 = vpop.f32.mrf.mxu2  ;;  %v553_v6 = vpop.f32.mrf.mxu0 }
  0xa9   :  { %v610_v5 = vadd.f32 %v609_v58, %v581_v49  ;;  %v638_v62 = vpop.f32.mrf.mxu3  ;;  %v554_v7 = vadd.f32 %v553_v6, %v1774_v57  ;;  %v582_v8 = vpop.f32.mrf.mxu1 }
  0xaa   :  { %v1804_v0 = vpop.permute.xlu1 %139 }
  0xab   :  { %v1777_v9 = vadd.f32 %v638_v62, %v610_v5  ;;  %v583_v10 = vadd.f32 %v582_v8, %v554_v7 }
  0xb0   :  { %v611_v12 = vpop.f32.mrf.mxu2  ;;  %v556_v15 = vpop.f32.mrf.mxu0 }
  0xb1   :  { %v612_v13 = vadd.f32 %v611_v12, %v583_v10  ;;  %v640_v14 = vpop.f32.mrf.mxu3  ;;  %v557_v16 = vadd.f32 %v556_v15, %v1779_v11  ;;  %v585_v17 = vpop.f32.mrf.mxu1 }
  0xb3   :  { %v1782_v18 = vadd.f32 %v640_v14, %v612_v13  ;;  %v586_v19 = vadd.f32 %v585_v17, %v557_v16 }
  0xb8   :  { %v614_v21 = vpop.f32.mrf.mxu2  ;;  %v558_v24 = vpop.f32.mrf.mxu0 }
  0xb9   :  { %v615_v22 = vadd.f32 %v614_v21, %v586_v19  ;;  %v643_v23 = vpop.f32.mrf.mxu3  ;;  %v559_v25 = vadd.f32 %v558_v24, %v1784_v20  ;;  %v587_v26 = vpop.f32.mrf.mxu1 }
  0xbb   :  { %v1787_v27 = vadd.f32 %v643_v23, %v615_v22  ;;  %v588_v28 = vadd.f32 %v587_v26, %v559_v25  ;;  %v774_v22 = vmax.f32 %v1777_v9, 0.0 }
  0xc0   :  { %v616_v30 = vpop.f32.mrf.mxu2  ;;  %v561_v33 = vpop.f32.mrf.mxu0 }
  0xc1   :  { %v617_v31 = vadd.f32 %v616_v30, %v588_v28  ;;  %v645_v32 = vpop.f32.mrf.mxu3  ;;  %v562_v34 = vadd.f32 %v561_v33, %v1789_v29  ;;  %v590_v35 = vpop.f32.mrf.mxu1 }
  0xc3   :  { %v1792_v36 = vadd.f32 %v645_v32, %v617_v31  ;;  %v591_v37 = vadd.f32 %v590_v35, %v562_v34  ;;  %v776_v34 = vmax.f32 %v1782_v18, 0.0 }
  0xc8   :  { %v619_v39 = vpop.f32.mrf.mxu2  ;;  %v563_v42 = vpop.f32.mrf.mxu0 }
  0xc9   :  { %v620_v40 = vadd.f32 %v619_v39, %v591_v37  ;;  %v648_v41 = vpop.f32.mrf.mxu3  ;;  %v564_v43 = vadd.f32 %v563_v42, %v1794_v38  ;;  %v592_v44 = vpop.f32.mrf.mxu1 }
  0xcb   :  { %v1797_v45 = vadd.f32 %v648_v41, %v620_v40  ;;  %v593_v46 = vadd.f32 %v592_v44, %v564_v43 }
  0xd0   :  { %v621_v48 = vpop.f32.mrf.mxu2  ;;  %v566_v53 = vpop.f32.mrf.mxu0 }
  0xd1   :  { %v622_v51 = vadd.f32 %v621_v48, %v593_v46  ;;  %v650_v52 = vpop.f32.mrf.mxu3  ;;  %v595_v54 = vpop.f32.mrf.mxu1  ;;  %v567_v60 = vadd.f32 %v566_v53, %v1799_v47 }
  0xd3   :  { %v1802_v61 = vadd.f32 %v650_v52, %v622_v51  ;;  %v596_v63 = vadd.f32 %v595_v54, %v567_v60 }
  0xd8   :  { %v624_v1 = vpop.f32.mrf.mxu2  ;;  %v568_v4 = vpop.f32.mrf.mxu0 }
  0xd9   :  { %v625_v2 = vadd.f32 %v624_v1, %v596_v63  ;;  %v653_v3 = vpop.f32.mrf.mxu3  ;;  %v569_v55 = vadd.f32 %v568_v4, %v1804_v0  ;;  %v597_v56 = vpop.f32.mrf.mxu1 }
  0xdb   :  { %v1807_v59 = vadd.f32 %v653_v3, %v625_v2  ;;  %v598_v49 = vadd.f32 %v597_v56, %v569_v55  ;;  %v780_v2 = vmax.f32 %v1792_v36, 0.0 }
  0xe0   :  { %v626_v58 = vpop.f32.mrf.mxu2  ;;  %v667_v6 = vpop.f32.mrf.mxu0 }
  0xe1   :  { %v627_v5 = vadd.f32 %v626_v58, %v598_v49  ;;  %v655_v62 = vpop.f32.mrf.mxu3  ;;  %v668_v7 = vadd.f32 %v667_v6, %v1771_v50  ;;  %v696_v8 = vpop.f32.mrf.mxu1 }
  0xe3   :  { %v1810_v10 = vadd.f32 %v655_v62, %v627_v5  ;;  %v697_v12 = vadd.f32 %v696_v8, %v668_v7 }
  0xe8   :  { %v725_v13 = vpop.f32.mrf.mxu2  ;;  %v669_v16 = vpop.f32.mrf.mxu0 }
  0xe9   :  { %v726_v14 = vadd.f32 %v725_v13, %v697_v12  ;;  %v754_v15 = vpop.f32.mrf.mxu3  ;;  %v698_v17 = vpop.f32.mrf.mxu1  ;;  %v670_v21 = vadd.f32 %v669_v16, %v1774_v57 }
  0xeb   :  { %v755_v19 = vadd.f32 %v754_v15, %v726_v14  ;;  %v699_v25 = vadd.f32 %v698_v17, %v670_v21 }
  0xed   :  { %v775_v23 = vmax.f32 %v755_v19, 0.0  ;;  %v784_v19 = vmax.f32 %v1802_v61, 0.0 }
  0xef   :  { %v790_v24 = vpack.c.bf16 %v775_v23, %v774_v22 }
  0xf0   :  { %v727_v26 = vpop.f32.mrf.mxu2  ;;  %v672_v30 = vpop.f32.mrf.mxu0 }
  0xf1   :  { %798 = vst [vmem:[%s1854_s3] sm:$0xff] %v790_v24  ;;  %v728_v50 = vadd.f32 %v727_v26, %v699_v25  ;;  %v756_v28 = vpop.f32.mrf.mxu3  ;;  %v673_v31 = vadd.f32 %v672_v30, %v1779_v11  ;;  %v701_v32 = vpop.f32.mrf.mxu1  ;;  %v778_v11 = vmax.f32 %v1787_v27, 0.0 }
  0xf3   :  { %v757_v33 = vadd.f32 %v756_v28, %v728_v50  ;;  %v702_v35 = vadd.f32 %v701_v32, %v673_v31  ;;  %v786_v28 = vmax.f32 %v1807_v59, 0.0 }
  0xf5   :  { %v777_v57 = vmax.f32 %v757_v33, 0.0 }
  0xf7   :  { %v791_v9 = vpack.c.bf16 %v777_v57, %v776_v34 }
  0xf8   :  { %v730_v37 = vpop.f32.mrf.mxu2  ;;  %v674_v41 = vpop.f32.mrf.mxu0 }
  0xf9   :  { %799 = vst [vmem:[%s1854_s3 + $0x8] sm:$0xff] %v791_v9  ;;  %v731_v39 = vadd.f32 %v730_v37, %v702_v35  ;;  %v759_v40 = vpop.f32.mrf.mxu3  ;;  %v703_v42 = vpop.f32.mrf.mxu1  ;;  %v675_v44 = vadd.f32 %v674_v41, %v1784_v20  ;;  %v788_v35 = vmax.f32 %v1810_v10, 0.0 }
  0xfb   :  { %v760_v43 = vadd.f32 %v759_v40, %v731_v39  ;;  %v704_v18 = vadd.f32 %v703_v42, %v675_v44 }
  0xfd   :  { %v779_v46 = vmax.f32 %v760_v43, 0.0 }
  0xff   :  { %v792_v48 = vpack.c.bf16 %v779_v46, %v778_v11 }
 0x100   :  { %v732_v51 = vpop.f32.mrf.mxu2  ;;  %v677_v54 = vpop.f32.mrf.mxu0 }
 0x101   :  { %800 = vst [vmem:[%s1854_s3 + $0x10] sm:$0xff] %v792_v48  ;;  %v733_v52 = vadd.f32 %v732_v51, %v704_v18  ;;  %v761_v53 = vpop.f32.mrf.mxu3  ;;  %v678_v60 = vadd.f32 %v677_v54, %v1789_v29  ;;  %v706_v63 = vpop.f32.mrf.mxu1  ;;  %v782_v29 = vmax.f32 %v1797_v45, 0.0 }
 0x103   :  { %v762_v1 = vadd.f32 %v761_v53, %v733_v52  ;;  %v707_v3 = vadd.f32 %v706_v63, %v678_v60 }
 0x105   :  { %v781_v20 = vmax.f32 %v762_v1, 0.0 }
 0x107   :  { %v793_v27 = vpack.c.bf16 %v781_v20, %v780_v2 }
 0x108   :  { %v735_v4 = vpop.f32.mrf.mxu2  ;;  %v679_v49 = vpop.f32.mrf.mxu0 }
 0x109   :  { %801 = vst [vmem:[%s1854_s3 + $0x18] sm:$0xff] %v793_v27  ;;  %v736_v55 = vadd.f32 %v735_v4, %v707_v3  ;;  %v764_v56 = vpop.f32.mrf.mxu3  ;;  %v708_v58 = vpop.f32.mrf.mxu1  ;;  %v680_v62 = vadd.f32 %v679_v49, %v1794_v38 }
 0x10b   :  { %v765_v5 = vadd.f32 %v764_v56, %v736_v55  ;;  %v709_v36 = vadd.f32 %v708_v58, %v680_v62 }
 0x10d   :  { %v783_v6 = vmax.f32 %v765_v5, 0.0 }
 0x10f   :  { %v794_v7 = vpack.c.bf16 %v783_v6, %v782_v29 }
 0x110   :  { %v737_v8 = vpop.f32.mrf.mxu2  ;;  %v682_v14 = vpop.f32.mrf.mxu0 }
 0x111   :  { %802 = vst [vmem:[%s1854_s3 + $0x20] sm:$0xff] %v794_v7  ;;  %v738_v12 = vadd.f32 %v737_v8, %v709_v36  ;;  %v766_v13 = vpop.f32.mrf.mxu3  ;;  %v683_v16 = vadd.f32 %v682_v14, %v1799_v47  ;;  %v711_v17 = vpop.f32.mrf.mxu1 }
 0x113   :  { %v767_v15 = vadd.f32 %v766_v13, %v738_v12  ;;  %v712_v45 = vadd.f32 %v711_v17, %v683_v16 }
 0x115   :  { %v785_v38 = vmax.f32 %v767_v15, 0.0 }
 0x117   :  { %v795_v21 = vpack.c.bf16 %v785_v38, %v784_v19 }
 0x118   :  { %v740_v22 = vpop.f32.mrf.mxu2  ;;  %v684_v25 = vpop.f32.mrf.mxu0 }
 0x119   :  { %803 = vst [vmem:[%s1854_s3 + $0x28] sm:$0xff] %v795_v21  ;;  %v741_v23 = vadd.f32 %v740_v22, %v712_v45  ;;  %v769_v24 = vpop.f32.mrf.mxu3  ;;  %v685_v50 = vadd.f32 %v684_v25, %v1804_v0  ;;  %v713_v30 = vpop.f32.mrf.mxu1 }
 0x11b   :  { %v770_v26 = vadd.f32 %v769_v24, %v741_v23  ;;  %v714_v61 = vadd.f32 %v713_v30, %v685_v50 }
 0x11d   :  { %v787_v47 = vmax.f32 %v770_v26, 0.0 }
 0x11f   :  { %v796_v31 = vpack.c.bf16 %v787_v47, %v786_v28 }
 0x120   :  { %v742_v32 = vpop.f32.mrf.mxu2 }
 0x121   :  { %804 = vst [vmem:[%s1854_s3 + $0x30] sm:$0xff] %v796_v31  ;;  %v743_v33 = vadd.f32 %v742_v32, %v714_v61  ;;  %v771_v34 = vpop.f32.mrf.mxu3 }
 0x123   :  { %v772_v57 = vadd.f32 %v771_v34, %v743_v33 }
 0x125   :  { %v789_v9 = vmax.f32 %v772_v57, 0.0 }
 0x127   :  { %v797_v37 = vpack.c.bf16 %v789_v9, %v788_v35 }
 0x129   :  { %805 = vst [vmem:[%s1854_s3 + $0x38] sm:$0xff] %v797_v37 }

// kernel: dqn_forward.6
= control target key start
LH: loop header
LB: loop body
LE: loop exit
PB: predicated region body
PF: predicated region fallthrough
CT: control target
= control target key end

     0   :  { %v988_v6 = vmov 0   ;;  %vm475_vm0 = vcmask 523264   ;;  %s1283_s1 = inlined_call_operand.vmem [shape: bf16[576,128], index: 1, kind: input, shape index: {}]   ;;  %s1284_s2 = inlined_call_operand.vmem [shape: f32[64,1], index: 2, kind: input, shape index: {}]   ;;  %s1285_s0 = inlined_call_operand.vmem [shape: bf16[64,576], index: 0, kind: input, shape index: {}]   ;;  %s1286_s3 = inlined_call_operand.vmem [shape: bf16[64,128], index: 3, kind: output, shape index: {}]  }
   0x1   :  { %v916_v0 = vld [vmem:[%s1283_s1 + $0x38] sm:$0xff]  ;;  %v915_v1 = vld [vmem:[%s1283_s1 + $0x30] sm:$0xff]  ;;  %v914_v4 = vld [vmem:[%s1283_s1 + $0x28] sm:$0xff]  ;;  %986 = vset.pattern.permute.xlu1 %v988_v6  ;;  %985 = vset.pattern.permute.xlu0 %v988_v6 }
   0x2   :  { %968 = vmatpush.bf16.msra.mxu1 %v916_v0  ;;  %969 = vmatpush.bf16.msra.mxu2 %v916_v0  ;;  %v940_v2 = vld [vmem:[%s1283_s1 + $0xf8] sm:$0xff]  ;;  %v939_v3 = vld [vmem:[%s1283_s1 + $0xf0] sm:$0xff]  ;;  %v938_v5 = vld [vmem:[%s1283_s1 + $0xe8] sm:$0xff] }
   0x3   :  { %488 = vmatpush.bf16.msra.mxu0 %v916_v0  ;;  %575 = vmatpush.bf16.msra.mxu3 %v940_v2  ;;  %v913_v7 = vld [vmem:[%s1283_s1 + $0x20] sm:$0xff]  ;;  %v113_v8 = vld [vmem:[%s1284_s2 + $0x10] sm:$0xff]  ;;  %v912_v11 = vld [vmem:[%s1283_s1 + $0x18] sm:$0xff] }
   0x4   :  { %987 = vset.pattern.permute.xlu2 %v988_v6  ;;  %v937_v9 = vld [vmem:[%s1283_s1 + $0xe0] sm:$0xff]  ;;  %131 = vperm.xlu1 %986, %v113_v8   ;;  %v936_v12 = vld [vmem:[%s1283_s1 + $0xd8] sm:$0xff]  ;;  %v911_v13 = vld [vmem:[%s1283_s1 + $0x10] sm:$0xff] }
   0x5   :  { %v111_v10 = vld [vmem:[%s1284_s2] sm:$0xff]  ;;  %v114_v14 = vld [vmem:[%s1284_s2 + $0x18] sm:$0xff]  ;;  %v935_v15 = vld [vmem:[%s1283_s1 + $0xd0] sm:$0xff] }
   0x6   :  { %970 = vmatpush.bf16.msra.mxu1 %v915_v1  ;;  %971 = vmatpush.bf16.msra.mxu2 %v915_v1  ;;  %v112_v16 = vld [vmem:[%s1284_s2 + $0x8] sm:$0xff]  ;;  %v909_v19 = vld [vmem:[%s1283_s1] sm:$0xff]  ;;  %v896_v21 = vld [vmem:[%s1285_s0 + $0x38] sm:$0xf0] }
   0x7   :  { %489 = vmatpush.bf16.msra.mxu0 %v915_v1  ;;  %576 = vmatpush.bf16.msra.mxu3 %v939_v3  ;;  %v910_v17 = vld [vmem:[%s1283_s1 + $0x8] sm:$0xff]  ;;  %v723_v22 = vld [vmem:[%s1285_s0 + $0x78] sm:$0xf]  ;;  %v663_v26 = vld [vmem:[%s1285_s0] sm:$0xf] }
   0x8   :  { %121 = vperm.xlu0 %985, %v111_v10   ;;  %v934_v18 = vld [vmem:[%s1283_s1 + $0xc8] sm:$0xff]  ;;  %v932_v24 = vld [vmem:[%s1283_s1 + $0xb8] sm:$0xff]  ;;  %v933_v27 = vld [vmem:[%s1283_s1 + $0xc0] sm:$0xff] }
   0x9   :  { %v683_v20 = vld [vmem:[%s1285_s0 + $0x28] sm:$0xf]  ;;  %v906_v23 = vld [vmem:[%s1285_s0 + $0x88] sm:$0xf0]  ;;  %v924_v25 = vld [vmem:[%s1283_s1 + $0x78] sm:$0xff] }
   0xa   :  { %972 = vmatpush.bf16.msra.mxu1 %v914_v4  ;;  %973 = vmatpush.bf16.msra.mxu2 %v914_v4  ;;  %v684_v28 = vor.u32 %v896_v21, %v683_v20  ;;  %v724_v29 = vor.u32 %v906_v23, %v723_v22  ;;  %v891_v30 = vld [vmem:[%s1285_s0 + $0x10] sm:$0xf0]  ;;  %v890_v31 = vld [vmem:[%s1285_s0 + $0xc] sm:$0xf]  ;;  %v673_v32 = vld [vmem:[%s1285_s0 + $0x1c] sm:$0xf0] }
   0xb   :  { %490 = vmatpush.bf16.msra.mxu0 %v914_v4  ;;  %577 = vmatpush.bf16.msra.mxu3 %v938_v5  ;;  %v944_v33 = vld [vmem:[%s1283_s1 + $0x118] sm:$0xff]  ;;  %v931_v34 = vld [vmem:[%s1283_s1 + $0xb0] sm:$0xff]  ;;  %v664_v37 = vor.u32 %v891_v30, %v663_v26  ;;  %v676_v38 = vor.u32 %v890_v31, %v673_v32  ;;  %v930_v41 = vld [vmem:[%s1283_s1 + $0xa8] sm:$0xff] }
   0xc   :  { %136 = vperm.xlu1 %986, %v114_v14   ;;  %v923_v35 = vld [vmem:[%s1283_s1 + $0x70] sm:$0xff]  ;;  %v118_v36 = vld [vmem:[%s1284_s2 + $0x38] sm:$0xff]  ;;  %v922_v42 = vld [vmem:[%s1283_s1 + $0x68] sm:$0xff] }
   0xd   :  { %v943_v39 = vld [vmem:[%s1283_s1 + $0x110] sm:$0xff]  ;;  %v942_v43 = vld [vmem:[%s1283_s1 + $0x108] sm:$0xff]  ;;  %v929_v44 = vld [vmem:[%s1283_s1 + $0xa0] sm:$0xff] }
   0xe   :  { %974 = vmatpush.bf16.msra.mxu1 %v913_v7  ;;  %975 = vmatpush.bf16.msra.mxu2 %v913_v7  ;;  %v117_v40 = vld [vmem:[%s1284_s2 + $0x30] sm:$0xff]  ;;  %v921_v45 = vld [vmem:[%s1283_s1 + $0x60] sm:$0xff]  ;;  %v928_v49 = vld [vmem:[%s1283_s1 + $0x98] sm:$0xff] }
   0xf   :  { %491 = vmatpush.bf16.msra.mxu0 %v913_v7  ;;  %578 = vmatpush.bf16.msra.mxu3 %v937_v9  ;;  %v703_v46 = vld [vmem:[%s1285_s0 + $0x50] sm:$0xf]  ;;  %v901_v47 = vld [vmem:[%s1285_s0 + $0x60] sm:$0xf0]  ;;  %v920_v50 = vld [vmem:[%s1283_s1 + $0x58] sm:$0xff] }
  0x10   :  { %126 = vperm.xlu0 %985, %v112_v16   ;;  %v941_v48 = vld [vmem:[%s1283_s1 + $0x100] sm:$0xff]  ;;  %v679_v51 = vld [vmem:[%s1285_s0 + $0x10] sm:$0xf]  ;;  %v704_v52 = vor.u32 %v901_v47, %v703_v46  ;;  %v895_v54 = vld [vmem:[%s1285_s0 + $0x34] sm:$0xf] }
  0x11   :  { %v893_v53 = vld [vmem:[%s1285_s0 + $0x20] sm:$0xf0]  ;;  %v693_v55 = vld [vmem:[%s1285_s0 + $0x44] sm:$0xf0]  ;;  %v927_v56 = vld [vmem:[%s1283_s1 + $0x90] sm:$0xff] }
  0x12   :  { %976 = vmatpush.bf16.msra.mxu1 %v912_v11  ;;  %977 = vmatpush.bf16.msra.mxu2 %v912_v11  ;;  %v919_v57 = vld [vmem:[%s1283_s1 + $0x50] sm:$0xff]  ;;  %v680_v58 = vor.u32 %v893_v53, %v679_v51  ;;  %v696_v59 = vor.u32 %v895_v54, %v693_v55  ;;  %v115_v60 = vld [vmem:[%s1284_s2 + $0x20] sm:$0xff]  ;;  %v926_v61 = vld [vmem:[%s1283_s1 + $0x88] sm:$0xff] }
  0x13   :  { %492 = vmatpush.bf16.msra.mxu0 %v912_v11  ;;  %579 = vmatpush.bf16.msra.mxu3 %v936_v12  ;;  %v918_v62 = vld [vmem:[%s1283_s1 + $0x48] sm:$0xff]  ;;  %v925_v63 = vld [vmem:[%s1283_s1 + $0x80] sm:$0xff]  ;;  %v892_v2 = vld [vmem:[%s1285_s0 + $0x18] sm:$0xf0] }
  0x14   :  { %156 = vperm.xlu1 %986, %v118_v36   ;;  %141 = vperm.xlu2 %987, %v115_v60   ;;  %v917_v0 = vld [vmem:[%s1283_s1 + $0x40] sm:$0xff]  ;;  %v671_v1 = vld [vmem:[%s1285_s0 + $0x8] sm:$0xf]  ;;  %v665_v6 = vld [vmem:[%s1285_s0 + $0x14] sm:$0xf0] }
  0x15   :  { %v116_v3 = vld [vmem:[%s1284_s2 + $0x28] sm:$0xff]  ;;  %v672_v4 = vor.u32 %v892_v2, %v671_v1  ;;  %v889_v5 = vld [vmem:[%s1285_s0 + $0x4] sm:$0xf]  ;;  %v699_v7 = vld [vmem:[%s1285_s0 + $0x38] sm:$0xf] }
  0x16   :  { %978 = vmatpush.bf16.msra.mxu1 %v911_v13  ;;  %979 = vmatpush.bf16.msra.mxu2 %v911_v13  ;;  %v668_v8 = vor.u32 %v889_v5, %v665_v6  ;;  %v898_v9 = vld [vmem:[%s1285_s0 + $0x48] sm:$0xf0]  ;;  %v900_v10 = vld [vmem:[%s1285_s0 + $0x5c] sm:$0xf]  ;;  %v713_v11 = vld [vmem:[%s1285_s0 + $0x6c] sm:$0xf0] }
  0x17   :  { %493 = vmatpush.bf16.msra.mxu0 %v911_v13  ;;  %580 = vmatpush.bf16.msra.mxu3 %v935_v15  ;;  %v700_v12 = vor.u32 %v898_v9, %v699_v7  ;;  %v716_v13 = vor.u32 %v900_v10, %v713_v11  ;;  %v691_v14 = vld [vmem:[%s1285_s0 + $0x30] sm:$0xf]  ;;  %v897_v15 = vld [vmem:[%s1285_s0 + $0x40] sm:$0xf0]  ;;  %v903_v21 = vld [vmem:[%s1285_s0 + $0x70] sm:$0xf0] }
  0x18   :  { %151 = vperm.xlu0 %985, %v117_v40   ;;  %v692_v16 = vor.u32 %v897_v15, %v691_v14  ;;  %v905_v22 = vld [vmem:[%s1285_s0 + $0x84] sm:$0xf]  ;;  %v733_v23 = vld [vmem:[%s1285_s0 + $0x94] sm:$0xf0]  ;;  %v705_v30 = vld [vmem:[%s1285_s0 + $0x64] sm:$0xf0] }
  0x19   :  { %v711_v26 = vld [vmem:[%s1285_s0 + $0x58] sm:$0xf]  ;;  %v739_v32 = vld [vmem:[%s1285_s0 + $0x88] sm:$0xf]  ;;  %v907_v36 = vld [vmem:[%s1285_s0 + $0x90] sm:$0xf0] }
  0x1a   :  { %980 = vmatpush.bf16.msra.mxu1 %v910_v17  ;;  %981 = vmatpush.bf16.msra.mxu2 %v910_v17 }
  0x1b   :  { %494 = vmatpush.bf16.msra.mxu0 %v910_v17  ;;  %581 = vmatpush.bf16.msra.mxu3 %v934_v18  ;;  %v894_v17 = vld [vmem:[%s1285_s0 + $0x2c] sm:$0xf]  ;;  %v685_v18 = vld [vmem:[%s1285_s0 + $0x3c] sm:$0xf0] }
  0x1c   :  { %146 = vperm.xlu2 %987, %v116_v3   ;;  %v688_v20 = vor.u32 %v894_v17, %v685_v18 }
  0x1e   :  { %982 = vmatpush.bf16.msra.mxu1 %v909_v19  ;;  %983 = vmatpush.bf16.msra.mxu2 %v909_v19 }
  0x1f   :  { %495 = vmatpush.bf16.msra.mxu0 %v909_v19  ;;  %582 = vmatpush.bf16.msra.mxu3 %v933_v27  ;;  %v719_v19 = vld [vmem:[%s1285_s0 + $0x60] sm:$0xf]  ;;  %v902_v27 = vld [vmem:[%s1285_s0 + $0x68] sm:$0xf0] }
  0x21   :  { %501 = vmatmul.bf16.vlgmr.msra.gmra.mxu1 %v684_v28  ;;  %511 = vmatmul.bf16.vlgmr.msra.gmra.mxu2 %v724_v29  ;;  %v712_v28 = vor.u32 %v902_v27, %v711_v26  ;;  %v899_v29 = vld [vmem:[%s1285_s0 + $0x54] sm:$0xf] }
  0x22   :  { %546 = vmatpush.bf16.msrb.mxu2 %v932_v24  ;;  %517 = vmatpush.bf16.msrb.mxu1 %v924_v25  ;;  %v720_v24 = vor.u32 %v903_v21, %v719_v19  ;;  %v736_v25 = vor.u32 %v905_v22, %v733_v23  ;;  %v708_v31 = vor.u32 %v899_v29, %v705_v30 }
  0x23   :  { %608 = vmatpush.bf16.msrb.mxu0 %v944_v33  ;;  %583 = vmatmul.bf16.vlgmr.msra.gmra.mxu3 %v676_v38  ;;  %v908_v33 = vld [vmem:[%s1285_s0 + $0x98] sm:$0xf0] }
  0x24   :  { %496 = vmatmul.bf16.vlgmr.msra.gmra.mxu0 %v664_v37  ;;  %v904_v38 = vld [vmem:[%s1285_s0 + $0x7c] sm:$0xf] }
  0x26   :  { %547 = vmatpush.bf16.msrb.mxu2 %v931_v34  ;;  %518 = vmatpush.bf16.msrb.mxu1 %v923_v35  ;;  %v740_v34 = vor.u32 %v908_v33, %v739_v32  ;;  %v731_v35 = vld [vmem:[%s1285_s0 + $0x80] sm:$0xf] }
  0x27   :  { %609 = vmatpush.bf16.msrb.mxu0 %v943_v39  ;;  %v732_v37 = vor.u32 %v907_v36, %v731_v35  ;;  %v725_v39 = vld [vmem:[%s1285_s0 + $0x8c] sm:$0xf0] }
  0x28   :  { %v728_v40 = vor.u32 %v904_v38, %v725_v39 }
  0x2a   :  { %548 = vmatpush.bf16.msrb.mxu2 %v930_v41  ;;  %519 = vmatpush.bf16.msrb.mxu1 %v922_v42 }
  0x2b   :  { %610 = vmatpush.bf16.msrb.mxu0 %v942_v43 }
  0x2e   :  { %549 = vmatpush.bf16.msrb.mxu2 %v929_v44  ;;  %520 = vmatpush.bf16.msrb.mxu1 %v921_v45 }
  0x2f   :  { %611 = vmatpush.bf16.msrb.mxu0 %v941_v48 }
  0x31   :  { %506 = vmatmul.bf16.gmra.mxu1 %v704_v52 }
  0x32   :  { %550 = vmatpush.bf16.msrb.mxu2 %v928_v49  ;;  %521 = vmatpush.bf16.msrb.mxu1 %v920_v50 }
  0x33   :  { %588 = vmatmul.bf16.gmra.mxu3 %v696_v59 }
  0x34   :  { %885 = vmatmul.msk.bf16.vlgmr.msrb.gmra.mxu0 %vm475_vm0, %v680_v58 }
  0x36   :  { %551 = vmatpush.bf16.msrb.mxu2 %v927_v56  ;;  %522 = vmatpush.bf16.msrb.mxu1 %v919_v57 }
  0x3a   :  { %552 = vmatpush.bf16.msrb.mxu2 %v926_v61  ;;  %523 = vmatpush.bf16.msrb.mxu1 %v918_v62 }
  0x3e   :  { %553 = vmatpush.bf16.msrb.mxu2 %v925_v63  ;;  %524 = vmatpush.bf16.msrb.mxu1 %v917_v0 }
  0x41   :  { %554 = vmatmul.bf16.vlgmr.msrb.gmra.mxu2 %v672_v4  ;;  %525 = vmatmul.bf16.vlgmr.msrb.gmra.mxu1 %v668_v8 }
  0x43   :  { %593 = vmatmul.bf16.gmra.mxu3 %v716_v13 }
  0x44   :  { %886 = vmatmul.msk.bf16.gmra.mxu0 %vm475_vm0, %v700_v12 }
  0x51   :  { %559 = vmatmul.bf16.gmra.mxu2 %v692_v16  ;;  %530 = vmatmul.bf16.gmra.mxu1 %v688_v20 }
  0x53   :  { %598 = vmatmul.bf16.gmra.mxu3 %v736_v25 }
  0x54   :  { %887 = vmatmul.msk.bf16.gmra.mxu0 %vm475_vm0, %v720_v24 }
  0x61   :  { %564 = vmatmul.bf16.gmra.mxu2 %v712_v28  ;;  %535 = vmatmul.bf16.gmra.mxu1 %v708_v31 }
  0x64   :  { %888 = vmatmul.msk.bf16.gmra.mxu0 %vm475_vm0, %v740_v34 }
  0x6e   :  { %v142_v22 = vpop.permute.xlu2 %141 }
  0x71   :  { %569 = vmatmul.bf16.gmra.mxu2 %v732_v37  ;;  %540 = vmatmul.bf16.gmra.mxu1 %v728_v40 }
  0x76   :  { %v132_v63 = vpop.permute.xlu1 %131  ;;  %v147_v37 = vpop.permute.xlu2 %146 }
  0x7a   :  { %v122_v51 = vpop.permute.xlu0 %121 }
  0x7e   :  { %v137_v14 = vpop.permute.xlu1 %136 }
  0x82   :  { %v127_v58 = vpop.permute.xlu0 %126 }
  0x9e   :  { %v502_v41 = vpop.f32.mrf.mxu1 }
  0x9f   :  { %v503_v7 = vadd.f32 %v502_v41, %v132_v63 }
  0xa1   :  { %v497_v42 = vpop.f32.mrf.mxu0 }
  0xa2   :  { %v498_v52 = vadd.f32 %v497_v42, %v122_v51  ;;  %v152_v51 = vpop.permute.xlu0 %151 }
  0xa4   :  { %v1265_v46 = vpop.f32.mrf.mxu2 }
  0xa6   :  { %v504_v43 = vpop.f32.mrf.mxu1  ;;  %v584_v47 = vpop.f32.mrf.mxu3 }
  0xa7   :  { %v505_v18 = vadd.f32 %v504_v43, %v137_v14 }
  0xa9   :  { %v499_v44 = vpop.f32.mrf.mxu0 }
  0xaa   :  { %v500_v60 = vadd.f32 %v499_v44, %v127_v58 }
  0xac   :  { %v1267_v50 = vpop.f32.mrf.mxu2 }
  0xae   :  { %v507_v45 = vpop.f32.mrf.mxu1  ;;  %v586_v54 = vpop.f32.mrf.mxu3 }
  0xaf   :  { %v508_v29 = vadd.f32 %v507_v45, %v142_v22 }
  0xb1   :  { %v613_v49 = vpop.f32.mrf.mxu0 }
  0xb6   :  { %v509_v48 = vpop.f32.mrf.mxu1  ;;  %v589_v2 = vpop.f32.mrf.mxu3 }
  0xb7   :  { %v510_v40 = vadd.f32 %v509_v48, %v147_v37  ;;  %v157_v48 = vpop.permute.xlu1 %156 }
  0xb9   :  { %v615_v57 = vpop.f32.mrf.mxu0 }
  0xbe   :  { %v526_v53 = vpop.f32.mrf.mxu1  ;;  %v591_v16 = vpop.f32.mrf.mxu3 }
  0xbf   :  { %v527_v55 = vadd.f32 %v526_v53, %v498_v52 }
  0xc1   :  { %v618_v4 = vpop.f32.mrf.mxu0 }
  0xc4   :  { %v555_v56 = vpop.f32.mrf.mxu2 }
  0xc5   :  { %v556_v59 = vadd.f32 %v555_v56, %v527_v55 }
  0xc6   :  { %v528_v61 = vpop.f32.mrf.mxu1  ;;  %v594_v28 = vpop.f32.mrf.mxu3 }
  0xc7   :  { %v529_v62 = vadd.f32 %v528_v61, %v500_v60  ;;  %v585_v0 = vadd.f32 %v584_v47, %v556_v59 }
  0xc9   :  { %v614_v5 = vadd.f32 %v613_v49, %v585_v0  ;;  %v620_v19 = vpop.f32.mrf.mxu0 }
  0xcb   :  { %v633_v10 = vmax.f32 %v614_v5, 0.0 }
  0xcc   :  { %v557_v1 = vpop.f32.mrf.mxu2 }
  0xcd   :  { %v558_v3 = vadd.f32 %v557_v1, %v529_v62  ;;  %v515_v1 = vadd.f32 %v1267_v50, %v157_v48 }
  0xce   :  { %v531_v9 = vpop.f32.mrf.mxu1  ;;  %v596_v42 = vpop.f32.mrf.mxu3 }
  0xcf   :  { %v587_v6 = vadd.f32 %v586_v54, %v558_v3  ;;  %v532_v12 = vadd.f32 %v531_v9, %v503_v7  ;;  %v513_v54 = vadd.f32 %v1265_v46, %v152_v51 }
  0xd1   :  { %v616_v8 = vadd.f32 %v615_v57, %v587_v6  ;;  %v623_v32 = vpop.f32.mrf.mxu0 }
  0xd3   :  { %v634_v11 = vmax.f32 %v616_v8, 0.0 }
  0xd4   :  { %v560_v13 = vpop.f32.mrf.mxu2 }
  0xd5   :  { %v948_v15 = vpack.c.bf16 %v634_v11, %v633_v10  ;;  %v561_v17 = vadd.f32 %v560_v13, %v532_v12 }
  0xd6   :  { %v533_v20 = vpop.f32.mrf.mxu1  ;;  %v599_v60 = vpop.f32.mrf.mxu3 }
  0xd7   :  { %949 = vst [vmem:[%s1286_s3] sm:$0xff] %v948_v15   ;;  %v534_v21 = vadd.f32 %v533_v20, %v505_v18  ;;  %v590_v23 = vadd.f32 %v589_v2, %v561_v17 }
  0xd9   :  { %v619_v26 = vadd.f32 %v618_v4, %v590_v23  ;;  %v625_v45 = vpop.f32.mrf.mxu0 }
  0xdb   :  { %v635_v33 = vmax.f32 %v619_v26, 0.0 }
  0xdc   :  { %v562_v24 = vpop.f32.mrf.mxu2 }
  0xdd   :  { %v563_v25 = vadd.f32 %v562_v24, %v534_v21 }
  0xde   :  { %v536_v31 = vpop.f32.mrf.mxu1  ;;  %v601_v6 = vpop.f32.mrf.mxu3 }
  0xdf   :  { %v592_v27 = vadd.f32 %v591_v16, %v563_v25  ;;  %v537_v35 = vadd.f32 %v536_v31, %v508_v29 }
  0xe1   :  { %v621_v30 = vadd.f32 %v620_v19, %v592_v27  ;;  %v628_v63 = vpop.f32.mrf.mxu0 }
  0xe3   :  { %v636_v34 = vmax.f32 %v621_v30, 0.0 }
  0xe4   :  { %v565_v36 = vpop.f32.mrf.mxu2 }
  0xe5   :  { %v953_v38 = vpack.c.bf16 %v636_v34, %v635_v33  ;;  %v566_v39 = vadd.f32 %v565_v36, %v537_v35 }
  0xe6   :  { %v538_v41 = vpop.f32.mrf.mxu1 }
  0xe7   :  { %965 = vst [vmem:[%s1286_s3 + $0x8] sm:$0xff] %v953_v38   ;;  %v539_v43 = vadd.f32 %v538_v41, %v510_v40  ;;  %v595_v44 = vadd.f32 %v594_v28, %v566_v39 }
  0xe9   :  { %v624_v52 = vadd.f32 %v623_v32, %v595_v44  ;;  %v630_v9 = vpop.f32.mrf.mxu0 }
  0xeb   :  { %v637_v57 = vmax.f32 %v624_v52, 0.0 }
  0xec   :  { %v567_v47 = vpop.f32.mrf.mxu2 }
  0xed   :  { %v568_v49 = vadd.f32 %v567_v47, %v539_v43 }
  0xee   :  { %v541_v56 = vpop.f32.mrf.mxu1 }
  0xef   :  { %v597_v53 = vadd.f32 %v596_v42, %v568_v49  ;;  %v542_v59 = vadd.f32 %v541_v56, %v513_v54 }
  0xf1   :  { %v626_v55 = vadd.f32 %v625_v45, %v597_v53 }
  0xf3   :  { %v638_v58 = vmax.f32 %v626_v55, 0.0 }
  0xf4   :  { %v570_v61 = vpop.f32.mrf.mxu2 }
  0xf5   :  { %v958_v62 = vpack.c.bf16 %v638_v58, %v637_v57  ;;  %v571_v0 = vadd.f32 %v570_v61, %v542_v59 }
  0xf6   :  { %v543_v2 = vpop.f32.mrf.mxu1 }
  0xf7   :  { %966 = vst [vmem:[%s1286_s3 + $0x10] sm:$0xff] %v958_v62   ;;  %v544_v3 = vadd.f32 %v543_v2, %v515_v1  ;;  %v600_v46 = vadd.f32 %v599_v60, %v571_v0 }
  0xf9   :  { %v629_v7 = vadd.f32 %v628_v63, %v600_v46 }
  0xfb   :  { %v639_v11 = vmax.f32 %v629_v7, 0.0 }
  0xfc   :  { %v572_v4 = vpop.f32.mrf.mxu2 }
  0xfd   :  { %v573_v5 = vadd.f32 %v572_v4, %v544_v3 }
  0xff   :  { %v602_v8 = vadd.f32 %v601_v6, %v573_v5 }
 0x101   :  { %v631_v10 = vadd.f32 %v630_v9, %v602_v8 }
 0x103   :  { %v640_v12 = vmax.f32 %v631_v10, 0.0 }
 0x105   :  { %v963_v13 = vpack.c.bf16 %v640_v12, %v639_v11 }
 0x107   :  { %967 = vst [vmem:[%s1286_s3 + $0x18] sm:$0xff] %v963_v13  }

// kernel: dqn_forward.7
= control target key start
LH: loop header
LB: loop body
LE: loop exit
PB: predicated region body
PF: predicated region fallthrough
CT: control target
= control target key end

     0   :  { %vm4962_vm0 = vcmask 523264   ;;  %s16134_s1 = inlined_call_operand.vmem [shape: bf16[512,3136], index: 1, kind: input, shape index: {}]   ;;  %s16135_s0 = inlined_call_operand.vmem [shape: bf16[8,3136], index: 0, kind: input, shape index: {}]   ;;  %s16136_s2 = inlined_call_operand.vmem [shape: f32[1,512], index: 2, kind: input, shape index: {}]   ;;  %s16137_s3 = inlined_call_operand.vmem [shape: bf16[128,512], index: 3, kind: input, shape index: {}]   ;;  %s16138_s4 = inlined_call_operand.vmem [shape: f32[1,128], index: 4, kind: input, shape index: {}]   ;;  %s16139_s5 = inlined_call_operand.vmem [shape: f32[8,128], index: 5, kind: output, shape index: {}]  }
   0x1   :  { %v7325_v0 = vld [vmem:[%s16134_s1 + $0x578] sm:$0xf]  ;;  %v10142_v1 = vld [vmem:[%s16134_s1 + $0x5d8] sm:$0xf0]  ;;  %v7327_v4 = vld [vmem:[%s16134_s1 + $0x5dc] sm:$0xf0] }
   0x2   :  { %v10130_v2 = vld [vmem:[%s16134_s1 + $0x57c] sm:$0xf]  ;;  %v7326_v3 = vor.u32 %v10142_v1, %v7325_v0  ;;  %v7333_v5 = vld [vmem:[%s16134_s1 + $0x580] sm:$0xf]  ;;  %v10143_v6 = vld [vmem:[%s16134_s1 + $0x5e0] sm:$0xf0] }
   0x3   :  { %v7330_v7 = vor.u32 %v10130_v2, %v7327_v4  ;;  %v7334_v8 = vor.u32 %v10143_v6, %v7333_v5  ;;  %v10131_v9 = vld [vmem:[%s16134_s1 + $0x584] sm:$0xf]  ;;  %v7335_v10 = vld [vmem:[%s16134_s1 + $0x5e4] sm:$0xf0]  ;;  %v7225_v12 = vld [vmem:[%s16134_s1 + $0x4b0] sm:$0xf] }
   0x4   :  { %5062 = vmatpush.bf16.xpose.msra.mxu0 %v7326_v3  ;;  %v7338_v11 = vor.u32 %v10131_v9, %v7335_v10  ;;  %v10117_v13 = vld [vmem:[%s16134_s1 + $0x510] sm:$0xf0]  ;;  %v7227_v15 = vld [vmem:[%s16134_s1 + $0x514] sm:$0xf0]  ;;  %v10118_v17 = vld [vmem:[%s16134_s1 + $0x518] sm:$0xf0] }
   0x5   :  { %5075 = vmatpush.bf16.xpose.msra.mxu1 %v7330_v7  ;;  %5088 = vmatpush.bf16.xpose.msra.mxu2 %v7334_v8  ;;  %v10105_v14 = vld [vmem:[%s16134_s1 + $0x4b4] sm:$0xf]  ;;  %v7233_v16 = vld [vmem:[%s16134_s1 + $0x4b8] sm:$0xf]  ;;  %v10106_v18 = vld [vmem:[%s16134_s1 + $0x4bc] sm:$0xf]  ;;  %v7226_v20 = vor.u32 %v10117_v13, %v7225_v12 }
   0x6   :  { %5101 = vmatpush.bf16.xpose.msra.mxu3 %v7338_v11  ;;  %v7235_v19 = vld [vmem:[%s16134_s1 + $0x51c] sm:$0xf0]  ;;  %v7230_v21 = vor.u32 %v10105_v14, %v7227_v15  ;;  %v7234_v22 = vor.u32 %v10118_v17, %v7233_v16  ;;  %v7125_v24 = vld [vmem:[%s16134_s1 + $0x3e8] sm:$0xf]  ;;  %v10092_v25 = vld [vmem:[%s16134_s1 + $0x448] sm:$0xf0] }
   0x7   :  { %v7238_v23 = vor.u32 %v10106_v18, %v7235_v19  ;;  %v10080_v26 = vld [vmem:[%s16134_s1 + $0x3ec] sm:$0xf]  ;;  %v7127_v27 = vld [vmem:[%s16134_s1 + $0x44c] sm:$0xf0]  ;;  %v10093_v29 = vld [vmem:[%s16134_s1 + $0x450] sm:$0xf0]  ;;  %v7126_v32 = vor.u32 %v10092_v25, %v7125_v24 }
   0x8   :  { %v7133_v28 = vld [vmem:[%s16134_s1 + $0x3f0] sm:$0xf]  ;;  %v10081_v30 = vld [vmem:[%s16134_s1 + $0x3f4] sm:$0xf]  ;;  %v7135_v31 = vld [vmem:[%s16134_s1 + $0x454] sm:$0xf0]  ;;  %v7130_v33 = vor.u32 %v10080_v26, %v7127_v27 }
   0x9   :  { %v7134_v34 = vor.u32 %v10093_v29, %v7133_v28  ;;  %v7138_v35 = vor.u32 %v10081_v30, %v7135_v31  ;;  %v7025_v36 = vld [vmem:[%s16134_s1 + $0x320] sm:$0xf]  ;;  %v10067_v37 = vld [vmem:[%s16134_s1 + $0x380] sm:$0xf0]  ;;  %v7027_v39 = vld [vmem:[%s16134_s1 + $0x384] sm:$0xf0] }
   0xa   :  { %v10055_v38 = vld [vmem:[%s16134_s1 + $0x324] sm:$0xf]  ;;  %v7033_v40 = vld [vmem:[%s16134_s1 + $0x328] sm:$0xf]  ;;  %v10068_v41 = vld [vmem:[%s16134_s1 + $0x388] sm:$0xf0]  ;;  %v7026_v44 = vor.u32 %v10067_v37, %v7025_v36 }
   0xb   :  { %v10056_v42 = vld [vmem:[%s16134_s1 + $0x32c] sm:$0xf]  ;;  %v7035_v43 = vld [vmem:[%s16134_s1 + $0x38c] sm:$0xf0]  ;;  %v7030_v45 = vor.u32 %v10055_v38, %v7027_v39  ;;  %v7034_v46 = vor.u32 %v10068_v41, %v7033_v40  ;;  %v6925_v48 = vld [vmem:[%s16134_s1 + $0x258] sm:$0xf] }
   0xc   :  { %5063 = vmatpush.bf16.xpose.msra.mxu0 %v7226_v20  ;;  %v7038_v47 = vor.u32 %v10056_v42, %v7035_v43  ;;  %v10042_v49 = vld [vmem:[%s16134_s1 + $0x2b8] sm:$0xf0]  ;;  %v6927_v51 = vld [vmem:[%s16134_s1 + $0x2bc] sm:$0xf0]  ;;  %v10043_v53 = vld [vmem:[%s16134_s1 + $0x2c0] sm:$0xf0] }
   0xd   :  { %5076 = vmatpush.bf16.xpose.msra.mxu1 %v7230_v21  ;;  %5089 = vmatpush.bf16.xpose.msra.mxu2 %v7234_v22  ;;  %v10030_v50 = vld [vmem:[%s16134_s1 + $0x25c] sm:$0xf]  ;;  %v6933_v52 = vld [vmem:[%s16134_s1 + $0x260] sm:$0xf]  ;;  %v10031_v54 = vld [vmem:[%s16134_s1 + $0x264] sm:$0xf]  ;;  %v6926_v56 = vor.u32 %v10042_v49, %v6925_v48 }
   0xe   :  { %5102 = vmatpush.bf16.xpose.msra.mxu3 %v7238_v23  ;;  %v6935_v55 = vld [vmem:[%s16134_s1 + $0x2c4] sm:$0xf0]  ;;  %v6930_v57 = vor.u32 %v10030_v50, %v6927_v51  ;;  %v6934_v58 = vor.u32 %v10043_v53, %v6933_v52  ;;  %v6825_v60 = vld [vmem:[%s16134_s1 + $0x190] sm:$0xf]  ;;  %v10017_v61 = vld [vmem:[%s16134_s1 + $0x1f0] sm:$0xf0] }
   0xf   :  { %v6938_v59 = vor.u32 %v10031_v54, %v6935_v55  ;;  %v10005_v62 = vld [vmem:[%s16134_s1 + $0x194] sm:$0xf]  ;;  %v6827_v63 = vld [vmem:[%s16134_s1 + $0x1f4] sm:$0xf0]  ;;  %v10018_v1 = vld [vmem:[%s16134_s1 + $0x1f8] sm:$0xf0]  ;;  %v6826_v4 = vor.u32 %v10017_v61, %v6825_v60 }
  0x10   :  { %v6833_v0 = vld [vmem:[%s16134_s1 + $0x198] sm:$0xf]  ;;  %v10006_v2 = vld [vmem:[%s16134_s1 + $0x19c] sm:$0xf]  ;;  %v6835_v3 = vld [vmem:[%s16134_s1 + $0x1fc] sm:$0xf0]  ;;  %v6830_v5 = vor.u32 %v10005_v62, %v6827_v63 }
  0x11   :  { %v6834_v6 = vor.u32 %v10018_v1, %v6833_v0  ;;  %v6838_v7 = vor.u32 %v10006_v2, %v6835_v3  ;;  %v6725_v8 = vld [vmem:[%s16134_s1 + $0xc8] sm:$0xf]  ;;  %v9992_v9 = vld [vmem:[%s16134_s1 + $0x128] sm:$0xf0]  ;;  %v6727_v11 = vld [vmem:[%s16134_s1 + $0x12c] sm:$0xf0] }
  0x12   :  { %v9980_v10 = vld [vmem:[%s16134_s1 + $0xcc] sm:$0xf]  ;;  %v6733_v12 = vld [vmem:[%s16134_s1 + $0xd0] sm:$0xf]  ;;  %v9993_v13 = vld [vmem:[%s16134_s1 + $0x130] sm:$0xf0]  ;;  %v6726_v16 = vor.u32 %v9992_v9, %v6725_v8 }
  0x13   :  { %v9981_v14 = vld [vmem:[%s16134_s1 + $0xd4] sm:$0xf]  ;;  %v6735_v15 = vld [vmem:[%s16134_s1 + $0x134] sm:$0xf0]  ;;  %v6730_v17 = vor.u32 %v9980_v10, %v6727_v11  ;;  %v6734_v18 = vor.u32 %v9993_v13, %v6733_v12  ;;  %v6625_v20 = vld [vmem:[%s16134_s1] sm:$0xf] }
  0x14   :  { %5064 = vmatpush.bf16.xpose.msra.mxu0 %v7126_v32  ;;  %v6738_v19 = vor.u32 %v9981_v14, %v6735_v15  ;;  %v9967_v21 = vld [vmem:[%s16134_s1 + $0x60] sm:$0xf0]  ;;  %v6627_v23 = vld [vmem:[%s16134_s1 + $0x64] sm:$0xf0]  ;;  %v9968_v25 = vld [vmem:[%s16134_s1 + $0x68] sm:$0xf0] }
  0x15   :  { %5077 = vmatpush.bf16.xpose.msra.mxu1 %v7130_v33  ;;  %5090 = vmatpush.bf16.xpose.msra.mxu2 %v7134_v34  ;;  %v9955_v22 = vld [vmem:[%s16134_s1 + $0x4] sm:$0xf]  ;;  %v6633_v24 = vld [vmem:[%s16134_s1 + $0x8] sm:$0xf]  ;;  %v9956_v26 = vld [vmem:[%s16134_s1 + $0xc] sm:$0xf]  ;;  %v6626_v31 = vor.u32 %v9967_v21, %v6625_v20 }
  0x16   :  { %5103 = vmatpush.bf16.xpose.msra.mxu3 %v7138_v35  ;;  %v6635_v27 = vld [vmem:[%s16134_s1 + $0x6c] sm:$0xf0]  ;;  %v7341_v28 = vld [vmem:[%s16134_s1 + $0x588] sm:$0xf]  ;;  %v10144_v29 = vld [vmem:[%s16134_s1 + $0x5e8] sm:$0xf0]  ;;  %v6630_v35 = vor.u32 %v9955_v22, %v6627_v23  ;;  %v6634_v36 = vor.u32 %v9968_v25, %v6633_v24 }
  0x17   :  { %v10132_v30 = vld [vmem:[%s16134_s1 + $0x58c] sm:$0xf]  ;;  %v7343_v32 = vld [vmem:[%s16134_s1 + $0x5ec] sm:$0xf0]  ;;  %v10145_v34 = vld [vmem:[%s16134_s1 + $0x5f0] sm:$0xf0]  ;;  %v6638_v39 = vor.u32 %v9956_v26, %v6635_v27  ;;  %v7342_v40 = vor.u32 %v10144_v29, %v7341_v28 }
  0x18   :  { %v7349_v33 = vld [vmem:[%s16134_s1 + $0x590] sm:$0xf]  ;;  %v10133_v37 = vld [vmem:[%s16134_s1 + $0x594] sm:$0xf]  ;;  %v7351_v38 = vld [vmem:[%s16134_s1 + $0x5f4] sm:$0xf0]  ;;  %v7346_v41 = vor.u32 %v10132_v30, %v7343_v32 }
  0x19   :  { %v7350_v42 = vor.u32 %v10145_v34, %v7349_v33  ;;  %v7354_v43 = vor.u32 %v10133_v37, %v7351_v38  ;;  %v7249_v48 = vld [vmem:[%s16134_s1 + $0x4c8] sm:$0xf]  ;;  %v10120_v49 = vld [vmem:[%s16134_s1 + $0x528] sm:$0xf0]  ;;  %v7251_v51 = vld [vmem:[%s16134_s1 + $0x52c] sm:$0xf0] }
  0x1a   :  { %v10108_v50 = vld [vmem:[%s16134_s1 + $0x4cc] sm:$0xf]  ;;  %v7250_v54 = vor.u32 %v10120_v49, %v7249_v48  ;;  %v7149_v60 = vld [vmem:[%s16134_s1 + $0x400] sm:$0xf]  ;;  %v10095_v61 = vld [vmem:[%s16134_s1 + $0x460] sm:$0xf0] }
  0x1b   :  { %v7254_v55 = vor.u32 %v10108_v50, %v7251_v51  ;;  %v10083_v62 = vld [vmem:[%s16134_s1 + $0x404] sm:$0xf]  ;;  %v7151_v63 = vld [vmem:[%s16134_s1 + $0x464] sm:$0xf0]  ;;  %v7150_v2 = vor.u32 %v10095_v61, %v7149_v60  ;;  %v10057_v8 = vld [vmem:[%s16134_s1 + $0x334] sm:$0xf] }
  0x1c   :  { %5065 = vmatpush.bf16.xpose.msra.mxu0 %v7026_v44  ;;  %v7241_v44 = vld [vmem:[%s16134_s1 + $0x4c0] sm:$0xf]  ;;  %v7154_v3 = vor.u32 %v10083_v62, %v7151_v63  ;;  %v7043_v12 = vld [vmem:[%s16134_s1 + $0x394] sm:$0xf0]  ;;  %v10070_v14 = vld [vmem:[%s16134_s1 + $0x398] sm:$0xf0] }
  0x1d   :  { %5078 = vmatpush.bf16.xpose.msra.mxu1 %v7030_v45  ;;  %5091 = vmatpush.bf16.xpose.msra.mxu2 %v7034_v46  ;;  %v10119_v45 = vld [vmem:[%s16134_s1 + $0x520] sm:$0xf0]  ;;  %v7049_v13 = vld [vmem:[%s16134_s1 + $0x338] sm:$0xf]  ;;  %v7046_v23 = vor.u32 %v10057_v8, %v7043_v12  ;;  %v6941_v26 = vld [vmem:[%s16134_s1 + $0x268] sm:$0xf] }
  0x1e   :  { %5104 = vmatpush.bf16.xpose.msra.mxu3 %v7038_v47  ;;  %v10107_v46 = vld [vmem:[%s16134_s1 + $0x4c4] sm:$0xf]  ;;  %v7243_v47 = vld [vmem:[%s16134_s1 + $0x524] sm:$0xf0]  ;;  %v7242_v52 = vor.u32 %v10119_v45, %v7241_v44  ;;  %v7050_v24 = vor.u32 %v10070_v14, %v7049_v13  ;;  %v10044_v27 = vld [vmem:[%s16134_s1 + $0x2c8] sm:$0xf0] }
  0x1f   :  { %v7246_v53 = vor.u32 %v10107_v46, %v7243_v47  ;;  %v20_v10 = vld [vmem:[%s16135_s0] sm:$0xff]  ;;  %v10032_v28 = vld [vmem:[%s16134_s1 + $0x26c] sm:$0xf]  ;;  %v6943_v29 = vld [vmem:[%s16134_s1 + $0x2cc] sm:$0xf0]  ;;  %v6942_v34 = vor.u32 %v10044_v27, %v6941_v26 }
  0x20   :  { %v888_v15 = vunpack.c.l.b16 %v20_v10  ;;  %v6949_v30 = vld [vmem:[%s16134_s1 + $0x270] sm:$0xf]  ;;  %v10033_v32 = vld [vmem:[%s16134_s1 + $0x274] sm:$0xf]  ;;  %v6951_v33 = vld [vmem:[%s16134_s1 + $0x2d4] sm:$0xf0] }
  0x21   :  { %v6954_v37 = vor.u32 %v10033_v32, %v6951_v33  ;;  %v6841_v38 = vld [vmem:[%s16134_s1 + $0x1a0] sm:$0xf]  ;;  %v10008_v44 = vld [vmem:[%s16134_s1 + $0x1ac] sm:$0xf]  ;;  %v6851_v45 = vld [vmem:[%s16134_s1 + $0x20c] sm:$0xf0] }
  0x22   :  { %v11120_v21 = vpack.c.b16 %v888_v15, %v888_v15  ;;  %v6854_v49 = vor.u32 %v10008_v44, %v6851_v45  ;;  %v6741_v50 = vld [vmem:[%s16134_s1 + $0xd8] sm:$0xf]  ;;  %v9994_v51 = vld [vmem:[%s16134_s1 + $0x138] sm:$0xf0]  ;;  %v6641_v62 = vld [vmem:[%s16134_s1 + $0x10] sm:$0xf] }
  0x23   :  { %v9969_v63 = vld [vmem:[%s16134_s1 + $0x70] sm:$0xf0]  ;;  %v10134_v8 = vld [vmem:[%s16134_s1 + $0x59c] sm:$0xf]  ;;  %v7365_v12 = vld [vmem:[%s16134_s1 + $0x5a0] sm:$0xf] }
  0x24   :  { %5066 = vmatpush.bf16.xpose.msra.mxu0 %v6926_v56  ;;  %v7141_v56 = vld [vmem:[%s16134_s1 + $0x3f8] sm:$0xf]  ;;  %v10147_v13 = vld [vmem:[%s16134_s1 + $0x600] sm:$0xf0]  ;;  %v22_v14 = vld [vmem:[%s16135_s0 + $0x10] sm:$0xff] }
  0x25   :  { %5079 = vmatpush.bf16.xpose.msra.mxu1 %v6930_v57  ;;  %5092 = vmatpush.bf16.xpose.msra.mxu2 %v6934_v58  ;;  %v10094_v57 = vld [vmem:[%s16134_s1 + $0x458] sm:$0xf0]  ;;  %v7366_v26 = vor.u32 %v10147_v13, %v7365_v12  ;;  %v892_v27 = vunpack.c.l.b16 %v22_v14  ;;  %v7257_v32 = vld [vmem:[%s16134_s1 + $0x4d0] sm:$0xf]  ;;  %v10121_v33 = vld [vmem:[%s16134_s1 + $0x530] sm:$0xf0] }
  0x26   :  { %5105 = vmatpush.bf16.xpose.msra.mxu3 %v6938_v59  ;;  %v10082_v58 = vld [vmem:[%s16134_s1 + $0x3fc] sm:$0xf]  ;;  %v7143_v59 = vld [vmem:[%s16134_s1 + $0x45c] sm:$0xf0]  ;;  %v7142_v0 = vor.u32 %v10094_v57, %v7141_v56  ;;  %v9983_v56 = vld [vmem:[%s16134_s1 + $0xe4] sm:$0xf]  ;;  %v7258_v44 = vor.u32 %v10121_v33, %v7257_v32 }
  0x27   :  { %v7146_v1 = vor.u32 %v10082_v58, %v7143_v59  ;;  %v6751_v57 = vld [vmem:[%s16134_s1 + $0x144] sm:$0xf0]  ;;  %v6742_v58 = vor.u32 %v9994_v51, %v6741_v50  ;;  %v10084_v50 = vld [vmem:[%s16134_s1 + $0x40c] sm:$0xf]  ;;  %v7159_v51 = vld [vmem:[%s16134_s1 + $0x46c] sm:$0xf0] }
  0x28   :  { %v6754_v61 = vor.u32 %v9983_v56, %v6751_v57  ;;  %v7162_v57 = vor.u32 %v10084_v50, %v7159_v51  ;;  %v6959_v12 = vld [vmem:[%s16134_s1 + $0x2dc] sm:$0xf0] }
  0x29   :  { %v6965_v13 = vld [vmem:[%s16134_s1 + $0x280] sm:$0xf] }
  0x2c   :  { %5067 = vmatpush.bf16.xpose.msra.mxu0 %v6826_v4  ;;  %v21_v4 = vld [vmem:[%s16135_s0 + $0x8] sm:$0xff] }
  0x2d   :  { %5080 = vmatpush.bf16.xpose.msra.mxu1 %v6830_v5  ;;  %5093 = vmatpush.bf16.xpose.msra.mxu2 %v6834_v6  ;;  %v890_v5 = vunpack.c.l.b16 %v21_v4  ;;  %v7041_v6 = vld [vmem:[%s16134_s1 + $0x330] sm:$0xf]  ;;  %v891_v11 = vunpack.c.h.b16 %v21_v4  ;;  %v9958_v4 = vld [vmem:[%s16134_s1 + $0x1c] sm:$0xf] }
  0x2e   :  { %5106 = vmatpush.bf16.xpose.msra.mxu3 %v6838_v7  ;;  %v10069_v7 = vld [vmem:[%s16134_s1 + $0x390] sm:$0xf0] }
  0x2f   :  { %v11097_v9 = vpack.c.b16 %v890_v5, %v890_v5  ;;  %v7042_v20 = vor.u32 %v10069_v7, %v7041_v6  ;;  %v6651_v5 = vld [vmem:[%s16134_s1 + $0x7c] sm:$0xf0]  ;;  %v7357_v6 = vld [vmem:[%s16134_s1 + $0x598] sm:$0xf]  ;;  %v10146_v7 = vld [vmem:[%s16134_s1 + $0x5f8] sm:$0xf0] }
  0x34   :  { %5068 = vmatpush.bf16.xpose.msra.mxu0 %v6726_v16  ;;  %v889_v16 = vunpack.c.h.b16 %v20_v10  ;;  %v7359_v10 = vld [vmem:[%s16134_s1 + $0x5fc] sm:$0xf0] }
  0x35   :  { %5081 = vmatpush.bf16.xpose.msra.mxu1 %v6730_v17  ;;  %5094 = vmatpush.bf16.xpose.msra.mxu2 %v6734_v18  ;;  %v10058_v17 = vld [vmem:[%s16134_s1 + $0x33c] sm:$0xf]  ;;  %v7051_v18 = vld [vmem:[%s16134_s1 + $0x39c] sm:$0xf0] }
  0x36   :  { %5107 = vmatpush.bf16.xpose.msra.mxu3 %v6738_v19  ;;  %v11118_v19 = vpack.c.b16 %v891_v11, %v891_v11  ;;  %v11122_v22 = vpack.c.b16 %v889_v16, %v889_v16  ;;  %v7054_v25 = vor.u32 %v10058_v17, %v7051_v18  ;;  %v6642_v11 = vor.u32 %v9969_v63, %v6641_v62  ;;  %v10135_v17 = vld [vmem:[%s16134_s1 + $0x5a4] sm:$0xf]  ;;  %v7367_v18 = vld [vmem:[%s16134_s1 + $0x604] sm:$0xf0] }
  0x37   :  { %v10059_v62 = vld [vmem:[%s16134_s1 + $0x344] sm:$0xf]  ;;  %v7059_v63 = vld [vmem:[%s16134_s1 + $0x3a4] sm:$0xf0] }
  0x3c   :  { %5069 = vmatpush.bf16.xpose.msra.mxu0 %v6626_v31  ;;  %v10045_v31 = vld [vmem:[%s16134_s1 + $0x2d0] sm:$0xf0] }
  0x3d   :  { %5082 = vmatpush.bf16.xpose.msra.mxu1 %v6630_v35  ;;  %5095 = vmatpush.bf16.xpose.msra.mxu2 %v6634_v36  ;;  %v6946_v35 = vor.u32 %v10032_v28, %v6943_v29  ;;  %v6950_v36 = vor.u32 %v10045_v31, %v6949_v30  ;;  %v7370_v28 = vor.u32 %v10135_v17, %v7367_v18  ;;  %v893_v30 = vunpack.c.h.b16 %v22_v14  ;;  %v10047_v14 = vld [vmem:[%s16134_s1 + $0x2e0] sm:$0xf0] }
  0x3e   :  { %5108 = vmatpush.bf16.xpose.msra.mxu3 %v6638_v39  ;;  %v10019_v39 = vld [vmem:[%s16134_s1 + $0x200] sm:$0xf0] }
  0x3f   :  { %v6842_v46 = vor.u32 %v10019_v39, %v6841_v38  ;;  %v7265_v38 = vld [vmem:[%s16134_s1 + $0x4d8] sm:$0xf]  ;;  %v10122_v39 = vld [vmem:[%s16134_s1 + $0x538] sm:$0xf0] }
  0x43   :  { %5070 = vmatmul.bf16.vlgmr.msra.gmra.mxu0 %v11120_v21 }
  0x44   :  { %5114 = vmatpush.bf16.xpose.msrb.mxu0 %v7342_v40  ;;  %5096 = vmatmul.bf16.vlgmr.msra.gmra.mxu2 %v11097_v9  ;;  %v10007_v40 = vld [vmem:[%s16134_s1 + $0x1a4] sm:$0xf] }
  0x45   :  { %5127 = vmatpush.bf16.xpose.msrb.mxu1 %v7346_v41  ;;  %5140 = vmatpush.bf16.xpose.msrb.mxu2 %v7350_v42  ;;  %v6843_v41 = vld [vmem:[%s16134_s1 + $0x204] sm:$0xf0] }
  0x46   :  { %5153 = vmatpush.bf16.xpose.msrb.mxu3 %v7354_v43  ;;  %5083 = vmatmul.bf16.vlgmr.msra.gmra.mxu1 %v11122_v22  ;;  %v6849_v42 = vld [vmem:[%s16134_s1 + $0x1a8] sm:$0xf]  ;;  %v10020_v43 = vld [vmem:[%s16134_s1 + $0x208] sm:$0xf0]  ;;  %v6846_v47 = vor.u32 %v10007_v40, %v6843_v41  ;;  %v11275_v40 = vpack.c.b16 %v893_v30, %v893_v30  ;;  %v10110_v41 = vld [vmem:[%s16134_s1 + $0x4dc] sm:$0xf] }
  0x47   :  { %5109 = vmatmul.bf16.vlgmr.msra.gmra.mxu3 %v11118_v19  ;;  %v6850_v48 = vor.u32 %v10020_v43, %v6849_v42  ;;  %v7267_v42 = vld [vmem:[%s16134_s1 + $0x53c] sm:$0xf0]  ;;  %v10010_v30 = vld [vmem:[%s16134_s1 + $0x1bc] sm:$0xf] }
  0x4c   :  { %5115 = vmatpush.bf16.xpose.msrb.mxu0 %v7242_v52  ;;  %v9982_v52 = vld [vmem:[%s16134_s1 + $0xdc] sm:$0xf] }
  0x4d   :  { %5128 = vmatpush.bf16.xpose.msrb.mxu1 %v7246_v53  ;;  %5141 = vmatpush.bf16.xpose.msrb.mxu2 %v7250_v54  ;;  %v6743_v53 = vld [vmem:[%s16134_s1 + $0x13c] sm:$0xf0] }
  0x4e   :  { %5154 = vmatpush.bf16.xpose.msrb.mxu3 %v7254_v55  ;;  %v6749_v54 = vld [vmem:[%s16134_s1 + $0xe0] sm:$0xf]  ;;  %v9995_v55 = vld [vmem:[%s16134_s1 + $0x140] sm:$0xf0]  ;;  %v6746_v59 = vor.u32 %v9982_v52, %v6743_v53  ;;  %v7165_v52 = vld [vmem:[%s16134_s1 + $0x410] sm:$0xf] }
  0x4f   :  { %v6750_v60 = vor.u32 %v9995_v55, %v6749_v54  ;;  %v10097_v53 = vld [vmem:[%s16134_s1 + $0x470] sm:$0xf0]  ;;  %v7167_v55 = vld [vmem:[%s16134_s1 + $0x474] sm:$0xf0] }
  0x50   :  { %v10085_v54 = vld [vmem:[%s16134_s1 + $0x414] sm:$0xf] }
  0x54   :  { %5116 = vmatpush.bf16.xpose.msrb.mxu0 %v7142_v0  ;;  %v9957_v0 = vld [vmem:[%s16134_s1 + $0x14] sm:$0xf] }
  0x55   :  { %5129 = vmatpush.bf16.xpose.msrb.mxu1 %v7146_v1  ;;  %5142 = vmatpush.bf16.xpose.msrb.mxu2 %v7150_v2  ;;  %v6643_v1 = vld [vmem:[%s16134_s1 + $0x74] sm:$0xf0] }
  0x56   :  { %5155 = vmatpush.bf16.xpose.msrb.mxu3 %v7154_v3  ;;  %v6649_v2 = vld [vmem:[%s16134_s1 + $0x18] sm:$0xf]  ;;  %v9970_v3 = vld [vmem:[%s16134_s1 + $0x78] sm:$0xf0]  ;;  %v6646_v15 = vor.u32 %v9957_v0, %v6643_v1  ;;  %v7065_v0 = vld [vmem:[%s16134_s1 + $0x348] sm:$0xf] }
  0x57   :  { %v6650_v16 = vor.u32 %v9970_v3, %v6649_v2  ;;  %v10072_v1 = vld [vmem:[%s16134_s1 + $0x3a8] sm:$0xf0]  ;;  %v7067_v3 = vld [vmem:[%s16134_s1 + $0x3ac] sm:$0xf0] }
  0x58   :  { %v10060_v2 = vld [vmem:[%s16134_s1 + $0x34c] sm:$0xf] }
  0x5c   :  { %5117 = vmatpush.bf16.xpose.msrb.mxu0 %v7042_v20  ;;  %v23_v20 = vld [vmem:[%s16135_s0 + $0x18] sm:$0xff] }
  0x5d   :  { %5130 = vmatpush.bf16.xpose.msrb.mxu1 %v7046_v23  ;;  %5143 = vmatpush.bf16.xpose.msrb.mxu2 %v7050_v24  ;;  %v6654_v23 = vor.u32 %v9958_v4, %v6651_v5  ;;  %v7358_v24 = vor.u32 %v10146_v7, %v7357_v6  ;;  %v894_v29 = vunpack.c.l.b16 %v23_v20  ;;  %v895_v31 = vunpack.c.h.b16 %v23_v20 }
  0x5e   :  { %5156 = vmatpush.bf16.xpose.msrb.mxu3 %v7054_v25  ;;  %v7362_v25 = vor.u32 %v10134_v8, %v7359_v10  ;;  %v7062_v5 = vor.u32 %v10059_v62, %v7059_v63  ;;  %v7066_v6 = vor.u32 %v10072_v1, %v7065_v0  ;;  %v7070_v7 = vor.u32 %v10060_v2, %v7067_v3  ;;  %v6957_v8 = vld [vmem:[%s16134_s1 + $0x278] sm:$0xf]  ;;  %v10046_v10 = vld [vmem:[%s16134_s1 + $0x2d8] sm:$0xf0]  ;;  %v10136_v62 = vld [vmem:[%s16134_s1 + $0x5ac] sm:$0xf] }
  0x5f   :  { %v11283_v43 = vpack.c.b16 %v895_v31, %v895_v31  ;;  %v6958_v17 = vor.u32 %v10046_v10, %v6957_v8  ;;  %v6966_v20 = vor.u32 %v10047_v14, %v6965_v13  ;;  %v6867_v31 = vld [vmem:[%s16134_s1 + $0x21c] sm:$0xf0]  ;;  %v7375_v63 = vld [vmem:[%s16134_s1 + $0x60c] sm:$0xf0]  ;;  %v10149_v2 = vld [vmem:[%s16134_s1 + $0x610] sm:$0xf0] }
  0x60   :  { %v7381_v1 = vld [vmem:[%s16134_s1 + $0x5b0] sm:$0xf]  ;;  %v24_v3 = vld [vmem:[%s16135_s0 + $0x20] sm:$0xff]  ;;  %v25_v8 = vld [vmem:[%s16135_s0 + $0x28] sm:$0xff] }
  0x61   :  { %v7382_v13 = vor.u32 %v10149_v2, %v7381_v1  ;;  %v896_v14 = vunpack.c.l.b16 %v24_v3  ;;  %v6973_v2 = vld [vmem:[%s16134_s1 + $0x288] sm:$0xf] }
  0x64   :  { %5118 = vmatpush.bf16.xpose.msrb.mxu0 %v6942_v34  ;;  %v10109_v34 = vld [vmem:[%s16134_s1 + $0x4d4] sm:$0xf] }
  0x65   :  { %5131 = vmatpush.bf16.xpose.msrb.mxu1 %v6946_v35  ;;  %5144 = vmatpush.bf16.xpose.msrb.mxu2 %v6950_v36  ;;  %v11262_v35 = vpack.c.b16 %v892_v27, %v892_v27  ;;  %v11264_v36 = vpack.c.b16 %v894_v29, %v894_v29  ;;  %v6859_v27 = vld [vmem:[%s16134_s1 + $0x214] sm:$0xf0]  ;;  %v10022_v29 = vld [vmem:[%s16134_s1 + $0x218] sm:$0xf0] }
  0x66   :  { %5157 = vmatpush.bf16.xpose.msrb.mxu3 %v6954_v37  ;;  %v7259_v37 = vld [vmem:[%s16134_s1 + $0x534] sm:$0xf0] }
  0x67   :  { %v7262_v45 = vor.u32 %v10109_v34, %v7259_v37  ;;  %v6870_v37 = vor.u32 %v10010_v30, %v6867_v31  ;;  %v10124_v30 = vld [vmem:[%s16134_s1 + $0x548] sm:$0xf0] }
  0x6c   :  { %5119 = vmatpush.bf16.xpose.msrb.mxu0 %v6842_v46  ;;  %v7266_v46 = vor.u32 %v10122_v39, %v7265_v38  ;;  %v6757_v38 = vld [vmem:[%s16134_s1 + $0xe8] sm:$0xf]  ;;  %v9996_v39 = vld [vmem:[%s16134_s1 + $0x148] sm:$0xf0] }
  0x6d   :  { %5132 = vmatpush.bf16.xpose.msrb.mxu1 %v6846_v47  ;;  %5145 = vmatpush.bf16.xpose.msrb.mxu2 %v6850_v48  ;;  %v7270_v47 = vor.u32 %v10110_v41, %v7267_v42  ;;  %v7157_v48 = vld [vmem:[%s16134_s1 + $0x408] sm:$0xf]  ;;  %v9984_v41 = vld [vmem:[%s16134_s1 + $0xec] sm:$0xf]  ;;  %v6759_v42 = vld [vmem:[%s16134_s1 + $0x14c] sm:$0xf0] }
  0x6e   :  { %5158 = vmatpush.bf16.xpose.msrb.mxu3 %v6854_v49  ;;  %v10096_v49 = vld [vmem:[%s16134_s1 + $0x468] sm:$0xf0] }
  0x6f   :  { %v7158_v56 = vor.u32 %v10096_v49, %v7157_v48  ;;  %v6758_v48 = vor.u32 %v9996_v39, %v6757_v38  ;;  %v6762_v49 = vor.u32 %v9984_v41, %v6759_v42  ;;  %v7173_v41 = vld [vmem:[%s16134_s1 + $0x418] sm:$0xf]  ;;  %v10098_v42 = vld [vmem:[%s16134_s1 + $0x478] sm:$0xf0] }
  0x74   :  { %5120 = vmatpush.bf16.xpose.msrb.mxu0 %v6742_v58  ;;  %v7166_v58 = vor.u32 %v10097_v53, %v7165_v52  ;;  %v6657_v52 = vld [vmem:[%s16134_s1 + $0x20] sm:$0xf]  ;;  %v9971_v53 = vld [vmem:[%s16134_s1 + $0x80] sm:$0xf0] }
  0x75   :  { %5133 = vmatpush.bf16.xpose.msrb.mxu1 %v6746_v59  ;;  %5146 = vmatpush.bf16.xpose.msrb.mxu2 %v6750_v60  ;;  %v7170_v59 = vor.u32 %v10085_v54, %v7167_v55  ;;  %v7057_v60 = vld [vmem:[%s16134_s1 + $0x340] sm:$0xf]  ;;  %v9959_v54 = vld [vmem:[%s16134_s1 + $0x24] sm:$0xf]  ;;  %v6659_v55 = vld [vmem:[%s16134_s1 + $0x84] sm:$0xf0]  ;;  %v6658_v0 = vor.u32 %v9971_v53, %v6657_v52 }
  0x76   :  { %5159 = vmatpush.bf16.xpose.msrb.mxu3 %v6754_v61  ;;  %v10071_v61 = vld [vmem:[%s16134_s1 + $0x3a0] sm:$0xf0] }
  0x77   :  { %v7058_v4 = vor.u32 %v10071_v61, %v7057_v60  ;;  %v7373_v60 = vld [vmem:[%s16134_s1 + $0x5a8] sm:$0xf]  ;;  %v10148_v61 = vld [vmem:[%s16134_s1 + $0x608] sm:$0xf0] }
  0x7c   :  { %5121 = vmatpush.bf16.xpose.msrb.mxu0 %v6642_v11  ;;  %v10034_v11 = vld [vmem:[%s16134_s1 + $0x27c] sm:$0xf] }
  0x7d   :  { %5134 = vmatpush.bf16.xpose.msrb.mxu1 %v6646_v15  ;;  %5147 = vmatpush.bf16.xpose.msrb.mxu2 %v6650_v16  ;;  %v10035_v15 = vld [vmem:[%s16134_s1 + $0x284] sm:$0xf]  ;;  %v6967_v16 = vld [vmem:[%s16134_s1 + $0x2e4] sm:$0xf0]  ;;  %v6962_v18 = vor.u32 %v10034_v11, %v6959_v12  ;;  %v7374_v11 = vor.u32 %v10148_v61, %v7373_v60  ;;  %v7378_v12 = vor.u32 %v10136_v62, %v7375_v63  ;;  %v10062_v60 = vld [vmem:[%s16134_s1 + $0x35c] sm:$0xf] }
  0x7e   :  { %5160 = vmatpush.bf16.xpose.msrb.mxu3 %v6654_v23  ;;  %v6970_v23 = vor.u32 %v10035_v15, %v6967_v16  ;;  %v898_v16 = vunpack.c.l.b16 %v25_v8  ;;  %v7083_v61 = vld [vmem:[%s16134_s1 + $0x3bc] sm:$0xf0] }
  0x7f   :  { %v7086_v1 = vor.u32 %v10062_v60, %v7083_v61 }
  0x83   :  { %5122 = vmatmul.bf16.vlgmr.msrb.gmra.mxu0 %v11262_v35 }
  0x84   :  { %5166 = vmatpush.bf16.xpose.msra.mxu0 %v7358_v24  ;;  %5148 = vmatmul.bf16.vlgmr.msrb.gmra.mxu2 %v11264_v36  ;;  %v6857_v24 = vld [vmem:[%s16134_s1 + $0x1b0] sm:$0xf] }
  0x85   :  { %5179 = vmatpush.bf16.xpose.msra.mxu1 %v7362_v25  ;;  %5192 = vmatpush.bf16.xpose.msra.mxu2 %v7366_v26  ;;  %v10021_v25 = vld [vmem:[%s16134_s1 + $0x210] sm:$0xf0] }
  0x86   :  { %5205 = vmatpush.bf16.xpose.msra.mxu3 %v7370_v28  ;;  %5135 = vmatmul.bf16.vlgmr.msrb.gmra.mxu1 %v11275_v40  ;;  %v10009_v26 = vld [vmem:[%s16134_s1 + $0x1b4] sm:$0xf]  ;;  %v6865_v28 = vld [vmem:[%s16134_s1 + $0x1b8] sm:$0xf]  ;;  %v6858_v32 = vor.u32 %v10021_v25, %v6857_v24  ;;  %v10123_v24 = vld [vmem:[%s16134_s1 + $0x540] sm:$0xf0] }
  0x87   :  { %5161 = vmatmul.bf16.vlgmr.msrb.gmra.mxu3 %v11283_v43  ;;  %v6862_v33 = vor.u32 %v10009_v26, %v6859_v27  ;;  %v6866_v34 = vor.u32 %v10022_v29, %v6865_v28  ;;  %v10111_v25 = vld [vmem:[%s16134_s1 + $0x4e4] sm:$0xf]  ;;  %v11474_v26 = vpack.c.b16 %v898_v16, %v898_v16  ;;  %v7275_v28 = vld [vmem:[%s16134_s1 + $0x544] sm:$0xf0] }
  0x88   :  { %v7281_v29 = vld [vmem:[%s16134_s1 + $0x4e8] sm:$0xf] }
  0x89   :  { %v7282_v38 = vor.u32 %v10124_v30, %v7281_v29  ;;  %v6875_v29 = vld [vmem:[%s16134_s1 + $0x224] sm:$0xf0] }
  0x8a   :  { %v6881_v30 = vld [vmem:[%s16134_s1 + $0x1c8] sm:$0xf] }
  0x8c   :  { %5167 = vmatpush.bf16.xpose.msra.mxu0 %v7258_v44  ;;  %v6765_v44 = vld [vmem:[%s16134_s1 + $0xf0] sm:$0xf] }
  0x8d   :  { %5180 = vmatpush.bf16.xpose.msra.mxu1 %v7262_v45  ;;  %5193 = vmatpush.bf16.xpose.msra.mxu2 %v7266_v46  ;;  %v9997_v45 = vld [vmem:[%s16134_s1 + $0x150] sm:$0xf0] }
  0x8e   :  { %5206 = vmatpush.bf16.xpose.msra.mxu3 %v7270_v47  ;;  %v9985_v46 = vld [vmem:[%s16134_s1 + $0xf4] sm:$0xf]  ;;  %v6767_v47 = vld [vmem:[%s16134_s1 + $0x154] sm:$0xf0]  ;;  %v6766_v50 = vor.u32 %v9997_v45, %v6765_v44  ;;  %v10086_v44 = vld [vmem:[%s16134_s1 + $0x41c] sm:$0xf] }
  0x8f   :  { %v6770_v51 = vor.u32 %v9985_v46, %v6767_v47  ;;  %v7175_v45 = vld [vmem:[%s16134_s1 + $0x47c] sm:$0xf0]  ;;  %v10099_v47 = vld [vmem:[%s16134_s1 + $0x480] sm:$0xf0] }
  0x90   :  { %v7181_v46 = vld [vmem:[%s16134_s1 + $0x420] sm:$0xf] }
  0x91   :  { %v7182_v52 = vor.u32 %v10099_v47, %v7181_v46 }
  0x94   :  { %5168 = vmatpush.bf16.xpose.msra.mxu0 %v7158_v56  ;;  %v6665_v56 = vld [vmem:[%s16134_s1 + $0x28] sm:$0xf] }
  0x95   :  { %5181 = vmatpush.bf16.xpose.msra.mxu1 %v7162_v57  ;;  %5194 = vmatpush.bf16.xpose.msra.mxu2 %v7166_v58  ;;  %v9972_v57 = vld [vmem:[%s16134_s1 + $0x88] sm:$0xf0] }
  0x96   :  { %5207 = vmatpush.bf16.xpose.msra.mxu3 %v7170_v59  ;;  %v9960_v58 = vld [vmem:[%s16134_s1 + $0x2c] sm:$0xf]  ;;  %v6667_v59 = vld [vmem:[%s16134_s1 + $0x8c] sm:$0xf0] }
  0x97   :  { %v6670_v10 = vor.u32 %v9960_v58, %v6667_v59  ;;  %v7081_v58 = vld [vmem:[%s16134_s1 + $0x358] sm:$0xf]  ;;  %v10074_v59 = vld [vmem:[%s16134_s1 + $0x3b8] sm:$0xf0] }
  0x9c   :  { %5169 = vmatpush.bf16.xpose.msra.mxu0 %v7058_v4  ;;  %v6662_v4 = vor.u32 %v9959_v54, %v6659_v55  ;;  %v7073_v54 = vld [vmem:[%s16134_s1 + $0x350] sm:$0xf]  ;;  %v10073_v55 = vld [vmem:[%s16134_s1 + $0x3b0] sm:$0xf0] }
  0x9d   :  { %5182 = vmatpush.bf16.xpose.msra.mxu1 %v7062_v5  ;;  %5195 = vmatpush.bf16.xpose.msra.mxu2 %v7066_v6  ;;  %v6666_v5 = vor.u32 %v9972_v57, %v6665_v56  ;;  %v10137_v6 = vld [vmem:[%s16134_s1 + $0x5b4] sm:$0xf]  ;;  %v7075_v57 = vld [vmem:[%s16134_s1 + $0x3b4] sm:$0xf0]  ;;  %v7074_v62 = vor.u32 %v10073_v55, %v7073_v54  ;;  %v6781_v54 = vld [vmem:[%s16134_s1 + $0x100] sm:$0xf] }
  0x9e   :  { %5208 = vmatpush.bf16.xpose.msra.mxu3 %v7070_v7  ;;  %v7383_v7 = vld [vmem:[%s16134_s1 + $0x614] sm:$0xf0]  ;;  %v10061_v56 = vld [vmem:[%s16134_s1 + $0x354] sm:$0xf]  ;;  %v9999_v55 = vld [vmem:[%s16134_s1 + $0x160] sm:$0xf0] }
  0x9f   :  { %v7386_v15 = vor.u32 %v10137_v6, %v7383_v7  ;;  %v7078_v63 = vor.u32 %v10061_v56, %v7075_v57  ;;  %v6981_v6 = vld [vmem:[%s16134_s1 + $0x290] sm:$0xf]  ;;  %v10049_v7 = vld [vmem:[%s16134_s1 + $0x2f0] sm:$0xf0]  ;;  %v9987_v56 = vld [vmem:[%s16134_s1 + $0x104] sm:$0xf] }
  0xa0   :  { %v6783_v57 = vld [vmem:[%s16134_s1 + $0x164] sm:$0xf0] }
  0xa4   :  { %5170 = vmatpush.bf16.xpose.msra.mxu0 %v6958_v17  ;;  %v897_v17 = vunpack.c.h.b16 %v24_v3  ;;  %v10048_v3 = vld [vmem:[%s16134_s1 + $0x2e8] sm:$0xf0] }
  0xa5   :  { %5183 = vmatpush.bf16.xpose.msra.mxu1 %v6962_v18  ;;  %5196 = vmatpush.bf16.xpose.msra.mxu2 %v6966_v20  ;;  %v899_v18 = vunpack.c.h.b16 %v25_v8  ;;  %v11463_v20 = vpack.c.b16 %v896_v14, %v896_v14  ;;  %v10037_v8 = vld [vmem:[%s16134_s1 + $0x294] sm:$0xf]  ;;  %v6982_v14 = vor.u32 %v10049_v7, %v6981_v6  ;;  %v9962_v6 = vld [vmem:[%s16134_s1 + $0x3c] sm:$0xf]  ;;  %v6683_v7 = vld [vmem:[%s16134_s1 + $0x9c] sm:$0xf0] }
  0xa6   :  { %5209 = vmatpush.bf16.xpose.msra.mxu3 %v6970_v23  ;;  %v7273_v23 = vld [vmem:[%s16134_s1 + $0x4e0] sm:$0xf]  ;;  %v11476_v27 = vpack.c.b16 %v897_v17, %v897_v17 }
  0xa7   :  { %v11487_v31 = vpack.c.b16 %v899_v18, %v899_v18 }
  0xac   :  { %5171 = vmatpush.bf16.xpose.msra.mxu0 %v6858_v32  ;;  %v10112_v32 = vld [vmem:[%s16134_s1 + $0x4ec] sm:$0xf] }
  0xad   :  { %5184 = vmatpush.bf16.xpose.msra.mxu1 %v6862_v33  ;;  %5197 = vmatpush.bf16.xpose.msra.mxu2 %v6866_v34  ;;  %v7283_v33 = vld [vmem:[%s16134_s1 + $0x54c] sm:$0xf0]  ;;  %v7274_v34 = vor.u32 %v10123_v24, %v7273_v23  ;;  %v6873_v24 = vld [vmem:[%s16134_s1 + $0x1c0] sm:$0xf] }
  0xae   :  { %5210 = vmatpush.bf16.xpose.msra.mxu3 %v6870_v37  ;;  %v7278_v37 = vor.u32 %v10111_v25, %v7275_v28  ;;  %v7286_v39 = vor.u32 %v10112_v32, %v7283_v33  ;;  %v10023_v25 = vld [vmem:[%s16134_s1 + $0x220] sm:$0xf0]  ;;  %v10024_v32 = vld [vmem:[%s16134_s1 + $0x228] sm:$0xf0] }
  0xaf   :  { %v10011_v28 = vld [vmem:[%s16134_s1 + $0x1c4] sm:$0xf] }
  0xb4   :  { %5172 = vmatpush.bf16.xpose.msra.mxu0 %v6758_v48  ;;  %v10087_v48 = vld [vmem:[%s16134_s1 + $0x424] sm:$0xf] }
  0xb5   :  { %5185 = vmatpush.bf16.xpose.msra.mxu1 %v6762_v49  ;;  %5198 = vmatpush.bf16.xpose.msra.mxu2 %v6766_v50  ;;  %v7183_v49 = vld [vmem:[%s16134_s1 + $0x484] sm:$0xf0]  ;;  %v7174_v50 = vor.u32 %v10098_v42, %v7173_v41  ;;  %v6878_v42 = vor.u32 %v10011_v28, %v6875_v29  ;;  %v6686_v28 = vor.u32 %v9962_v6, %v6683_v7 }
  0xb6   :  { %5211 = vmatpush.bf16.xpose.msra.mxu3 %v6770_v51  ;;  %v7178_v51 = vor.u32 %v10086_v44, %v7175_v45  ;;  %v7186_v53 = vor.u32 %v10087_v48, %v7183_v49  ;;  %v6882_v44 = vor.u32 %v10024_v32, %v6881_v30 }
  0xbc   :  { %5173 = vmatpush.bf16.xpose.msra.mxu0 %v6658_v0  ;;  %v7082_v0 = vor.u32 %v10074_v59, %v7081_v58 }
  0xbd   :  { %5186 = vmatpush.bf16.xpose.msra.mxu1 %v6662_v4  ;;  %5199 = vmatpush.bf16.xpose.msra.mxu2 %v6666_v5  ;;  %v10036_v4 = vld [vmem:[%s16134_s1 + $0x28c] sm:$0xf]  ;;  %v6975_v5 = vld [vmem:[%s16134_s1 + $0x2ec] sm:$0xf0] }
  0xbe   :  { %5212 = vmatpush.bf16.xpose.msra.mxu3 %v6670_v10  ;;  %v6983_v10 = vld [vmem:[%s16134_s1 + $0x2f4] sm:$0xf0] }
  0xbf   :  { %v6986_v16 = vor.u32 %v10037_v8, %v6983_v10  ;;  %v7389_v8 = vld [vmem:[%s16134_s1 + $0x5b8] sm:$0xf]  ;;  %v10150_v10 = vld [vmem:[%s16134_s1 + $0x618] sm:$0xf0] }
  0xc0   :  { %v5071_v17 = vpop.f32.mrf.mxu0  ;;  %v7390_v29 = vor.u32 %v10150_v10, %v7389_v8 }
  0xc3   :  { %5174 = vmatmul.bf16.vlgmr.msra.gmra.mxu0 %v11463_v20  ;;  %v5084_v23 = vpop.f32.mrf.mxu1 }
  0xc4   :  { %5218 = vmatpush.bf16.xpose.msrb.mxu0 %v7374_v11  ;;  %5200 = vmatmul.bf16.vlgmr.msra.gmra.mxu2 %v11474_v26  ;;  %v6974_v11 = vor.u32 %v10048_v3, %v6973_v2  ;;  %v9961_v2 = vld [vmem:[%s16134_s1 + $0x34] sm:$0xf]  ;;  %v6675_v3 = vld [vmem:[%s16134_s1 + $0x94] sm:$0xf0] }
  0xc5   :  { %5231 = vmatpush.bf16.xpose.msrb.mxu1 %v7378_v12  ;;  %5244 = vmatpush.bf16.xpose.msrb.mxu2 %v7382_v13  ;;  %v865_v12 = vld [vmem:[%s16136_s2] sm:$0xf]  ;;  %v6978_v13 = vor.u32 %v10036_v4, %v6975_v5  ;;  %v6681_v4 = vld [vmem:[%s16134_s1 + $0x38] sm:$0xf]  ;;  %v9974_v5 = vld [vmem:[%s16134_s1 + $0x98] sm:$0xf0] }
  0xc6   :  { %5257 = vmatpush.bf16.xpose.msrb.mxu3 %v7386_v15  ;;  %5187 = vmatmul.bf16.vlgmr.msra.gmra.mxu1 %v11476_v27  ;;  %v867_v15 = vperm.slane %v865_v12, 0  ;;  %v7391_v12 = vld [vmem:[%s16134_s1 + $0x61c] sm:$0xf0] }
  0xc7   :  { %5213 = vmatmul.bf16.vlgmr.msra.gmra.mxu3 %v11487_v31 }
  0xc8   :  { %v5072_v18 = vadd.f32 %v5071_v17, %v867_v15  ;;  %v5073_v48 = vpop.f32.mrf.mxu0  ;;  %v10151_v15 = vld [vmem:[%s16134_s1 + $0x620] sm:$0xf0]  ;;  %v6678_v17 = vor.u32 %v9961_v2, %v6675_v3  ;;  %v7199_v2 = vld [vmem:[%s16134_s1 + $0x494] sm:$0xf0] }
  0xca   :  { %v5085_v33 = vadd.f32 %v5084_v23, %v5072_v18  ;;  %v5110_v41 = vpop.f32.mrf.mxu3  ;;  %v6682_v18 = vor.u32 %v9974_v5, %v6681_v4  ;;  %v10139_v23 = vld [vmem:[%s16134_s1 + $0x5c4] sm:$0xf] }
  0xcb   :  { %v5086_v49 = vpop.f32.mrf.mxu1 }
  0xcc   :  { %5219 = vmatpush.bf16.xpose.msrb.mxu0 %v7274_v34  ;;  %v10012_v34 = vld [vmem:[%s16134_s1 + $0x1cc] sm:$0xf]  ;;  %v7291_v49 = vld [vmem:[%s16134_s1 + $0x554] sm:$0xf0] }
  0xcd   :  { %5232 = vmatpush.bf16.xpose.msrb.mxu1 %v7278_v37  ;;  %5245 = vmatpush.bf16.xpose.msrb.mxu2 %v7282_v38  ;;  %v6883_v37 = vld [vmem:[%s16134_s1 + $0x22c] sm:$0xf0]  ;;  %v6874_v38 = vor.u32 %v10023_v25, %v6873_v24  ;;  %v7399_v24 = vld [vmem:[%s16134_s1 + $0x624] sm:$0xf0]  ;;  %v27_v25 = vld [vmem:[%s16135_s0 + $0x38] sm:$0xff] }
  0xce   :  { %5258 = vmatpush.bf16.xpose.msrb.mxu3 %v7286_v39  ;;  %v5097_v39 = vpop.f32.mrf.mxu2  ;;  %v6886_v46 = vor.u32 %v10012_v34, %v6883_v37  ;;  %v7402_v34 = vor.u32 %v10139_v23, %v7399_v24  ;;  %v902_v37 = vunpack.c.l.b16 %v27_v25 }
  0xcf   :  { %v5098_v45 = vadd.f32 %v5097_v39, %v5085_v33  ;;  %v903_v39 = vunpack.c.h.b16 %v27_v25 }
  0xd1   :  { %v11598_v47 = vadd.f32 %v5110_v41, %v5098_v45  ;;  %v10113_v45 = vld [vmem:[%s16134_s1 + $0x4f4] sm:$0xf] }
  0xd2   :  { %v5112_v60 = vpop.f32.mrf.mxu3 }
  0xd3   :  { %v10100_v60 = vld [vmem:[%s16134_s1 + $0x488] sm:$0xf0] }
  0xd4   :  { %5220 = vmatpush.bf16.xpose.msrb.mxu0 %v7174_v50  ;;  %v6773_v50 = vld [vmem:[%s16134_s1 + $0xf8] sm:$0xf] }
  0xd5   :  { %5233 = vmatpush.bf16.xpose.msrb.mxu1 %v7178_v51  ;;  %5246 = vmatpush.bf16.xpose.msrb.mxu2 %v7182_v52  ;;  %v9998_v51 = vld [vmem:[%s16134_s1 + $0x158] sm:$0xf0] }
  0xd6   :  { %5259 = vmatpush.bf16.xpose.msrb.mxu3 %v7186_v53  ;;  %v9986_v52 = vld [vmem:[%s16134_s1 + $0xfc] sm:$0xf]  ;;  %v6775_v53 = vld [vmem:[%s16134_s1 + $0x15c] sm:$0xf0]  ;;  %v6774_v58 = vor.u32 %v9998_v51, %v6773_v50  ;;  %v5099_v59 = vpop.f32.mrf.mxu2  ;;  %v7297_v50 = vld [vmem:[%s16134_s1 + $0x4f8] sm:$0xf] }
  0xd7   :  { %v6778_v61 = vor.u32 %v9986_v52, %v6775_v53  ;;  %v10126_v51 = vld [vmem:[%s16134_s1 + $0x558] sm:$0xf0]  ;;  %v11702_v52 = vpack.c.b16 %v903_v39, %v903_v39  ;;  %v7189_v59 = vld [vmem:[%s16134_s1 + $0x428] sm:$0xf] }
  0xd8   :  { %v10114_v53 = vld [vmem:[%s16134_s1 + $0x4fc] sm:$0xf]  ;;  %v7190_v3 = vor.u32 %v10100_v60, %v7189_v59  ;;  %v6889_v59 = vld [vmem:[%s16134_s1 + $0x1d0] sm:$0xf]  ;;  %v10025_v60 = vld [vmem:[%s16134_s1 + $0x230] sm:$0xf0] }
  0xd9   :  { %v10050_v39 = vld [vmem:[%s16134_s1 + $0x2f8] sm:$0xf0] }
  0xdc   :  { %5221 = vmatpush.bf16.xpose.msrb.mxu0 %v7074_v62  ;;  %v6782_v62 = vor.u32 %v9999_v55, %v6781_v54  ;;  %v7299_v54 = vld [vmem:[%s16134_s1 + $0x55c] sm:$0xf0] }
  0xdd   :  { %5234 = vmatpush.bf16.xpose.msrb.mxu1 %v7078_v63  ;;  %5247 = vmatpush.bf16.xpose.msrb.mxu2 %v7082_v0  ;;  %v6786_v63 = vor.u32 %v9987_v56, %v6783_v57  ;;  %v6673_v0 = vld [vmem:[%s16134_s1 + $0x30] sm:$0xf]  ;;  %v7294_v56 = vor.u32 %v10113_v45, %v7291_v49  ;;  %v7298_v57 = vor.u32 %v10126_v51, %v7297_v50  ;;  %v6997_v45 = vld [vmem:[%s16134_s1 + $0x2a0] sm:$0xf]  ;;  %v10051_v49 = vld [vmem:[%s16134_s1 + $0x300] sm:$0xf0] }
  0xde   :  { %5260 = vmatpush.bf16.xpose.msrb.mxu3 %v7086_v1  ;;  %v9973_v1 = vld [vmem:[%s16134_s1 + $0x90] sm:$0xf0]  ;;  %v10039_v50 = vld [vmem:[%s16134_s1 + $0x2a4] sm:$0xf]  ;;  %v6999_v51 = vld [vmem:[%s16134_s1 + $0x304] sm:$0xf0] }
  0xe4   :  { %5222 = vmatpush.bf16.xpose.msrb.mxu0 %v6974_v11  ;;  %v10138_v11 = vld [vmem:[%s16134_s1 + $0x5bc] sm:$0xf] }
  0xe5   :  { %5235 = vmatpush.bf16.xpose.msrb.mxu1 %v6978_v13  ;;  %5248 = vmatpush.bf16.xpose.msrb.mxu2 %v6982_v14  ;;  %v6674_v13 = vor.u32 %v9973_v1, %v6673_v0  ;;  %v7397_v14 = vld [vmem:[%s16134_s1 + $0x5c0] sm:$0xf]  ;;  %v7394_v30 = vor.u32 %v10138_v11, %v7391_v12  ;;  %v10101_v0 = vld [vmem:[%s16134_s1 + $0x490] sm:$0xf0] }
  0xe6   :  { %5261 = vmatpush.bf16.xpose.msrb.mxu3 %v6986_v16  ;;  %v26_v16 = vld [vmem:[%s16135_s0 + $0x30] sm:$0xff]  ;;  %v7398_v32 = vor.u32 %v10151_v15, %v7397_v14  ;;  %v7089_v12 = vld [vmem:[%s16134_s1 + $0x360] sm:$0xf]  ;;  %v10063_v14 = vld [vmem:[%s16134_s1 + $0x364] sm:$0xf] }
  0xe7   :  { %v900_v33 = vunpack.c.l.b16 %v26_v16  ;;  %v10089_v1 = vld [vmem:[%s16134_s1 + $0x434] sm:$0xf]  ;;  %v7097_v15 = vld [vmem:[%s16134_s1 + $0x368] sm:$0xf] }
  0xe8   :  { %v7202_v6 = vor.u32 %v10089_v1, %v7199_v2  ;;  %v10014_v1 = vld [vmem:[%s16134_s1 + $0x1dc] sm:$0xf]  ;;  %v6899_v2 = vld [vmem:[%s16134_s1 + $0x23c] sm:$0xf0] }
  0xe9   :  { %v11678_v41 = vpack.c.b16 %v900_v33, %v900_v33 }
  0xec   :  { %5223 = vmatpush.bf16.xpose.msrb.mxu0 %v6874_v38  ;;  %v901_v38 = vunpack.c.h.b16 %v26_v16  ;;  %v10076_v16 = vld [vmem:[%s16134_s1 + $0x3c8] sm:$0xf0] }
  0xed   :  { %5236 = vmatpush.bf16.xpose.msrb.mxu1 %v6878_v42  ;;  %5249 = vmatpush.bf16.xpose.msrb.mxu2 %v6882_v44  ;;  %v7289_v42 = vld [vmem:[%s16134_s1 + $0x4f0] sm:$0xf]  ;;  %v10125_v44 = vld [vmem:[%s16134_s1 + $0x550] sm:$0xf0]  ;;  %v7098_v25 = vor.u32 %v10076_v16, %v7097_v15 }
  0xee   :  { %5262 = vmatpush.bf16.xpose.msrb.mxu3 %v6886_v46  ;;  %v11689_v46 = vpack.c.b16 %v902_v37, %v902_v37  ;;  %v11691_v48 = vpack.c.b16 %v901_v38, %v901_v38  ;;  %v7290_v55 = vor.u32 %v10125_v44, %v7289_v42  ;;  %v6989_v38 = vld [vmem:[%s16134_s1 + $0x298] sm:$0xf]  ;;  %v10038_v42 = vld [vmem:[%s16134_s1 + $0x29c] sm:$0xf]  ;;  %v6991_v44 = vld [vmem:[%s16134_s1 + $0x2fc] sm:$0xf0] }
  0xf4   :  { %5224 = vmatpush.bf16.xpose.msrb.mxu0 %v6774_v58  ;;  %v7302_v58 = vor.u32 %v10114_v53, %v7299_v54  ;;  %v6990_v53 = vor.u32 %v10050_v39, %v6989_v38  ;;  %v6994_v54 = vor.u32 %v10038_v42, %v6991_v44  ;;  %v10152_v38 = vld [vmem:[%s16134_s1 + $0x628] sm:$0xf0]  ;;  %v7407_v42 = vld [vmem:[%s16134_s1 + $0x62c] sm:$0xf0] }
  0xf5   :  { %5237 = vmatpush.bf16.xpose.msrb.mxu1 %v6778_v61  ;;  %5250 = vmatpush.bf16.xpose.msrb.mxu2 %v6782_v62  ;;  %v10088_v61 = vld [vmem:[%s16134_s1 + $0x42c] sm:$0xf]  ;;  %v7191_v62 = vld [vmem:[%s16134_s1 + $0x48c] sm:$0xf0] }
  0xf6   :  { %5263 = vmatpush.bf16.xpose.msrb.mxu3 %v6786_v63  ;;  %v7197_v63 = vld [vmem:[%s16134_s1 + $0x430] sm:$0xf]  ;;  %v7194_v4 = vor.u32 %v10088_v61, %v7191_v62  ;;  %v10013_v61 = vld [vmem:[%s16134_s1 + $0x1d4] sm:$0xf]  ;;  %v6891_v62 = vld [vmem:[%s16134_s1 + $0x234] sm:$0xf0] }
  0xf7   :  { %v7198_v5 = vor.u32 %v10101_v0, %v7197_v63  ;;  %v6897_v63 = vld [vmem:[%s16134_s1 + $0x1d8] sm:$0xf]  ;;  %v10026_v0 = vld [vmem:[%s16134_s1 + $0x238] sm:$0xf0]  ;;  %v10140_v39 = vld [vmem:[%s16134_s1 + $0x5cc] sm:$0xf] }
  0xfc   :  { %5225 = vmatpush.bf16.xpose.msrb.mxu0 %v6674_v13  ;;  %v10075_v13 = vld [vmem:[%s16134_s1 + $0x3c0] sm:$0xf0] }
  0xfd   :  { %5238 = vmatpush.bf16.xpose.msrb.mxu1 %v6678_v17  ;;  %5251 = vmatpush.bf16.xpose.msrb.mxu2 %v6682_v18  ;;  %v10064_v17 = vld [vmem:[%s16134_s1 + $0x36c] sm:$0xf]  ;;  %v7099_v18 = vld [vmem:[%s16134_s1 + $0x3cc] sm:$0xf0]  ;;  %v7090_v23 = vor.u32 %v10075_v13, %v7089_v12  ;;  %v10001_v13 = vld [vmem:[%s16134_s1 + $0x170] sm:$0xf0] }
  0xfe   :  { %5264 = vmatpush.bf16.xpose.msrb.mxu3 %v6686_v28  ;;  %v6797_v12 = vld [vmem:[%s16134_s1 + $0x110] sm:$0xf] }
 0x100   :  { %v5123_v7 = vpop.f32.mrf.mxu0 }
 0x101   :  { %v5124_v8 = vadd.f32 %v5123_v7, %v11598_v47  ;;  %v7091_v47 = vld [vmem:[%s16134_s1 + $0x3c4] sm:$0xf0] }
 0x102   :  { %v7094_v24 = vor.u32 %v10063_v14, %v7091_v47  ;;  %v6789_v7 = vld [vmem:[%s16134_s1 + $0x108] sm:$0xf]  ;;  %v9989_v14 = vld [vmem:[%s16134_s1 + $0x114] sm:$0xf]  ;;  %v6799_v47 = vld [vmem:[%s16134_s1 + $0x174] sm:$0xf0] }
 0x103   :  { %5226 = vmatmul.bf16.vlgmr.msrb.gmra.mxu0 %v11678_v41  ;;  %v5136_v10 = vpop.f32.mrf.mxu1 }
 0x104   :  { %5270 = vmatpush.bf16.xpose.msra.mxu0 %v7390_v29  ;;  %5252 = vmatmul.bf16.vlgmr.msrb.gmra.mxu2 %v11689_v46  ;;  %v5137_v11 = vadd.f32 %v5136_v10, %v5124_v8  ;;  %v7102_v29 = vor.u32 %v10064_v17, %v7099_v18  ;;  %v10000_v8 = vld [vmem:[%s16134_s1 + $0x168] sm:$0xf0]  ;;  %v6798_v17 = vor.u32 %v10001_v13, %v6797_v12 }
 0x105   :  { %5283 = vmatpush.bf16.xpose.msra.mxu1 %v7394_v30  ;;  %5296 = vmatpush.bf16.xpose.msra.mxu2 %v7398_v32  ;;  %v9988_v10 = vld [vmem:[%s16134_s1 + $0x10c] sm:$0xf]  ;;  %v6790_v15 = vor.u32 %v10000_v8, %v6789_v7  ;;  %v6802_v18 = vor.u32 %v9989_v14, %v6799_v47  ;;  %v7307_v8 = vld [vmem:[%s16134_s1 + $0x564] sm:$0xf0]  ;;  %v7315_v14 = vld [vmem:[%s16134_s1 + $0x56c] sm:$0xf0] }
 0x106   :  { %5309 = vmatpush.bf16.xpose.msra.mxu3 %v7402_v34  ;;  %5239 = vmatmul.bf16.vlgmr.msrb.gmra.mxu1 %v11691_v48  ;;  %v10116_v13 = vld [vmem:[%s16134_s1 + $0x50c] sm:$0xf] }
 0x107   :  { %5265 = vmatmul.bf16.vlgmr.msrb.gmra.mxu3 %v11702_v52  ;;  %v5149_v28 = vpop.f32.mrf.mxu2 }
 0x108   :  { %v5150_v30 = vadd.f32 %v5149_v28, %v5137_v11  ;;  %v5125_v33 = vpop.f32.mrf.mxu0  ;;  %v6791_v11 = vld [vmem:[%s16134_s1 + $0x16c] sm:$0xf0]  ;;  %v6691_v28 = vld [vmem:[%s16134_s1 + $0xa4] sm:$0xf0] }
 0x109   :  { %v6794_v16 = vor.u32 %v9988_v10, %v6791_v11  ;;  %v6699_v33 = vld [vmem:[%s16134_s1 + $0xac] sm:$0xf0]  ;;  %v7313_v10 = vld [vmem:[%s16134_s1 + $0x508] sm:$0xf]  ;;  %v10128_v11 = vld [vmem:[%s16134_s1 + $0x568] sm:$0xf0] }
 0x10a   :  { %v5162_v32 = vpop.f32.mrf.mxu3 }
 0x10b   :  { %v5138_v34 = vpop.f32.mrf.mxu1  ;;  %v11763_v37 = vadd.f32 %v5162_v32, %v5150_v30  ;;  %v9976_v30 = vld [vmem:[%s16134_s1 + $0xa8] sm:$0xf0] }
 0x10c   :  { %5271 = vmatpush.bf16.xpose.msra.mxu0 %v7290_v55  ;;  %v6998_v55 = vor.u32 %v10051_v49, %v6997_v45  ;;  %v9964_v32 = vld [vmem:[%s16134_s1 + $0x4c] sm:$0xf]  ;;  %v7405_v34 = vld [vmem:[%s16134_s1 + $0x5c8] sm:$0xf]  ;;  %v7413_v45 = vld [vmem:[%s16134_s1 + $0x5d0] sm:$0xf] }
 0x10d   :  { %5284 = vmatpush.bf16.xpose.msra.mxu1 %v7294_v56  ;;  %5297 = vmatpush.bf16.xpose.msra.mxu2 %v7298_v57  ;;  %v7002_v57 = vor.u32 %v10039_v50, %v6999_v51  ;;  %v10153_v49 = vld [vmem:[%s16134_s1 + $0x630] sm:$0xf0]  ;;  %v28_v50 = vld [vmem:[%s16135_s0 + $0x40] sm:$0xff] }
 0x10e   :  { %5310 = vmatpush.bf16.xpose.msra.mxu3 %v7302_v58 }
 0x10f   :  { %v5151_v56 = vpop.f32.mrf.mxu2 }
 0x110   :  { %v29_v56 = vld [vmem:[%s16135_s0 + $0x48] sm:$0xff] }
 0x112   :  { %v5164_v58 = vpop.f32.mrf.mxu3 }
 0x113   :  { %v7406_v58 = vor.u32 %v10152_v38, %v7405_v34 }
 0x114   :  { %5272 = vmatpush.bf16.xpose.msra.mxu0 %v7190_v3  ;;  %v6890_v3 = vor.u32 %v10025_v60, %v6889_v59  ;;  %v7410_v59 = vor.u32 %v10140_v39, %v7407_v42  ;;  %v7414_v60 = vor.u32 %v10153_v49, %v7413_v45 }
 0x115   :  { %5285 = vmatpush.bf16.xpose.msra.mxu1 %v7194_v4  ;;  %5298 = vmatpush.bf16.xpose.msra.mxu2 %v7198_v5  ;;  %v6894_v4 = vor.u32 %v10013_v61, %v6891_v62  ;;  %v6898_v5 = vor.u32 %v10026_v0, %v6897_v63  ;;  %v904_v61 = vunpack.c.l.b16 %v28_v50  ;;  %v906_v63 = vunpack.c.l.b16 %v29_v56 }
 0x116   :  { %5311 = vmatpush.bf16.xpose.msra.mxu3 %v7202_v6  ;;  %v6902_v6 = vor.u32 %v10014_v1, %v6899_v2  ;;  %v905_v0 = vunpack.c.h.b16 %v28_v50  ;;  %v907_v1 = vunpack.c.h.b16 %v29_v56  ;;  %v7105_v50 = vld [vmem:[%s16134_s1 + $0x370] sm:$0xf]  ;;  %v10066_v56 = vld [vmem:[%s16134_s1 + $0x37c] sm:$0xf] }
 0x117   :  { %v11891_v2 = vpack.c.b16 %v904_v61, %v904_v61 }
 0x118   :  { %v11904_v7 = vpack.c.b16 %v905_v0, %v905_v0  ;;  %v11915_v12 = vpack.c.b16 %v907_v1, %v907_v1 }
 0x11c   :  { %5273 = vmatpush.bf16.xpose.msra.mxu0 %v7090_v23  ;;  %v6689_v23 = vld [vmem:[%s16134_s1 + $0x40] sm:$0xf] }
 0x11d   :  { %5286 = vmatpush.bf16.xpose.msra.mxu1 %v7094_v24  ;;  %5299 = vmatpush.bf16.xpose.msra.mxu2 %v7098_v25  ;;  %v9975_v24 = vld [vmem:[%s16134_s1 + $0xa0] sm:$0xf0] }
 0x11e   :  { %5312 = vmatpush.bf16.xpose.msra.mxu3 %v7102_v29  ;;  %v9963_v25 = vld [vmem:[%s16134_s1 + $0x44] sm:$0xf]  ;;  %v6697_v29 = vld [vmem:[%s16134_s1 + $0x48] sm:$0xf]  ;;  %v6690_v44 = vor.u32 %v9975_v24, %v6689_v23  ;;  %v10102_v23 = vld [vmem:[%s16134_s1 + $0x498] sm:$0xf0] }
 0x11f   :  { %v6694_v51 = vor.u32 %v9963_v25, %v6691_v28  ;;  %v10090_v24 = vld [vmem:[%s16134_s1 + $0x43c] sm:$0xf]  ;;  %v7207_v25 = vld [vmem:[%s16134_s1 + $0x49c] sm:$0xf0] }
 0x120   :  { %v7213_v28 = vld [vmem:[%s16134_s1 + $0x440] sm:$0xf]  ;;  %v7210_v34 = vor.u32 %v10090_v24, %v7207_v25 }
 0x124   :  { %5274 = vmatpush.bf16.xpose.msra.mxu0 %v6990_v53  ;;  %v6698_v53 = vor.u32 %v9976_v30, %v6697_v29  ;;  %v10103_v29 = vld [vmem:[%s16134_s1 + $0x4a0] sm:$0xf0] }
 0x125   :  { %5287 = vmatpush.bf16.xpose.msra.mxu1 %v6994_v54  ;;  %5300 = vmatpush.bf16.xpose.msra.mxu2 %v6998_v55  ;;  %v10141_v54 = vld [vmem:[%s16134_s1 + $0x5d4] sm:$0xf]  ;;  %v7415_v55 = vld [vmem:[%s16134_s1 + $0x634] sm:$0xf0]  ;;  %v10091_v30 = vld [vmem:[%s16134_s1 + $0x444] sm:$0xf]  ;;  %v7214_v38 = vor.u32 %v10103_v29, %v7213_v28 }
 0x126   :  { %5313 = vmatpush.bf16.xpose.msra.mxu3 %v7002_v57  ;;  %v6702_v57 = vor.u32 %v9964_v32, %v6699_v33  ;;  %v7418_v62 = vor.u32 %v10141_v54, %v7415_v55  ;;  %v7215_v32 = vld [vmem:[%s16134_s1 + $0x4a4] sm:$0xf0]  ;;  %v7113_v54 = vld [vmem:[%s16134_s1 + $0x378] sm:$0xf]  ;;  %v10078_v55 = vld [vmem:[%s16134_s1 + $0x3d8] sm:$0xf0] }
 0x127   :  { %v7218_v39 = vor.u32 %v10091_v30, %v7215_v32  ;;  %v7114_v61 = vor.u32 %v10078_v55, %v7113_v54  ;;  %v6905_v28 = vld [vmem:[%s16134_s1 + $0x1e0] sm:$0xf]  ;;  %v10027_v29 = vld [vmem:[%s16134_s1 + $0x240] sm:$0xf0]  ;;  %v6907_v32 = vld [vmem:[%s16134_s1 + $0x244] sm:$0xf0] }
 0x128   :  { %v10015_v30 = vld [vmem:[%s16134_s1 + $0x1e4] sm:$0xf]  ;;  %v6813_v54 = vld [vmem:[%s16134_s1 + $0x120] sm:$0xf] }
 0x129   :  { %v10003_v55 = vld [vmem:[%s16134_s1 + $0x180] sm:$0xf0] }
 0x12c   :  { %5275 = vmatpush.bf16.xpose.msra.mxu0 %v6890_v3  ;;  %v7305_v3 = vld [vmem:[%s16134_s1 + $0x500] sm:$0xf] }
 0x12d   :  { %5288 = vmatpush.bf16.xpose.msra.mxu1 %v6894_v4  ;;  %5301 = vmatpush.bf16.xpose.msra.mxu2 %v6898_v5  ;;  %v10127_v4 = vld [vmem:[%s16134_s1 + $0x560] sm:$0xf0] }
 0x12e   :  { %5314 = vmatpush.bf16.xpose.msra.mxu3 %v6902_v6  ;;  %v10115_v5 = vld [vmem:[%s16134_s1 + $0x504] sm:$0xf]  ;;  %v11902_v6 = vpack.c.b16 %v906_v63, %v906_v63  ;;  %v7306_v47 = vor.u32 %v10127_v4, %v7305_v3 }
 0x134   :  { %5276 = vmatpush.bf16.xpose.msra.mxu0 %v6790_v15  ;;  %v7310_v15 = vor.u32 %v10115_v5, %v7307_v8  ;;  %v7005_v5 = vld [vmem:[%s16134_s1 + $0x2a8] sm:$0xf]  ;;  %v10052_v8 = vld [vmem:[%s16134_s1 + $0x308] sm:$0xf0] }
 0x135   :  { %5289 = vmatpush.bf16.xpose.msra.mxu1 %v6794_v16  ;;  %5302 = vmatpush.bf16.xpose.msra.mxu2 %v6798_v17  ;;  %v7314_v16 = vor.u32 %v10128_v11, %v7313_v10  ;;  %v7318_v17 = vor.u32 %v10116_v13, %v7315_v14  ;;  %v10040_v10 = vld [vmem:[%s16134_s1 + $0x2ac] sm:$0xf]  ;;  %v7007_v11 = vld [vmem:[%s16134_s1 + $0x30c] sm:$0xf0]  ;;  %v10053_v14 = vld [vmem:[%s16134_s1 + $0x310] sm:$0xf0] }
 0x136   :  { %5315 = vmatpush.bf16.xpose.msra.mxu3 %v6802_v18  ;;  %v7205_v18 = vld [vmem:[%s16134_s1 + $0x438] sm:$0xf]  ;;  %v7013_v13 = vld [vmem:[%s16134_s1 + $0x2b0] sm:$0xf] }
 0x137   :  { %v7206_v33 = vor.u32 %v10102_v23, %v7205_v18  ;;  %v7014_v18 = vor.u32 %v10053_v14, %v7013_v13  ;;  %v6715_v13 = vld [vmem:[%s16134_s1 + $0xbc] sm:$0xf0] }
 0x13c   :  { %5277 = vmatpush.bf16.xpose.msra.mxu0 %v6690_v44 }
 0x13d   :  { %5290 = vmatpush.bf16.xpose.msra.mxu1 %v6694_v51  ;;  %5303 = vmatpush.bf16.xpose.msra.mxu2 %v6698_v53  ;;  %v10077_v51 = vld [vmem:[%s16134_s1 + $0x3d0] sm:$0xf0] }
 0x13e   :  { %5316 = vmatpush.bf16.xpose.msra.mxu3 %v6702_v57  ;;  %v10065_v53 = vld [vmem:[%s16134_s1 + $0x374] sm:$0xf]  ;;  %v7115_v57 = vld [vmem:[%s16134_s1 + $0x3dc] sm:$0xf0] }
 0x13f   :  { %v7118_v63 = vor.u32 %v10066_v56, %v7115_v57  ;;  %v9991_v56 = vld [vmem:[%s16134_s1 + $0x124] sm:$0xf]  ;;  %v6815_v57 = vld [vmem:[%s16134_s1 + $0x184] sm:$0xf0] }
 0x140   :  { %v5175_v42 = vpop.f32.mrf.mxu0 }
 0x141   :  { %v5176_v44 = vadd.f32 %v5175_v42, %v11763_v37  ;;  %v7107_v37 = vld [vmem:[%s16134_s1 + $0x3d4] sm:$0xf0]  ;;  %v6906_v42 = vor.u32 %v10027_v29, %v6905_v28  ;;  %v8133_v28 = vld [vmem:[%s16134_s1 + $0xbc0] sm:$0xf]  ;;  %v10343_v29 = vld [vmem:[%s16134_s1 + $0xc20] sm:$0xf0] }
 0x143   :  { %5278 = vmatmul.bf16.vlgmr.msra.gmra.mxu0 %v11891_v2  ;;  %v5188_v45 = vpop.f32.mrf.mxu1 }
 0x144   :  { %5322 = vmatpush.bf16.xpose.msrb.mxu0 %v7406_v58  ;;  %5304 = vmatmul.bf16.vlgmr.msra.gmra.mxu2 %v11902_v6  ;;  %v5189_v49 = vadd.f32 %v5188_v45, %v5176_v44  ;;  %v7106_v58 = vor.u32 %v10077_v51, %v7105_v50  ;;  %v6910_v44 = vor.u32 %v10015_v30, %v6907_v32  ;;  %v6805_v50 = vld [vmem:[%s16134_s1 + $0x118] sm:$0xf]  ;;  %v10002_v51 = vld [vmem:[%s16134_s1 + $0x178] sm:$0xf0] }
 0x145   :  { %5335 = vmatpush.bf16.xpose.msrb.mxu1 %v7410_v59  ;;  %5348 = vmatpush.bf16.xpose.msrb.mxu2 %v7414_v60  ;;  %v7110_v60 = vor.u32 %v10065_v53, %v7107_v37  ;;  %v9990_v53 = vld [vmem:[%s16134_s1 + $0x11c] sm:$0xf]  ;;  %v6807_v37 = vld [vmem:[%s16134_s1 + $0x17c] sm:$0xf0] }
 0x146   :  { %5361 = vmatpush.bf16.xpose.msrb.mxu3 %v7418_v62  ;;  %5291 = vmatmul.bf16.vlgmr.msra.gmra.mxu1 %v11904_v7  ;;  %v31_v30 = vld [vmem:[%s16135_s0 + $0x58] sm:$0xff] }
 0x147   :  { %5317 = vmatmul.bf16.vlgmr.msra.gmra.mxu3 %v11915_v12  ;;  %v5201_v59 = vpop.f32.mrf.mxu2 }
 0x148   :  { %v5202_v62 = vadd.f32 %v5201_v59, %v5189_v49  ;;  %v5177_v1 = vpop.f32.mrf.mxu0  ;;  %v6810_v59 = vor.u32 %v9990_v53, %v6807_v37 }
 0x149   :  { %v9977_v1 = vld [vmem:[%s16134_s1 + $0xb0] sm:$0xf0] }
 0x14a   :  { %v5214_v0 = vpop.f32.mrf.mxu3 }
 0x14b   :  { %v5190_v3 = vpop.f32.mrf.mxu1  ;;  %v11976_v4 = vadd.f32 %v5214_v0, %v5202_v62  ;;  %v6705_v62 = vld [vmem:[%s16134_s1 + $0x50] sm:$0xf]  ;;  %v10154_v0 = vld [vmem:[%s16134_s1 + $0x638] sm:$0xf0] }
 0x14c   :  { %5323 = vmatpush.bf16.xpose.msrb.mxu0 %v7306_v47  ;;  %v10041_v47 = vld [vmem:[%s16134_s1 + $0x2b4] sm:$0xf] }
 0x14d   :  { %5336 = vmatpush.bf16.xpose.msrb.mxu1 %v7310_v15  ;;  %5349 = vmatpush.bf16.xpose.msrb.mxu2 %v7314_v16  ;;  %v7015_v15 = vld [vmem:[%s16134_s1 + $0x314] sm:$0xf0]  ;;  %v7006_v16 = vor.u32 %v10052_v8, %v7005_v5  ;;  %v9965_v3 = vld [vmem:[%s16134_s1 + $0x54] sm:$0xf] }
 0x14e   :  { %5362 = vmatpush.bf16.xpose.msrb.mxu3 %v7318_v17  ;;  %v7010_v17 = vor.u32 %v10040_v10, %v7007_v11  ;;  %v7018_v24 = vor.u32 %v10041_v47, %v7015_v15  ;;  %v6707_v5 = vld [vmem:[%s16134_s1 + $0xb4] sm:$0xf0]  ;;  %v9978_v10 = vld [vmem:[%s16134_s1 + $0xb8] sm:$0xf0] }
 0x14f   :  { %v5203_v23 = vpop.f32.mrf.mxu2  ;;  %v6713_v8 = vld [vmem:[%s16134_s1 + $0x58] sm:$0xf]  ;;  %v9966_v11 = vld [vmem:[%s16134_s1 + $0x5c] sm:$0xf] }
 0x150   :  { %v8125_v47 = vld [vmem:[%s16134_s1 + $0xbb8] sm:$0xf]  ;;  %v10342_v15 = vld [vmem:[%s16134_s1 + $0xc18] sm:$0xf0]  ;;  %v30_v23 = vld [vmem:[%s16135_s0 + $0x50] sm:$0xff]  ;;  %v6718_v32 = vor.u32 %v9966_v11, %v6715_v13 }
 0x151   :  { %v7925_v11 = vld [vmem:[%s16134_s1 + $0xa28] sm:$0xf]  ;;  %v10292_v13 = vld [vmem:[%s16134_s1 + $0xa88] sm:$0xf0] }
 0x152   :  { %v5216_v25 = vpop.f32.mrf.mxu3 }
 0x153   :  { %v6714_v25 = vor.u32 %v9978_v10, %v6713_v8  ;;  %v10104_v8 = vld [vmem:[%s16134_s1 + $0x4a8] sm:$0xf0] }
 0x154   :  { %5324 = vmatpush.bf16.xpose.msrb.mxu0 %v7206_v33  ;;  %v6913_v33 = vld [vmem:[%s16134_s1 + $0x1e8] sm:$0xf] }
 0x155   :  { %5337 = vmatpush.bf16.xpose.msrb.mxu1 %v7210_v34  ;;  %5350 = vmatpush.bf16.xpose.msrb.mxu2 %v7214_v38  ;;  %v10028_v34 = vld [vmem:[%s16134_s1 + $0x248] sm:$0xf0] }
 0x156   :  { %5363 = vmatpush.bf16.xpose.msrb.mxu3 %v7218_v39  ;;  %v10016_v38 = vld [vmem:[%s16134_s1 + $0x1ec] sm:$0xf]  ;;  %v6915_v39 = vld [vmem:[%s16134_s1 + $0x24c] sm:$0xf0]  ;;  %v6914_v45 = vor.u32 %v10028_v34, %v6913_v33  ;;  %v8126_v34 = vor.u32 %v10342_v15, %v8125_v47 }
 0x157   :  { %v6918_v49 = vor.u32 %v10016_v38, %v6915_v39  ;;  %v908_v39 = vunpack.c.l.b16 %v30_v23  ;;  %v7927_v47 = vld [vmem:[%s16134_s1 + $0xa8c] sm:$0xf0] }
 0x158   :  { %v7933_v15 = vld [vmem:[%s16134_s1 + $0xa30] sm:$0xf] }
 0x159   :  { %v12111_v53 = vpack.c.b16 %v908_v39, %v908_v39  ;;  %v10267_v39 = vld [vmem:[%s16134_s1 + $0x9c0] sm:$0xf0] }
 0x15c   :  { %5325 = vmatpush.bf16.xpose.msrb.mxu0 %v7106_v58  ;;  %v6806_v58 = vor.u32 %v10002_v51, %v6805_v50  ;;  %v10129_v50 = vld [vmem:[%s16134_s1 + $0x570] sm:$0xf0]  ;;  %v911_v51 = vunpack.c.h.b16 %v31_v30 }
 0x15d   :  { %5338 = vmatpush.bf16.xpose.msrb.mxu1 %v7110_v60  ;;  %5351 = vmatpush.bf16.xpose.msrb.mxu2 %v7114_v61  ;;  %v6814_v60 = vor.u32 %v10003_v55, %v6813_v54  ;;  %v6818_v61 = vor.u32 %v9991_v56, %v6815_v57  ;;  %v8025_v54 = vld [vmem:[%s16134_s1 + $0xaf0] sm:$0xf]  ;;  %v10317_v57 = vld [vmem:[%s16134_s1 + $0xb50] sm:$0xf0] }
 0x15e   :  { %5364 = vmatpush.bf16.xpose.msrb.mxu3 %v7118_v63  ;;  %v7421_v63 = vld [vmem:[%s16134_s1 + $0x5d8] sm:$0xf] }
 0x15f   :  { %v7422_v14 = vor.u32 %v10154_v0, %v7421_v63  ;;  %v8026_v0 = vor.u32 %v10317_v57, %v8025_v54 }
 0x161   :  { %v4988_v33 = vsel %vm4962_vm0, %v7422_v14, 0  ;;  %v10280_v14 = vld [vmem:[%s16134_s1 + $0xa2c] sm:$0xf] }
 0x164   :  { %5326 = vmatpush.bf16.xpose.msrb.mxu0 %v7006_v16  ;;  %v6706_v16 = vor.u32 %v9977_v1, %v6705_v62  ;;  %v10318_v62 = vld [vmem:[%s16134_s1 + $0xb58] sm:$0xf0] }
 0x165   :  { %5339 = vmatpush.bf16.xpose.msrb.mxu1 %v7010_v17  ;;  %5352 = vmatpush.bf16.xpose.msrb.mxu2 %v7014_v18  ;;  %v10330_v17 = vld [vmem:[%s16134_s1 + $0xbbc] sm:$0xf]  ;;  %v8127_v18 = vld [vmem:[%s16134_s1 + $0xc1c] sm:$0xf0] }
 0x166   :  { %5365 = vmatpush.bf16.xpose.msrb.mxu3 %v7018_v24  ;;  %v6710_v24 = vor.u32 %v9965_v3, %v6707_v5  ;;  %v8130_v38 = vor.u32 %v10330_v17, %v8127_v18  ;;  %v7221_v5 = vld [vmem:[%s16134_s1 + $0x448] sm:$0xf]  ;;  %v7926_v18 = vor.u32 %v10292_v13, %v7925_v11  ;;  %v7733_v11 = vld [vmem:[%s16134_s1 + $0x8a0] sm:$0xf]  ;;  %v10243_v13 = vld [vmem:[%s16134_s1 + $0x900] sm:$0xf0] }
 0x167   :  { %v7222_v10 = vor.u32 %v10104_v8, %v7221_v5  ;;  %v10242_v5 = vld [vmem:[%s16134_s1 + $0x8f8] sm:$0xf0] }
 0x168   :  { %v10230_v8 = vld [vmem:[%s16134_s1 + $0x89c] sm:$0xf] }
 0x169   :  { %v4982_v17 = vsel %vm4962_vm0, %v7222_v10, 0  ;;  %v7727_v10 = vld [vmem:[%s16134_s1 + $0x8fc] sm:$0xf0] }
 0x16c   :  { %5327 = vmatpush.bf16.xpose.msrb.mxu0 %v6906_v42  ;;  %v8134_v42 = vor.u32 %v10343_v29, %v8133_v28  ;;  %v7121_v28 = vld [vmem:[%s16134_s1 + $0x380] sm:$0xf]  ;;  %v10079_v29 = vld [vmem:[%s16134_s1 + $0x3e0] sm:$0xf0] }
 0x16d   :  { %5340 = vmatpush.bf16.xpose.msrb.mxu1 %v6910_v44  ;;  %5353 = vmatpush.bf16.xpose.msrb.mxu2 %v6914_v45  ;;  %v910_v44 = vunpack.c.l.b16 %v31_v30  ;;  %v909_v45 = vunpack.c.h.b16 %v30_v23  ;;  %v7930_v23 = vor.u32 %v10280_v14, %v7927_v47 }
 0x16e   :  { %5366 = vmatpush.bf16.xpose.msrb.mxu3 %v6918_v49  ;;  %v7321_v49 = vld [vmem:[%s16134_s1 + $0x510] sm:$0xf] }
 0x16f   :  { %v7322_v37 = vor.u32 %v10129_v50, %v7321_v49  ;;  %v12116_v55 = vpack.c.b16 %v910_v44, %v910_v44  ;;  %v12118_v56 = vpack.c.b16 %v909_v45, %v909_v45  ;;  %v7833_v44 = vld [vmem:[%s16134_s1 + $0x968] sm:$0xf]  ;;  %v10268_v45 = vld [vmem:[%s16134_s1 + $0x9c8] sm:$0xf0] }
 0x170   :  { %v7834_v57 = vor.u32 %v10268_v45, %v7833_v44  ;;  %v6821_v44 = vld [vmem:[%s16134_s1 + $0x128] sm:$0xf]  ;;  %v10004_v45 = vld [vmem:[%s16134_s1 + $0x188] sm:$0xf0] }
 0x171   :  { %v4985_v63 = vsel %vm4962_vm0, %v7322_v37, 0 }
 0x174   :  { %5328 = vmatpush.bf16.xpose.msrb.mxu0 %v6806_v58  ;;  %v10305_v58 = vld [vmem:[%s16134_s1 + $0xaf4] sm:$0xf] }
 0x175   :  { %5341 = vmatpush.bf16.xpose.msrb.mxu1 %v6810_v59  ;;  %5354 = vmatpush.bf16.xpose.msrb.mxu2 %v6814_v60  ;;  %v8027_v59 = vld [vmem:[%s16134_s1 + $0xb54] sm:$0xf0]  ;;  %v12129_v60 = vpack.c.b16 %v911_v51, %v911_v51 }
 0x176   :  { %5367 = vmatpush.bf16.xpose.msrb.mxu3 %v6818_v61  ;;  %v8033_v61 = vld [vmem:[%s16134_s1 + $0xaf8] sm:$0xf]  ;;  %v8030_v1 = vor.u32 %v10305_v58, %v8027_v59 }
 0x177   :  { %v8034_v3 = vor.u32 %v10318_v62, %v8033_v61  ;;  %v7021_v59 = vld [vmem:[%s16134_s1 + $0x2b8] sm:$0xf]  ;;  %v10054_v61 = vld [vmem:[%s16134_s1 + $0x318] sm:$0xf0] }
 0x17c   :  { %5329 = vmatpush.bf16.xpose.msrb.mxu0 %v6706_v16  ;;  %v10293_v16 = vld [vmem:[%s16134_s1 + $0xa90] sm:$0xf0] }
 0x17d   :  { %5342 = vmatpush.bf16.xpose.msrb.mxu1 %v6710_v24  ;;  %5355 = vmatpush.bf16.xpose.msrb.mxu2 %v6714_v25  ;;  %v7934_v24 = vor.u32 %v10293_v16, %v7933_v15  ;;  %v7730_v15 = vor.u32 %v10230_v8, %v7727_v10  ;;  %v10167_v10 = vld [vmem:[%s16134_s1 + $0x6a0] sm:$0xf0] }
 0x17e   :  { %5368 = vmatpush.bf16.xpose.msrb.mxu3 %v6718_v32 }
 0x180   :  { %v5227_v25 = vpop.f32.mrf.mxu0 }
 0x181   :  { %v5228_v30 = vadd.f32 %v5227_v25, %v11976_v4  ;;  %v7827_v4 = vld [vmem:[%s16134_s1 + $0x9c4] sm:$0xf0] }
 0x183   :  { %5330 = vmatmul.bf16.vlgmr.msrb.gmra.mxu0 %v12111_v53  ;;  %v5240_v32 = vpop.f32.mrf.mxu1 }
 0x184   :  { %5374 = vmatpush.bf16.xpose.msra.mxu0 %v4988_v33  ;;  %5356 = vmatmul.bf16.vlgmr.msrb.gmra.mxu2 %v12116_v55  ;;  %v5241_v33 = vadd.f32 %v5240_v32, %v5228_v30  ;;  %v10205_v30 = vld [vmem:[%s16134_s1 + $0x7d4] sm:$0xf]  ;;  %v7627_v32 = vld [vmem:[%s16134_s1 + $0x834] sm:$0xf0] }
 0x185   :  { %5387 = vmatpush.bf16.xpose.msra.mxu1 %v8126_v34  ;;  %5400 = vmatpush.bf16.xpose.msra.mxu2 %v8130_v38  ;;  %v7122_v34 = vor.u32 %v10079_v29, %v7121_v28  ;;  %v7825_v38 = vld [vmem:[%s16134_s1 + $0x960] sm:$0xf]  ;;  %v7625_v28 = vld [vmem:[%s16134_s1 + $0x7d0] sm:$0xf]  ;;  %v10217_v29 = vld [vmem:[%s16134_s1 + $0x830] sm:$0xf0] }
 0x186   :  { %5413 = vmatpush.bf16.xpose.msra.mxu3 %v8134_v42  ;;  %5343 = vmatmul.bf16.vlgmr.msrb.gmra.mxu1 %v12118_v56  ;;  %v10255_v42 = vld [vmem:[%s16134_s1 + $0x964] sm:$0xf]  ;;  %v7826_v51 = vor.u32 %v10267_v39, %v7825_v38  ;;  %v7626_v39 = vor.u32 %v10217_v29, %v7625_v28 }
 0x187   :  { %5369 = vmatmul.bf16.vlgmr.msrb.gmra.mxu3 %v12129_v60  ;;  %v5253_v49 = vpop.f32.mrf.mxu2  ;;  %v4979_v50 = vsel %vm4962_vm0, %v7122_v34, 0  ;;  %v7830_v37 = vor.u32 %v10255_v42, %v7827_v4  ;;  %v10218_v34 = vld [vmem:[%s16134_s1 + $0x838] sm:$0xf0]  ;;  %v7630_v42 = vor.u32 %v10205_v30, %v7627_v32  ;;  %v8149_v32 = vld [vmem:[%s16134_s1 + $0xbd0] sm:$0xf] }
 0x188   :  { %v5254_v54 = vadd.f32 %v5253_v49, %v5241_v33  ;;  %v5229_v62 = vpop.f32.mrf.mxu0  ;;  %v7633_v33 = vld [vmem:[%s16134_s1 + $0x7d8] sm:$0xf]  ;;  %v6822_v49 = vor.u32 %v10004_v45, %v6821_v44 }
 0x189   :  { %v7634_v4 = vor.u32 %v10218_v34, %v7633_v33  ;;  %v10345_v33 = vld [vmem:[%s16134_s1 + $0xc30] sm:$0xf0] }
 0x18a   :  { %v5266_v58 = vpop.f32.mrf.mxu3  ;;  %v8150_v44 = vor.u32 %v10345_v33, %v8149_v32  ;;  %v7841_v32 = vld [vmem:[%s16134_s1 + $0x970] sm:$0xf]  ;;  %v10257_v33 = vld [vmem:[%s16134_s1 + $0x974] sm:$0xf] }
 0x18c   :  { %5375 = vmatpush.bf16.xpose.msra.mxu0 %v4985_v63  ;;  %v5242_v63 = vpop.f32.mrf.mxu1 }
 0x18d   :  { %5388 = vmatpush.bf16.xpose.msra.mxu1 %v8026_v0  ;;  %5401 = vmatpush.bf16.xpose.msra.mxu2 %v8030_v1  ;;  %v12199_v0 = vadd.f32 %v5266_v58, %v5254_v54  ;;  %v7022_v1 = vor.u32 %v10054_v61, %v7021_v59  ;;  %v7527_v54 = vld [vmem:[%s16134_s1 + $0x76c] sm:$0xf0]  ;;  %v10193_v58 = vld [vmem:[%s16134_s1 + $0x770] sm:$0xf0]  ;;  %v4970_v59 = vsel %vm4962_vm0, %v6822_v49, 0 }
 0x18e   :  { %5414 = vmatpush.bf16.xpose.msra.mxu3 %v8034_v3  ;;  %v7725_v3 = vld [vmem:[%s16134_s1 + $0x898] sm:$0xf]  ;;  %v10306_v49 = vld [vmem:[%s16134_s1 + $0xafc] sm:$0xf] }
 0x18f   :  { %v4976_v14 = vsel %vm4962_vm0, %v7022_v1, 0  ;;  %v7726_v47 = vor.u32 %v10242_v5, %v7725_v3  ;;  %v5255_v16 = vpop.f32.mrf.mxu2  ;;  %v6721_v1 = vld [vmem:[%s16134_s1 + $0x60] sm:$0xf]  ;;  %v9979_v3 = vld [vmem:[%s16134_s1 + $0xc0] sm:$0xf0] }
 0x190   :  { %v7425_v5 = vld [vmem:[%s16134_s1 + $0x640] sm:$0xf]  ;;  %v6722_v8 = vor.u32 %v9979_v3, %v6721_v1  ;;  %v8135_v16 = vld [vmem:[%s16134_s1 + $0xc24] sm:$0xf0]  ;;  %v10281_v3 = vld [vmem:[%s16134_s1 + $0xa34] sm:$0xf] }
 0x191   :  { %v7426_v29 = vor.u32 %v10167_v10, %v7425_v5  ;;  %v7935_v5 = vld [vmem:[%s16134_s1 + $0xa94] sm:$0xf0]  ;;  %v10294_v10 = vld [vmem:[%s16134_s1 + $0xa98] sm:$0xf0] }
 0x192   :  { %v4967_v28 = vsel %vm4962_vm0, %v6722_v8, 0  ;;  %v7941_v8 = vld [vmem:[%s16134_s1 + $0xa38] sm:$0xf] }
 0x194   :  { %5376 = vmatpush.bf16.xpose.msra.mxu0 %v4982_v17  ;;  %v7734_v17 = vor.u32 %v10243_v13, %v7733_v11  ;;  %v10155_v11 = vld [vmem:[%s16134_s1 + $0x644] sm:$0xf]  ;;  %v7427_v13 = vld [vmem:[%s16134_s1 + $0x6a4] sm:$0xf0] }
 0x195   :  { %5389 = vmatpush.bf16.xpose.msra.mxu1 %v7926_v18  ;;  %5402 = vmatpush.bf16.xpose.msra.mxu2 %v7930_v23  ;;  %v6921_v18 = vld [vmem:[%s16134_s1 + $0x1f0] sm:$0xf]  ;;  %v10029_v23 = vld [vmem:[%s16134_s1 + $0x250] sm:$0xf0]  ;;  %v7430_v30 = vor.u32 %v10155_v11, %v7427_v13  ;;  %v10282_v11 = vld [vmem:[%s16134_s1 + $0xa3c] sm:$0xf] }
 0x196   :  { %5415 = vmatpush.bf16.xpose.msra.mxu3 %v7934_v24  ;;  %v5268_v24 = vpop.f32.mrf.mxu3  ;;  %v6922_v25 = vor.u32 %v10029_v23, %v6921_v18  ;;  %v10344_v18 = vld [vmem:[%s16134_s1 + $0xc28] sm:$0xf0]  ;;  %v7943_v13 = vld [vmem:[%s16134_s1 + $0xa9c] sm:$0xf0] }
 0x197   :  { %v10332_v23 = vld [vmem:[%s16134_s1 + $0xbcc] sm:$0xf]  ;;  %v8143_v24 = vld [vmem:[%s16134_s1 + $0xc2c] sm:$0xf0] }
 0x198   :  { %v4973_v38 = vsel %vm4962_vm0, %v6922_v25, 0  ;;  %v32_v25 = vld [vmem:[%s16135_s0 + $0x60] sm:$0xf] }
 0x19c   :  { %5377 = vmatpush.bf16.xpose.msra.mxu0 %v4979_v50  ;;  %v7525_v50 = vld [vmem:[%s16134_s1 + $0x708] sm:$0xf] }
 0x19d   :  { %5390 = vmatpush.bf16.xpose.msra.mxu1 %v7826_v51  ;;  %5403 = vmatpush.bf16.xpose.msra.mxu2 %v7830_v37  ;;  %v10192_v51 = vld [vmem:[%s16134_s1 + $0x768] sm:$0xf0] }
 0x19e   :  { %5416 = vmatpush.bf16.xpose.msra.mxu3 %v7834_v57  ;;  %v10180_v37 = vld [vmem:[%s16134_s1 + $0x70c] sm:$0xf]  ;;  %v7533_v57 = vld [vmem:[%s16134_s1 + $0x710] sm:$0xf]  ;;  %v7526_v61 = vor.u32 %v10192_v51, %v7525_v50  ;;  %v8035_v50 = vld [vmem:[%s16134_s1 + $0xb5c] sm:$0xf0] }
 0x19f   :  { %v7530_v62 = vor.u32 %v10180_v37, %v7527_v54  ;;  %v7534_v63 = vor.u32 %v10193_v58, %v7533_v57  ;;  %v8041_v51 = vld [vmem:[%s16134_s1 + $0xb00] sm:$0xf]  ;;  %v10319_v37 = vld [vmem:[%s16134_s1 + $0xb60] sm:$0xf0]  ;;  %v8043_v57 = vld [vmem:[%s16134_s1 + $0xb64] sm:$0xf0] }
 0x1a0   :  { %v10307_v54 = vld [vmem:[%s16134_s1 + $0xb04] sm:$0xf]  ;;  %v8049_v58 = vld [vmem:[%s16134_s1 + $0xb08] sm:$0xf] }
 0x1a4   :  { %5378 = vmatpush.bf16.xpose.msra.mxu0 %v4976_v14  ;;  %v7433_v14 = vld [vmem:[%s16134_s1 + $0x648] sm:$0xf] }
 0x1a5   :  { %5391 = vmatpush.bf16.xpose.msra.mxu1 %v7726_v47  ;;  %5404 = vmatpush.bf16.xpose.msra.mxu2 %v7730_v15  ;;  %v10168_v47 = vld [vmem:[%s16134_s1 + $0x6a8] sm:$0xf0]  ;;  %v10331_v15 = vld [vmem:[%s16134_s1 + $0xbc4] sm:$0xf] }
 0x1a6   :  { %5417 = vmatpush.bf16.xpose.msra.mxu3 %v7734_v17  ;;  %v8141_v17 = vld [vmem:[%s16134_s1 + $0xbc8] sm:$0xf]  ;;  %v7434_v34 = vor.u32 %v10168_v47, %v7433_v14  ;;  %v7949_v14 = vld [vmem:[%s16134_s1 + $0xa40] sm:$0xf]  ;;  %v10295_v47 = vld [vmem:[%s16134_s1 + $0xaa0] sm:$0xf0] }
 0x1ac   :  { %5379 = vmatpush.bf16.xpose.msra.mxu0 %v4973_v38  ;;  %v8138_v38 = vor.u32 %v10331_v15, %v8135_v16  ;;  %v7938_v15 = vor.u32 %v10281_v3, %v7935_v5  ;;  %v7942_v16 = vor.u32 %v10294_v10, %v7941_v8  ;;  %v7743_v3 = vld [vmem:[%s16134_s1 + $0x90c] sm:$0xf0]  ;;  %v10245_v8 = vld [vmem:[%s16134_s1 + $0x910] sm:$0xf0] }
 0x1ad   :  { %5392 = vmatpush.bf16.xpose.msra.mxu1 %v7626_v39  ;;  %5405 = vmatpush.bf16.xpose.msra.mxu2 %v7630_v42  ;;  %v8142_v39 = vor.u32 %v10344_v18, %v8141_v17  ;;  %v8146_v42 = vor.u32 %v10332_v23, %v8143_v24  ;;  %v7946_v17 = vor.u32 %v10282_v11, %v7943_v13  ;;  %v7749_v5 = vld [vmem:[%s16134_s1 + $0x8b0] sm:$0xf] }
 0x1ae   :  { %5418 = vmatpush.bf16.xpose.msra.mxu3 %v7634_v4  ;;  %v912_v4 = vunpack.c.l.b16 %v32_v25  ;;  %v7950_v18 = vor.u32 %v10295_v47, %v7949_v14  ;;  %v7750_v47 = vor.u32 %v10245_v8, %v7749_v5  ;;  %v7449_v5 = vld [vmem:[%s16134_s1 + $0x658] sm:$0xf]  ;;  %v10170_v8 = vld [vmem:[%s16134_s1 + $0x6b8] sm:$0xf0] }
 0x1b0   :  { %v12322_v45 = vpack.c.b16 %v912_v4, %v912_v4 }
 0x1b4   :  { %5380 = vmatpush.bf16.xpose.msra.mxu0 %v4970_v59  ;;  %v10320_v59 = vld [vmem:[%s16134_s1 + $0xb68] sm:$0xf0] }
 0x1b5   :  { %5393 = vmatpush.bf16.xpose.msra.mxu1 %v7526_v61  ;;  %5406 = vmatpush.bf16.xpose.msra.mxu2 %v7530_v62  ;;  %v8038_v61 = vor.u32 %v10306_v49, %v8035_v50  ;;  %v8042_v62 = vor.u32 %v10319_v37, %v8041_v51  ;;  %v8050_v1 = vor.u32 %v10320_v59, %v8049_v58  ;;  %v10231_v59 = vld [vmem:[%s16134_s1 + $0x8a4] sm:$0xf] }
 0x1b6   :  { %5419 = vmatpush.bf16.xpose.msra.mxu3 %v7534_v63  ;;  %v8046_v63 = vor.u32 %v10307_v54, %v8043_v57 }
 0x1bc   :  { %5381 = vmatpush.bf16.xpose.msra.mxu0 %v4967_v28 }
 0x1bd   :  { %5394 = vmatpush.bf16.xpose.msra.mxu1 %v7426_v29  ;;  %5407 = vmatpush.bf16.xpose.msra.mxu2 %v7430_v30  ;;  %v10256_v29 = vld [vmem:[%s16134_s1 + $0x96c] sm:$0xf]  ;;  %v7835_v30 = vld [vmem:[%s16134_s1 + $0x9cc] sm:$0xf0] }
 0x1be   :  { %5420 = vmatpush.bf16.xpose.msra.mxu3 %v7434_v34  ;;  %v7843_v34 = vld [vmem:[%s16134_s1 + $0x9d4] sm:$0xf0] }
 0x1bf   :  { %v7846_v49 = vor.u32 %v10257_v33, %v7843_v34  ;;  %v10181_v34 = vld [vmem:[%s16134_s1 + $0x714] sm:$0xf] }
 0x1c0   :  { %v5279_v23 = vpop.f32.mrf.mxu0 }
 0x1c1   :  { %v5280_v24 = vadd.f32 %v5279_v23, %v12199_v0  ;;  %v10269_v0 = vld [vmem:[%s16134_s1 + $0x9d0] sm:$0xf0]  ;;  %v10219_v23 = vld [vmem:[%s16134_s1 + $0x840] sm:$0xf0] }
 0x1c3   :  { %9823 = vmatmul.msk.bf16.vlgmr.msra.gmra.mxu0 %vm4962_vm0, %v12322_v45  ;;  %v5292_v25 = vpop.f32.mrf.mxu1 }
 0x1c4   :  { %5426 = vmatpush.bf16.xpose.msrb.mxu0 %v8138_v38  ;;  %5408 = vmatmul.bf16.vlgmr.msra.gmra.mxu2 %v11122_v22  ;;  %v5293_v28 = vadd.f32 %v5292_v25, %v5280_v24  ;;  %v7849_v38 = vld [vmem:[%s16134_s1 + $0x978] sm:$0xf]  ;;  %v10207_v24 = vld [vmem:[%s16134_s1 + $0x7e4] sm:$0xf]  ;;  %v7643_v25 = vld [vmem:[%s16134_s1 + $0x844] sm:$0xf0] }
 0x1c5   :  { %5439 = vmatpush.bf16.xpose.msrb.mxu1 %v8142_v39  ;;  %5452 = vmatpush.bf16.xpose.msrb.mxu2 %v8146_v42  ;;  %v10270_v39 = vld [vmem:[%s16134_s1 + $0x9d8] sm:$0xf0]  ;;  %v7838_v42 = vor.u32 %v10256_v29, %v7835_v30  ;;  %v10220_v29 = vld [vmem:[%s16134_s1 + $0x848] sm:$0xf0] }
 0x1c6   :  { %5465 = vmatpush.bf16.xpose.msrb.mxu3 %v8150_v44  ;;  %5395 = vmatmul.bf16.vlgmr.msra.gmra.mxu1 %v11120_v21  ;;  %v7842_v44 = vor.u32 %v10269_v0, %v7841_v32  ;;  %v7850_v51 = vor.u32 %v10270_v39, %v7849_v38  ;;  %v7646_v0 = vor.u32 %v10207_v24, %v7643_v25  ;;  %v7535_v38 = vld [vmem:[%s16134_s1 + $0x774] sm:$0xf0]  ;;  %v10347_v24 = vld [vmem:[%s16134_s1 + $0xc40] sm:$0xf0] }
 0x1c7   :  { %5421 = vmatmul.bf16.vlgmr.msra.gmra.mxu3 %v11097_v9  ;;  %v5305_v4 = vpop.f32.mrf.mxu2  ;;  %v7541_v39 = vld [vmem:[%s16134_s1 + $0x718] sm:$0xf]  ;;  %v7450_v25 = vor.u32 %v10170_v8, %v7449_v5 }
 0x1c8   :  { %v5306_v50 = vadd.f32 %v5305_v4, %v5293_v28  ;;  %v5281_v54 = vpop.f32.mrf.mxu0  ;;  %v7649_v28 = vld [vmem:[%s16134_s1 + $0x7e8] sm:$0xf]  ;;  %v10182_v4 = vld [vmem:[%s16134_s1 + $0x71c] sm:$0xf] }
 0x1c9   :  { %v7650_v33 = vor.u32 %v10220_v29, %v7649_v28 }
 0x1ca   :  { %v5318_v37 = vpop.f32.mrf.mxu3 }
 0x1cb   :  { %v5294_v57 = vpop.f32.mrf.mxu1  ;;  %v12402_v58 = vadd.f32 %v5318_v37, %v5306_v50  ;;  %v10195_v50 = vld [vmem:[%s16134_s1 + $0x780] sm:$0xf0] }
 0x1cc   :  { %5427 = vmatpush.bf16.xpose.msrb.mxu0 %v8038_v61  ;;  %v7735_v61 = vld [vmem:[%s16134_s1 + $0x904] sm:$0xf0] }
 0x1cd   :  { %5440 = vmatpush.bf16.xpose.msrb.mxu1 %v8042_v62  ;;  %5453 = vmatpush.bf16.xpose.msrb.mxu2 %v8046_v63  ;;  %v7741_v62 = vld [vmem:[%s16134_s1 + $0x8a8] sm:$0xf]  ;;  %v10244_v63 = vld [vmem:[%s16134_s1 + $0x908] sm:$0xf0]  ;;  %v7738_v10 = vor.u32 %v10231_v59, %v7735_v61  ;;  %v7435_v61 = vld [vmem:[%s16134_s1 + $0x6ac] sm:$0xf0] }
 0x1ce   :  { %5466 = vmatpush.bf16.xpose.msrb.mxu3 %v8050_v1  ;;  %v10232_v1 = vld [vmem:[%s16134_s1 + $0x8ac] sm:$0xf]  ;;  %v7742_v11 = vor.u32 %v10244_v63, %v7741_v62  ;;  %v7441_v62 = vld [vmem:[%s16134_s1 + $0x650] sm:$0xf]  ;;  %v10169_v63 = vld [vmem:[%s16134_s1 + $0x6b0] sm:$0xf0] }
 0x1cf   :  { %v7746_v13 = vor.u32 %v10232_v1, %v7743_v3  ;;  %v5307_v14 = vpop.f32.mrf.mxu2  ;;  %v10156_v59 = vld [vmem:[%s16134_s1 + $0x64c] sm:$0xf]  ;;  %v10157_v1 = vld [vmem:[%s16134_s1 + $0x654] sm:$0xf]  ;;  %v7443_v3 = vld [vmem:[%s16134_s1 + $0x6b4] sm:$0xf0] }
 0x1d0   :  { %v7438_v14 = vor.u32 %v10156_v59, %v7435_v61  ;;  %v7957_v59 = vld [vmem:[%s16134_s1 + $0xa48] sm:$0xf]  ;;  %v10296_v61 = vld [vmem:[%s16134_s1 + $0xaa8] sm:$0xf0] }
 0x1d1   :  { %v7958_v8 = vor.u32 %v10296_v61, %v7957_v59  ;;  %v10247_v59 = vld [vmem:[%s16134_s1 + $0x920] sm:$0xf0] }
 0x1d4   :  { %5428 = vmatpush.bf16.xpose.msrb.mxu0 %v7938_v15  ;;  %v5320_v15 = vpop.f32.mrf.mxu3 }
 0x1d5   :  { %5441 = vmatpush.bf16.xpose.msrb.mxu1 %v7942_v16  ;;  %5454 = vmatpush.bf16.xpose.msrb.mxu2 %v7946_v17  ;;  %v10206_v16 = vld [vmem:[%s16134_s1 + $0x7dc] sm:$0xf]  ;;  %v7635_v17 = vld [vmem:[%s16134_s1 + $0x83c] sm:$0xf0] }
 0x1d6   :  { %5467 = vmatpush.bf16.xpose.msrb.mxu3 %v7950_v18  ;;  %v7641_v18 = vld [vmem:[%s16134_s1 + $0x7e0] sm:$0xf]  ;;  %v7638_v30 = vor.u32 %v10206_v16, %v7635_v17  ;;  %v10334_v15 = vld [vmem:[%s16134_s1 + $0xbdc] sm:$0xf]  ;;  %v7442_v17 = vor.u32 %v10169_v63, %v7441_v62  ;;  %v10284_v62 = vld [vmem:[%s16134_s1 + $0xa4c] sm:$0xf] }
 0x1d7   :  { %v7642_v32 = vor.u32 %v10219_v23, %v7641_v18  ;;  %v8159_v16 = vld [vmem:[%s16134_s1 + $0xc3c] sm:$0xf0]  ;;  %v7446_v18 = vor.u32 %v10157_v1, %v7443_v3  ;;  %v7959_v63 = vld [vmem:[%s16134_s1 + $0xaac] sm:$0xf0]  ;;  %v10297_v3 = vld [vmem:[%s16134_s1 + $0xab0] sm:$0xf0] }
 0x1d8   :  { %v8165_v23 = vld [vmem:[%s16134_s1 + $0xbe0] sm:$0xf]  ;;  %v7965_v1 = vld [vmem:[%s16134_s1 + $0xa50] sm:$0xf] }
 0x1dc   :  { %5429 = vmatpush.bf16.xpose.msrb.mxu0 %v7838_v42  ;;  %v10194_v42 = vld [vmem:[%s16134_s1 + $0x778] sm:$0xf0] }
 0x1dd   :  { %5442 = vmatpush.bf16.xpose.msrb.mxu1 %v7842_v44  ;;  %5455 = vmatpush.bf16.xpose.msrb.mxu2 %v7846_v49  ;;  %v7543_v44 = vld [vmem:[%s16134_s1 + $0x77c] sm:$0xf0]  ;;  %v7542_v37 = vor.u32 %v10194_v42, %v7541_v39  ;;  %v10309_v39 = vld [vmem:[%s16134_s1 + $0xb14] sm:$0xf]  ;;  %v8059_v42 = vld [vmem:[%s16134_s1 + $0xb74] sm:$0xf0] }
 0x1de   :  { %5468 = vmatpush.bf16.xpose.msrb.mxu3 %v7850_v51  ;;  %v7549_v49 = vld [vmem:[%s16134_s1 + $0x720] sm:$0xf]  ;;  %v7538_v51 = vor.u32 %v10181_v34, %v7535_v38  ;;  %v7546_v54 = vor.u32 %v10182_v4, %v7543_v44  ;;  %v8057_v34 = vld [vmem:[%s16134_s1 + $0xb10] sm:$0xf]  ;;  %v10321_v38 = vld [vmem:[%s16134_s1 + $0xb70] sm:$0xf0] }
 0x1df   :  { %v7550_v57 = vor.u32 %v10195_v50, %v7549_v49  ;;  %v8065_v4 = vld [vmem:[%s16134_s1 + $0xb18] sm:$0xf]  ;;  %v10322_v44 = vld [vmem:[%s16134_s1 + $0xb78] sm:$0xf0]  ;;  %v8058_v50 = vor.u32 %v10321_v38, %v8057_v34 }
 0x1e4   :  { %5430 = vmatpush.bf16.xpose.msrb.mxu0 %v7738_v10  ;;  %v10333_v10 = vld [vmem:[%s16134_s1 + $0xbd4] sm:$0xf] }
 0x1e5   :  { %5443 = vmatpush.bf16.xpose.msrb.mxu1 %v7742_v11  ;;  %5456 = vmatpush.bf16.xpose.msrb.mxu2 %v7746_v13  ;;  %v8151_v11 = vld [vmem:[%s16134_s1 + $0xc34] sm:$0xf0] }
 0x1e6   :  { %5469 = vmatpush.bf16.xpose.msrb.mxu3 %v7750_v47  ;;  %v8157_v13 = vld [vmem:[%s16134_s1 + $0xbd8] sm:$0xf]  ;;  %v10346_v47 = vld [vmem:[%s16134_s1 + $0xc38] sm:$0xf0]  ;;  %v8154_v28 = vor.u32 %v10333_v10, %v8151_v11  ;;  %v7962_v10 = vor.u32 %v10284_v62, %v7959_v63  ;;  %v7966_v11 = vor.u32 %v10297_v3, %v7965_v1 }
 0x1e7   :  { %v8158_v29 = vor.u32 %v10346_v47, %v8157_v13 }
 0x1ec   :  { %5431 = vmatpush.bf16.xpose.msrb.mxu0 %v7638_v30  ;;  %v8162_v30 = vor.u32 %v10334_v15, %v8159_v16  ;;  %v10258_v16 = vld [vmem:[%s16134_s1 + $0x97c] sm:$0xf] }
 0x1ed   :  { %5444 = vmatpush.bf16.xpose.msrb.mxu1 %v7642_v32  ;;  %5457 = vmatpush.bf16.xpose.msrb.mxu2 %v7646_v0  ;;  %v8166_v32 = vor.u32 %v10347_v24, %v8165_v23  ;;  %v10308_v0 = vld [vmem:[%s16134_s1 + $0xb0c] sm:$0xf]  ;;  %v10259_v23 = vld [vmem:[%s16134_s1 + $0x984] sm:$0xf]  ;;  %v7859_v24 = vld [vmem:[%s16134_s1 + $0x9e4] sm:$0xf0] }
 0x1ee   :  { %5470 = vmatpush.bf16.xpose.msrb.mxu3 %v7650_v33  ;;  %v8051_v33 = vld [vmem:[%s16134_s1 + $0xb6c] sm:$0xf0] }
 0x1ef   :  { %v8054_v49 = vor.u32 %v10308_v0, %v8051_v33  ;;  %v7862_v0 = vor.u32 %v10259_v23, %v7859_v24  ;;  %v10183_v24 = vld [vmem:[%s16134_s1 + $0x724] sm:$0xf] }
 0x1f4   :  { %5432 = vmatpush.bf16.xpose.msrb.mxu0 %v7538_v51  ;;  %v8062_v51 = vor.u32 %v10309_v39, %v8059_v42 }
 0x1f5   :  { %5445 = vmatpush.bf16.xpose.msrb.mxu1 %v7542_v37  ;;  %5458 = vmatpush.bf16.xpose.msrb.mxu2 %v7546_v54  ;;  %v8066_v37 = vor.u32 %v10322_v44, %v8065_v4  ;;  %v10283_v54 = vld [vmem:[%s16134_s1 + $0xa44] sm:$0xf]  ;;  %v10233_v44 = vld [vmem:[%s16134_s1 + $0x8b4] sm:$0xf] }
 0x1f6   :  { %5471 = vmatpush.bf16.xpose.msrb.mxu3 %v7550_v57  ;;  %v7951_v57 = vld [vmem:[%s16134_s1 + $0xaa4] sm:$0xf0] }
 0x1f7   :  { %v7954_v5 = vor.u32 %v10283_v54, %v7951_v57  ;;  %v7759_v54 = vld [vmem:[%s16134_s1 + $0x91c] sm:$0xf0] }
 0x1f8   :  { %v7765_v57 = vld [vmem:[%s16134_s1 + $0x8c0] sm:$0xf] }
 0x1f9   :  { %v7766_v3 = vor.u32 %v10247_v59, %v7765_v57  ;;  %v7465_v57 = vld [vmem:[%s16134_s1 + $0x668] sm:$0xf]  ;;  %v10172_v59 = vld [vmem:[%s16134_s1 + $0x6c8] sm:$0xf0] }
 0x1fc   :  { %5433 = vmatpush.bf16.xpose.msrb.mxu0 %v7438_v14 }
 0x1fd   :  { %5446 = vmatpush.bf16.xpose.msrb.mxu1 %v7442_v17  ;;  %5459 = vmatpush.bf16.xpose.msrb.mxu2 %v7446_v18  ;;  %v7851_v17 = vld [vmem:[%s16134_s1 + $0x9dc] sm:$0xf0] }
 0x1fe   :  { %5472 = vmatpush.bf16.xpose.msrb.mxu3 %v7450_v25  ;;  %v7857_v18 = vld [vmem:[%s16134_s1 + $0x980] sm:$0xf]  ;;  %v7865_v25 = vld [vmem:[%s16134_s1 + $0x988] sm:$0xf] }
 0x200   :  { %v5331_v13 = vpop.f32.mrf.mxu0 }
 0x201   :  { %v5332_v14 = vadd.f32 %v5331_v13, %v12402_v58  ;;  %v10271_v58 = vld [vmem:[%s16134_s1 + $0x9e0] sm:$0xf0]  ;;  %v10221_v13 = vld [vmem:[%s16134_s1 + $0x850] sm:$0xf0] }
 0x203   :  { %5434 = vmatmul.bf16.vlgmr.msrb.gmra.mxu0 %v11118_v19  ;;  %v5344_v47 = vpop.f32.mrf.mxu1 }
 0x204   :  { %5478 = vmatpush.bf16.xpose.msra.mxu0 %v8154_v28  ;;  %5460 = vmatmul.bf16.vlgmr.msrb.gmra.mxu2 %v11275_v40  ;;  %v5345_v15 = vadd.f32 %v5344_v47, %v5332_v14  ;;  %v10272_v28 = vld [vmem:[%s16134_s1 + $0x9e8] sm:$0xf0]  ;;  %v10209_v14 = vld [vmem:[%s16134_s1 + $0x7f4] sm:$0xf]  ;;  %v7659_v47 = vld [vmem:[%s16134_s1 + $0x854] sm:$0xf0] }
 0x205   :  { %5491 = vmatpush.bf16.xpose.msra.mxu1 %v8158_v29  ;;  %5504 = vmatpush.bf16.xpose.msra.mxu2 %v8162_v30  ;;  %v7854_v29 = vor.u32 %v10258_v16, %v7851_v17  ;;  %v7866_v34 = vor.u32 %v10272_v28, %v7865_v25  ;;  %v10222_v16 = vld [vmem:[%s16134_s1 + $0x858] sm:$0xf0]  ;;  %v7551_v25 = vld [vmem:[%s16134_s1 + $0x784] sm:$0xf0] }
 0x206   :  { %5517 = vmatpush.bf16.xpose.msra.mxu3 %v8166_v32  ;;  %5447 = vmatmul.bf16.vlgmr.msrb.gmra.mxu1 %v11262_v35  ;;  %v7858_v32 = vor.u32 %v10271_v58, %v7857_v18  ;;  %v7662_v58 = vor.u32 %v10209_v14, %v7659_v47  ;;  %v7557_v28 = vld [vmem:[%s16134_s1 + $0x728] sm:$0xf]  ;;  %v10349_v14 = vld [vmem:[%s16134_s1 + $0xc50] sm:$0xf0]  ;;  %v7466_v47 = vor.u32 %v10172_v59, %v7465_v57 }
 0x207   :  { %5473 = vmatmul.bf16.vlgmr.msrb.gmra.mxu3 %v11264_v36  ;;  %v5357_v30 = vpop.f32.mrf.mxu2 }
 0x208   :  { %v5358_v33 = vadd.f32 %v5357_v30, %v5345_v15  ;;  %v5333_v39 = vpop.f32.mrf.mxu0  ;;  %v7665_v15 = vld [vmem:[%s16134_s1 + $0x7f8] sm:$0xf]  ;;  %v10184_v30 = vld [vmem:[%s16134_s1 + $0x72c] sm:$0xf] }
 0x209   :  { %v7666_v23 = vor.u32 %v10222_v16, %v7665_v15 }
 0x20a   :  { %v5370_v38 = vpop.f32.mrf.mxu3 }
 0x20b   :  { %v5346_v42 = vpop.f32.mrf.mxu1  ;;  %v12601_v4 = vadd.f32 %v5370_v38, %v5358_v33  ;;  %v10197_v33 = vld [vmem:[%s16134_s1 + $0x790] sm:$0xf0] }
 0x20c   :  { %5479 = vmatpush.bf16.xpose.msra.mxu0 %v8054_v49  ;;  %v7751_v49 = vld [vmem:[%s16134_s1 + $0x914] sm:$0xf0] }
 0x20d   :  { %5492 = vmatpush.bf16.xpose.msra.mxu1 %v8058_v50  ;;  %5505 = vmatpush.bf16.xpose.msra.mxu2 %v8062_v51  ;;  %v7757_v50 = vld [vmem:[%s16134_s1 + $0x8b8] sm:$0xf]  ;;  %v10246_v51 = vld [vmem:[%s16134_s1 + $0x918] sm:$0xf0]  ;;  %v7754_v61 = vor.u32 %v10233_v44, %v7751_v49  ;;  %v7451_v49 = vld [vmem:[%s16134_s1 + $0x6bc] sm:$0xf0] }
 0x20e   :  { %5518 = vmatpush.bf16.xpose.msra.mxu3 %v8066_v37  ;;  %v10234_v37 = vld [vmem:[%s16134_s1 + $0x8bc] sm:$0xf]  ;;  %v7758_v62 = vor.u32 %v10246_v51, %v7757_v50  ;;  %v7457_v50 = vld [vmem:[%s16134_s1 + $0x660] sm:$0xf]  ;;  %v10171_v51 = vld [vmem:[%s16134_s1 + $0x6c0] sm:$0xf0] }
 0x20f   :  { %v7762_v63 = vor.u32 %v10234_v37, %v7759_v54  ;;  %v5359_v1 = vpop.f32.mrf.mxu2  ;;  %v10158_v44 = vld [vmem:[%s16134_s1 + $0x65c] sm:$0xf]  ;;  %v10159_v37 = vld [vmem:[%s16134_s1 + $0x664] sm:$0xf]  ;;  %v7459_v54 = vld [vmem:[%s16134_s1 + $0x6c4] sm:$0xf0] }
 0x210   :  { %v7454_v1 = vor.u32 %v10158_v44, %v7451_v49  ;;  %v7973_v44 = vld [vmem:[%s16134_s1 + $0xa58] sm:$0xf]  ;;  %v10298_v49 = vld [vmem:[%s16134_s1 + $0xab8] sm:$0xf0] }
 0x211   :  { %v7974_v59 = vor.u32 %v10298_v49, %v7973_v44  ;;  %v10210_v49 = vld [vmem:[%s16134_s1 + $0x7fc] sm:$0xf] }
 0x214   :  { %5480 = vmatpush.bf16.xpose.msra.mxu0 %v7954_v5  ;;  %v5372_v5 = vpop.f32.mrf.mxu3 }
 0x215   :  { %5493 = vmatpush.bf16.xpose.msra.mxu1 %v7958_v8  ;;  %5506 = vmatpush.bf16.xpose.msra.mxu2 %v7962_v10  ;;  %v10208_v8 = vld [vmem:[%s16134_s1 + $0x7ec] sm:$0xf]  ;;  %v7651_v10 = vld [vmem:[%s16134_s1 + $0x84c] sm:$0xf0] }
 0x216   :  { %5519 = vmatpush.bf16.xpose.msra.mxu3 %v7966_v11  ;;  %v7657_v11 = vld [vmem:[%s16134_s1 + $0x7f0] sm:$0xf]  ;;  %v7654_v17 = vor.u32 %v10208_v8, %v7651_v10  ;;  %v10336_v5 = vld [vmem:[%s16134_s1 + $0xbec] sm:$0xf]  ;;  %v7458_v10 = vor.u32 %v10171_v51, %v7457_v50  ;;  %v10286_v50 = vld [vmem:[%s16134_s1 + $0xa5c] sm:$0xf] }
 0x217   :  { %v7658_v18 = vor.u32 %v10221_v13, %v7657_v11  ;;  %v8175_v8 = vld [vmem:[%s16134_s1 + $0xc4c] sm:$0xf0]  ;;  %v7462_v11 = vor.u32 %v10159_v37, %v7459_v54  ;;  %v7975_v51 = vld [vmem:[%s16134_s1 + $0xabc] sm:$0xf0]  ;;  %v10299_v54 = vld [vmem:[%s16134_s1 + $0xac0] sm:$0xf0] }
 0x218   :  { %v8181_v13 = vld [vmem:[%s16134_s1 + $0xbf0] sm:$0xf]  ;;  %v7981_v37 = vld [vmem:[%s16134_s1 + $0xa60] sm:$0xf] }
 0x21c   :  { %5481 = vmatpush.bf16.xpose.msra.mxu0 %v7854_v29  ;;  %v10196_v29 = vld [vmem:[%s16134_s1 + $0x788] sm:$0xf0] }
 0x21d   :  { %5494 = vmatpush.bf16.xpose.msra.mxu1 %v7858_v32  ;;  %5507 = vmatpush.bf16.xpose.msra.mxu2 %v7862_v0  ;;  %v7559_v32 = vld [vmem:[%s16134_s1 + $0x78c] sm:$0xf0]  ;;  %v7558_v38 = vor.u32 %v10196_v29, %v7557_v28  ;;  %v10311_v28 = vld [vmem:[%s16134_s1 + $0xb24] sm:$0xf]  ;;  %v8075_v29 = vld [vmem:[%s16134_s1 + $0xb84] sm:$0xf0] }
 0x21e   :  { %5520 = vmatpush.bf16.xpose.msra.mxu3 %v7866_v34  ;;  %v7565_v0 = vld [vmem:[%s16134_s1 + $0x730] sm:$0xf]  ;;  %v7554_v34 = vor.u32 %v10183_v24, %v7551_v25  ;;  %v7562_v39 = vor.u32 %v10184_v30, %v7559_v32  ;;  %v8073_v24 = vld [vmem:[%s16134_s1 + $0xb20] sm:$0xf]  ;;  %v10323_v25 = vld [vmem:[%s16134_s1 + $0xb80] sm:$0xf0] }
 0x21f   :  { %v7566_v42 = vor.u32 %v10197_v33, %v7565_v0  ;;  %v8081_v30 = vld [vmem:[%s16134_s1 + $0xb28] sm:$0xf]  ;;  %v10324_v32 = vld [vmem:[%s16134_s1 + $0xb88] sm:$0xf0]  ;;  %v8074_v33 = vor.u32 %v10323_v25, %v8073_v24 }
 0x220   :  { %v7773_v24 = vld [vmem:[%s16134_s1 + $0x8c8] sm:$0xf]  ;;  %v10248_v25 = vld [vmem:[%s16134_s1 + $0x928] sm:$0xf0] }
 0x224   :  { %5482 = vmatpush.bf16.xpose.msra.mxu0 %v7754_v61  ;;  %v10335_v61 = vld [vmem:[%s16134_s1 + $0xbe4] sm:$0xf] }
 0x225   :  { %5495 = vmatpush.bf16.xpose.msra.mxu1 %v7758_v62  ;;  %5508 = vmatpush.bf16.xpose.msra.mxu2 %v7762_v63  ;;  %v8167_v62 = vld [vmem:[%s16134_s1 + $0xc44] sm:$0xf0] }
 0x226   :  { %5521 = vmatpush.bf16.xpose.msra.mxu3 %v7766_v3  ;;  %v8173_v63 = vld [vmem:[%s16134_s1 + $0xbe8] sm:$0xf]  ;;  %v10348_v3 = vld [vmem:[%s16134_s1 + $0xc48] sm:$0xf0]  ;;  %v8170_v15 = vor.u32 %v10335_v61, %v8167_v62  ;;  %v7978_v61 = vor.u32 %v10286_v50, %v7975_v51  ;;  %v7982_v62 = vor.u32 %v10299_v54, %v7981_v37  ;;  %v7667_v50 = vld [vmem:[%s16134_s1 + $0x85c] sm:$0xf0] }
 0x227   :  { %v8174_v16 = vor.u32 %v10348_v3, %v8173_v63  ;;  %v10260_v3 = vld [vmem:[%s16134_s1 + $0x98c] sm:$0xf]  ;;  %v7673_v51 = vld [vmem:[%s16134_s1 + $0x800] sm:$0xf]  ;;  %v10223_v37 = vld [vmem:[%s16134_s1 + $0x860] sm:$0xf0] }
 0x228   :  { %v10211_v54 = vld [vmem:[%s16134_s1 + $0x804] sm:$0xf] }
 0x22c   :  { %5483 = vmatpush.bf16.xpose.msra.mxu0 %v7654_v17  ;;  %v8178_v17 = vor.u32 %v10336_v5, %v8175_v8  ;;  %v7867_v5 = vld [vmem:[%s16134_s1 + $0x9ec] sm:$0xf0] }
 0x22d   :  { %5496 = vmatpush.bf16.xpose.msra.mxu1 %v7658_v18  ;;  %5509 = vmatpush.bf16.xpose.msra.mxu2 %v7662_v58  ;;  %v8182_v18 = vor.u32 %v10349_v14, %v8181_v13  ;;  %v10310_v58 = vld [vmem:[%s16134_s1 + $0xb1c] sm:$0xf]  ;;  %v7873_v8 = vld [vmem:[%s16134_s1 + $0x990] sm:$0xf]  ;;  %v7881_v13 = vld [vmem:[%s16134_s1 + $0x998] sm:$0xf] }
 0x22e   :  { %5522 = vmatpush.bf16.xpose.msra.mxu3 %v7666_v23  ;;  %v8067_v23 = vld [vmem:[%s16134_s1 + $0xb7c] sm:$0xf0]  ;;  %v10274_v14 = vld [vmem:[%s16134_s1 + $0x9f8] sm:$0xf0] }
 0x22f   :  { %v8070_v0 = vor.u32 %v10310_v58, %v8067_v23  ;;  %v10235_v58 = vld [vmem:[%s16134_s1 + $0x8c4] sm:$0xf]  ;;  %v7767_v23 = vld [vmem:[%s16134_s1 + $0x924] sm:$0xf0] }
 0x234   :  { %5484 = vmatpush.bf16.xpose.msra.mxu0 %v7554_v34  ;;  %v8078_v34 = vor.u32 %v10311_v28, %v8075_v29  ;;  %v10236_v28 = vld [vmem:[%s16134_s1 + $0x8cc] sm:$0xf]  ;;  %v7775_v29 = vld [vmem:[%s16134_s1 + $0x92c] sm:$0xf0] }
 0x235   :  { %5497 = vmatpush.bf16.xpose.msra.mxu1 %v7558_v38  ;;  %5510 = vmatpush.bf16.xpose.msra.mxu2 %v7562_v39  ;;  %v8082_v38 = vor.u32 %v10324_v32, %v8081_v30  ;;  %v10285_v39 = vld [vmem:[%s16134_s1 + $0xa54] sm:$0xf]  ;;  %v7781_v30 = vld [vmem:[%s16134_s1 + $0x8d0] sm:$0xf] }
 0x236   :  { %5523 = vmatpush.bf16.xpose.msra.mxu3 %v7566_v42  ;;  %v7967_v42 = vld [vmem:[%s16134_s1 + $0xab4] sm:$0xf0]  ;;  %v10249_v32 = vld [vmem:[%s16134_s1 + $0x930] sm:$0xf0] }
 0x237   :  { %v7970_v57 = vor.u32 %v10285_v39, %v7967_v42  ;;  %v10788_v39 = vld [vmem:[%s16136_s2] sm:$0xf] }
 0x238   :  { %v868_v42 = vperm.slane %v10788_v39, 1  ;;  %v10173_v39 = vld [vmem:[%s16134_s1 + $0x6d0] sm:$0xf0] }
 0x23c   :  { %5485 = vmatpush.bf16.xpose.msra.mxu0 %v7454_v1 }
 0x23d   :  { %5498 = vmatpush.bf16.xpose.msra.mxu1 %v7458_v10  ;;  %5511 = vmatpush.bf16.xpose.msra.mxu2 %v7462_v11  ;;  %v10261_v10 = vld [vmem:[%s16134_s1 + $0x994] sm:$0xf]  ;;  %v7875_v11 = vld [vmem:[%s16134_s1 + $0x9f4] sm:$0xf0] }
 0x23e   :  { %5524 = vmatpush.bf16.xpose.msra.mxu3 %v7466_v47  ;;  %v7870_v47 = vor.u32 %v10260_v3, %v7867_v5 }
 0x240   :  { %v5383_v63 = vpop.f32.mrf.mxu0 }
 0x241   :  { %v12776_v1 = vadd.f32 %v5383_v63, %v12601_v4  ;;  %v10273_v4 = vld [vmem:[%s16134_s1 + $0x9f0] sm:$0xf0]  ;;  %v7670_v63 = vor.u32 %v10210_v49, %v7667_v50  ;;  %v7481_v49 = vld [vmem:[%s16134_s1 + $0x678] sm:$0xf]  ;;  %v10174_v50 = vld [vmem:[%s16134_s1 + $0x6d8] sm:$0xf0] }
 0x243   :  { %5486 = vmatmul.bf16.vlgmr.msra.gmra.mxu0 %v11283_v43  ;;  %v5396_v44 = vpop.f32.mrf.mxu1 }
 0x244   :  { %5530 = vmatpush.bf16.xpose.msrb.mxu0 %v8170_v15  ;;  %5512 = vmatmul.bf16.vlgmr.msra.gmra.mxu2 %v11476_v27  ;;  %v7874_v15 = vor.u32 %v10273_v4, %v7873_v8  ;;  %v7674_v8 = vor.u32 %v10223_v37, %v7673_v51  ;;  %v10337_v51 = vld [vmem:[%s16134_s1 + $0xbf4] sm:$0xf]  ;;  %v8183_v37 = vld [vmem:[%s16134_s1 + $0xc54] sm:$0xf0] }
 0x245   :  { %5543 = vmatpush.bf16.xpose.msrb.mxu1 %v8174_v16  ;;  %5556 = vmatpush.bf16.xpose.msrb.mxu2 %v8178_v17  ;;  %v7878_v16 = vor.u32 %v10261_v10, %v7875_v11  ;;  %v7882_v17 = vor.u32 %v10274_v14, %v7881_v13 }
 0x246   :  { %5569 = vmatpush.bf16.xpose.msrb.mxu3 %v8182_v18  ;;  %5499 = vmatmul.bf16.vlgmr.msra.gmra.mxu1 %v11463_v20 }
 0x247   :  { %5525 = vmatmul.bf16.vlgmr.msra.gmra.mxu3 %v11474_v26  ;;  %v5409_v3 = vpop.f32.mrf.mxu2 }
 0x248   :  { %v5385_v18 = vpop.f32.mrf.mxu0 }
 0x249   :  { %v10186_v18 = vld [vmem:[%s16134_s1 + $0x73c] sm:$0xf] }
 0x24a   :  { %v5422_v5 = vpop.f32.mrf.mxu3 }
 0x24b   :  { %v5398_v14 = vpop.f32.mrf.mxu1 }
 0x24c   :  { %5531 = vmatpush.bf16.xpose.msrb.mxu0 %v8070_v0  ;;  %v7770_v0 = vor.u32 %v10235_v58, %v7767_v23  ;;  %v7575_v58 = vld [vmem:[%s16134_s1 + $0x79c] sm:$0xf0] }
 0x24d   :  { %5544 = vmatpush.bf16.xpose.msrb.mxu1 %v8074_v33  ;;  %5557 = vmatpush.bf16.xpose.msrb.mxu2 %v8078_v34  ;;  %v7774_v33 = vor.u32 %v10248_v25, %v7773_v24  ;;  %v7778_v34 = vor.u32 %v10236_v28, %v7775_v29  ;;  %v7581_v23 = vld [vmem:[%s16134_s1 + $0x740] sm:$0xf]  ;;  %v10199_v24 = vld [vmem:[%s16134_s1 + $0x7a0] sm:$0xf0] }
 0x24e   :  { %5570 = vmatpush.bf16.xpose.msrb.mxu3 %v8082_v38  ;;  %v7782_v38 = vor.u32 %v10249_v32, %v7781_v30  ;;  %v7578_v32 = vor.u32 %v10186_v18, %v7575_v58  ;;  %v10325_v18 = vld [vmem:[%s16134_s1 + $0xb90] sm:$0xf0] }
 0x24f   :  { %v5411_v28 = vpop.f32.mrf.mxu2  ;;  %v10313_v58 = vld [vmem:[%s16134_s1 + $0xb34] sm:$0xf] }
 0x252   :  { %v5424_v29 = vpop.f32.mrf.mxu3 }
 0x254   :  { %5532 = vmatpush.bf16.xpose.msrb.mxu0 %v7970_v57  ;;  %v7675_v57 = vld [vmem:[%s16134_s1 + $0x864] sm:$0xf0] }
 0x255   :  { %5545 = vmatpush.bf16.xpose.msrb.mxu1 %v7974_v59  ;;  %5558 = vmatpush.bf16.xpose.msrb.mxu2 %v7978_v61  ;;  %v5397_v59 = vadd.f32 %v5396_v44, %v868_v42  ;;  %v7681_v61 = vld [vmem:[%s16134_s1 + $0x808] sm:$0xf]  ;;  %v7678_v4 = vor.u32 %v10211_v54, %v7675_v57  ;;  %v10161_v42 = vld [vmem:[%s16134_s1 + $0x674] sm:$0xf]  ;;  %v7475_v44 = vld [vmem:[%s16134_s1 + $0x6d4] sm:$0xf0] }
 0x256   :  { %5571 = vmatpush.bf16.xpose.msrb.mxu3 %v7982_v62  ;;  %v10224_v62 = vld [vmem:[%s16134_s1 + $0x868] sm:$0xf0]  ;;  %v8189_v54 = vld [vmem:[%s16134_s1 + $0xbf8] sm:$0xf] }
 0x257   :  { %v5410_v10 = vadd.f32 %v5409_v3, %v5397_v59  ;;  %v7682_v11 = vor.u32 %v10224_v62, %v7681_v61  ;;  %v10350_v59 = vld [vmem:[%s16134_s1 + $0xc58] sm:$0xf0]  ;;  %v8191_v62 = vld [vmem:[%s16134_s1 + $0xc5c] sm:$0xf0]  ;;  %v7478_v3 = vor.u32 %v10161_v42, %v7475_v44  ;;  %v7991_v42 = vld [vmem:[%s16134_s1 + $0xacc] sm:$0xf0] }
 0x258   :  { %v10338_v61 = vld [vmem:[%s16134_s1 + $0xbfc] sm:$0xf]  ;;  %v7997_v44 = vld [vmem:[%s16134_s1 + $0xa70] sm:$0xf] }
 0x259   :  { %v12853_v13 = vadd.f32 %v5422_v5, %v5410_v10  ;;  %v8197_v5 = vld [vmem:[%s16134_s1 + $0xc00] sm:$0xf]  ;;  %v8186_v10 = vor.u32 %v10337_v51, %v8183_v37  ;;  %v8194_v14 = vor.u32 %v10338_v61, %v8191_v62 }
 0x25c   :  { %5533 = vmatpush.bf16.xpose.msrb.mxu0 %v7870_v47  ;;  %v10185_v47 = vld [vmem:[%s16134_s1 + $0x734] sm:$0xf] }
 0x25d   :  { %5546 = vmatpush.bf16.xpose.msrb.mxu1 %v7874_v15  ;;  %5559 = vmatpush.bf16.xpose.msrb.mxu2 %v7878_v16  ;;  %v7567_v15 = vld [vmem:[%s16134_s1 + $0x794] sm:$0xf0] }
 0x25e   :  { %5572 = vmatpush.bf16.xpose.msrb.mxu3 %v7882_v17  ;;  %v7573_v16 = vld [vmem:[%s16134_s1 + $0x738] sm:$0xf]  ;;  %v10198_v17 = vld [vmem:[%s16134_s1 + $0x798] sm:$0xf0]  ;;  %v7570_v25 = vor.u32 %v10185_v47, %v7567_v15  ;;  %v10312_v15 = vld [vmem:[%s16134_s1 + $0xb2c] sm:$0xf] }
 0x25f   :  { %v7574_v30 = vor.u32 %v10198_v17, %v7573_v16  ;;  %v8083_v16 = vld [vmem:[%s16134_s1 + $0xb8c] sm:$0xf0] }
 0x260   :  { %v8089_v17 = vld [vmem:[%s16134_s1 + $0xb30] sm:$0xf]  ;;  %v8086_v28 = vor.u32 %v10312_v15, %v8083_v16 }
 0x261   :  { %v8090_v29 = vor.u32 %v10325_v18, %v8089_v17 }
 0x264   :  { %5534 = vmatpush.bf16.xpose.msrb.mxu0 %v7770_v0  ;;  %v7582_v0 = vor.u32 %v10199_v24, %v7581_v23  ;;  %v8091_v23 = vld [vmem:[%s16134_s1 + $0xb94] sm:$0xf0] }
 0x265   :  { %5547 = vmatpush.bf16.xpose.msrb.mxu1 %v7774_v33  ;;  %5560 = vmatpush.bf16.xpose.msrb.mxu2 %v7778_v34  ;;  %v10160_v33 = vld [vmem:[%s16134_s1 + $0x66c] sm:$0xf]  ;;  %v7467_v34 = vld [vmem:[%s16134_s1 + $0x6cc] sm:$0xf0]  ;;  %v8097_v24 = vld [vmem:[%s16134_s1 + $0xb38] sm:$0xf] }
 0x266   :  { %5573 = vmatpush.bf16.xpose.msrb.mxu3 %v7782_v38  ;;  %v7473_v38 = vld [vmem:[%s16134_s1 + $0x670] sm:$0xf]  ;;  %v7470_v57 = vor.u32 %v10160_v33, %v7467_v34  ;;  %v7983_v33 = vld [vmem:[%s16134_s1 + $0xac4] sm:$0xf0] }
 0x267   :  { %v7989_v34 = vld [vmem:[%s16134_s1 + $0xa68] sm:$0xf] }
 0x26c   :  { %5535 = vmatpush.bf16.xpose.msrb.mxu0 %v7670_v63  ;;  %v7474_v63 = vor.u32 %v10173_v39, %v7473_v38  ;;  %v10300_v38 = vld [vmem:[%s16134_s1 + $0xac8] sm:$0xf0] }
 0x26d   :  { %5548 = vmatpush.bf16.xpose.msrb.mxu1 %v7674_v8  ;;  %5561 = vmatpush.bf16.xpose.msrb.mxu2 %v7678_v4  ;;  %v10351_v8 = vld [vmem:[%s16134_s1 + $0xc60] sm:$0xf0]  ;;  %v7482_v4 = vor.u32 %v10174_v50, %v7481_v49  ;;  %v10288_v39 = vld [vmem:[%s16134_s1 + $0xa6c] sm:$0xf]  ;;  %v10301_v49 = vld [vmem:[%s16134_s1 + $0xad0] sm:$0xf0]  ;;  %v7990_v51 = vor.u32 %v10300_v38, %v7989_v34 }
 0x26e   :  { %5574 = vmatpush.bf16.xpose.msrb.mxu3 %v7682_v11  ;;  %v8190_v11 = vor.u32 %v10350_v59, %v8189_v54  ;;  %v8198_v47 = vor.u32 %v10351_v8, %v8197_v5  ;;  %v7994_v37 = vor.u32 %v10288_v39, %v7991_v42  ;;  %v7998_v54 = vor.u32 %v10301_v49, %v7997_v44  ;;  %v7889_v5 = vld [vmem:[%s16134_s1 + $0x9a0] sm:$0xf]  ;;  %v10263_v8 = vld [vmem:[%s16134_s1 + $0x9a4] sm:$0xf] }
 0x26f   :  { %v7797_v34 = vld [vmem:[%s16134_s1 + $0x8e0] sm:$0xf]  ;;  %v10251_v38 = vld [vmem:[%s16134_s1 + $0x940] sm:$0xf0] }
 0x274   :  { %5536 = vmatpush.bf16.xpose.msrb.mxu0 %v7570_v25  ;;  %v10326_v25 = vld [vmem:[%s16134_s1 + $0xb98] sm:$0xf0] }
 0x275   :  { %5549 = vmatpush.bf16.xpose.msrb.mxu1 %v7574_v30  ;;  %5562 = vmatpush.bf16.xpose.msrb.mxu2 %v7578_v32  ;;  %v8094_v30 = vor.u32 %v10313_v58, %v8091_v23  ;;  %v8098_v32 = vor.u32 %v10326_v25, %v8097_v24 }
 0x276   :  { %5575 = vmatpush.bf16.xpose.msrb.mxu3 %v7582_v0  ;;  %v10287_v0 = vld [vmem:[%s16134_s1 + $0xa64] sm:$0xf] }
 0x277   :  { %v7986_v50 = vor.u32 %v10287_v0, %v7983_v33  ;;  %v10238_v0 = vld [vmem:[%s16134_s1 + $0x8dc] sm:$0xf]  ;;  %v7791_v33 = vld [vmem:[%s16134_s1 + $0x93c] sm:$0xf0] }
 0x278   :  { %v7794_v44 = vor.u32 %v10238_v0, %v7791_v33  ;;  %v10175_v0 = vld [vmem:[%s16134_s1 + $0x6e0] sm:$0xf0] }
 0x279   :  { %v10163_v33 = vld [vmem:[%s16134_s1 + $0x684] sm:$0xf] }
 0x27c   :  { %5537 = vmatpush.bf16.xpose.msrb.mxu0 %v7470_v57 }
 0x27d   :  { %5550 = vmatpush.bf16.xpose.msrb.mxu1 %v7474_v63  ;;  %5563 = vmatpush.bf16.xpose.msrb.mxu2 %v7478_v3  ;;  %v10262_v63 = vld [vmem:[%s16134_s1 + $0x99c] sm:$0xf]  ;;  %v7883_v3 = vld [vmem:[%s16134_s1 + $0x9fc] sm:$0xf0] }
 0x27e   :  { %5576 = vmatpush.bf16.xpose.msrb.mxu3 %v7482_v4  ;;  %v7891_v4 = vld [vmem:[%s16134_s1 + $0xa04] sm:$0xf0] }
 0x27f   :  { %v7894_v15 = vor.u32 %v10263_v8, %v7891_v4 }
 0x280   :  { %v5435_v57 = vpop.f32.mrf.mxu0 }
 0x281   :  { %v5436_v59 = vadd.f32 %v5435_v57, %v12853_v13  ;;  %v10275_v13 = vld [vmem:[%s16134_s1 + $0xa00] sm:$0xf0]  ;;  %v7689_v57 = vld [vmem:[%s16134_s1 + $0x810] sm:$0xf] }
 0x283   :  { %5538 = vmatmul.bf16.vlgmr.msrb.gmra.mxu0 %v11487_v31  ;;  %v5448_v61 = vpop.f32.mrf.mxu1 }
 0x284   :  { %5582 = vmatpush.bf16.xpose.msra.mxu0 %v8186_v10  ;;  %5564 = vmatmul.bf16.vlgmr.msrb.gmra.mxu2 %v11691_v48  ;;  %v5449_v62 = vadd.f32 %v5448_v61, %v5436_v59  ;;  %v7897_v10 = vld [vmem:[%s16134_s1 + $0x9a8] sm:$0xf]  ;;  %v10225_v59 = vld [vmem:[%s16134_s1 + $0x870] sm:$0xf0] }
 0x285   :  { %5595 = vmatpush.bf16.xpose.msra.mxu1 %v8190_v11  ;;  %5608 = vmatpush.bf16.xpose.msra.mxu2 %v8194_v14  ;;  %v10276_v11 = vld [vmem:[%s16134_s1 + $0xa08] sm:$0xf0]  ;;  %v7886_v14 = vor.u32 %v10262_v63, %v7883_v3  ;;  %v10213_v61 = vld [vmem:[%s16134_s1 + $0x814] sm:$0xf]  ;;  %v7697_v63 = vld [vmem:[%s16134_s1 + $0x818] sm:$0xf] }
 0x286   :  { %5621 = vmatpush.bf16.xpose.msra.mxu3 %v8198_v47  ;;  %5551 = vmatmul.bf16.vlgmr.msrb.gmra.mxu1 %v11678_v41  ;;  %v7890_v47 = vor.u32 %v10275_v13, %v7889_v5  ;;  %v7898_v17 = vor.u32 %v10276_v11, %v7897_v10  ;;  %v10226_v3 = vld [vmem:[%s16134_s1 + $0x878] sm:$0xf0]  ;;  %v7690_v13 = vor.u32 %v10225_v59, %v7689_v57  ;;  %v10187_v10 = vld [vmem:[%s16134_s1 + $0x744] sm:$0xf]  ;;  %v7583_v11 = vld [vmem:[%s16134_s1 + $0x7a4] sm:$0xf0] }
 0x287   :  { %5577 = vmatmul.bf16.vlgmr.msrb.gmra.mxu3 %v11689_v46  ;;  %v5461_v16 = vpop.f32.mrf.mxu2  ;;  %v7698_v4 = vor.u32 %v10226_v3, %v7697_v63 }
 0x288   :  { %v5462_v18 = vadd.f32 %v5461_v16, %v5449_v62  ;;  %v5437_v23 = vpop.f32.mrf.mxu0  ;;  %v7691_v62 = vld [vmem:[%s16134_s1 + $0x874] sm:$0xf0]  ;;  %v7591_v16 = vld [vmem:[%s16134_s1 + $0x7ac] sm:$0xf0] }
 0x289   :  { %v7694_v8 = vor.u32 %v10213_v61, %v7691_v62  ;;  %v8213_v61 = vld [vmem:[%s16134_s1 + $0xc10] sm:$0xf]  ;;  %v10353_v62 = vld [vmem:[%s16134_s1 + $0xc70] sm:$0xf0] }
 0x28a   :  { %v5474_v58 = vpop.f32.mrf.mxu3 }
 0x28b   :  { %v5450_v24 = vpop.f32.mrf.mxu1  ;;  %v13004_v25 = vadd.f32 %v5474_v58, %v5462_v18  ;;  %v10201_v18 = vld [vmem:[%s16134_s1 + $0x7b0] sm:$0xf0]  ;;  %v7586_v58 = vor.u32 %v10187_v10, %v7583_v11  ;;  %v8099_v10 = vld [vmem:[%s16134_s1 + $0xb9c] sm:$0xf0] }
 0x28c   :  { %5583 = vmatpush.bf16.xpose.msra.mxu0 %v8086_v28  ;;  %v10237_v28 = vld [vmem:[%s16134_s1 + $0x8d4] sm:$0xf]  ;;  %v8105_v11 = vld [vmem:[%s16134_s1 + $0xb40] sm:$0xf] }
 0x28d   :  { %5596 = vmatpush.bf16.xpose.msra.mxu1 %v8090_v29  ;;  %5609 = vmatpush.bf16.xpose.msra.mxu2 %v8094_v30  ;;  %v7783_v29 = vld [vmem:[%s16134_s1 + $0x934] sm:$0xf0] }
 0x28e   :  { %5622 = vmatpush.bf16.xpose.msra.mxu3 %v8098_v32  ;;  %v7789_v30 = vld [vmem:[%s16134_s1 + $0x8d8] sm:$0xf]  ;;  %v10250_v32 = vld [vmem:[%s16134_s1 + $0x938] sm:$0xf0]  ;;  %v7786_v39 = vor.u32 %v10237_v28, %v7783_v29 }
 0x28f   :  { %v7790_v42 = vor.u32 %v10250_v32, %v7789_v30  ;;  %v5463_v49 = vpop.f32.mrf.mxu2  ;;  %v10162_v29 = vld [vmem:[%s16134_s1 + $0x67c] sm:$0xf]  ;;  %v7483_v30 = vld [vmem:[%s16134_s1 + $0x6dc] sm:$0xf0] }
 0x290   :  { %v7489_v32 = vld [vmem:[%s16134_s1 + $0x680] sm:$0xf]  ;;  %v8205_v49 = vld [vmem:[%s16134_s1 + $0xc08] sm:$0xf] }
 0x291   :  { %v7490_v57 = vor.u32 %v10175_v0, %v7489_v32  ;;  %v10302_v32 = vld [vmem:[%s16134_s1 + $0xad8] sm:$0xf0] }
 0x292   :  { %v10290_v0 = vld [vmem:[%s16134_s1 + $0xa7c] sm:$0xf] }
 0x294   :  { %5584 = vmatpush.bf16.xpose.msra.mxu0 %v7986_v50  ;;  %v7798_v50 = vor.u32 %v10251_v38, %v7797_v34  ;;  %v7491_v34 = vld [vmem:[%s16134_s1 + $0x6e4] sm:$0xf0] }
 0x295   :  { %5597 = vmatpush.bf16.xpose.msra.mxu1 %v7990_v51  ;;  %5610 = vmatpush.bf16.xpose.msra.mxu2 %v7994_v37  ;;  %v5476_v51 = vpop.f32.mrf.mxu3  ;;  %v10212_v37 = vld [vmem:[%s16134_s1 + $0x80c] sm:$0xf]  ;;  %v7497_v38 = vld [vmem:[%s16134_s1 + $0x688] sm:$0xf]  ;;  %v7494_v59 = vor.u32 %v10163_v33, %v7491_v34  ;;  %v8007_v33 = vld [vmem:[%s16134_s1 + $0xadc] sm:$0xf0] }
 0x296   :  { %5623 = vmatpush.bf16.xpose.msra.mxu3 %v7998_v54  ;;  %v7683_v54 = vld [vmem:[%s16134_s1 + $0x86c] sm:$0xf0]  ;;  %v10352_v51 = vld [vmem:[%s16134_s1 + $0xc68] sm:$0xf0]  ;;  %v8013_v34 = vld [vmem:[%s16134_s1 + $0xa80] sm:$0xf] }
 0x297   :  { %v7686_v5 = vor.u32 %v10212_v37, %v7683_v54  ;;  %v10340_v37 = vld [vmem:[%s16134_s1 + $0xc0c] sm:$0xf]  ;;  %v8207_v54 = vld [vmem:[%s16134_s1 + $0xc6c] sm:$0xf0] }
 0x29c   :  { %5585 = vmatpush.bf16.xpose.msra.mxu0 %v7886_v14  ;;  %v7589_v14 = vld [vmem:[%s16134_s1 + $0x748] sm:$0xf] }
 0x29d   :  { %5598 = vmatpush.bf16.xpose.msra.mxu1 %v7890_v47  ;;  %5611 = vmatpush.bf16.xpose.msra.mxu2 %v7894_v15  ;;  %v10200_v47 = vld [vmem:[%s16134_s1 + $0x7a8] sm:$0xf0] }
 0x29e   :  { %5624 = vmatpush.bf16.xpose.msra.mxu3 %v7898_v17  ;;  %v10188_v15 = vld [vmem:[%s16134_s1 + $0x74c] sm:$0xf]  ;;  %v7597_v17 = vld [vmem:[%s16134_s1 + $0x750] sm:$0xf]  ;;  %v7590_v23 = vor.u32 %v10200_v47, %v7589_v14  ;;  %v10327_v14 = vld [vmem:[%s16134_s1 + $0xba0] sm:$0xf0] }
 0x29f   :  { %v7594_v24 = vor.u32 %v10188_v15, %v7591_v16  ;;  %v7598_v28 = vor.u32 %v10201_v18, %v7597_v17  ;;  %v10315_v47 = vld [vmem:[%s16134_s1 + $0xb44] sm:$0xf]  ;;  %v8107_v15 = vld [vmem:[%s16134_s1 + $0xba4] sm:$0xf0]  ;;  %v10328_v17 = vld [vmem:[%s16134_s1 + $0xba8] sm:$0xf0] }
 0x2a0   :  { %v8113_v16 = vld [vmem:[%s16134_s1 + $0xb48] sm:$0xf] }
 0x2a4   :  { %5586 = vmatpush.bf16.xpose.msra.mxu0 %v7786_v39  ;;  %v10176_v39 = vld [vmem:[%s16134_s1 + $0x6e8] sm:$0xf0] }
 0x2a5   :  { %5599 = vmatpush.bf16.xpose.msra.mxu1 %v7790_v42  ;;  %5612 = vmatpush.bf16.xpose.msra.mxu2 %v7794_v44  ;;  %v10339_v42 = vld [vmem:[%s16134_s1 + $0xc04] sm:$0xf]  ;;  %v8199_v44 = vld [vmem:[%s16134_s1 + $0xc64] sm:$0xf0]  ;;  %v7498_v63 = vor.u32 %v10176_v39, %v7497_v38 }
 0x2a6   :  { %5625 = vmatpush.bf16.xpose.msra.mxu3 %v7798_v50  ;;  %v7486_v50 = vor.u32 %v10162_v29, %v7483_v30  ;;  %v8202_v3 = vor.u32 %v10339_v42, %v8199_v44  ;;  %v7999_v29 = vld [vmem:[%s16134_s1 + $0xad4] sm:$0xf0]  ;;  %v10303_v38 = vld [vmem:[%s16134_s1 + $0xae0] sm:$0xf0]  ;;  %v8010_v44 = vor.u32 %v10290_v0, %v8007_v33 }
 0x2a7   :  { %v8005_v30 = vld [vmem:[%s16134_s1 + $0xa78] sm:$0xf] }
 0x2a8   :  { %v8006_v42 = vor.u32 %v10302_v32, %v8005_v30  ;;  %v7813_v30 = vld [vmem:[%s16134_s1 + $0x8f0] sm:$0xf]  ;;  %v10253_v32 = vld [vmem:[%s16134_s1 + $0x950] sm:$0xf0] }
 0x2ac   :  { %5587 = vmatpush.bf16.xpose.msra.mxu0 %v7686_v5  ;;  %v8206_v5 = vor.u32 %v10352_v51, %v8205_v49  ;;  %v8014_v49 = vor.u32 %v10303_v38, %v8013_v34 }
 0x2ad   :  { %5600 = vmatpush.bf16.xpose.msra.mxu1 %v7690_v13  ;;  %5613 = vmatpush.bf16.xpose.msra.mxu2 %v7694_v8  ;;  %v8210_v13 = vor.u32 %v10340_v37, %v8207_v54  ;;  %v8214_v8 = vor.u32 %v10353_v62, %v8213_v61  ;;  %v7905_v61 = vld [vmem:[%s16134_s1 + $0x9b0] sm:$0xf]  ;;  %v10265_v62 = vld [vmem:[%s16134_s1 + $0x9b4] sm:$0xf] }
 0x2ae   :  { %5626 = vmatpush.bf16.xpose.msra.mxu3 %v7698_v4  ;;  %v10314_v4 = vld [vmem:[%s16134_s1 + $0xb3c] sm:$0xf] }
 0x2af   :  { %v8102_v18 = vor.u32 %v10314_v4, %v8099_v10 }
 0x2b4   :  { %5588 = vmatpush.bf16.xpose.msra.mxu0 %v7586_v58  ;;  %v8106_v58 = vor.u32 %v10327_v14, %v8105_v11 }
 0x2b5   :  { %5601 = vmatpush.bf16.xpose.msra.mxu1 %v7590_v23  ;;  %5614 = vmatpush.bf16.xpose.msra.mxu2 %v7594_v24  ;;  %v8110_v23 = vor.u32 %v10315_v47, %v8107_v15  ;;  %v8114_v24 = vor.u32 %v10328_v17, %v8113_v16 }
 0x2b6   :  { %5627 = vmatpush.bf16.xpose.msra.mxu3 %v7598_v28  ;;  %v10289_v28 = vld [vmem:[%s16134_s1 + $0xa74] sm:$0xf] }
 0x2b7   :  { %v8002_v39 = vor.u32 %v10289_v28, %v7999_v29  ;;  %v10240_v28 = vld [vmem:[%s16134_s1 + $0x8ec] sm:$0xf]  ;;  %v7807_v29 = vld [vmem:[%s16134_s1 + $0x94c] sm:$0xf0] }
 0x2b8   :  { %v7810_v34 = vor.u32 %v10240_v28, %v7807_v29  ;;  %v10177_v28 = vld [vmem:[%s16134_s1 + $0x6f0] sm:$0xf0]  ;;  %v8221_v29 = vld [vmem:[%s16134_s1 + $0xc18] sm:$0xf] }
 0x2bc   :  { %5589 = vmatpush.bf16.xpose.msra.mxu0 %v7486_v50 }
 0x2bd   :  { %5602 = vmatpush.bf16.xpose.msra.mxu1 %v7490_v57  ;;  %5615 = vmatpush.bf16.xpose.msra.mxu2 %v7494_v59  ;;  %v10264_v57 = vld [vmem:[%s16134_s1 + $0x9ac] sm:$0xf]  ;;  %v7899_v59 = vld [vmem:[%s16134_s1 + $0xa0c] sm:$0xf0] }
 0x2be   :  { %5628 = vmatpush.bf16.xpose.msra.mxu3 %v7498_v63  ;;  %v7907_v63 = vld [vmem:[%s16134_s1 + $0xa14] sm:$0xf0] }
 0x2bf   :  { %v7910_v10 = vor.u32 %v10265_v62, %v7907_v63 }
 0x2c0   :  { %v5487_v50 = vpop.f32.mrf.mxu0 }
 0x2c1   :  { %v5488_v51 = vadd.f32 %v5487_v50, %v13004_v25  ;;  %v10277_v25 = vld [vmem:[%s16134_s1 + $0xa10] sm:$0xf0]  ;;  %v7705_v50 = vld [vmem:[%s16134_s1 + $0x820] sm:$0xf] }
 0x2c2   :  { %v7906_v4 = vor.u32 %v10277_v25, %v7905_v61 }
 0x2c3   :  { %5590 = vmatmul.bf16.vlgmr.msra.gmra.mxu0 %v11702_v52  ;;  %v5500_v37 = vpop.f32.mrf.mxu1 }
 0x2c4   :  { %5634 = vmatpush.bf16.xpose.msrb.mxu0 %v8202_v3  ;;  %5616 = vmatmul.bf16.vlgmr.msra.gmra.mxu2 %v11904_v7  ;;  %v5501_v54 = vadd.f32 %v5500_v37, %v5488_v51  ;;  %v7913_v3 = vld [vmem:[%s16134_s1 + $0x9b8] sm:$0xf]  ;;  %v10227_v51 = vld [vmem:[%s16134_s1 + $0x880] sm:$0xf0] }
 0x2c5   :  { %5647 = vmatpush.bf16.xpose.msrb.mxu1 %v8206_v5  ;;  %5660 = vmatpush.bf16.xpose.msrb.mxu2 %v8210_v13  ;;  %v10278_v5 = vld [vmem:[%s16134_s1 + $0xa18] sm:$0xf0]  ;;  %v7902_v13 = vor.u32 %v10264_v57, %v7899_v59  ;;  %v10215_v37 = vld [vmem:[%s16134_s1 + $0x824] sm:$0xf]  ;;  %v7713_v57 = vld [vmem:[%s16134_s1 + $0x828] sm:$0xf]  ;;  %v7706_v25 = vor.u32 %v10227_v51, %v7705_v50 }
 0x2c6   :  { %5673 = vmatpush.bf16.xpose.msrb.mxu3 %v8214_v8  ;;  %5603 = vmatmul.bf16.vlgmr.msra.gmra.mxu1 %v11891_v2  ;;  %v7914_v14 = vor.u32 %v10278_v5, %v7913_v3  ;;  %v10228_v59 = vld [vmem:[%s16134_s1 + $0x888] sm:$0xf0]  ;;  %v10189_v3 = vld [vmem:[%s16134_s1 + $0x754] sm:$0xf]  ;;  %v7599_v5 = vld [vmem:[%s16134_s1 + $0x7b4] sm:$0xf0] }
 0x2c7   :  { %5629 = vmatmul.bf16.vlgmr.msra.gmra.mxu3 %v11902_v6  ;;  %v5513_v8 = vpop.f32.mrf.mxu2  ;;  %v7714_v63 = vor.u32 %v10228_v59, %v7713_v57  ;;  %v10542_v50 = vld [vmem:[%s16134_s1 + $0x1258] sm:$0xf0]  ;;  %v8927_v57 = vld [vmem:[%s16134_s1 + $0x125c] sm:$0xf0] }
 0x2c8   :  { %v5514_v11 = vadd.f32 %v5513_v8, %v5501_v54  ;;  %v5489_v15 = vpop.f32.mrf.mxu0  ;;  %v7707_v54 = vld [vmem:[%s16134_s1 + $0x884] sm:$0xf0]  ;;  %v10202_v8 = vld [vmem:[%s16134_s1 + $0x7b8] sm:$0xf0] }
 0x2c9   :  { %v7710_v62 = vor.u32 %v10215_v37, %v7707_v54  ;;  %v10530_v54 = vld [vmem:[%s16134_s1 + $0x11fc] sm:$0xf] }
 0x2ca   :  { %v5526_v47 = vpop.f32.mrf.mxu3 }
 0x2cb   :  { %v5502_v16 = vpop.f32.mrf.mxu1  ;;  %v13203_v17 = vadd.f32 %v5526_v47, %v5514_v11  ;;  %v7613_v11 = vld [vmem:[%s16134_s1 + $0x760] sm:$0xf]  ;;  %v7602_v47 = vor.u32 %v10189_v3, %v7599_v5  ;;  %v8121_v3 = vld [vmem:[%s16134_s1 + $0xb50] sm:$0xf]  ;;  %v10329_v5 = vld [vmem:[%s16134_s1 + $0xbb0] sm:$0xf0] }
 0x2cc   :  { %5635 = vmatpush.bf16.xpose.msrb.mxu0 %v8102_v18  ;;  %v10239_v18 = vld [vmem:[%s16134_s1 + $0x8e4] sm:$0xf] }
 0x2cd   :  { %5648 = vmatpush.bf16.xpose.msrb.mxu1 %v8106_v58  ;;  %5661 = vmatpush.bf16.xpose.msrb.mxu2 %v8110_v23  ;;  %v7799_v58 = vld [vmem:[%s16134_s1 + $0x944] sm:$0xf0] }
 0x2ce   :  { %5674 = vmatpush.bf16.xpose.msrb.mxu3 %v8114_v24  ;;  %v7805_v23 = vld [vmem:[%s16134_s1 + $0x8e8] sm:$0xf]  ;;  %v10252_v24 = vld [vmem:[%s16134_s1 + $0x948] sm:$0xf0]  ;;  %v7802_v0 = vor.u32 %v10239_v18, %v7799_v58 }
 0x2cf   :  { %v7806_v33 = vor.u32 %v10252_v24, %v7805_v23  ;;  %v5515_v38 = vpop.f32.mrf.mxu2  ;;  %v10164_v58 = vld [vmem:[%s16134_s1 + $0x68c] sm:$0xf]  ;;  %v7499_v23 = vld [vmem:[%s16134_s1 + $0x6ec] sm:$0xf0] }
 0x2d0   :  { %v7505_v24 = vld [vmem:[%s16134_s1 + $0x690] sm:$0xf]  ;;  %v10341_v38 = vld [vmem:[%s16134_s1 + $0xc14] sm:$0xf] }
 0x2d1   :  { %v7506_v51 = vor.u32 %v10177_v28, %v7505_v24  ;;  %v10304_v24 = vld [vmem:[%s16134_s1 + $0xae8] sm:$0xf0]  ;;  %v10291_v28 = vld [vmem:[%s16134_s1 + $0xa84] sm:$0xf] }
 0x2d4   :  { %5636 = vmatpush.bf16.xpose.msrb.mxu0 %v8002_v39  ;;  %v7814_v39 = vor.u32 %v10253_v32, %v7813_v30  ;;  %v10354_v30 = vld [vmem:[%s16134_s1 + $0xc78] sm:$0xf0]  ;;  %v10165_v32 = vld [vmem:[%s16134_s1 + $0x694] sm:$0xf] }
 0x2d5   :  { %5649 = vmatpush.bf16.xpose.msrb.mxu1 %v8006_v42  ;;  %5662 = vmatpush.bf16.xpose.msrb.mxu2 %v8010_v44  ;;  %v5528_v42 = vpop.f32.mrf.mxu3  ;;  %v10214_v44 = vld [vmem:[%s16134_s1 + $0x81c] sm:$0xf] }
 0x2d6   :  { %5675 = vmatpush.bf16.xpose.msrb.mxu3 %v8014_v49  ;;  %v7699_v49 = vld [vmem:[%s16134_s1 + $0x87c] sm:$0xf0]  ;;  %v7502_v42 = vor.u32 %v10164_v58, %v7499_v23  ;;  %v8021_v23 = vld [vmem:[%s16134_s1 + $0xa88] sm:$0xf] }
 0x2d7   :  { %v7702_v61 = vor.u32 %v10214_v44, %v7699_v49  ;;  %v8222_v44 = vor.u32 %v10354_v30, %v8221_v29  ;;  %v8925_v49 = vld [vmem:[%s16134_s1 + $0x11f8] sm:$0xf]  ;;  %v8015_v29 = vld [vmem:[%s16134_s1 + $0xae4] sm:$0xf0]  ;;  %v8022_v30 = vor.u32 %v10304_v24, %v8021_v23  ;;  %v10241_v23 = vld [vmem:[%s16134_s1 + $0x8f4] sm:$0xf] }
 0x2d8   :  { %v7815_v24 = vld [vmem:[%s16134_s1 + $0x954] sm:$0xf0] }
 0x2dc   :  { %5637 = vmatpush.bf16.xpose.msrb.mxu0 %v7902_v13  ;;  %v7605_v13 = vld [vmem:[%s16134_s1 + $0x758] sm:$0xf] }
 0x2dd   :  { %5650 = vmatpush.bf16.xpose.msrb.mxu1 %v7906_v4  ;;  %5663 = vmatpush.bf16.xpose.msrb.mxu2 %v7910_v10  ;;  %v10190_v4 = vld [vmem:[%s16134_s1 + $0x75c] sm:$0xf]  ;;  %v7607_v10 = vld [vmem:[%s16134_s1 + $0x7bc] sm:$0xf0]  ;;  %v7606_v15 = vor.u32 %v10202_v8, %v7605_v13  ;;  %v10316_v13 = vld [vmem:[%s16134_s1 + $0xb4c] sm:$0xf] }
 0x2de   :  { %5676 = vmatpush.bf16.xpose.msrb.mxu3 %v7914_v14  ;;  %v10203_v14 = vld [vmem:[%s16134_s1 + $0x7c0] sm:$0xf0]  ;;  %v7610_v16 = vor.u32 %v10190_v4, %v7607_v10  ;;  %v8115_v8 = vld [vmem:[%s16134_s1 + $0xbac] sm:$0xf0]  ;;  %v8122_v4 = vor.u32 %v10329_v5, %v8121_v3  ;;  %v8627_v3 = vld [vmem:[%s16134_s1 + $0x1004] sm:$0xf0] }
 0x2df   :  { %v7614_v18 = vor.u32 %v10203_v14, %v7613_v11  ;;  %v8825_v10 = vld [vmem:[%s16134_s1 + $0x1130] sm:$0xf]  ;;  %v10517_v11 = vld [vmem:[%s16134_s1 + $0x1190] sm:$0xf0] }
 0x2e0   :  { %v10505_v14 = vld [vmem:[%s16134_s1 + $0x1134] sm:$0xf] }
 0x2e4   :  { %5638 = vmatpush.bf16.xpose.msrb.mxu0 %v7802_v0  ;;  %v7507_v0 = vld [vmem:[%s16134_s1 + $0x6f4] sm:$0xf0] }
 0x2e5   :  { %5651 = vmatpush.bf16.xpose.msrb.mxu1 %v7806_v33  ;;  %5664 = vmatpush.bf16.xpose.msrb.mxu2 %v7810_v34  ;;  %v7513_v33 = vld [vmem:[%s16134_s1 + $0x698] sm:$0xf]  ;;  %v10178_v34 = vld [vmem:[%s16134_s1 + $0x6f8] sm:$0xf0]  ;;  %v7510_v37 = vor.u32 %v10165_v32, %v7507_v0  ;;  %v8725_v32 = vld [vmem:[%s16134_s1 + $0x1068] sm:$0xf] }
 0x2e6   :  { %5677 = vmatpush.bf16.xpose.msrb.mxu3 %v7814_v39  ;;  %v8215_v39 = vld [vmem:[%s16134_s1 + $0xc74] sm:$0xf0]  ;;  %v7514_v59 = vor.u32 %v10178_v34, %v7513_v33  ;;  %v10492_v0 = vld [vmem:[%s16134_s1 + $0x10c8] sm:$0xf0]  ;;  %v8727_v34 = vld [vmem:[%s16134_s1 + $0x10cc] sm:$0xf0] }
 0x2e7   :  { %v10480_v33 = vld [vmem:[%s16134_s1 + $0x106c] sm:$0xf] }
 0x2ec   :  { %5639 = vmatpush.bf16.xpose.msrb.mxu0 %v7702_v61  ;;  %v8218_v61 = vor.u32 %v10341_v38, %v8215_v39  ;;  %v8018_v38 = vor.u32 %v10291_v28, %v8015_v29  ;;  %v8726_v39 = vor.u32 %v10492_v0, %v8725_v32  ;;  %v8525_v29 = vld [vmem:[%s16134_s1 + $0xed8] sm:$0xf]  ;;  %v10430_v32 = vld [vmem:[%s16134_s1 + $0xedc] sm:$0xf]  ;;  %v8527_v0 = vld [vmem:[%s16134_s1 + $0xf3c] sm:$0xf0] }
 0x2ed   :  { %5652 = vmatpush.bf16.xpose.msrb.mxu1 %v7706_v25  ;;  %5665 = vmatpush.bf16.xpose.msrb.mxu2 %v7710_v62  ;;  %v8926_v25 = vor.u32 %v10542_v50, %v8925_v49  ;;  %v5012_v62 = vsel %vm4962_vm0, %v8222_v44, 0  ;;  %v8730_v44 = vor.u32 %v10480_v33, %v8727_v34  ;;  %v7818_v33 = vor.u32 %v10241_v23, %v7815_v24 }
 0x2ee   :  { %5678 = vmatpush.bf16.xpose.msrb.mxu3 %v7714_v63  ;;  %v8930_v63 = vor.u32 %v10530_v54, %v8927_v57  ;;  %v10279_v54 = vld [vmem:[%s16134_s1 + $0xa20] sm:$0xf0] }
 0x2f4   :  { %5640 = vmatpush.bf16.xpose.msrb.mxu0 %v7602_v47  ;;  %v8827_v47 = vld [vmem:[%s16134_s1 + $0x1194] sm:$0xf0] }
 0x2f5   :  { %5653 = vmatpush.bf16.xpose.msrb.mxu1 %v7606_v15  ;;  %5666 = vmatpush.bf16.xpose.msrb.mxu2 %v7610_v16  ;;  %v8118_v15 = vor.u32 %v10316_v13, %v8115_v8  ;;  %v8826_v16 = vor.u32 %v10517_v11, %v8825_v10  ;;  %v8830_v58 = vor.u32 %v10505_v14, %v8827_v47 }
 0x2f6   :  { %5679 = vmatpush.bf16.xpose.msrb.mxu3 %v7614_v18  ;;  %v5009_v18 = vsel %vm4962_vm0, %v8122_v4, 0 }
 0x2fc   :  { %5641 = vmatpush.bf16.xpose.msrb.mxu0 %v7502_v42  ;;  %v5006_v42 = vsel %vm4962_vm0, %v8022_v30, 0  ;;  %v10442_v30 = vld [vmem:[%s16134_s1 + $0xf38] sm:$0xf0] }
 0x2fd   :  { %5654 = vmatpush.bf16.xpose.msrb.mxu1 %v7506_v51  ;;  %5667 = vmatpush.bf16.xpose.msrb.mxu2 %v7510_v37  ;;  %v7921_v37 = vld [vmem:[%s16134_s1 + $0x9c0] sm:$0xf]  ;;  %v8526_v34 = vor.u32 %v10442_v30, %v8525_v29  ;;  %v10179_v29 = vld [vmem:[%s16134_s1 + $0x700] sm:$0xf0]  ;;  %v10166_v30 = vld [vmem:[%s16134_s1 + $0x69c] sm:$0xf] }
 0x2fe   :  { %5680 = vmatpush.bf16.xpose.msrb.mxu3 %v7514_v59  ;;  %v10266_v59 = vld [vmem:[%s16134_s1 + $0x9bc] sm:$0xf] }
 0x300   :  { %v5539_v49 = vpop.f32.mrf.mxu0 }
 0x301   :  { %v5540_v50 = vadd.f32 %v5539_v49, %v13203_v17  ;;  %v7915_v17 = vld [vmem:[%s16134_s1 + $0xa1c] sm:$0xf0]  ;;  %v7721_v49 = vld [vmem:[%s16134_s1 + $0x830] sm:$0xf] }
 0x302   :  { %v7918_v5 = vor.u32 %v10266_v59, %v7915_v17  ;;  %v10417_v59 = vld [vmem:[%s16134_s1 + $0xe70] sm:$0xf0] }
 0x303   :  { %5642 = vmatmul.bf16.vlgmr.msrb.gmra.mxu0 %v11915_v12  ;;  %v5552_v51 = vpop.f32.mrf.mxu1  ;;  %v10405_v17 = vld [vmem:[%s16134_s1 + $0xe14] sm:$0xf] }
 0x304   :  { %5686 = vmatpush.bf16.xpose.msra.mxu0 %v8218_v61  ;;  %5668 = vmatmul.bf16.vlgmr.msrb.gmra.mxu2 %v12118_v56  ;;  %v5553_v57 = vadd.f32 %v5552_v51, %v5540_v50  ;;  %v7922_v61 = vor.u32 %v10279_v54, %v7921_v37  ;;  %v10229_v50 = vld [vmem:[%s16134_s1 + $0x890] sm:$0xf0]  ;;  %v10216_v51 = vld [vmem:[%s16134_s1 + $0x82c] sm:$0xf]  ;;  %v7715_v37 = vld [vmem:[%s16134_s1 + $0x88c] sm:$0xf0] }
 0x305   :  { %5699 = vmatpush.bf16.xpose.msra.mxu1 %v5012_v62  ;;  %5712 = vmatpush.bf16.xpose.msra.mxu2 %v8926_v25  ;;  %v8625_v25 = vld [vmem:[%s16134_s1 + $0xfa0] sm:$0xf]  ;;  %v10467_v62 = vld [vmem:[%s16134_s1 + $0x1000] sm:$0xf0]  ;;  %v7722_v54 = vor.u32 %v10229_v50, %v7721_v49 }
 0x306   :  { %5725 = vmatpush.bf16.xpose.msra.mxu3 %v8930_v63  ;;  %5655 = vmatmul.bf16.vlgmr.msrb.gmra.mxu1 %v12111_v53  ;;  %v10455_v63 = vld [vmem:[%s16134_s1 + $0xfa4] sm:$0xf]  ;;  %v8626_v8 = vor.u32 %v10467_v62, %v8625_v25  ;;  %v5003_v10 = vsel %vm4962_vm0, %v7922_v61, 0  ;;  %v8427_v61 = vld [vmem:[%s16134_s1 + $0xe74] sm:$0xf0]  ;;  %v7718_v25 = vor.u32 %v10216_v51, %v7715_v37 }
 0x307   :  { %5681 = vmatmul.bf16.vlgmr.msrb.gmra.mxu3 %v12116_v55  ;;  %v5565_v13 = vpop.f32.mrf.mxu2  ;;  %v8630_v11 = vor.u32 %v10455_v63, %v8627_v3  ;;  %v4997_v63 = vsel %vm4962_vm0, %v7722_v54, 0  ;;  %v8430_v3 = vor.u32 %v10405_v17, %v8427_v61  ;;  %v10531_v49 = vld [vmem:[%s16134_s1 + $0x1204] sm:$0xf]  ;;  %v8935_v51 = vld [vmem:[%s16134_s1 + $0x1264] sm:$0xf0] }
 0x308   :  { %v5566_v4 = vadd.f32 %v5565_v13, %v5553_v57  ;;  %v5541_v47 = vpop.f32.mrf.mxu0  ;;  %v8425_v57 = vld [vmem:[%s16134_s1 + $0xe10] sm:$0xf]  ;;  %v10204_v13 = vld [vmem:[%s16134_s1 + $0x7c8] sm:$0xf0]  ;;  %v8941_v37 = vld [vmem:[%s16134_s1 + $0x1208] sm:$0xf] }
 0x309   :  { %v8426_v62 = vor.u32 %v10417_v59, %v8425_v57  ;;  %v10380_v47 = vld [vmem:[%s16134_s1 + $0xd4c] sm:$0xf]  ;;  %v8943_v17 = vld [vmem:[%s16134_s1 + $0x126c] sm:$0xf0] }
 0x30a   :  { %v5578_v14 = vpop.f32.mrf.mxu3  ;;  %v10544_v54 = vld [vmem:[%s16134_s1 + $0x1268] sm:$0xf0] }
 0x30b   :  { %v10532_v59 = vld [vmem:[%s16134_s1 + $0x120c] sm:$0xf] }
 0x30c   :  { %5687 = vmatpush.bf16.xpose.msra.mxu0 %v8118_v15  ;;  %v7821_v15 = vld [vmem:[%s16134_s1 + $0x8f8] sm:$0xf] }
 0x30d   :  { %5700 = vmatpush.bf16.xpose.msra.mxu1 %v5009_v18  ;;  %5713 = vmatpush.bf16.xpose.msra.mxu2 %v8826_v16  ;;  %v10254_v16 = vld [vmem:[%s16134_s1 + $0x958] sm:$0xf0]  ;;  %v5554_v18 = vpop.f32.mrf.mxu1 }
 0x30e   :  { %5726 = vmatpush.bf16.xpose.msra.mxu3 %v8830_v58  ;;  %v13412_v58 = vadd.f32 %v5578_v14, %v5566_v4  ;;  %v7822_v28 = vor.u32 %v10254_v16, %v7821_v15  ;;  %v7615_v4 = vld [vmem:[%s16134_s1 + $0x7c4] sm:$0xf0]  ;;  %v10392_v14 = vld [vmem:[%s16134_s1 + $0xda8] sm:$0xf0]  ;;  %v8327_v15 = vld [vmem:[%s16134_s1 + $0xdac] sm:$0xf0] }
 0x30f   :  { %v8330_v24 = vor.u32 %v10380_v47, %v8327_v15  ;;  %v10507_v47 = vld [vmem:[%s16134_s1 + $0x1144] sm:$0xf]  ;;  %v8843_v15 = vld [vmem:[%s16134_s1 + $0x11a4] sm:$0xf0] }
 0x314   :  { %5688 = vmatpush.bf16.xpose.msra.mxu0 %v8018_v38  ;;  %v5567_v38 = vpop.f32.mrf.mxu2 }
 0x315   :  { %5701 = vmatpush.bf16.xpose.msra.mxu1 %v5006_v42  ;;  %5714 = vmatpush.bf16.xpose.msra.mxu2 %v8726_v39  ;;  %v5000_v39 = vsel %vm4962_vm0, %v7822_v28, 0  ;;  %v8530_v42 = vor.u32 %v10430_v32, %v8527_v0  ;;  %v7521_v28 = vld [vmem:[%s16134_s1 + $0x6a0] sm:$0xf]  ;;  %v10355_v38 = vld [vmem:[%s16134_s1 + $0xc84] sm:$0xf] }
 0x316   :  { %5727 = vmatpush.bf16.xpose.msra.mxu3 %v8730_v44  ;;  %v5580_v44 = vpop.f32.mrf.mxu3  ;;  %v7515_v32 = vld [vmem:[%s16134_s1 + $0x6fc] sm:$0xf0] }
 0x317   :  { %v8225_v0 = vld [vmem:[%s16134_s1 + $0xc80] sm:$0xf]  ;;  %v10543_v44 = vld [vmem:[%s16134_s1 + $0x1260] sm:$0xf0]  ;;  %v7518_v50 = vor.u32 %v10166_v30, %v7515_v32  ;;  %v10481_v30 = vld [vmem:[%s16134_s1 + $0x1074] sm:$0xf] }
 0x318   :  { %v8735_v32 = vld [vmem:[%s16134_s1 + $0x10d4] sm:$0xf0] }
 0x31c   :  { %5689 = vmatpush.bf16.xpose.msra.mxu0 %v7918_v5  ;;  %v7621_v5 = vld [vmem:[%s16134_s1 + $0x768] sm:$0xf] }
 0x31d   :  { %5702 = vmatpush.bf16.xpose.msra.mxu1 %v5003_v10  ;;  %5715 = vmatpush.bf16.xpose.msra.mxu2 %v8626_v8  ;;  %v10191_v8 = vld [vmem:[%s16134_s1 + $0x764] sm:$0xf]  ;;  %v7622_v10 = vor.u32 %v10204_v13, %v7621_v5  ;;  %v8946_v5 = vor.u32 %v10532_v59, %v8943_v17  ;;  %v8833_v13 = vld [vmem:[%s16134_s1 + $0x1138] sm:$0xf]  ;;  %v10468_v59 = vld [vmem:[%s16134_s1 + $0x1008] sm:$0xf0] }
 0x31e   :  { %5728 = vmatpush.bf16.xpose.msra.mxu3 %v8630_v11  ;;  %v8325_v11 = vld [vmem:[%s16134_s1 + $0xd48] sm:$0xf]  ;;  %v7618_v16 = vor.u32 %v10191_v8, %v7615_v4  ;;  %v10518_v8 = vld [vmem:[%s16134_s1 + $0x1198] sm:$0xf0]  ;;  %v10456_v17 = vld [vmem:[%s16134_s1 + $0xfac] sm:$0xf] }
 0x31f   :  { %v8326_v18 = vor.u32 %v10392_v14, %v8325_v11  ;;  %v4994_v23 = vsel %vm4962_vm0, %v7622_v10, 0  ;;  %v10506_v4 = vld [vmem:[%s16134_s1 + $0x113c] sm:$0xf]  ;;  %v8835_v10 = vld [vmem:[%s16134_s1 + $0x119c] sm:$0xf0] }
 0x320   :  { %v8841_v11 = vld [vmem:[%s16134_s1 + $0x1140] sm:$0xf]  ;;  %v10519_v14 = vld [vmem:[%s16134_s1 + $0x11a0] sm:$0xf0] }
 0x324   :  { %5690 = vmatpush.bf16.xpose.msra.mxu0 %v7818_v33  ;;  %v7522_v33 = vor.u32 %v10179_v29, %v7521_v28  ;;  %v8733_v28 = vld [vmem:[%s16134_s1 + $0x1070] sm:$0xf]  ;;  %v10493_v29 = vld [vmem:[%s16134_s1 + $0x10d0] sm:$0xf0] }
 0x325   :  { %5703 = vmatpush.bf16.xpose.msra.mxu1 %v5000_v39  ;;  %5716 = vmatpush.bf16.xpose.msra.mxu2 %v8526_v34  ;;  %v10367_v34 = vld [vmem:[%s16134_s1 + $0xce0] sm:$0xf0]  ;;  %v8227_v39 = vld [vmem:[%s16134_s1 + $0xce4] sm:$0xf0] }
 0x326   :  { %5729 = vmatpush.bf16.xpose.msra.mxu3 %v8530_v42  ;;  %v8933_v42 = vld [vmem:[%s16134_s1 + $0x1200] sm:$0xf]  ;;  %v8226_v57 = vor.u32 %v10367_v34, %v8225_v0  ;;  %v4991_v61 = vsel %vm4962_vm0, %v7522_v33, 0  ;;  %v8741_v0 = vld [vmem:[%s16134_s1 + $0x1078] sm:$0xf] }
 0x327   :  { %v10494_v33 = vld [vmem:[%s16134_s1 + $0x10d8] sm:$0xf0] }
 0x328   :  { %v10482_v34 = vld [vmem:[%s16134_s1 + $0x107c] sm:$0xf] }
 0x32c   :  { %5691 = vmatpush.bf16.xpose.msra.mxu0 %v7718_v25  ;;  %v8230_v25 = vor.u32 %v10355_v38, %v8227_v39  ;;  %v8743_v38 = vld [vmem:[%s16134_s1 + $0x10dc] sm:$0xf0]  ;;  %v8734_v39 = vor.u32 %v10493_v29, %v8733_v28  ;;  %v8541_v28 = vld [vmem:[%s16134_s1 + $0xee8] sm:$0xf]  ;;  %v10444_v29 = vld [vmem:[%s16134_s1 + $0xf48] sm:$0xf0] }
 0x32d   :  { %5704 = vmatpush.bf16.xpose.msra.mxu1 %v4997_v63  ;;  %5717 = vmatpush.bf16.xpose.msra.mxu2 %v8426_v62  ;;  %v8934_v62 = vor.u32 %v10543_v44, %v8933_v42  ;;  %v8938_v63 = vor.u32 %v10531_v49, %v8935_v51  ;;  %v8738_v42 = vor.u32 %v10481_v30, %v8735_v32  ;;  %v10432_v30 = vld [vmem:[%s16134_s1 + $0xeec] sm:$0xf]  ;;  %v8543_v32 = vld [vmem:[%s16134_s1 + $0xf4c] sm:$0xf0] }
 0x32e   :  { %5730 = vmatpush.bf16.xpose.msra.mxu3 %v8430_v3  ;;  %v8942_v3 = vor.u32 %v10544_v54, %v8941_v37  ;;  %v8742_v44 = vor.u32 %v10494_v33, %v8741_v0  ;;  %v8746_v49 = vor.u32 %v10482_v34, %v8743_v38  ;;  %v8542_v34 = vor.u32 %v10444_v29, %v8541_v28  ;;  %v8235_v28 = vld [vmem:[%s16134_s1 + $0xcec] sm:$0xf0] }
 0x32f   :  { %v8241_v29 = vld [vmem:[%s16134_s1 + $0xc90] sm:$0xf] }
 0x334   :  { %5692 = vmatpush.bf16.xpose.msra.mxu0 %v7618_v16  ;;  %v8834_v16 = vor.u32 %v10518_v8, %v8833_v13 }
 0x335   :  { %5705 = vmatpush.bf16.xpose.msra.mxu1 %v4994_v23  ;;  %5718 = vmatpush.bf16.xpose.msra.mxu2 %v8326_v18  ;;  %v8838_v18 = vor.u32 %v10506_v4, %v8835_v10  ;;  %v8842_v23 = vor.u32 %v10519_v14, %v8841_v11 }
 0x336   :  { %5731 = vmatpush.bf16.xpose.msra.mxu3 %v8330_v24  ;;  %v8846_v24 = vor.u32 %v10507_v47, %v8843_v15 }
 0x33c   :  { %5693 = vmatpush.bf16.xpose.msra.mxu0 %v7518_v50 }
 0x33d   :  { %5706 = vmatpush.bf16.xpose.msra.mxu1 %v4991_v61  ;;  %5719 = vmatpush.bf16.xpose.msra.mxu2 %v8226_v57  ;;  %v8633_v57 = vld [vmem:[%s16134_s1 + $0xfa8] sm:$0xf]  ;;  %v8641_v61 = vld [vmem:[%s16134_s1 + $0xfb0] sm:$0xf] }
 0x33e   :  { %5732 = vmatpush.bf16.xpose.msra.mxu3 %v8230_v25  ;;  %v10469_v25 = vld [vmem:[%s16134_s1 + $0x1010] sm:$0xf0] }
 0x33f   :  { %v8642_v8 = vor.u32 %v10469_v25, %v8641_v61 }
 0x340   :  { %v5591_v50 = vpop.f32.mrf.mxu0 }
 0x341   :  { %v5592_v51 = vadd.f32 %v5591_v50, %v13412_v58  ;;  %v8635_v58 = vld [vmem:[%s16134_s1 + $0x100c] sm:$0xf0]  ;;  %v10406_v50 = vld [vmem:[%s16134_s1 + $0xe1c] sm:$0xf] }
 0x342   :  { %v8638_v13 = vor.u32 %v10456_v17, %v8635_v58 }
 0x343   :  { %5694 = vmatmul.bf16.vlgmr.msra.gmra.mxu0 %v12129_v60  ;;  %v5604_v37 = vpop.f32.mrf.mxu1 }
 0x344   :  { %5738 = vmatpush.bf16.xpose.msrb.mxu0 %v8934_v62  ;;  %9824 = vmatmul.msk.bf16.vlgmr.msra.gmra.mxu1 %vm4962_vm0, %v12322_v45  ;;  %v5605_v54 = vadd.f32 %v5604_v37, %v5592_v51  ;;  %v10457_v62 = vld [vmem:[%s16134_s1 + $0xfb4] sm:$0xf]  ;;  %v8435_v51 = vld [vmem:[%s16134_s1 + $0xe7c] sm:$0xf0] }
 0x345   :  { %5751 = vmatpush.bf16.xpose.msrb.mxu1 %v8938_v63  ;;  %5764 = vmatpush.bf16.xpose.msrb.mxu2 %v8942_v3  ;;  %v8643_v63 = vld [vmem:[%s16134_s1 + $0x1014] sm:$0xf0]  ;;  %v8634_v3 = vor.u32 %v10468_v59, %v8633_v57  ;;  %v8441_v37 = vld [vmem:[%s16134_s1 + $0xe20] sm:$0xf]  ;;  %v10407_v57 = vld [vmem:[%s16134_s1 + $0xe24] sm:$0xf]  ;;  %v8438_v58 = vor.u32 %v10406_v50, %v8435_v51 }
 0x346   :  { %5777 = vmatpush.bf16.xpose.msrb.mxu3 %v8946_v5  ;;  %5720 = vmatmul.bf16.vlgmr.msra.gmra.mxu2 %v11120_v21  ;;  %v8646_v10 = vor.u32 %v10457_v62, %v8643_v63  ;;  %v8443_v59 = vld [vmem:[%s16134_s1 + $0xe84] sm:$0xf0]  ;;  %v8333_v62 = vld [vmem:[%s16134_s1 + $0xd50] sm:$0xf]  ;;  %v10393_v63 = vld [vmem:[%s16134_s1 + $0xdb0] sm:$0xf0] }
 0x347   :  { %5733 = vmatmul.bf16.vlgmr.msra.gmra.mxu3 %v11122_v22  ;;  %v5617_v5 = vpop.f32.mrf.mxu2  ;;  %v8446_v25 = vor.u32 %v10407_v57, %v8443_v59 }
 0x348   :  { %v5618_v4 = vadd.f32 %v5617_v5, %v5605_v54  ;;  %v5593_v14 = vpop.f32.mrf.mxu0  ;;  %v10419_v54 = vld [vmem:[%s16134_s1 + $0xe80] sm:$0xf0]  ;;  %v8335_v5 = vld [vmem:[%s16134_s1 + $0xdb4] sm:$0xf0] }
 0x349   :  { %v8442_v61 = vor.u32 %v10419_v54, %v8441_v37  ;;  %v10534_v37 = vld [vmem:[%s16134_s1 + $0x121c] sm:$0xf]  ;;  %v8959_v54 = vld [vmem:[%s16134_s1 + $0x127c] sm:$0xf0] }
 0x34a   :  { %v5630_v11 = vpop.f32.mrf.mxu3 }
 0x34b   :  { %v5606_v47 = vpop.f32.mrf.mxu1  ;;  %v13610_v15 = vadd.f32 %v5630_v11, %v5618_v4  ;;  %v10382_v4 = vld [vmem:[%s16134_s1 + $0xd5c] sm:$0xf]  ;;  %v8334_v11 = vor.u32 %v10393_v63, %v8333_v62  ;;  %v10520_v62 = vld [vmem:[%s16134_s1 + $0x11a8] sm:$0xf0] }
 0x34c   :  { %5739 = vmatpush.bf16.xpose.msrb.mxu0 %v8834_v16  ;;  %v8533_v16 = vld [vmem:[%s16134_s1 + $0xee0] sm:$0xf]  ;;  %v10508_v63 = vld [vmem:[%s16134_s1 + $0x114c] sm:$0xf] }
 0x34d   :  { %5752 = vmatpush.bf16.xpose.msrb.mxu1 %v8838_v18  ;;  %5765 = vmatpush.bf16.xpose.msrb.mxu2 %v8842_v23  ;;  %v10443_v18 = vld [vmem:[%s16134_s1 + $0xf40] sm:$0xf0] }
 0x34e   :  { %5778 = vmatpush.bf16.xpose.msrb.mxu3 %v8846_v24  ;;  %v10431_v23 = vld [vmem:[%s16134_s1 + $0xee4] sm:$0xf]  ;;  %v8535_v24 = vld [vmem:[%s16134_s1 + $0xf44] sm:$0xf0]  ;;  %v8534_v0 = vor.u32 %v10443_v18, %v8533_v16 }
 0x34f   :  { %v8538_v33 = vor.u32 %v10431_v23, %v8535_v24  ;;  %v5619_v38 = vpop.f32.mrf.mxu2  ;;  %v8233_v18 = vld [vmem:[%s16134_s1 + $0xc88] sm:$0xf]  ;;  %v10368_v23 = vld [vmem:[%s16134_s1 + $0xce8] sm:$0xf0] }
 0x350   :  { %v10356_v24 = vld [vmem:[%s16134_s1 + $0xc8c] sm:$0xf]  ;;  %v10533_v38 = vld [vmem:[%s16134_s1 + $0x1214] sm:$0xf] }
 0x351   :  { %v8238_v50 = vor.u32 %v10356_v24, %v8235_v28  ;;  %v8751_v24 = vld [vmem:[%s16134_s1 + $0x10e4] sm:$0xf0] }
 0x352   :  { %v8757_v28 = vld [vmem:[%s16134_s1 + $0x1088] sm:$0xf] }
 0x354   :  { %5740 = vmatpush.bf16.xpose.msrb.mxu0 %v8734_v39  ;;  %v8546_v39 = vor.u32 %v10432_v30, %v8543_v32  ;;  %v10369_v30 = vld [vmem:[%s16134_s1 + $0xcf0] sm:$0xf0] }
 0x355   :  { %5753 = vmatpush.bf16.xpose.msrb.mxu1 %v8738_v42  ;;  %5766 = vmatpush.bf16.xpose.msrb.mxu2 %v8742_v44  ;;  %v5632_v42 = vpop.f32.mrf.mxu3  ;;  %v8433_v44 = vld [vmem:[%s16134_s1 + $0xe18] sm:$0xf]  ;;  %v10357_v32 = vld [vmem:[%s16134_s1 + $0xc94] sm:$0xf]  ;;  %v8242_v51 = vor.u32 %v10369_v30, %v8241_v29  ;;  %v10496_v29 = vld [vmem:[%s16134_s1 + $0x10e8] sm:$0xf0] }
 0x356   :  { %5779 = vmatpush.bf16.xpose.msrb.mxu3 %v8746_v49  ;;  %v10418_v49 = vld [vmem:[%s16134_s1 + $0xe78] sm:$0xf0]  ;;  %v8951_v42 = vld [vmem:[%s16134_s1 + $0x1274] sm:$0xf0]  ;;  %v10484_v30 = vld [vmem:[%s16134_s1 + $0x108c] sm:$0xf] }
 0x357   :  { %v8434_v17 = vor.u32 %v10418_v49, %v8433_v44  ;;  %v8957_v44 = vld [vmem:[%s16134_s1 + $0x1218] sm:$0xf]  ;;  %v10546_v49 = vld [vmem:[%s16134_s1 + $0x1278] sm:$0xf0] }
 0x35c   :  { %5741 = vmatpush.bf16.xpose.msrb.mxu0 %v8634_v3  ;;  %v10381_v3 = vld [vmem:[%s16134_s1 + $0xd54] sm:$0xf] }
 0x35d   :  { %5754 = vmatpush.bf16.xpose.msrb.mxu1 %v8638_v13  ;;  %5767 = vmatpush.bf16.xpose.msrb.mxu2 %v8642_v8  ;;  %v8341_v13 = vld [vmem:[%s16134_s1 + $0xd58] sm:$0xf]  ;;  %v10394_v8 = vld [vmem:[%s16134_s1 + $0xdb8] sm:$0xf0]  ;;  %v8338_v14 = vor.u32 %v10381_v3, %v8335_v5  ;;  %v8851_v3 = vld [vmem:[%s16134_s1 + $0x11ac] sm:$0xf0] }
 0x35e   :  { %5780 = vmatpush.bf16.xpose.msrb.mxu3 %v8646_v10  ;;  %v8343_v10 = vld [vmem:[%s16134_s1 + $0xdbc] sm:$0xf0]  ;;  %v8342_v47 = vor.u32 %v10394_v8, %v8341_v13  ;;  %v8857_v5 = vld [vmem:[%s16134_s1 + $0x1150] sm:$0xf]  ;;  %v10521_v13 = vld [vmem:[%s16134_s1 + $0x11b0] sm:$0xf0] }
 0x35f   :  { %v8346_v16 = vor.u32 %v10382_v4, %v8343_v10  ;;  %v10509_v8 = vld [vmem:[%s16134_s1 + $0x1154] sm:$0xf]  ;;  %v8859_v4 = vld [vmem:[%s16134_s1 + $0x11b4] sm:$0xf0] }
 0x364   :  { %5742 = vmatpush.bf16.xpose.msrb.mxu0 %v8534_v0  ;;  %v8243_v0 = vld [vmem:[%s16134_s1 + $0xcf4] sm:$0xf0] }
 0x365   :  { %5755 = vmatpush.bf16.xpose.msrb.mxu1 %v8538_v33  ;;  %5768 = vmatpush.bf16.xpose.msrb.mxu2 %v8542_v34  ;;  %v8949_v33 = vld [vmem:[%s16134_s1 + $0x1210] sm:$0xf]  ;;  %v10545_v34 = vld [vmem:[%s16134_s1 + $0x1270] sm:$0xf0]  ;;  %v8246_v57 = vor.u32 %v10357_v32, %v8243_v0 }
 0x366   :  { %5781 = vmatpush.bf16.xpose.msrb.mxu3 %v8546_v39  ;;  %v8234_v39 = vor.u32 %v10368_v23, %v8233_v18  ;;  %v8950_v59 = vor.u32 %v10545_v34, %v8949_v33  ;;  %v10495_v18 = vld [vmem:[%s16134_s1 + $0x10e0] sm:$0xf0]  ;;  %v8759_v32 = vld [vmem:[%s16134_s1 + $0x10ec] sm:$0xf0]  ;;  %v8758_v34 = vor.u32 %v10496_v29, %v8757_v28 }
 0x367   :  { %v10483_v23 = vld [vmem:[%s16134_s1 + $0x1084] sm:$0xf] }
 0x368   :  { %v8754_v33 = vor.u32 %v10483_v23, %v8751_v24  ;;  %v10434_v23 = vld [vmem:[%s16134_s1 + $0xefc] sm:$0xf]  ;;  %v8559_v24 = vld [vmem:[%s16134_s1 + $0xf5c] sm:$0xf0] }
 0x36c   :  { %5743 = vmatpush.bf16.xpose.msrb.mxu0 %v8434_v17  ;;  %v8954_v17 = vor.u32 %v10533_v38, %v8951_v42  ;;  %v8762_v38 = vor.u32 %v10484_v30, %v8759_v32 }
 0x36d   :  { %5756 = vmatpush.bf16.xpose.msrb.mxu1 %v8438_v58  ;;  %5769 = vmatpush.bf16.xpose.msrb.mxu2 %v8442_v61  ;;  %v8958_v58 = vor.u32 %v10546_v49, %v8957_v44  ;;  %v8962_v61 = vor.u32 %v10534_v37, %v8959_v54  ;;  %v10458_v37 = vld [vmem:[%s16134_s1 + $0xfbc] sm:$0xf]  ;;  %v8657_v54 = vld [vmem:[%s16134_s1 + $0xfc0] sm:$0xf] }
 0x36e   :  { %5782 = vmatpush.bf16.xpose.msrb.mxu3 %v8446_v25  ;;  %v8849_v25 = vld [vmem:[%s16134_s1 + $0x1148] sm:$0xf] }
 0x36f   :  { %v8850_v10 = vor.u32 %v10520_v62, %v8849_v25 }
 0x374   :  { %5744 = vmatpush.bf16.xpose.msrb.mxu0 %v8334_v11  ;;  %v8854_v11 = vor.u32 %v10508_v63, %v8851_v3 }
 0x375   :  { %5757 = vmatpush.bf16.xpose.msrb.mxu1 %v8338_v14  ;;  %5770 = vmatpush.bf16.xpose.msrb.mxu2 %v8342_v47  ;;  %v8858_v14 = vor.u32 %v10521_v13, %v8857_v5  ;;  %v8862_v47 = vor.u32 %v10509_v8, %v8859_v4 }
 0x376   :  { %5783 = vmatpush.bf16.xpose.msrb.mxu3 %v8346_v16  ;;  %v8749_v16 = vld [vmem:[%s16134_s1 + $0x1080] sm:$0xf] }
 0x377   :  { %v8750_v0 = vor.u32 %v10495_v18, %v8749_v16  ;;  %v8557_v16 = vld [vmem:[%s16134_s1 + $0xef8] sm:$0xf]  ;;  %v10446_v18 = vld [vmem:[%s16134_s1 + $0xf58] sm:$0xf0] }
 0x378   :  { %v8558_v30 = vor.u32 %v10446_v18, %v8557_v16  ;;  %v8251_v16 = vld [vmem:[%s16134_s1 + $0xcfc] sm:$0xf0] }
 0x379   :  { %v8257_v18 = vld [vmem:[%s16134_s1 + $0xca0] sm:$0xf] }
 0x37c   :  { %5745 = vmatpush.bf16.xpose.msrb.mxu0 %v8234_v39 }
 0x37d   :  { %5758 = vmatpush.bf16.xpose.msrb.mxu1 %v8238_v50  ;;  %5771 = vmatpush.bf16.xpose.msrb.mxu2 %v8242_v51  ;;  %v8649_v50 = vld [vmem:[%s16134_s1 + $0xfb8] sm:$0xf]  ;;  %v10470_v51 = vld [vmem:[%s16134_s1 + $0x1018] sm:$0xf0] }
 0x37e   :  { %5784 = vmatpush.bf16.xpose.msrb.mxu3 %v8246_v57  ;;  %v10471_v57 = vld [vmem:[%s16134_s1 + $0x1020] sm:$0xf0] }
 0x37f   :  { %v8658_v62 = vor.u32 %v10471_v57, %v8657_v54 }
 0x380   :  { %v5643_v39 = vpop.f32.mrf.mxu0 }
 0x381   :  { %v5644_v42 = vadd.f32 %v5643_v39, %v13610_v15  ;;  %v8651_v15 = vld [vmem:[%s16134_s1 + $0x101c] sm:$0xf0]  ;;  %v10408_v39 = vld [vmem:[%s16134_s1 + $0xe2c] sm:$0xf] }
 0x382   :  { %v8654_v25 = vor.u32 %v10458_v37, %v8651_v15 }
 0x383   :  { %5746 = vmatmul.bf16.vlgmr.msrb.gmra.mxu0 %v11097_v9  ;;  %v5656_v44 = vpop.f32.mrf.mxu1 }
 0x384   :  { %5790 = vmatpush.bf16.xpose.msra.mxu0 %v8950_v59  ;;  %5772 = vmatmul.bf16.vlgmr.msrb.gmra.mxu2 %v11262_v35  ;;  %v5657_v49 = vadd.f32 %v5656_v44, %v5644_v42  ;;  %v10459_v59 = vld [vmem:[%s16134_s1 + $0xfc4] sm:$0xf]  ;;  %v8451_v42 = vld [vmem:[%s16134_s1 + $0xe8c] sm:$0xf0] }
 0x385   :  { %5803 = vmatpush.bf16.xpose.msra.mxu1 %v8954_v17  ;;  %5816 = vmatpush.bf16.xpose.msra.mxu2 %v8958_v58  ;;  %v8659_v17 = vld [vmem:[%s16134_s1 + $0x1024] sm:$0xf0]  ;;  %v8650_v58 = vor.u32 %v10470_v51, %v8649_v50  ;;  %v8457_v44 = vld [vmem:[%s16134_s1 + $0xe30] sm:$0xf]  ;;  %v10409_v50 = vld [vmem:[%s16134_s1 + $0xe34] sm:$0xf]  ;;  %v8454_v15 = vor.u32 %v10408_v39, %v8451_v42 }
 0x386   :  { %5829 = vmatpush.bf16.xpose.msra.mxu3 %v8962_v61  ;;  %5759 = vmatmul.bf16.vlgmr.msrb.gmra.mxu1 %v11118_v19  ;;  %v8662_v3 = vor.u32 %v10459_v59, %v8659_v17  ;;  %v8459_v51 = vld [vmem:[%s16134_s1 + $0xe94] sm:$0xf0]  ;;  %v8349_v59 = vld [vmem:[%s16134_s1 + $0xd60] sm:$0xf]  ;;  %v10395_v17 = vld [vmem:[%s16134_s1 + $0xdc0] sm:$0xf0] }
 0x387   :  { %5785 = vmatmul.bf16.vlgmr.msrb.gmra.mxu3 %v11275_v40  ;;  %v5669_v61 = vpop.f32.mrf.mxu2  ;;  %v8462_v57 = vor.u32 %v10409_v50, %v8459_v51 }
 0x388   :  { %v5670_v63 = vadd.f32 %v5669_v61, %v5657_v49  ;;  %v5645_v13 = vpop.f32.mrf.mxu0  ;;  %v10421_v49 = vld [vmem:[%s16134_s1 + $0xe90] sm:$0xf0]  ;;  %v8351_v61 = vld [vmem:[%s16134_s1 + $0xdc4] sm:$0xf0] }
 0x389   :  { %v8458_v54 = vor.u32 %v10421_v49, %v8457_v44  ;;  %v10536_v44 = vld [vmem:[%s16134_s1 + $0x122c] sm:$0xf]  ;;  %v8975_v49 = vld [vmem:[%s16134_s1 + $0x128c] sm:$0xf0] }
 0x38a   :  { %v5682_v5 = vpop.f32.mrf.mxu3 }
 0x38b   :  { %v5658_v8 = vpop.f32.mrf.mxu1  ;;  %v13809_v4 = vadd.f32 %v5682_v5, %v5670_v63  ;;  %v10384_v63 = vld [vmem:[%s16134_s1 + $0xd6c] sm:$0xf]  ;;  %v8350_v5 = vor.u32 %v10395_v17, %v8349_v59  ;;  %v10522_v59 = vld [vmem:[%s16134_s1 + $0x11b8] sm:$0xf0] }
 0x38c   :  { %5791 = vmatpush.bf16.xpose.msra.mxu0 %v8850_v10  ;;  %v8549_v10 = vld [vmem:[%s16134_s1 + $0xef0] sm:$0xf]  ;;  %v10510_v17 = vld [vmem:[%s16134_s1 + $0x115c] sm:$0xf] }
 0x38d   :  { %5804 = vmatpush.bf16.xpose.msra.mxu1 %v8854_v11  ;;  %5817 = vmatpush.bf16.xpose.msra.mxu2 %v8858_v14  ;;  %v10445_v11 = vld [vmem:[%s16134_s1 + $0xf50] sm:$0xf0] }
 0x38e   :  { %5830 = vmatpush.bf16.xpose.msra.mxu3 %v8862_v47  ;;  %v10433_v14 = vld [vmem:[%s16134_s1 + $0xef4] sm:$0xf]  ;;  %v8551_v47 = vld [vmem:[%s16134_s1 + $0xf54] sm:$0xf0]  ;;  %v8550_v28 = vor.u32 %v10445_v11, %v8549_v10 }
 0x38f   :  { %v8554_v29 = vor.u32 %v10433_v14, %v8551_v47  ;;  %v5671_v32 = vpop.f32.mrf.mxu2  ;;  %v8249_v11 = vld [vmem:[%s16134_s1 + $0xc98] sm:$0xf]  ;;  %v10370_v14 = vld [vmem:[%s16134_s1 + $0xcf8] sm:$0xf0] }
 0x390   :  { %v10358_v47 = vld [vmem:[%s16134_s1 + $0xc9c] sm:$0xf]  ;;  %v10535_v32 = vld [vmem:[%s16134_s1 + $0x1224] sm:$0xf] }
 0x391   :  { %v8254_v39 = vor.u32 %v10358_v47, %v8251_v16  ;;  %v8767_v47 = vld [vmem:[%s16134_s1 + $0x10f4] sm:$0xf0] }
 0x392   :  { %v8773_v16 = vld [vmem:[%s16134_s1 + $0x1098] sm:$0xf] }
 0x394   :  { %5792 = vmatpush.bf16.xpose.msra.mxu0 %v8750_v0  ;;  %v8562_v0 = vor.u32 %v10434_v23, %v8559_v24  ;;  %v10371_v23 = vld [vmem:[%s16134_s1 + $0xd00] sm:$0xf0] }
 0x395   :  { %5805 = vmatpush.bf16.xpose.msra.mxu1 %v8754_v33  ;;  %5818 = vmatpush.bf16.xpose.msra.mxu2 %v8758_v34  ;;  %v5684_v33 = vpop.f32.mrf.mxu3  ;;  %v8449_v34 = vld [vmem:[%s16134_s1 + $0xe28] sm:$0xf]  ;;  %v10359_v24 = vld [vmem:[%s16134_s1 + $0xca4] sm:$0xf]  ;;  %v8258_v42 = vor.u32 %v10371_v23, %v8257_v18  ;;  %v10498_v18 = vld [vmem:[%s16134_s1 + $0x10f8] sm:$0xf0] }
 0x396   :  { %5831 = vmatpush.bf16.xpose.msra.mxu3 %v8762_v38  ;;  %v10420_v38 = vld [vmem:[%s16134_s1 + $0xe88] sm:$0xf0]  ;;  %v8967_v33 = vld [vmem:[%s16134_s1 + $0x1284] sm:$0xf0]  ;;  %v10486_v23 = vld [vmem:[%s16134_s1 + $0x109c] sm:$0xf] }
 0x397   :  { %v8450_v37 = vor.u32 %v10420_v38, %v8449_v34  ;;  %v8973_v34 = vld [vmem:[%s16134_s1 + $0x1228] sm:$0xf]  ;;  %v10548_v38 = vld [vmem:[%s16134_s1 + $0x1288] sm:$0xf0] }
 0x39c   :  { %5793 = vmatpush.bf16.xpose.msra.mxu0 %v8650_v58  ;;  %v10383_v58 = vld [vmem:[%s16134_s1 + $0xd64] sm:$0xf] }
 0x39d   :  { %5806 = vmatpush.bf16.xpose.msra.mxu1 %v8654_v25  ;;  %5819 = vmatpush.bf16.xpose.msra.mxu2 %v8658_v62  ;;  %v8357_v25 = vld [vmem:[%s16134_s1 + $0xd68] sm:$0xf]  ;;  %v10396_v62 = vld [vmem:[%s16134_s1 + $0xdc8] sm:$0xf0]  ;;  %v8354_v13 = vor.u32 %v10383_v58, %v8351_v61  ;;  %v8867_v58 = vld [vmem:[%s16134_s1 + $0x11bc] sm:$0xf0] }
 0x39e   :  { %5832 = vmatpush.bf16.xpose.msra.mxu3 %v8662_v3  ;;  %v8359_v3 = vld [vmem:[%s16134_s1 + $0xdcc] sm:$0xf0]  ;;  %v8358_v8 = vor.u32 %v10396_v62, %v8357_v25  ;;  %v8873_v61 = vld [vmem:[%s16134_s1 + $0x1160] sm:$0xf]  ;;  %v10523_v25 = vld [vmem:[%s16134_s1 + $0x11c0] sm:$0xf0] }
 0x39f   :  { %v8362_v10 = vor.u32 %v10384_v63, %v8359_v3  ;;  %v10511_v62 = vld [vmem:[%s16134_s1 + $0x1164] sm:$0xf]  ;;  %v8875_v63 = vld [vmem:[%s16134_s1 + $0x11c4] sm:$0xf0] }
 0x3a4   :  { %5794 = vmatpush.bf16.xpose.msra.mxu0 %v8550_v28  ;;  %v8259_v28 = vld [vmem:[%s16134_s1 + $0xd04] sm:$0xf0] }
 0x3a5   :  { %5807 = vmatpush.bf16.xpose.msra.mxu1 %v8554_v29  ;;  %5820 = vmatpush.bf16.xpose.msra.mxu2 %v8558_v30  ;;  %v8965_v29 = vld [vmem:[%s16134_s1 + $0x1220] sm:$0xf]  ;;  %v10547_v30 = vld [vmem:[%s16134_s1 + $0x1280] sm:$0xf0]  ;;  %v8262_v50 = vor.u32 %v10359_v24, %v8259_v28 }
 0x3a6   :  { %5833 = vmatpush.bf16.xpose.msra.mxu3 %v8562_v0  ;;  %v8250_v0 = vor.u32 %v10370_v14, %v8249_v11  ;;  %v8966_v51 = vor.u32 %v10547_v30, %v8965_v29  ;;  %v10497_v11 = vld [vmem:[%s16134_s1 + $0x10f0] sm:$0xf0]  ;;  %v8775_v24 = vld [vmem:[%s16134_s1 + $0x10fc] sm:$0xf0]  ;;  %v8774_v30 = vor.u32 %v10498_v18, %v8773_v16  ;;  %v8465_v16 = vld [vmem:[%s16134_s1 + $0xe38] sm:$0xf] }
 0x3a7   :  { %v10485_v14 = vld [vmem:[%s16134_s1 + $0x1094] sm:$0xf]  ;;  %v10422_v18 = vld [vmem:[%s16134_s1 + $0xe98] sm:$0xf0] }
 0x3a8   :  { %v8770_v29 = vor.u32 %v10485_v14, %v8767_v47 }
 0x3ac   :  { %5795 = vmatpush.bf16.xpose.msra.mxu0 %v8450_v37  ;;  %v8970_v37 = vor.u32 %v10535_v32, %v8967_v33  ;;  %v8778_v32 = vor.u32 %v10486_v23, %v8775_v24  ;;  %v10410_v23 = vld [vmem:[%s16134_s1 + $0xe3c] sm:$0xf]  ;;  %v8467_v24 = vld [vmem:[%s16134_s1 + $0xe9c] sm:$0xf0] }
 0x3ad   :  { %5808 = vmatpush.bf16.xpose.msra.mxu1 %v8454_v15  ;;  %5821 = vmatpush.bf16.xpose.msra.mxu2 %v8458_v54  ;;  %v8974_v15 = vor.u32 %v10548_v38, %v8973_v34  ;;  %v8978_v54 = vor.u32 %v10536_v44, %v8975_v49  ;;  %v10460_v44 = vld [vmem:[%s16134_s1 + $0xfcc] sm:$0xf]  ;;  %v8673_v49 = vld [vmem:[%s16134_s1 + $0xfd0] sm:$0xf] }
 0x3ae   :  { %5834 = vmatpush.bf16.xpose.msra.mxu3 %v8462_v57  ;;  %v8865_v57 = vld [vmem:[%s16134_s1 + $0x1158] sm:$0xf] }
 0x3af   :  { %v8866_v3 = vor.u32 %v10522_v59, %v8865_v57 }
 0x3b4   :  { %5796 = vmatpush.bf16.xpose.msra.mxu0 %v8350_v5  ;;  %v8870_v5 = vor.u32 %v10510_v17, %v8867_v58 }
 0x3b5   :  { %5809 = vmatpush.bf16.xpose.msra.mxu1 %v8354_v13  ;;  %5822 = vmatpush.bf16.xpose.msra.mxu2 %v8358_v8  ;;  %v8874_v13 = vor.u32 %v10523_v25, %v8873_v61  ;;  %v8878_v8 = vor.u32 %v10511_v62, %v8875_v63  ;;  %v8565_v61 = vld [vmem:[%s16134_s1 + $0xf00] sm:$0xf]  ;;  %v10447_v25 = vld [vmem:[%s16134_s1 + $0xf60] sm:$0xf0]  ;;  %v8567_v63 = vld [vmem:[%s16134_s1 + $0xf64] sm:$0xf0] }
 0x3b6   :  { %5835 = vmatpush.bf16.xpose.msra.mxu3 %v8362_v10  ;;  %v8765_v10 = vld [vmem:[%s16134_s1 + $0x1090] sm:$0xf]  ;;  %v10435_v62 = vld [vmem:[%s16134_s1 + $0xf04] sm:$0xf] }
 0x3b7   :  { %v8766_v28 = vor.u32 %v10497_v11, %v8765_v10  ;;  %v8566_v10 = vor.u32 %v10447_v25, %v8565_v61  ;;  %v8570_v11 = vor.u32 %v10435_v62, %v8567_v63  ;;  %v8375_v61 = vld [vmem:[%s16134_s1 + $0xddc] sm:$0xf0] }
 0x3bc   :  { %5797 = vmatpush.bf16.xpose.msra.mxu0 %v8250_v0 }
 0x3bd   :  { %5810 = vmatpush.bf16.xpose.msra.mxu1 %v8254_v39  ;;  %5823 = vmatpush.bf16.xpose.msra.mxu2 %v8258_v42  ;;  %v8665_v39 = vld [vmem:[%s16134_s1 + $0xfc8] sm:$0xf]  ;;  %v10472_v42 = vld [vmem:[%s16134_s1 + $0x1028] sm:$0xf0] }
 0x3be   :  { %5836 = vmatpush.bf16.xpose.msra.mxu3 %v8262_v50  ;;  %v10473_v50 = vld [vmem:[%s16134_s1 + $0x1030] sm:$0xf0] }
 0x3bf   :  { %v8674_v57 = vor.u32 %v10473_v50, %v8673_v49 }
 0x3c0   :  { %v5695_v0 = vpop.f32.mrf.mxu0 }
 0x3c1   :  { %v5696_v33 = vadd.f32 %v5695_v0, %v13809_v4  ;;  %v5708_v34 = vpop.f32.mrf.mxu1  ;;  %v8667_v4 = vld [vmem:[%s16134_s1 + $0x102c] sm:$0xf0]  ;;  %v8466_v0 = vor.u32 %v10422_v18, %v8465_v16  ;;  %v10373_v16 = vld [vmem:[%s16134_s1 + $0xd10] sm:$0xf0] }
 0x3c2   :  { %v10361_v18 = vld [vmem:[%s16134_s1 + $0xcb4] sm:$0xf] }
 0x3c3   :  { %5798 = vmatmul.bf16.vlgmr.msra.gmra.mxu0 %v11264_v36  ;;  %v13984_v38 = vadd.f32 %v5708_v34, %v5696_v33  ;;  %v10789_v33 = vld [vmem:[%s16136_s2] sm:$0xf] }
 0x3c4   :  { %5842 = vmatpush.bf16.xpose.msrb.mxu0 %v8966_v51  ;;  %5824 = vmatmul.bf16.vlgmr.msra.gmra.mxu2 %v11463_v20  ;;  %v10461_v51 = vld [vmem:[%s16134_s1 + $0xfd4] sm:$0xf]  ;;  %v869_v34 = vperm.slane %v10789_v33, 2  ;;  %v10550_v33 = vld [vmem:[%s16134_s1 + $0x1298] sm:$0xf0] }
 0x3c5   :  { %5855 = vmatpush.bf16.xpose.msrb.mxu1 %v8970_v37  ;;  %5868 = vmatpush.bf16.xpose.msrb.mxu2 %v8974_v15  ;;  %v8675_v37 = vld [vmem:[%s16134_s1 + $0x1034] sm:$0xf0]  ;;  %v8666_v15 = vor.u32 %v10472_v42, %v8665_v39 }
 0x3c6   :  { %5881 = vmatpush.bf16.xpose.msrb.mxu3 %v8978_v54  ;;  %5811 = vmatmul.bf16.vlgmr.msra.gmra.mxu1 %v11283_v43  ;;  %v8670_v54 = vor.u32 %v10460_v44, %v8667_v4  ;;  %v8678_v59 = vor.u32 %v10461_v51, %v8675_v37  ;;  %v8470_v44 = vor.u32 %v10410_v23, %v8467_v24  ;;  %v8365_v37 = vld [vmem:[%s16134_s1 + $0xd70] sm:$0xf]  ;;  %v8275_v23 = vld [vmem:[%s16134_s1 + $0xd14] sm:$0xf0] }
 0x3c7   :  { %5837 = vmatmul.bf16.vlgmr.msra.gmra.mxu3 %v11476_v27  ;;  %v8981_v24 = vld [vmem:[%s16134_s1 + $0x1230] sm:$0xf] }
 0x3c8   :  { %v5697_v17 = vpop.f32.mrf.mxu0 }
 0x3c9   :  { %v5710_v58 = vpop.f32.mrf.mxu1  ;;  %v5721_v39 = vpop.f32.mrf.mxu2  ;;  %v10398_v17 = vld [vmem:[%s16134_s1 + $0xdd8] sm:$0xf0] }
 0x3ca   :  { %v5734_v42 = vpop.f32.mrf.mxu3  ;;  %v5722_v50 = vadd.f32 %v5721_v39, %v869_v34  ;;  %v10386_v58 = vld [vmem:[%s16134_s1 + $0xd7c] sm:$0xf] }
 0x3cc   :  { %5843 = vmatpush.bf16.xpose.msrb.mxu0 %v8866_v3  ;;  %v8573_v3 = vld [vmem:[%s16134_s1 + $0xf08] sm:$0xf]  ;;  %v14061_v51 = vadd.f32 %v5734_v42, %v5722_v50  ;;  %v10538_v42 = vld [vmem:[%s16134_s1 + $0x123c] sm:$0xf] }
 0x3cd   :  { %5856 = vmatpush.bf16.xpose.msrb.mxu1 %v8870_v5  ;;  %5869 = vmatpush.bf16.xpose.msrb.mxu2 %v8874_v13  ;;  %v10448_v5 = vld [vmem:[%s16134_s1 + $0xf68] sm:$0xf0] }
 0x3ce   :  { %5882 = vmatpush.bf16.xpose.msrb.mxu3 %v8878_v8  ;;  %v10436_v13 = vld [vmem:[%s16134_s1 + $0xf0c] sm:$0xf]  ;;  %v8575_v8 = vld [vmem:[%s16134_s1 + $0xf6c] sm:$0xf0]  ;;  %v8574_v14 = vor.u32 %v10448_v5, %v8573_v3 }
 0x3cf   :  { %v8578_v47 = vor.u32 %v10436_v13, %v8575_v8  ;;  %v8378_v13 = vor.u32 %v10386_v58, %v8375_v61  ;;  %v8265_v8 = vld [vmem:[%s16134_s1 + $0xca8] sm:$0xf]  ;;  %v8889_v58 = vld [vmem:[%s16134_s1 + $0x1170] sm:$0xf]  ;;  %v10525_v61 = vld [vmem:[%s16134_s1 + $0x11d0] sm:$0xf0] }
 0x3d1   :  { %v5723_v62 = vpop.f32.mrf.mxu2 }
 0x3d2   :  { %v5736_v63 = vpop.f32.mrf.mxu3  ;;  %v8891_v62 = vld [vmem:[%s16134_s1 + $0x11d4] sm:$0xf0] }
 0x3d4   :  { %5844 = vmatpush.bf16.xpose.msrb.mxu0 %v8766_v28  ;;  %v8473_v28 = vld [vmem:[%s16134_s1 + $0xe40] sm:$0xf] }
 0x3d5   :  { %5857 = vmatpush.bf16.xpose.msrb.mxu1 %v8770_v29  ;;  %5870 = vmatpush.bf16.xpose.msrb.mxu2 %v8774_v30  ;;  %v10423_v29 = vld [vmem:[%s16134_s1 + $0xea0] sm:$0xf0] }
 0x3d6   :  { %5883 = vmatpush.bf16.xpose.msrb.mxu3 %v8778_v32  ;;  %v10411_v30 = vld [vmem:[%s16134_s1 + $0xe44] sm:$0xf]  ;;  %v8475_v32 = vld [vmem:[%s16134_s1 + $0xea4] sm:$0xf0]  ;;  %v8474_v4 = vor.u32 %v10423_v29, %v8473_v28  ;;  %v10549_v28 = vld [vmem:[%s16134_s1 + $0x1290] sm:$0xf0] }
 0x3d7   :  { %v8478_v49 = vor.u32 %v10411_v30, %v8475_v32  ;;  %v10537_v29 = vld [vmem:[%s16134_s1 + $0x1234] sm:$0xf]  ;;  %v8983_v32 = vld [vmem:[%s16134_s1 + $0x1294] sm:$0xf0] }
 0x3d8   :  { %v8986_v50 = vor.u32 %v10537_v29, %v8983_v32 }
 0x3dc   :  { %5845 = vmatpush.bf16.xpose.msrb.mxu0 %v8666_v15  ;;  %v10397_v15 = vld [vmem:[%s16134_s1 + $0xdd0] sm:$0xf0] }
 0x3dd   :  { %5858 = vmatpush.bf16.xpose.msrb.mxu1 %v8670_v54  ;;  %5871 = vmatpush.bf16.xpose.msrb.mxu2 %v8674_v57  ;;  %v10385_v54 = vld [vmem:[%s16134_s1 + $0xd74] sm:$0xf]  ;;  %v8367_v57 = vld [vmem:[%s16134_s1 + $0xdd4] sm:$0xf0]  ;;  %v8366_v25 = vor.u32 %v10397_v15, %v8365_v37 }
 0x3de   :  { %5884 = vmatpush.bf16.xpose.msrb.mxu3 %v8678_v59  ;;  %v8373_v59 = vld [vmem:[%s16134_s1 + $0xd78] sm:$0xf]  ;;  %v8370_v3 = vor.u32 %v10385_v54, %v8367_v57  ;;  %v8881_v54 = vld [vmem:[%s16134_s1 + $0x1168] sm:$0xf]  ;;  %v10524_v57 = vld [vmem:[%s16134_s1 + $0x11c8] sm:$0xf0] }
 0x3df   :  { %v8374_v5 = vor.u32 %v10398_v17, %v8373_v59  ;;  %v10512_v59 = vld [vmem:[%s16134_s1 + $0x116c] sm:$0xf]  ;;  %v8883_v17 = vld [vmem:[%s16134_s1 + $0x11cc] sm:$0xf0]  ;;  %v8882_v63 = vor.u32 %v10524_v57, %v8881_v54 }
 0x3e4   :  { %5846 = vmatpush.bf16.xpose.msrb.mxu0 %v8566_v10  ;;  %v10372_v10 = vld [vmem:[%s16134_s1 + $0xd08] sm:$0xf0] }
 0x3e5   :  { %5859 = vmatpush.bf16.xpose.msrb.mxu1 %v8570_v11  ;;  %5872 = vmatpush.bf16.xpose.msrb.mxu2 %v8574_v14  ;;  %v10360_v11 = vld [vmem:[%s16134_s1 + $0xcac] sm:$0xf]  ;;  %v8267_v14 = vld [vmem:[%s16134_s1 + $0xd0c] sm:$0xf0]  ;;  %v8266_v30 = vor.u32 %v10372_v10, %v8265_v8  ;;  %v8781_v8 = vld [vmem:[%s16134_s1 + $0x10a0] sm:$0xf] }
 0x3e6   :  { %5885 = vmatpush.bf16.xpose.msrb.mxu3 %v8578_v47  ;;  %v8273_v47 = vld [vmem:[%s16134_s1 + $0xcb0] sm:$0xf]  ;;  %v8270_v34 = vor.u32 %v10360_v11, %v8267_v14  ;;  %v10499_v10 = vld [vmem:[%s16134_s1 + $0x1100] sm:$0xf0]  ;;  %v8783_v14 = vld [vmem:[%s16134_s1 + $0x1104] sm:$0xf0] }
 0x3e7   :  { %v8274_v39 = vor.u32 %v10373_v16, %v8273_v47  ;;  %v10487_v11 = vld [vmem:[%s16134_s1 + $0x10a4] sm:$0xf]  ;;  %v8789_v47 = vld [vmem:[%s16134_s1 + $0x10a8] sm:$0xf]  ;;  %v10500_v16 = vld [vmem:[%s16134_s1 + $0x1108] sm:$0xf0] }
 0x3e8   :  { %v8790_v29 = vor.u32 %v10500_v16, %v8789_v47  ;;  %v8591_v47 = vld [vmem:[%s16134_s1 + $0xf7c] sm:$0xf0] }
 0x3ec   :  { %5847 = vmatpush.bf16.xpose.msrb.mxu0 %v8466_v0  ;;  %v8989_v0 = vld [vmem:[%s16134_s1 + $0x1238] sm:$0xf] }
 0x3ed   :  { %5860 = vmatpush.bf16.xpose.msrb.mxu1 %v8470_v44  ;;  %5873 = vmatpush.bf16.xpose.msrb.mxu2 %v8474_v4  ;;  %v8991_v44 = vld [vmem:[%s16134_s1 + $0x129c] sm:$0xf0]  ;;  %v8278_v4 = vor.u32 %v10361_v18, %v8275_v23  ;;  %v8990_v37 = vor.u32 %v10550_v33, %v8989_v0  ;;  %v10488_v18 = vld [vmem:[%s16134_s1 + $0x10ac] sm:$0xf]  ;;  %v8791_v23 = vld [vmem:[%s16134_s1 + $0x110c] sm:$0xf0] }
 0x3ee   :  { %5886 = vmatpush.bf16.xpose.msrb.mxu3 %v8478_v49  ;;  %v8982_v49 = vor.u32 %v10549_v28, %v8981_v24  ;;  %v8994_v15 = vor.u32 %v10538_v42, %v8991_v44  ;;  %v8782_v24 = vor.u32 %v10499_v10, %v8781_v8  ;;  %v8786_v28 = vor.u32 %v10487_v11, %v8783_v14  ;;  %v10474_v42 = vld [vmem:[%s16134_s1 + $0x1038] sm:$0xf0]  ;;  %v8583_v8 = vld [vmem:[%s16134_s1 + $0xf74] sm:$0xf0] }
 0x3ef   :  { %v10462_v44 = vld [vmem:[%s16134_s1 + $0xfdc] sm:$0xf]  ;;  %v8589_v10 = vld [vmem:[%s16134_s1 + $0xf18] sm:$0xf] }
 0x3f0   :  { %v10450_v11 = vld [vmem:[%s16134_s1 + $0xf78] sm:$0xf0] }
 0x3f1   :  { %v10438_v14 = vld [vmem:[%s16134_s1 + $0xf1c] sm:$0xf] }
 0x3f4   :  { %5848 = vmatpush.bf16.xpose.msrb.mxu0 %v8366_v25  ;;  %v10513_v25 = vld [vmem:[%s16134_s1 + $0x1174] sm:$0xf] }
 0x3f5   :  { %5861 = vmatpush.bf16.xpose.msrb.mxu1 %v8370_v3  ;;  %5874 = vmatpush.bf16.xpose.msrb.mxu2 %v8374_v5  ;;  %v8886_v3 = vor.u32 %v10512_v59, %v8883_v17  ;;  %v8890_v5 = vor.u32 %v10525_v61, %v8889_v58 }
 0x3f6   :  { %5887 = vmatpush.bf16.xpose.msrb.mxu3 %v8378_v13  ;;  %v8894_v13 = vor.u32 %v10513_v25, %v8891_v62 }
 0x3fc   :  { %5849 = vmatpush.bf16.xpose.msrb.mxu0 %v8266_v30  ;;  %v8794_v30 = vor.u32 %v10488_v18, %v8791_v23  ;;  %v8590_v23 = vor.u32 %v10450_v11, %v8589_v10  ;;  %v10362_v10 = vld [vmem:[%s16134_s1 + $0xcbc] sm:$0xf]  ;;  %v8283_v11 = vld [vmem:[%s16134_s1 + $0xd1c] sm:$0xf0] }
 0x3fd   :  { %5862 = vmatpush.bf16.xpose.msrb.mxu1 %v8270_v34  ;;  %5875 = vmatpush.bf16.xpose.msrb.mxu2 %v8274_v39  ;;  %v8681_v39 = vld [vmem:[%s16134_s1 + $0xfd8] sm:$0xf] }
 0x3fe   :  { %5888 = vmatpush.bf16.xpose.msrb.mxu3 %v8278_v4  ;;  %v8689_v4 = vld [vmem:[%s16134_s1 + $0xfe0] sm:$0xf] }
 0x400   :  { %v5747_v32 = vpop.f32.mrf.mxu0 }
 0x401   :  { %v5748_v0 = vadd.f32 %v5747_v32, %v14061_v51  ;;  %v8683_v51 = vld [vmem:[%s16134_s1 + $0x103c] sm:$0xf0]  ;;  %v10424_v32 = vld [vmem:[%s16134_s1 + $0xea8] sm:$0xf0] }
 0x402   :  { %v8686_v54 = vor.u32 %v10462_v44, %v8683_v51  ;;  %v8491_v44 = vld [vmem:[%s16134_s1 + $0xeb4] sm:$0xf0] }
 0x403   :  { %5850 = vmatmul.bf16.vlgmr.msrb.gmra.mxu0 %v11474_v26  ;;  %v5760_v33 = vpop.f32.mrf.mxu1 }
 0x404   :  { %5894 = vmatpush.bf16.xpose.msra.mxu0 %v8982_v49  ;;  %5876 = vmatmul.bf16.vlgmr.msrb.gmra.mxu2 %v11678_v41  ;;  %v5761_v34 = vadd.f32 %v5760_v33, %v5748_v0  ;;  %v10475_v49 = vld [vmem:[%s16134_s1 + $0x1040] sm:$0xf0]  ;;  %v10412_v0 = vld [vmem:[%s16134_s1 + $0xe4c] sm:$0xf]  ;;  %v8483_v33 = vld [vmem:[%s16134_s1 + $0xeac] sm:$0xf0] }
 0x405   :  { %5907 = vmatpush.bf16.xpose.msra.mxu1 %v8986_v50  ;;  %5920 = vmatpush.bf16.xpose.msra.mxu2 %v8990_v37  ;;  %v10463_v50 = vld [vmem:[%s16134_s1 + $0xfe4] sm:$0xf]  ;;  %v8691_v37 = vld [vmem:[%s16134_s1 + $0x1044] sm:$0xf0]  ;;  %v8690_v57 = vor.u32 %v10475_v49, %v8689_v4  ;;  %v8486_v4 = vor.u32 %v10412_v0, %v8483_v33  ;;  %v10552_v0 = vld [vmem:[%s16134_s1 + $0x12a8] sm:$0xf0]  ;;  %v8286_v33 = vor.u32 %v10362_v10, %v8283_v11 }
 0x406   :  { %5933 = vmatpush.bf16.xpose.msra.mxu3 %v8994_v15  ;;  %5863 = vmatmul.bf16.vlgmr.msrb.gmra.mxu1 %v11487_v31  ;;  %v8682_v15 = vor.u32 %v10474_v42, %v8681_v39  ;;  %v8694_v17 = vor.u32 %v10463_v50, %v8691_v37  ;;  %v10425_v39 = vld [vmem:[%s16134_s1 + $0xeb0] sm:$0xf0]  ;;  %v8381_v37 = vld [vmem:[%s16134_s1 + $0xd80] sm:$0xf]  ;;  %v8799_v11 = vld [vmem:[%s16134_s1 + $0x1114] sm:$0xf0] }
 0x407   :  { %5889 = vmatmul.bf16.vlgmr.msrb.gmra.mxu3 %v11691_v48  ;;  %v5773_v59 = vpop.f32.mrf.mxu2  ;;  %v10413_v42 = vld [vmem:[%s16134_s1 + $0xe54] sm:$0xf] }
 0x408   :  { %v5774_v58 = vadd.f32 %v5773_v59, %v5761_v34  ;;  %v5749_v25 = vpop.f32.mrf.mxu0  ;;  %v8489_v34 = vld [vmem:[%s16134_s1 + $0xe50] sm:$0xf]  ;;  %v8494_v50 = vor.u32 %v10413_v42, %v8491_v44  ;;  %v8389_v59 = vld [vmem:[%s16134_s1 + $0xd88] sm:$0xf]  ;;  %v10489_v10 = vld [vmem:[%s16134_s1 + $0x10b4] sm:$0xf] }
 0x409   :  { %v8490_v49 = vor.u32 %v10425_v39, %v8489_v34  ;;  %v10540_v39 = vld [vmem:[%s16134_s1 + $0x124c] sm:$0xf]  ;;  %v9007_v42 = vld [vmem:[%s16134_s1 + $0x12ac] sm:$0xf0] }
 0x40a   :  { %v5786_v61 = vpop.f32.mrf.mxu3 }
 0x40b   :  { %v5762_v62 = vpop.f32.mrf.mxu1 }
 0x40c   :  { %5895 = vmatpush.bf16.xpose.msra.mxu0 %v8882_v63  ;;  %v14212_v63 = vadd.f32 %v5786_v61, %v5774_v58  ;;  %v10388_v58 = vld [vmem:[%s16134_s1 + $0xd8c] sm:$0xf]  ;;  %v8391_v61 = vld [vmem:[%s16134_s1 + $0xdec] sm:$0xf0] }
 0x40d   :  { %5908 = vmatpush.bf16.xpose.msra.mxu1 %v8886_v3  ;;  %5921 = vmatpush.bf16.xpose.msra.mxu2 %v8890_v5  ;;  %v8581_v3 = vld [vmem:[%s16134_s1 + $0xf10] sm:$0xf]  ;;  %v10449_v5 = vld [vmem:[%s16134_s1 + $0xf70] sm:$0xf0] }
 0x40e   :  { %5934 = vmatpush.bf16.xpose.msra.mxu3 %v8894_v13  ;;  %v10437_v13 = vld [vmem:[%s16134_s1 + $0xf14] sm:$0xf]  ;;  %v8582_v16 = vor.u32 %v10449_v5, %v8581_v3  ;;  %v8394_v5 = vor.u32 %v10388_v58, %v8391_v61  ;;  %v10515_v58 = vld [vmem:[%s16134_s1 + $0x1184] sm:$0xf]  ;;  %v8907_v61 = vld [vmem:[%s16134_s1 + $0x11e4] sm:$0xf0] }
 0x40f   :  { %v8586_v18 = vor.u32 %v10437_v13, %v8583_v8  ;;  %v8281_v13 = vld [vmem:[%s16134_s1 + $0xcb8] sm:$0xf]  ;;  %v10374_v8 = vld [vmem:[%s16134_s1 + $0xd18] sm:$0xf0] }
 0x414   :  { %5896 = vmatpush.bf16.xpose.msra.mxu0 %v8782_v24  ;;  %v5775_v24 = vpop.f32.mrf.mxu2 }
 0x415   :  { %5909 = vmatpush.bf16.xpose.msra.mxu1 %v8786_v28  ;;  %5922 = vmatpush.bf16.xpose.msra.mxu2 %v8790_v29  ;;  %v8594_v28 = vor.u32 %v10438_v14, %v8591_v47  ;;  %v5788_v29 = vpop.f32.mrf.mxu3  ;;  %v8289_v14 = vld [vmem:[%s16134_s1 + $0xcc0] sm:$0xf]  ;;  %v10375_v47 = vld [vmem:[%s16134_s1 + $0xd20] sm:$0xf0] }
 0x416   :  { %5935 = vmatpush.bf16.xpose.msra.mxu3 %v8794_v30  ;;  %v8481_v30 = vld [vmem:[%s16134_s1 + $0xe48] sm:$0xf]  ;;  %v10551_v24 = vld [vmem:[%s16134_s1 + $0x12a0] sm:$0xf0]  ;;  %v8282_v29 = vor.u32 %v10374_v8, %v8281_v13  ;;  %v8290_v34 = vor.u32 %v10375_v47, %v8289_v14  ;;  %v8797_v13 = vld [vmem:[%s16134_s1 + $0x10b0] sm:$0xf] }
 0x417   :  { %v8482_v51 = vor.u32 %v10424_v32, %v8481_v30  ;;  %v8999_v30 = vld [vmem:[%s16134_s1 + $0x12a4] sm:$0xf0]  ;;  %v10501_v8 = vld [vmem:[%s16134_s1 + $0x1110] sm:$0xf0]  ;;  %v8805_v14 = vld [vmem:[%s16134_s1 + $0x10b8] sm:$0xf] }
 0x418   :  { %v9005_v32 = vld [vmem:[%s16134_s1 + $0x1248] sm:$0xf]  ;;  %v10502_v47 = vld [vmem:[%s16134_s1 + $0x1118] sm:$0xf0] }
 0x41c   :  { %5897 = vmatpush.bf16.xpose.msra.mxu0 %v8682_v15  ;;  %v10399_v15 = vld [vmem:[%s16134_s1 + $0xde0] sm:$0xf0] }
 0x41d   :  { %5910 = vmatpush.bf16.xpose.msra.mxu1 %v8686_v54  ;;  %5923 = vmatpush.bf16.xpose.msra.mxu2 %v8690_v57  ;;  %v10387_v54 = vld [vmem:[%s16134_s1 + $0xd84] sm:$0xf]  ;;  %v8383_v57 = vld [vmem:[%s16134_s1 + $0xde4] sm:$0xf0]  ;;  %v8382_v25 = vor.u32 %v10399_v15, %v8381_v37  ;;  %v8897_v37 = vld [vmem:[%s16134_s1 + $0x1178] sm:$0xf] }
 0x41e   :  { %5936 = vmatpush.bf16.xpose.msra.mxu3 %v8694_v17  ;;  %v10400_v17 = vld [vmem:[%s16134_s1 + $0xde8] sm:$0xf0]  ;;  %v8386_v62 = vor.u32 %v10387_v54, %v8383_v57  ;;  %v10526_v15 = vld [vmem:[%s16134_s1 + $0x11d8] sm:$0xf0]  ;;  %v8899_v57 = vld [vmem:[%s16134_s1 + $0x11dc] sm:$0xf0] }
 0x41f   :  { %v8390_v3 = vor.u32 %v10400_v17, %v8389_v59  ;;  %v10514_v54 = vld [vmem:[%s16134_s1 + $0x117c] sm:$0xf]  ;;  %v8905_v59 = vld [vmem:[%s16134_s1 + $0x1180] sm:$0xf]  ;;  %v10527_v17 = vld [vmem:[%s16134_s1 + $0x11e0] sm:$0xf0] }
 0x424   :  { %5898 = vmatpush.bf16.xpose.msra.mxu0 %v8582_v16  ;;  %v10363_v16 = vld [vmem:[%s16134_s1 + $0xcc4] sm:$0xf] }
 0x425   :  { %5911 = vmatpush.bf16.xpose.msra.mxu1 %v8586_v18  ;;  %5924 = vmatpush.bf16.xpose.msra.mxu2 %v8590_v23  ;;  %v8291_v18 = vld [vmem:[%s16134_s1 + $0xd24] sm:$0xf0]  ;;  %v8997_v23 = vld [vmem:[%s16134_s1 + $0x1240] sm:$0xf] }
 0x426   :  { %5937 = vmatpush.bf16.xpose.msra.mxu3 %v8594_v28  ;;  %v10539_v28 = vld [vmem:[%s16134_s1 + $0x1244] sm:$0xf]  ;;  %v8294_v44 = vor.u32 %v10363_v16, %v8291_v18  ;;  %v10490_v16 = vld [vmem:[%s16134_s1 + $0x10bc] sm:$0xf]  ;;  %v8807_v18 = vld [vmem:[%s16134_s1 + $0x111c] sm:$0xf0] }
 0x42c   :  { %5899 = vmatpush.bf16.xpose.msra.mxu0 %v8482_v51  ;;  %v8998_v51 = vor.u32 %v10551_v24, %v8997_v23  ;;  %v8798_v23 = vor.u32 %v10501_v8, %v8797_v13  ;;  %v8802_v24 = vor.u32 %v10489_v10, %v8799_v11  ;;  %v8599_v13 = vld [vmem:[%s16134_s1 + $0xf84] sm:$0xf0]  ;;  %v10452_v10 = vld [vmem:[%s16134_s1 + $0xf88] sm:$0xf0] }
 0x42d   :  { %5912 = vmatpush.bf16.xpose.msra.mxu1 %v8486_v4  ;;  %5925 = vmatpush.bf16.xpose.msra.mxu2 %v8490_v49  ;;  %v9002_v4 = vor.u32 %v10539_v28, %v8999_v30  ;;  %v9006_v49 = vor.u32 %v10552_v0, %v9005_v32  ;;  %v8806_v28 = vor.u32 %v10502_v47, %v8805_v14  ;;  %v8605_v8 = vld [vmem:[%s16134_s1 + $0xf28] sm:$0xf]  ;;  %v10440_v11 = vld [vmem:[%s16134_s1 + $0xf2c] sm:$0xf]  ;;  %v8607_v14 = vld [vmem:[%s16134_s1 + $0xf8c] sm:$0xf0] }
 0x42e   :  { %5938 = vmatpush.bf16.xpose.msra.mxu3 %v8494_v50  ;;  %v9010_v50 = vor.u32 %v10540_v39, %v9007_v42  ;;  %v10476_v39 = vld [vmem:[%s16134_s1 + $0x1048] sm:$0xf0] }
 0x42f   :  { %v10464_v42 = vld [vmem:[%s16134_s1 + $0xfec] sm:$0xf] }
 0x434   :  { %5900 = vmatpush.bf16.xpose.msra.mxu0 %v8382_v25  ;;  %v8898_v25 = vor.u32 %v10526_v15, %v8897_v37 }
 0x435   :  { %5913 = vmatpush.bf16.xpose.msra.mxu1 %v8386_v62  ;;  %5926 = vmatpush.bf16.xpose.msra.mxu2 %v8390_v3  ;;  %v8902_v62 = vor.u32 %v10514_v54, %v8899_v57  ;;  %v8906_v3 = vor.u32 %v10527_v17, %v8905_v59 }
 0x436   :  { %5939 = vmatpush.bf16.xpose.msra.mxu3 %v8394_v5  ;;  %v8910_v5 = vor.u32 %v10515_v58, %v8907_v61 }
 0x43c   :  { %5901 = vmatpush.bf16.xpose.msra.mxu0 %v8282_v29  ;;  %v8810_v29 = vor.u32 %v10490_v16, %v8807_v18  ;;  %v8606_v18 = vor.u32 %v10452_v10, %v8605_v8  ;;  %v10364_v8 = vld [vmem:[%s16134_s1 + $0xccc] sm:$0xf]  ;;  %v8299_v10 = vld [vmem:[%s16134_s1 + $0xd2c] sm:$0xf0] }
 0x43d   :  { %5914 = vmatpush.bf16.xpose.msra.mxu1 %v8286_v33  ;;  %5927 = vmatpush.bf16.xpose.msra.mxu2 %v8290_v34  ;;  %v8697_v34 = vld [vmem:[%s16134_s1 + $0xfe8] sm:$0xf] }
 0x43e   :  { %5940 = vmatpush.bf16.xpose.msra.mxu3 %v8294_v44  ;;  %v8705_v44 = vld [vmem:[%s16134_s1 + $0xff0] sm:$0xf] }
 0x440   :  { %v5799_v30 = vpop.f32.mrf.mxu0 }
 0x441   :  { %v5800_v32 = vadd.f32 %v5799_v30, %v14212_v63  ;;  %v8699_v63 = vld [vmem:[%s16134_s1 + $0x104c] sm:$0xf0]  ;;  %v10426_v30 = vld [vmem:[%s16134_s1 + $0xeb8] sm:$0xf0] }
 0x442   :  { %v8702_v15 = vor.u32 %v10464_v42, %v8699_v63  ;;  %v8507_v42 = vld [vmem:[%s16134_s1 + $0xec4] sm:$0xf0] }
 0x443   :  { %5902 = vmatmul.bf16.vlgmr.msra.gmra.mxu0 %v11689_v46  ;;  %v5812_v0 = vpop.f32.mrf.mxu1 }
 0x444   :  { %5946 = vmatpush.bf16.xpose.msrb.mxu0 %v8998_v51  ;;  %5928 = vmatmul.bf16.vlgmr.msra.gmra.mxu2 %v11891_v2  ;;  %v5813_v33 = vadd.f32 %v5812_v0, %v5800_v32  ;;  %v10477_v51 = vld [vmem:[%s16134_s1 + $0x1050] sm:$0xf0]  ;;  %v10414_v32 = vld [vmem:[%s16134_s1 + $0xe5c] sm:$0xf]  ;;  %v8499_v0 = vld [vmem:[%s16134_s1 + $0xebc] sm:$0xf0] }
 0x445   :  { %5959 = vmatpush.bf16.xpose.msrb.mxu1 %v9002_v4  ;;  %5972 = vmatpush.bf16.xpose.msrb.mxu2 %v9006_v49  ;;  %v10465_v4 = vld [vmem:[%s16134_s1 + $0xff4] sm:$0xf]  ;;  %v8707_v49 = vld [vmem:[%s16134_s1 + $0x1054] sm:$0xf0]  ;;  %v8706_v54 = vor.u32 %v10477_v51, %v8705_v44  ;;  %v8502_v44 = vor.u32 %v10414_v32, %v8499_v0 }
 0x446   :  { %5985 = vmatpush.bf16.xpose.msrb.mxu3 %v9010_v50  ;;  %5915 = vmatmul.bf16.vlgmr.msra.gmra.mxu1 %v11702_v52  ;;  %v8698_v50 = vor.u32 %v10476_v39, %v8697_v34  ;;  %v8710_v59 = vor.u32 %v10465_v4, %v8707_v49  ;;  %v10427_v34 = vld [vmem:[%s16134_s1 + $0xec0] sm:$0xf0]  ;;  %v8397_v49 = vld [vmem:[%s16134_s1 + $0xd90] sm:$0xf]  ;;  %v9015_v32 = vld [vmem:[%s16134_s1 + $0x12b4] sm:$0xf0] }
 0x447   :  { %5941 = vmatmul.bf16.vlgmr.msra.gmra.mxu3 %v11904_v7  ;;  %v5825_v37 = vpop.f32.mrf.mxu2  ;;  %v10415_v39 = vld [vmem:[%s16134_s1 + $0xe64] sm:$0xf] }
 0x448   :  { %v5826_v57 = vadd.f32 %v5825_v37, %v5813_v33  ;;  %v5801_v58 = vpop.f32.mrf.mxu0  ;;  %v8505_v33 = vld [vmem:[%s16134_s1 + $0xe60] sm:$0xf]  ;;  %v8510_v4 = vor.u32 %v10415_v39, %v8507_v42  ;;  %v10389_v37 = vld [vmem:[%s16134_s1 + $0xd94] sm:$0xf]  ;;  %v9725_v39 = vld [vmem:[%s16134_s1 + $0x1838] sm:$0xf] }
 0x449   :  { %v8506_v51 = vor.u32 %v10427_v34, %v8505_v33  ;;  %v8302_v33 = vor.u32 %v10364_v8, %v8299_v10  ;;  %v10742_v42 = vld [vmem:[%s16134_s1 + $0x1898] sm:$0xf0]  ;;  %v8821_v8 = vld [vmem:[%s16134_s1 + $0x10c8] sm:$0xf]  ;;  %v10504_v10 = vld [vmem:[%s16134_s1 + $0x1128] sm:$0xf0] }
 0x44a   :  { %v5838_v17 = vpop.f32.mrf.mxu3 }
 0x44b   :  { %v5814_v61 = vpop.f32.mrf.mxu1 }
 0x44c   :  { %5947 = vmatpush.bf16.xpose.msrb.mxu0 %v8898_v25  ;;  %v14411_v25 = vadd.f32 %v5838_v17, %v5826_v57  ;;  %v10402_v57 = vld [vmem:[%s16134_s1 + $0xdf8] sm:$0xf0]  ;;  %v8407_v17 = vld [vmem:[%s16134_s1 + $0xdfc] sm:$0xf0] }
 0x44d   :  { %5960 = vmatpush.bf16.xpose.msrb.mxu1 %v8902_v62  ;;  %5973 = vmatpush.bf16.xpose.msrb.mxu2 %v8906_v3  ;;  %v8597_v62 = vld [vmem:[%s16134_s1 + $0xf20] sm:$0xf]  ;;  %v10451_v3 = vld [vmem:[%s16134_s1 + $0xf80] sm:$0xf0] }
 0x44e   :  { %5986 = vmatpush.bf16.xpose.msrb.mxu3 %v8910_v5  ;;  %v10439_v5 = vld [vmem:[%s16134_s1 + $0xf24] sm:$0xf]  ;;  %v8598_v47 = vor.u32 %v10451_v3, %v8597_v62 }
 0x44f   :  { %v8602_v16 = vor.u32 %v10439_v5, %v8599_v13  ;;  %v8297_v5 = vld [vmem:[%s16134_s1 + $0xcc8] sm:$0xf]  ;;  %v10376_v13 = vld [vmem:[%s16134_s1 + $0xd28] sm:$0xf0] }
 0x454   :  { %5948 = vmatpush.bf16.xpose.msrb.mxu0 %v8798_v23  ;;  %v5827_v23 = vpop.f32.mrf.mxu2 }
 0x455   :  { %5961 = vmatpush.bf16.xpose.msrb.mxu1 %v8802_v24  ;;  %5974 = vmatpush.bf16.xpose.msrb.mxu2 %v8806_v28  ;;  %v8610_v24 = vor.u32 %v10440_v11, %v8607_v14  ;;  %v5840_v28 = vpop.f32.mrf.mxu3  ;;  %v9021_v11 = vld [vmem:[%s16134_s1 + $0x1258] sm:$0xf]  ;;  %v10554_v14 = vld [vmem:[%s16134_s1 + $0x12b8] sm:$0xf0] }
 0x456   :  { %5987 = vmatpush.bf16.xpose.msrb.mxu3 %v8810_v29  ;;  %v8497_v29 = vld [vmem:[%s16134_s1 + $0xe58] sm:$0xf]  ;;  %v10553_v28 = vld [vmem:[%s16134_s1 + $0x12b0] sm:$0xf0]  ;;  %v9022_v0 = vor.u32 %v10554_v14, %v9021_v11  ;;  %v8813_v11 = vld [vmem:[%s16134_s1 + $0x10c0] sm:$0xf] }
 0x457   :  { %v8498_v63 = vor.u32 %v10426_v30, %v8497_v29  ;;  %v8307_v23 = vld [vmem:[%s16134_s1 + $0xd34] sm:$0xf0]  ;;  %v8298_v29 = vor.u32 %v10376_v13, %v8297_v5  ;;  %v10541_v30 = vld [vmem:[%s16134_s1 + $0x1254] sm:$0xf]  ;;  %v10503_v14 = vld [vmem:[%s16134_s1 + $0x1120] sm:$0xf0] }
 0x45c   :  { %5949 = vmatpush.bf16.xpose.msrb.mxu0 %v8698_v50  ;;  %v10401_v50 = vld [vmem:[%s16134_s1 + $0xdf0] sm:$0xf0] }
 0x45d   :  { %5962 = vmatpush.bf16.xpose.msrb.mxu1 %v8702_v15  ;;  %5975 = vmatpush.bf16.xpose.msrb.mxu2 %v8706_v54  ;;  %v8399_v15 = vld [vmem:[%s16134_s1 + $0xdf4] sm:$0xf0]  ;;  %v8398_v58 = vor.u32 %v10401_v50, %v8397_v49  ;;  %v9726_v49 = vor.u32 %v10742_v42, %v9725_v39  ;;  %v8921_v50 = vld [vmem:[%s16134_s1 + $0x1190] sm:$0xf]  ;;  %v8721_v39 = vld [vmem:[%s16134_s1 + $0x1000] sm:$0xf] }
 0x45e   :  { %5988 = vmatpush.bf16.xpose.msrb.mxu3 %v8710_v59  ;;  %v8405_v54 = vld [vmem:[%s16134_s1 + $0xd98] sm:$0xf]  ;;  %v10390_v59 = vld [vmem:[%s16134_s1 + $0xd9c] sm:$0xf]  ;;  %v8402_v61 = vor.u32 %v10389_v37, %v8399_v15  ;;  %v10529_v37 = vld [vmem:[%s16134_s1 + $0x11f0] sm:$0xf0] }
 0x45f   :  { %v8406_v62 = vor.u32 %v10402_v57, %v8405_v54  ;;  %v8410_v3 = vor.u32 %v10390_v59, %v8407_v17  ;;  %v8913_v15 = vld [vmem:[%s16134_s1 + $0x1188] sm:$0xf]  ;;  %v10528_v54 = vld [vmem:[%s16134_s1 + $0x11e8] sm:$0xf0]  ;;  %v8915_v59 = vld [vmem:[%s16134_s1 + $0x11ec] sm:$0xf0]  ;;  %v8922_v17 = vor.u32 %v10529_v37, %v8921_v50 }
 0x460   :  { %v10516_v57 = vld [vmem:[%s16134_s1 + $0x118c] sm:$0xf]  ;;  %v10479_v42 = vld [vmem:[%s16134_s1 + $0x1060] sm:$0xf0]  ;;  %v9425_v50 = vld [vmem:[%s16134_s1 + $0x15e0] sm:$0xf] }
 0x461   :  { %v5033_v5 = vsel %vm4962_vm0, %v8922_v17, 0  ;;  %v10667_v37 = vld [vmem:[%s16134_s1 + $0x1640] sm:$0xf0] }
 0x464   :  { %5950 = vmatpush.bf16.xpose.msrb.mxu0 %v8598_v47  ;;  %v8305_v47 = vld [vmem:[%s16134_s1 + $0xcd0] sm:$0xf] }
 0x465   :  { %5963 = vmatpush.bf16.xpose.msrb.mxu1 %v8602_v16  ;;  %5976 = vmatpush.bf16.xpose.msrb.mxu2 %v8606_v18  ;;  %v10377_v16 = vld [vmem:[%s16134_s1 + $0xd30] sm:$0xf0] }
 0x466   :  { %5989 = vmatpush.bf16.xpose.msrb.mxu3 %v8610_v24  ;;  %v10365_v18 = vld [vmem:[%s16134_s1 + $0xcd4] sm:$0xf]  ;;  %v9013_v24 = vld [vmem:[%s16134_s1 + $0x1250] sm:$0xf]  ;;  %v8306_v34 = vor.u32 %v10377_v16, %v8305_v47  ;;  %v10491_v47 = vld [vmem:[%s16134_s1 + $0x10c4] sm:$0xf] }
 0x467   :  { %v8815_v16 = vld [vmem:[%s16134_s1 + $0x1124] sm:$0xf0] }
 0x46c   :  { %5951 = vmatpush.bf16.xpose.msrb.mxu0 %v8498_v63  ;;  %v8310_v63 = vor.u32 %v10365_v18, %v8307_v23  ;;  %v8822_v18 = vor.u32 %v10504_v10, %v8821_v8  ;;  %v9525_v23 = vld [vmem:[%s16134_s1 + $0x16a8] sm:$0xf]  ;;  %v8613_v10 = vld [vmem:[%s16134_s1 + $0xf30] sm:$0xf] }
 0x46d   :  { %5964 = vmatpush.bf16.xpose.msrb.mxu1 %v8502_v44  ;;  %5977 = vmatpush.bf16.xpose.msrb.mxu2 %v8506_v51  ;;  %v9014_v44 = vor.u32 %v10553_v28, %v9013_v24  ;;  %v9018_v51 = vor.u32 %v10541_v30, %v9015_v32  ;;  %v10692_v24 = vld [vmem:[%s16134_s1 + $0x1708] sm:$0xf0]  ;;  %v8814_v28 = vor.u32 %v10503_v14, %v8813_v11  ;;  %v10453_v11 = vld [vmem:[%s16134_s1 + $0xf90] sm:$0xf0] }
 0x46e   :  { %5990 = vmatpush.bf16.xpose.msrb.mxu3 %v8510_v4  ;;  %v5036_v4 = vsel %vm4962_vm0, %v9022_v0, 0  ;;  %v5030_v30 = vsel %vm4962_vm0, %v8822_v18, 0  ;;  %v9526_v32 = vor.u32 %v10692_v24, %v9525_v23  ;;  %v10441_v14 = vld [vmem:[%s16134_s1 + $0xf34] sm:$0xf]  ;;  %v9325_v18 = vld [vmem:[%s16134_s1 + $0x1518] sm:$0xf]  ;;  %v8614_v24 = vor.u32 %v10453_v11, %v8613_v10 }
 0x46f   :  { %v10642_v23 = vld [vmem:[%s16134_s1 + $0x1578] sm:$0xf0] }
 0x474   :  { %5952 = vmatpush.bf16.xpose.msrb.mxu0 %v8398_v58  ;;  %v9625_v58 = vld [vmem:[%s16134_s1 + $0x1770] sm:$0xf] }
 0x475   :  { %5965 = vmatpush.bf16.xpose.msrb.mxu1 %v8402_v61  ;;  %5978 = vmatpush.bf16.xpose.msrb.mxu2 %v8406_v62  ;;  %v10717_v61 = vld [vmem:[%s16134_s1 + $0x17d0] sm:$0xf0]  ;;  %v8914_v62 = vor.u32 %v10528_v54, %v8913_v15 }
 0x476   :  { %5991 = vmatpush.bf16.xpose.msrb.mxu3 %v8410_v3  ;;  %v8918_v3 = vor.u32 %v10516_v57, %v8915_v59  ;;  %v9626_v13 = vor.u32 %v10717_v61, %v9625_v58  ;;  %v9426_v58 = vor.u32 %v10667_v37, %v9425_v50 }
 0x47c   :  { %5953 = vmatpush.bf16.xpose.msrb.mxu0 %v8298_v29  ;;  %v8818_v29 = vor.u32 %v10491_v47, %v8815_v16  ;;  %v8615_v47 = vld [vmem:[%s16134_s1 + $0xf94] sm:$0xf0] }
 0x47d   :  { %5966 = vmatpush.bf16.xpose.msrb.mxu1 %v8302_v33  ;;  %5979 = vmatpush.bf16.xpose.msrb.mxu2 %v8306_v34 }
 0x47e   :  { %5992 = vmatpush.bf16.xpose.msrb.mxu3 %v8310_v63 }
 0x480   :  { %v5851_v0 = vpop.f32.mrf.mxu0 }
 0x481   :  { %v5852_v33 = vadd.f32 %v5851_v0, %v14411_v25  ;;  %v10478_v25 = vld [vmem:[%s16134_s1 + $0x1058] sm:$0xf0] }
 0x483   :  { %5954 = vmatmul.bf16.vlgmr.msrb.gmra.mxu0 %v11902_v6  ;;  %v5864_v34 = vpop.f32.mrf.mxu1 }
 0x484   :  { %5998 = vmatpush.bf16.xpose.msra.mxu0 %v9014_v44  ;;  %5980 = vmatmul.bf16.vlgmr.msrb.gmra.mxu2 %v12111_v53  ;;  %v5865_v63 = vadd.f32 %v5864_v34, %v5852_v33  ;;  %v8713_v44 = vld [vmem:[%s16134_s1 + $0xff8] sm:$0xf]  ;;  %v8521_v33 = vld [vmem:[%s16134_s1 + $0xe70] sm:$0xf]  ;;  %v10429_v34 = vld [vmem:[%s16134_s1 + $0xed0] sm:$0xf0] }
 0x485   :  { %6011 = vmatpush.bf16.xpose.msra.mxu1 %v9018_v51  ;;  %6024 = vmatpush.bf16.xpose.msra.mxu2 %v5036_v4  ;;  %v10466_v51 = vld [vmem:[%s16134_s1 + $0xffc] sm:$0xf]  ;;  %v8715_v4 = vld [vmem:[%s16134_s1 + $0x105c] sm:$0xf0]  ;;  %v8714_v15 = vor.u32 %v10478_v25, %v8713_v44  ;;  %v8515_v44 = vld [vmem:[%s16134_s1 + $0xecc] sm:$0xf0]  ;;  %v8522_v25 = vor.u32 %v10429_v34, %v8521_v33 }
 0x486   :  { %6037 = vmatpush.bf16.xpose.msra.mxu3 %v9726_v49  ;;  %5967 = vmatmul.bf16.vlgmr.msrb.gmra.mxu1 %v11915_v12  ;;  %v8722_v49 = vor.u32 %v10479_v42, %v8721_v39  ;;  %v8718_v57 = vor.u32 %v10466_v51, %v8715_v4  ;;  %v8513_v39 = vld [vmem:[%s16134_s1 + $0xe68] sm:$0xf]  ;;  %v10428_v42 = vld [vmem:[%s16134_s1 + $0xec8] sm:$0xf0]  ;;  %v9225_v51 = vld [vmem:[%s16134_s1 + $0x1450] sm:$0xf] }
 0x487   :  { %5993 = vmatmul.bf16.vlgmr.msrb.gmra.mxu3 %v12118_v56  ;;  %v5877_v54 = vpop.f32.mrf.mxu2  ;;  %v10617_v4 = vld [vmem:[%s16134_s1 + $0x14b0] sm:$0xf0]  ;;  %v5021_v37 = vsel %vm4962_vm0, %v8522_v25, 0  ;;  %v9727_v33 = vld [vmem:[%s16134_s1 + $0x189c] sm:$0xf0] }
 0x488   :  { %v5878_v59 = vadd.f32 %v5877_v54, %v5865_v63  ;;  %v5027_v17 = vsel %vm4962_vm0, %v8722_v49, 0  ;;  %v10416_v63 = vld [vmem:[%s16134_s1 + $0xe6c] sm:$0xf]  ;;  %v8514_v49 = vor.u32 %v10428_v42, %v8513_v39  ;;  %v8421_v54 = vld [vmem:[%s16134_s1 + $0xda8] sm:$0xf] }
 0x489   :  { %v8518_v50 = vor.u32 %v10416_v63, %v8515_v44  ;;  %v9733_v34 = vld [vmem:[%s16134_s1 + $0x1840] sm:$0xf]  ;;  %v10743_v42 = vld [vmem:[%s16134_s1 + $0x18a0] sm:$0xf0]  ;;  %v9735_v44 = vld [vmem:[%s16134_s1 + $0x18a4] sm:$0xf0] }
 0x48a   :  { %v5890_v61 = vpop.f32.mrf.mxu3  ;;  %v10731_v63 = vld [vmem:[%s16134_s1 + $0x1844] sm:$0xf] }
 0x48b   :  { %v14620_v8 = vadd.f32 %v5890_v61, %v5878_v59  ;;  %v8413_v59 = vld [vmem:[%s16134_s1 + $0xda0] sm:$0xf]  ;;  %v8415_v61 = vld [vmem:[%s16134_s1 + $0xe04] sm:$0xf0] }
 0x48c   :  { %5999 = vmatpush.bf16.xpose.msra.mxu0 %v8914_v62  ;;  %v5853_v62 = vpop.f32.mrf.mxu0 }
 0x48d   :  { %6012 = vmatpush.bf16.xpose.msra.mxu1 %v8918_v3  ;;  %6025 = vmatpush.bf16.xpose.msra.mxu2 %v5033_v5  ;;  %v8621_v3 = vld [vmem:[%s16134_s1 + $0xf38] sm:$0xf]  ;;  %v10454_v5 = vld [vmem:[%s16134_s1 + $0xf98] sm:$0xf0] }
 0x48e   :  { %6038 = vmatpush.bf16.xpose.msra.mxu3 %v9626_v13  ;;  %v5866_v13 = vpop.f32.mrf.mxu1  ;;  %v8622_v16 = vor.u32 %v10454_v5, %v8621_v3  ;;  %v9125_v3 = vld [vmem:[%s16134_s1 + $0x1388] sm:$0xf]  ;;  %v10592_v5 = vld [vmem:[%s16134_s1 + $0x13e8] sm:$0xf0] }
 0x492   :  { %v5892_v0 = vpop.f32.mrf.mxu3 }
 0x493   :  { %v10730_v0 = vld [vmem:[%s16134_s1 + $0x183c] sm:$0xf] }
 0x494   :  { %6000 = vmatpush.bf16.xpose.msra.mxu0 %v8814_v28  ;;  %v8618_v28 = vor.u32 %v10441_v14, %v8615_v47  ;;  %v9126_v14 = vor.u32 %v10592_v5, %v9125_v3  ;;  %v8321_v47 = vld [vmem:[%s16134_s1 + $0xce0] sm:$0xf] }
 0x495   :  { %6013 = vmatpush.bf16.xpose.msra.mxu1 %v8818_v29  ;;  %6026 = vmatpush.bf16.xpose.msra.mxu2 %v5030_v30  ;;  %v5879_v29 = vpop.f32.mrf.mxu2  ;;  %v5024_v30 = vsel %vm4962_vm0, %v8622_v16, 0  ;;  %v10379_v16 = vld [vmem:[%s16134_s1 + $0xd40] sm:$0xf0]  ;;  %v9635_v3 = vld [vmem:[%s16134_s1 + $0x17dc] sm:$0xf0] }
 0x496   :  { %6039 = vmatpush.bf16.xpose.msra.mxu3 %v9526_v32  ;;  %v9326_v32 = vor.u32 %v10642_v23, %v9325_v18  ;;  %v8313_v18 = vld [vmem:[%s16134_s1 + $0xcd8] sm:$0xf]  ;;  %v10378_v23 = vld [vmem:[%s16134_s1 + $0xd38] sm:$0xf0]  ;;  %v8322_v29 = vor.u32 %v10379_v16, %v8321_v47  ;;  %v9641_v5 = vld [vmem:[%s16134_s1 + $0x1780] sm:$0xf] }
 0x497   :  { %v8314_v39 = vor.u32 %v10378_v23, %v8313_v18  ;;  %v10680_v16 = vld [vmem:[%s16134_s1 + $0x16ac] sm:$0xf]  ;;  %v9527_v18 = vld [vmem:[%s16134_s1 + $0x170c] sm:$0xf0] }
 0x498   :  { %v9533_v23 = vld [vmem:[%s16134_s1 + $0x16b0] sm:$0xf] }
 0x49c   :  { %6001 = vmatpush.bf16.xpose.msra.mxu0 %v8714_v15  ;;  %v9226_v15 = vor.u32 %v10617_v4, %v9225_v51  ;;  %v9741_v51 = vld [vmem:[%s16134_s1 + $0x1848] sm:$0xf]  ;;  %v10744_v4 = vld [vmem:[%s16134_s1 + $0x18a8] sm:$0xf0] }
 0x49d   :  { %6014 = vmatpush.bf16.xpose.msra.mxu1 %v8718_v57  ;;  %6027 = vmatpush.bf16.xpose.msra.mxu2 %v5027_v17  ;;  %v10404_v57 = vld [vmem:[%s16134_s1 + $0xe08] sm:$0xf0]  ;;  %v10403_v17 = vld [vmem:[%s16134_s1 + $0xe00] sm:$0xf0] }
 0x49e   :  { %6040 = vmatpush.bf16.xpose.msra.mxu3 %v9426_v58  ;;  %v10391_v58 = vld [vmem:[%s16134_s1 + $0xda4] sm:$0xf]  ;;  %v8422_v62 = vor.u32 %v10404_v57, %v8421_v54  ;;  %v8414_v13 = vor.u32 %v10403_v17, %v8413_v59  ;;  %v9738_v54 = vor.u32 %v10731_v63, %v9735_v44  ;;  %v9742_v57 = vor.u32 %v10744_v4, %v9741_v51  ;;  %v10705_v59 = vld [vmem:[%s16134_s1 + $0x1774] sm:$0xf]  ;;  %v9627_v17 = vld [vmem:[%s16134_s1 + $0x17d4] sm:$0xf0] }
 0x49f   :  { %v8418_v10 = vor.u32 %v10391_v58, %v8415_v61  ;;  %v9633_v58 = vld [vmem:[%s16134_s1 + $0x1778] sm:$0xf]  ;;  %v10718_v61 = vld [vmem:[%s16134_s1 + $0x17d8] sm:$0xf0]  ;;  %v9427_v51 = vld [vmem:[%s16134_s1 + $0x1644] sm:$0xf0] }
 0x4a0   :  { %v5018_v11 = vsel %vm4962_vm0, %v8422_v62, 0  ;;  %v10706_v62 = vld [vmem:[%s16134_s1 + $0x177c] sm:$0xf]  ;;  %v9433_v4 = vld [vmem:[%s16134_s1 + $0x15e8] sm:$0xf] }
 0x4a4   :  { %6002 = vmatpush.bf16.xpose.msra.mxu0 %v8614_v24  ;;  %v10366_v24 = vld [vmem:[%s16134_s1 + $0xcdc] sm:$0xf] }
 0x4a5   :  { %6015 = vmatpush.bf16.xpose.msra.mxu1 %v8618_v28  ;;  %6028 = vmatpush.bf16.xpose.msra.mxu2 %v5024_v30  ;;  %v8315_v28 = vld [vmem:[%s16134_s1 + $0xd3c] sm:$0xf0] }
 0x4a6   :  { %6041 = vmatpush.bf16.xpose.msra.mxu3 %v9326_v32  ;;  %v9025_v30 = vld [vmem:[%s16134_s1 + $0x12c0] sm:$0xf]  ;;  %v10567_v32 = vld [vmem:[%s16134_s1 + $0x1320] sm:$0xf0]  ;;  %v8318_v25 = vor.u32 %v10366_v24, %v8315_v28  ;;  %v10681_v24 = vld [vmem:[%s16134_s1 + $0x16b4] sm:$0xf] }
 0x4a7   :  { %v9535_v28 = vld [vmem:[%s16134_s1 + $0x1714] sm:$0xf0] }
 0x4ac   :  { %6003 = vmatpush.bf16.xpose.msra.mxu0 %v8514_v49  ;;  %v5015_v49 = vsel %vm4962_vm0, %v8322_v29, 0  ;;  %v9541_v29 = vld [vmem:[%s16134_s1 + $0x16b8] sm:$0xf] }
 0x4ad   :  { %6016 = vmatpush.bf16.xpose.msra.mxu1 %v8518_v50  ;;  %6029 = vmatpush.bf16.xpose.msra.mxu2 %v5021_v37  ;;  %v9026_v50 = vor.u32 %v10567_v32, %v9025_v30  ;;  %v9730_v37 = vor.u32 %v10730_v0, %v9727_v33  ;;  %v10694_v30 = vld [vmem:[%s16134_s1 + $0x1718] sm:$0xf0]  ;;  %v9530_v32 = vor.u32 %v10680_v16, %v9527_v18  ;;  %v10631_v16 = vld [vmem:[%s16134_s1 + $0x1524] sm:$0xf]  ;;  %v9335_v18 = vld [vmem:[%s16134_s1 + $0x1584] sm:$0xf0] }
 0x4ae   :  { %6042 = vmatpush.bf16.xpose.msra.mxu3 %v9226_v15  ;;  %v9734_v15 = vor.u32 %v10743_v42, %v9733_v34  ;;  %v9538_v33 = vor.u32 %v10681_v24, %v9535_v28  ;;  %v9542_v34 = vor.u32 %v10694_v30, %v9541_v29  ;;  %v9338_v29 = vor.u32 %v10631_v16, %v9335_v18  ;;  %v10568_v16 = vld [vmem:[%s16134_s1 + $0x1328] sm:$0xf0] }
 0x4af   :  { %v10556_v18 = vld [vmem:[%s16134_s1 + $0x12cc] sm:$0xf] }
 0x4b4   :  { %6004 = vmatpush.bf16.xpose.msra.mxu0 %v8414_v13  ;;  %v10719_v13 = vld [vmem:[%s16134_s1 + $0x17e0] sm:$0xf0] }
 0x4b5   :  { %6017 = vmatpush.bf16.xpose.msra.mxu1 %v8418_v10  ;;  %6030 = vmatpush.bf16.xpose.msra.mxu2 %v5018_v11  ;;  %v9630_v10 = vor.u32 %v10705_v59, %v9627_v17  ;;  %v9634_v11 = vor.u32 %v10718_v61, %v9633_v58  ;;  %v9642_v47 = vor.u32 %v10719_v13, %v9641_v5 }
 0x4b6   :  { %6043 = vmatpush.bf16.xpose.msra.mxu3 %v9126_v14  ;;  %v9638_v14 = vor.u32 %v10706_v62, %v9635_v3 }
 0x4bc   :  { %6005 = vmatpush.bf16.xpose.msra.mxu0 %v8314_v39 }
 0x4bd   :  { %6018 = vmatpush.bf16.xpose.msra.mxu1 %v8318_v25  ;;  %6031 = vmatpush.bf16.xpose.msra.mxu2 %v5015_v49  ;;  %v10655_v25 = vld [vmem:[%s16134_s1 + $0x15e4] sm:$0xf]  ;;  %v10656_v49 = vld [vmem:[%s16134_s1 + $0x15ec] sm:$0xf] }
 0x4be   :  { %6044 = vmatpush.bf16.xpose.msra.mxu3 %v9026_v50  ;;  %v9435_v50 = vld [vmem:[%s16134_s1 + $0x164c] sm:$0xf0] }
 0x4bf   :  { %v9438_v17 = vor.u32 %v10656_v49, %v9435_v50 }
 0x4c0   :  { %v5903_v39 = vpop.f32.mrf.mxu0 }
 0x4c1   :  { %v5904_v42 = vadd.f32 %v5903_v39, %v14620_v8  ;;  %v10668_v8 = vld [vmem:[%s16134_s1 + $0x1648] sm:$0xf0]  ;;  %v9233_v39 = vld [vmem:[%s16134_s1 + $0x1458] sm:$0xf] }
 0x4c2   :  { %v9434_v59 = vor.u32 %v10668_v8, %v9433_v4 }
 0x4c3   :  { %6006 = vmatmul.bf16.vlgmr.msra.gmra.mxu0 %v12116_v55  ;;  %v5916_v63 = vpop.f32.mrf.mxu1 }
 0x4c4   :  { %6050 = vmatpush.bf16.xpose.msrb.mxu0 %v9730_v37  ;;  %9825 = vmatmul.msk.bf16.vlgmr.msra.gmra.mxu2 %vm4962_vm0, %v12322_v45  ;;  %v5917_v44 = vadd.f32 %v5916_v63, %v5904_v42  ;;  %v9441_v37 = vld [vmem:[%s16134_s1 + $0x15f0] sm:$0xf]  ;;  %v10618_v42 = vld [vmem:[%s16134_s1 + $0x14b8] sm:$0xf0] }
 0x4c5   :  { %6063 = vmatpush.bf16.xpose.msrb.mxu1 %v9734_v15  ;;  %6076 = vmatpush.bf16.xpose.msrb.mxu2 %v9738_v54  ;;  %v10669_v15 = vld [vmem:[%s16134_s1 + $0x1650] sm:$0xf0]  ;;  %v9430_v54 = vor.u32 %v10655_v25, %v9427_v51  ;;  %v10606_v63 = vld [vmem:[%s16134_s1 + $0x145c] sm:$0xf]  ;;  %v9241_v25 = vld [vmem:[%s16134_s1 + $0x1460] sm:$0xf]  ;;  %v9234_v8 = vor.u32 %v10618_v42, %v9233_v39 }
 0x4c6   :  { %6089 = vmatpush.bf16.xpose.msrb.mxu3 %v9742_v57  ;;  %6019 = vmatmul.bf16.vlgmr.msra.gmra.mxu1 %v12129_v60  ;;  %v9442_v61 = vor.u32 %v10669_v15, %v9441_v37  ;;  %v10619_v51 = vld [vmem:[%s16134_s1 + $0x14c0] sm:$0xf0]  ;;  %v10580_v37 = vld [vmem:[%s16134_s1 + $0x138c] sm:$0xf]  ;;  %v9127_v15 = vld [vmem:[%s16134_s1 + $0x13ec] sm:$0xf0] }
 0x4c7   :  { %6045 = vmatmul.bf16.vlgmr.msra.gmra.mxu3 %v11120_v21  ;;  %v10693_v21 = vld [vmem:[%s16134_s1 + $0x1710] sm:$0xf0]  ;;  %v5929_v57 = vpop.f32.mrf.mxu2  ;;  %v9242_v50 = vor.u32 %v10619_v51, %v9241_v25 }
 0x4c8   :  { %v9534_v0 = vor.u32 %v10693_v21, %v9533_v23  ;;  %v5930_v58 = vadd.f32 %v5929_v57, %v5917_v44  ;;  %v5905_v3 = vpop.f32.mrf.mxu0  ;;  %v9341_v23 = vld [vmem:[%s16134_s1 + $0x1528] sm:$0xf]  ;;  %v10644_v21 = vld [vmem:[%s16134_s1 + $0x1588] sm:$0xf0]  ;;  %v9235_v44 = vld [vmem:[%s16134_s1 + $0x14bc] sm:$0xf0] }
 0x4c9   :  { %v9238_v49 = vor.u32 %v10606_v63, %v9235_v44  ;;  %v10593_v57 = vld [vmem:[%s16134_s1 + $0x13f0] sm:$0xf0]  ;;  %v9757_v63 = vld [vmem:[%s16134_s1 + $0x1858] sm:$0xf]  ;;  %v10746_v44 = vld [vmem:[%s16134_s1 + $0x18b8] sm:$0xf0] }
 0x4ca   :  { %v5942_v62 = vpop.f32.mrf.mxu3 }
 0x4cb   :  { %v5918_v5 = vpop.f32.mrf.mxu1  ;;  %v14818_v13 = vadd.f32 %v5942_v62, %v5930_v58  ;;  %v9141_v58 = vld [vmem:[%s16134_s1 + $0x1398] sm:$0xf]  ;;  %v9130_v62 = vor.u32 %v10580_v37, %v9127_v15  ;;  %v9643_v37 = vld [vmem:[%s16134_s1 + $0x17e4] sm:$0xf0] }
 0x4cc   :  { %6051 = vmatpush.bf16.xpose.msrb.mxu0 %v9630_v10  ;;  %v10630_v10 = vld [vmem:[%s16134_s1 + $0x151c] sm:$0xf]  ;;  %v9649_v15 = vld [vmem:[%s16134_s1 + $0x1788] sm:$0xf] }
 0x4cd   :  { %6064 = vmatpush.bf16.xpose.msrb.mxu1 %v9634_v11  ;;  %6077 = vmatpush.bf16.xpose.msrb.mxu2 %v9638_v14  ;;  %v9327_v11 = vld [vmem:[%s16134_s1 + $0x157c] sm:$0xf0] }
 0x4ce   :  { %6090 = vmatpush.bf16.xpose.msrb.mxu3 %v9642_v47  ;;  %v9333_v14 = vld [vmem:[%s16134_s1 + $0x1520] sm:$0xf]  ;;  %v10643_v47 = vld [vmem:[%s16134_s1 + $0x1580] sm:$0xf0]  ;;  %v9330_v24 = vor.u32 %v10630_v10, %v9327_v11 }
 0x4cf   :  { %v9334_v28 = vor.u32 %v10643_v47, %v9333_v14  ;;  %v5931_v30 = vpop.f32.mrf.mxu2  ;;  %v10555_v11 = vld [vmem:[%s16134_s1 + $0x12c4] sm:$0xf]  ;;  %v9027_v14 = vld [vmem:[%s16134_s1 + $0x1324] sm:$0xf0] }
 0x4d0   :  { %v9033_v47 = vld [vmem:[%s16134_s1 + $0x12c8] sm:$0xf]  ;;  %v9749_v30 = vld [vmem:[%s16134_s1 + $0x1850] sm:$0xf] }
 0x4d1   :  { %v9034_v39 = vor.u32 %v10568_v16, %v9033_v47  ;;  %v10696_v47 = vld [vmem:[%s16134_s1 + $0x1728] sm:$0xf0] }
 0x4d4   :  { %6052 = vmatpush.bf16.xpose.msrb.mxu0 %v9530_v32  ;;  %v9342_v32 = vor.u32 %v10644_v21, %v9341_v23  ;;  %v9035_v23 = vld [vmem:[%s16134_s1 + $0x132c] sm:$0xf0] }
 0x4d5   :  { %6065 = vmatpush.bf16.xpose.msrb.mxu1 %v9534_v0  ;;  %6078 = vmatpush.bf16.xpose.msrb.mxu2 %v9538_v33  ;;  %v5944_v0 = vpop.f32.mrf.mxu3  ;;  %v10605_v33 = vld [vmem:[%s16134_s1 + $0x1454] sm:$0xf]  ;;  %v9041_v21 = vld [vmem:[%s16134_s1 + $0x12d0] sm:$0xf]  ;;  %v9038_v42 = vor.u32 %v10556_v18, %v9035_v23 }
 0x4d6   :  { %6091 = vmatpush.bf16.xpose.msrb.mxu3 %v9542_v34  ;;  %v9227_v34 = vld [vmem:[%s16134_s1 + $0x14b4] sm:$0xf0]  ;;  %v10745_v0 = vld [vmem:[%s16134_s1 + $0x18b0] sm:$0xf0] }
 0x4d7   :  { %v9230_v4 = vor.u32 %v10605_v33, %v9227_v34  ;;  %v10733_v33 = vld [vmem:[%s16134_s1 + $0x1854] sm:$0xf]  ;;  %v9751_v34 = vld [vmem:[%s16134_s1 + $0x18b4] sm:$0xf0] }
 0x4dc   :  { %6053 = vmatpush.bf16.xpose.msrb.mxu0 %v9430_v54  ;;  %v9133_v54 = vld [vmem:[%s16134_s1 + $0x1390] sm:$0xf] }
 0x4dd   :  { %6066 = vmatpush.bf16.xpose.msrb.mxu1 %v9434_v59  ;;  %6079 = vmatpush.bf16.xpose.msrb.mxu2 %v9438_v17  ;;  %v10581_v59 = vld [vmem:[%s16134_s1 + $0x1394] sm:$0xf]  ;;  %v9135_v17 = vld [vmem:[%s16134_s1 + $0x13f4] sm:$0xf0]  ;;  %v9134_v3 = vor.u32 %v10593_v57, %v9133_v54  ;;  %v10720_v54 = vld [vmem:[%s16134_s1 + $0x17e8] sm:$0xf0] }
 0x4de   :  { %6092 = vmatpush.bf16.xpose.msrb.mxu3 %v9442_v61  ;;  %v10594_v61 = vld [vmem:[%s16134_s1 + $0x13f8] sm:$0xf0]  ;;  %v9138_v5 = vor.u32 %v10581_v59, %v9135_v17  ;;  %v10708_v57 = vld [vmem:[%s16134_s1 + $0x178c] sm:$0xf]  ;;  %v9651_v59 = vld [vmem:[%s16134_s1 + $0x17ec] sm:$0xf0] }
 0x4df   :  { %v9142_v10 = vor.u32 %v10594_v61, %v9141_v58  ;;  %v9657_v17 = vld [vmem:[%s16134_s1 + $0x1790] sm:$0xf]  ;;  %v10721_v58 = vld [vmem:[%s16134_s1 + $0x17f0] sm:$0xf0] }
 0x4e4   :  { %6054 = vmatpush.bf16.xpose.msrb.mxu0 %v9330_v24  ;;  %v10569_v24 = vld [vmem:[%s16134_s1 + $0x1330] sm:$0xf0] }
 0x4e5   :  { %6067 = vmatpush.bf16.xpose.msrb.mxu1 %v9334_v28  ;;  %6080 = vmatpush.bf16.xpose.msrb.mxu2 %v9338_v29  ;;  %v10732_v28 = vld [vmem:[%s16134_s1 + $0x184c] sm:$0xf]  ;;  %v9743_v29 = vld [vmem:[%s16134_s1 + $0x18ac] sm:$0xf0]  ;;  %v9042_v25 = vor.u32 %v10569_v24, %v9041_v21 }
 0x4e6   :  { %6093 = vmatpush.bf16.xpose.msrb.mxu3 %v9342_v32  ;;  %v9030_v32 = vor.u32 %v10555_v11, %v9027_v14  ;;  %v9746_v51 = vor.u32 %v10732_v28, %v9743_v29  ;;  %v9543_v11 = vld [vmem:[%s16134_s1 + $0x171c] sm:$0xf0]  ;;  %v9557_v14 = vld [vmem:[%s16134_s1 + $0x16c8] sm:$0xf] }
 0x4e7   :  { %v9558_v21 = vor.u32 %v10696_v47, %v9557_v14  ;;  %v10607_v14 = vld [vmem:[%s16134_s1 + $0x1464] sm:$0xf]  ;;  %v9243_v47 = vld [vmem:[%s16134_s1 + $0x14c4] sm:$0xf0] }
 0x4ec   :  { %6055 = vmatpush.bf16.xpose.msrb.mxu0 %v9230_v4  ;;  %v9750_v4 = vor.u32 %v10745_v0, %v9749_v30  ;;  %v9443_v0 = vld [vmem:[%s16134_s1 + $0x1654] sm:$0xf0] }
 0x4ed   :  { %6068 = vmatpush.bf16.xpose.msrb.mxu1 %v9234_v8  ;;  %6081 = vmatpush.bf16.xpose.msrb.mxu2 %v9238_v49  ;;  %v9754_v8 = vor.u32 %v10733_v33, %v9751_v34  ;;  %v9758_v49 = vor.u32 %v10746_v44, %v9757_v63  ;;  %v9449_v33 = vld [vmem:[%s16134_s1 + $0x15f8] sm:$0xf]  ;;  %v10658_v34 = vld [vmem:[%s16134_s1 + $0x15fc] sm:$0xf]  ;;  %v10671_v63 = vld [vmem:[%s16134_s1 + $0x1660] sm:$0xf0] }
 0x4ee   :  { %6094 = vmatpush.bf16.xpose.msrb.mxu3 %v9242_v50  ;;  %v10707_v50 = vld [vmem:[%s16134_s1 + $0x1784] sm:$0xf] }
 0x4ef   :  { %v9646_v61 = vor.u32 %v10707_v50, %v9643_v37 }
 0x4f4   :  { %6056 = vmatpush.bf16.xpose.msrb.mxu0 %v9130_v62  ;;  %v9650_v62 = vor.u32 %v10720_v54, %v9649_v15 }
 0x4f5   :  { %6069 = vmatpush.bf16.xpose.msrb.mxu1 %v9134_v3  ;;  %6082 = vmatpush.bf16.xpose.msrb.mxu2 %v9138_v5  ;;  %v9654_v3 = vor.u32 %v10708_v57, %v9651_v59  ;;  %v9658_v5 = vor.u32 %v10721_v58, %v9657_v17  ;;  %v10632_v57 = vld [vmem:[%s16134_s1 + $0x152c] sm:$0xf]  ;;  %v9343_v59 = vld [vmem:[%s16134_s1 + $0x158c] sm:$0xf0]  ;;  %v10645_v58 = vld [vmem:[%s16134_s1 + $0x1590] sm:$0xf0] }
 0x4f6   :  { %6095 = vmatpush.bf16.xpose.msrb.mxu3 %v9142_v10  ;;  %v10682_v10 = vld [vmem:[%s16134_s1 + $0x16bc] sm:$0xf]  ;;  %v9349_v17 = vld [vmem:[%s16134_s1 + $0x1530] sm:$0xf] }
 0x4f7   :  { %v9546_v16 = vor.u32 %v10682_v10, %v9543_v11  ;;  %v9346_v10 = vor.u32 %v10632_v57, %v9343_v59  ;;  %v9350_v11 = vor.u32 %v10645_v58, %v9349_v17  ;;  %v10570_v57 = vld [vmem:[%s16134_s1 + $0x1338] sm:$0xf0]  ;;  %v9051_v17 = vld [vmem:[%s16134_s1 + $0x133c] sm:$0xf0] }
 0x4f8   :  { %v10558_v59 = vld [vmem:[%s16134_s1 + $0x12dc] sm:$0xf]  ;;  %v9057_v58 = vld [vmem:[%s16134_s1 + $0x12e0] sm:$0xf] }
 0x4fc   :  { %6057 = vmatpush.bf16.xpose.msrb.mxu0 %v9030_v32  ;;  %v10657_v32 = vld [vmem:[%s16134_s1 + $0x15f4] sm:$0xf] }
 0x4fd   :  { %6070 = vmatpush.bf16.xpose.msrb.mxu1 %v9034_v39  ;;  %6083 = vmatpush.bf16.xpose.msrb.mxu2 %v9038_v42  ;;  %v9451_v39 = vld [vmem:[%s16134_s1 + $0x165c] sm:$0xf0]  ;;  %v9446_v44 = vor.u32 %v10657_v32, %v9443_v0 }
 0x4fe   :  { %6096 = vmatpush.bf16.xpose.msrb.mxu3 %v9042_v25  ;;  %v9457_v42 = vld [vmem:[%s16134_s1 + $0x1600] sm:$0xf] }
 0x500   :  { %v5955_v24 = vpop.f32.mrf.mxu0 }
 0x501   :  { %v5956_v28 = vadd.f32 %v5955_v24, %v14818_v13  ;;  %v10670_v13 = vld [vmem:[%s16134_s1 + $0x1658] sm:$0xf0]  ;;  %v9257_v24 = vld [vmem:[%s16134_s1 + $0x1470] sm:$0xf] }
 0x503   :  { %6058 = vmatmul.bf16.vlgmr.msrb.gmra.mxu0 %v11122_v22  ;;  %v10683_v22 = vld [vmem:[%s16134_s1 + $0x16c4] sm:$0xf]  ;;  %v5968_v29 = vpop.f32.mrf.mxu1 }
 0x504   :  { %6102 = vmatpush.bf16.xpose.msra.mxu0 %v9746_v51  ;;  %6084 = vmatmul.bf16.vlgmr.msrb.gmra.mxu2 %v11118_v19  ;;  %v9549_v19 = vld [vmem:[%s16134_s1 + $0x16c0] sm:$0xf]  ;;  %v5969_v30 = vadd.f32 %v5968_v29, %v5956_v28  ;;  %v9450_v51 = vor.u32 %v10670_v13, %v9449_v33  ;;  %v10621_v28 = vld [vmem:[%s16134_s1 + $0x14d0] sm:$0xf0]  ;;  %v9246_v29 = vor.u32 %v10607_v14, %v9243_v47  ;;  %v10582_v33 = vld [vmem:[%s16134_s1 + $0x139c] sm:$0xf] }
 0x505   :  { %6115 = vmatpush.bf16.xpose.msra.mxu1 %v9750_v4  ;;  %6128 = vmatpush.bf16.xpose.msra.mxu2 %v9754_v8  ;;  %v9454_v4 = vor.u32 %v10658_v34, %v9451_v39  ;;  %v9258_v0 = vor.u32 %v10621_v28, %v9257_v24  ;;  %v9143_v13 = vld [vmem:[%s16134_s1 + $0x13fc] sm:$0xf0]  ;;  %v10595_v39 = vld [vmem:[%s16134_s1 + $0x1400] sm:$0xf0]  ;;  %v9773_v14 = vld [vmem:[%s16134_s1 + $0x1868] sm:$0xf] }
 0x506   :  { %6141 = vmatpush.bf16.xpose.msra.mxu3 %v9758_v49  ;;  %6071 = vmatmul.bf16.vlgmr.msrb.gmra.mxu1 %v11097_v9  ;;  %v10695_v9 = vld [vmem:[%s16134_s1 + $0x1720] sm:$0xf0]  ;;  %v9458_v49 = vor.u32 %v10671_v63, %v9457_v42  ;;  %v9149_v34 = vld [vmem:[%s16134_s1 + $0x13a0] sm:$0xf]  ;;  %v9151_v63 = vld [vmem:[%s16134_s1 + $0x1404] sm:$0xf0] }
 0x507   :  { %6097 = vmatmul.bf16.vlgmr.msrb.gmra.mxu3 %v11262_v35  ;;  %v9551_v35 = vld [vmem:[%s16134_s1 + $0x1724] sm:$0xf0]  ;;  %v9550_v18 = vor.u32 %v10695_v9, %v9549_v19  ;;  %v5981_v25 = vpop.f32.mrf.mxu2  ;;  %v10583_v42 = vld [vmem:[%s16134_s1 + $0x13a4] sm:$0xf]  ;;  %v10748_v47 = vld [vmem:[%s16134_s1 + $0x18c8] sm:$0xf0] }
 0x508   :  { %v9554_v23 = vor.u32 %v10683_v22, %v9551_v35  ;;  %v5982_v8 = vadd.f32 %v5981_v25, %v5969_v30  ;;  %v5957_v37 = vpop.f32.mrf.mxu0  ;;  %v10596_v25 = vld [vmem:[%s16134_s1 + $0x1408] sm:$0xf0]  ;;  %v9774_v24 = vor.u32 %v10748_v47, %v9773_v14  ;;  %v10709_v28 = vld [vmem:[%s16134_s1 + $0x1794] sm:$0xf] }
 0x509   :  { %v9043_v37 = vld [vmem:[%s16134_s1 + $0x1334] sm:$0xf0] }
 0x50a   :  { %v5994_v50 = vpop.f32.mrf.mxu3 }
 0x50b   :  { %v5970_v15 = vpop.f32.mrf.mxu1  ;;  %v15017_v54 = vadd.f32 %v5994_v50, %v5982_v8  ;;  %v9154_v8 = vor.u32 %v10583_v42, %v9151_v63  ;;  %v10557_v50 = vld [vmem:[%s16134_s1 + $0x12d4] sm:$0xf] }
 0x50c   :  { %6103 = vmatpush.bf16.xpose.msra.mxu0 %v9646_v61  ;;  %v10633_v61 = vld [vmem:[%s16134_s1 + $0x1534] sm:$0xf]  ;;  %v9049_v15 = vld [vmem:[%s16134_s1 + $0x12d8] sm:$0xf] }
 0x50d   :  { %6116 = vmatpush.bf16.xpose.msra.mxu1 %v9650_v62  ;;  %6129 = vmatpush.bf16.xpose.msra.mxu2 %v9654_v3  ;;  %v9351_v62 = vld [vmem:[%s16134_s1 + $0x1594] sm:$0xf0] }
 0x50e   :  { %6142 = vmatpush.bf16.xpose.msra.mxu3 %v9658_v5  ;;  %v9357_v3 = vld [vmem:[%s16134_s1 + $0x1538] sm:$0xf]  ;;  %v10646_v5 = vld [vmem:[%s16134_s1 + $0x1598] sm:$0xf0]  ;;  %v9354_v19 = vor.u32 %v10633_v61, %v9351_v62  ;;  %v10571_v61 = vld [vmem:[%s16134_s1 + $0x1340] sm:$0xf0] }
 0x50f   :  { %v5983_v9 = vpop.f32.mrf.mxu2  ;;  %v9358_v22 = vor.u32 %v10646_v5, %v9357_v3  ;;  %v10734_v62 = vld [vmem:[%s16134_s1 + $0x185c] sm:$0xf]  ;;  %v9759_v3 = vld [vmem:[%s16134_s1 + $0x18bc] sm:$0xf0] }
 0x510   :  { %v9765_v5 = vld [vmem:[%s16134_s1 + $0x1860] sm:$0xf]  ;;  %v9767_v9 = vld [vmem:[%s16134_s1 + $0x18c4] sm:$0xf0] }
 0x512   :  { %v5996_v35 = vpop.f32.mrf.mxu3 }
 0x513   :  { %v9054_v35 = vor.u32 %v10558_v59, %v9051_v17 }
 0x514   :  { %6104 = vmatpush.bf16.xpose.msra.mxu0 %v9546_v16  ;;  %v9249_v16 = vld [vmem:[%s16134_s1 + $0x1468] sm:$0xf] }
 0x515   :  { %6117 = vmatpush.bf16.xpose.msra.mxu1 %v9550_v18  ;;  %6130 = vmatpush.bf16.xpose.msra.mxu2 %v9554_v23  ;;  %v10620_v18 = vld [vmem:[%s16134_s1 + $0x14c8] sm:$0xf0] }
 0x516   :  { %6143 = vmatpush.bf16.xpose.msra.mxu3 %v9558_v21  ;;  %v10608_v23 = vld [vmem:[%s16134_s1 + $0x146c] sm:$0xf]  ;;  %v9251_v21 = vld [vmem:[%s16134_s1 + $0x14cc] sm:$0xf0]  ;;  %v9250_v30 = vor.u32 %v10620_v18, %v9249_v16  ;;  %v9058_v16 = vor.u32 %v10571_v61, %v9057_v58  ;;  %v9762_v18 = vor.u32 %v10734_v62, %v9759_v3  ;;  %v10659_v61 = vld [vmem:[%s16134_s1 + $0x1604] sm:$0xf] }
 0x517   :  { %v9254_v32 = vor.u32 %v10608_v23, %v9251_v21  ;;  %v9459_v62 = vld [vmem:[%s16134_s1 + $0x1664] sm:$0xf0] }
 0x518   :  { %v9465_v3 = vld [vmem:[%s16134_s1 + $0x1608] sm:$0xf] }
 0x51c   :  { %6105 = vmatpush.bf16.xpose.msra.mxu0 %v9446_v44  ;;  %v9157_v44 = vld [vmem:[%s16134_s1 + $0x13a8] sm:$0xf] }
 0x51d   :  { %6118 = vmatpush.bf16.xpose.msra.mxu1 %v9450_v51  ;;  %6131 = vmatpush.bf16.xpose.msra.mxu2 %v9454_v4  ;;  %v9146_v51 = vor.u32 %v10582_v33, %v9143_v13  ;;  %v9150_v4 = vor.u32 %v10595_v39, %v9149_v34  ;;  %v9667_v33 = vld [vmem:[%s16134_s1 + $0x17fc] sm:$0xf0]  ;;  %v10723_v34 = vld [vmem:[%s16134_s1 + $0x1800] sm:$0xf0] }
 0x51e   :  { %6144 = vmatpush.bf16.xpose.msra.mxu3 %v9458_v49  ;;  %v9158_v49 = vor.u32 %v10596_v25, %v9157_v44  ;;  %v9673_v13 = vld [vmem:[%s16134_s1 + $0x17a0] sm:$0xf]  ;;  %v10684_v25 = vld [vmem:[%s16134_s1 + $0x16cc] sm:$0xf] }
 0x51f   :  { %v9674_v44 = vor.u32 %v10723_v34, %v9673_v13 }
 0x524   :  { %6106 = vmatpush.bf16.xpose.msra.mxu0 %v9346_v10  ;;  %v9046_v10 = vor.u32 %v10557_v50, %v9043_v37 }
 0x525   :  { %6119 = vmatpush.bf16.xpose.msra.mxu1 %v9350_v11  ;;  %6132 = vmatpush.bf16.xpose.msra.mxu2 %v9354_v19  ;;  %v10747_v11 = vld [vmem:[%s16134_s1 + $0x18c0] sm:$0xf0] }
 0x526   :  { %6145 = vmatpush.bf16.xpose.msra.mxu3 %v9358_v22  ;;  %v10735_v19 = vld [vmem:[%s16134_s1 + $0x1864] sm:$0xf]  ;;  %v9050_v22 = vor.u32 %v10570_v57, %v9049_v15  ;;  %v9766_v23 = vor.u32 %v10747_v11, %v9765_v5  ;;  %v10660_v5 = vld [vmem:[%s16134_s1 + $0x160c] sm:$0xf]  ;;  %v9473_v11 = vld [vmem:[%s16134_s1 + $0x1610] sm:$0xf] }
 0x527   :  { %v9770_v21 = vor.u32 %v10735_v19, %v9767_v9  ;;  %v10673_v19 = vld [vmem:[%s16134_s1 + $0x1670] sm:$0xf0]  ;;  %v9462_v9 = vor.u32 %v10659_v61, %v9459_v62  ;;  %v9167_v62 = vld [vmem:[%s16134_s1 + $0x1414] sm:$0xf0] }
 0x528   :  { %v10585_v61 = vld [vmem:[%s16134_s1 + $0x13b4] sm:$0xf] }
 0x52c   :  { %6107 = vmatpush.bf16.xpose.msra.mxu0 %v9246_v29  ;;  %v9659_v29 = vld [vmem:[%s16134_s1 + $0x17f4] sm:$0xf0] }
 0x52d   :  { %6120 = vmatpush.bf16.xpose.msra.mxu1 %v9250_v30  ;;  %6133 = vmatpush.bf16.xpose.msra.mxu2 %v9254_v32  ;;  %v9665_v30 = vld [vmem:[%s16134_s1 + $0x1798] sm:$0xf]  ;;  %v10722_v32 = vld [vmem:[%s16134_s1 + $0x17f8] sm:$0xf0]  ;;  %v9662_v39 = vor.u32 %v10709_v28, %v9659_v29  ;;  %v9365_v28 = vld [vmem:[%s16134_s1 + $0x1540] sm:$0xf] }
 0x52e   :  { %6146 = vmatpush.bf16.xpose.msra.mxu3 %v9258_v0  ;;  %v10710_v0 = vld [vmem:[%s16134_s1 + $0x179c] sm:$0xf]  ;;  %v9666_v42 = vor.u32 %v10722_v32, %v9665_v30  ;;  %v10647_v29 = vld [vmem:[%s16134_s1 + $0x15a0] sm:$0xf0]  ;;  %v9367_v32 = vld [vmem:[%s16134_s1 + $0x15a4] sm:$0xf0] }
 0x52f   :  { %v9670_v63 = vor.u32 %v10710_v0, %v9667_v33  ;;  %v10635_v30 = vld [vmem:[%s16134_s1 + $0x1544] sm:$0xf]  ;;  %v9373_v0 = vld [vmem:[%s16134_s1 + $0x1548] sm:$0xf]  ;;  %v10648_v33 = vld [vmem:[%s16134_s1 + $0x15a8] sm:$0xf0]  ;;  %v9366_v34 = vor.u32 %v10647_v29, %v9365_v28 }
 0x530   :  { %v10736_v28 = vld [vmem:[%s16134_s1 + $0x186c] sm:$0xf]  ;;  %v9775_v29 = vld [vmem:[%s16134_s1 + $0x18cc] sm:$0xf0] }
 0x534   :  { %6108 = vmatpush.bf16.xpose.msra.mxu0 %v9146_v51  ;;  %v9567_v51 = vld [vmem:[%s16134_s1 + $0x1734] sm:$0xf0] }
 0x535   :  { %6121 = vmatpush.bf16.xpose.msra.mxu1 %v9150_v4  ;;  %6134 = vmatpush.bf16.xpose.msra.mxu2 %v9154_v8  ;;  %v9573_v4 = vld [vmem:[%s16134_s1 + $0x16d8] sm:$0xf]  ;;  %v10698_v8 = vld [vmem:[%s16134_s1 + $0x1738] sm:$0xf0] }
 0x536   :  { %6147 = vmatpush.bf16.xpose.msra.mxu3 %v9158_v49  ;;  %v9574_v15 = vor.u32 %v10698_v8, %v9573_v4  ;;  %v10623_v4 = vld [vmem:[%s16134_s1 + $0x14e0] sm:$0xf0] }
 0x53c   :  { %6109 = vmatpush.bf16.xpose.msra.mxu0 %v9046_v10  ;;  %v9467_v10 = vld [vmem:[%s16134_s1 + $0x166c] sm:$0xf0] }
 0x53d   :  { %6122 = vmatpush.bf16.xpose.msra.mxu1 %v9050_v22  ;;  %6135 = vmatpush.bf16.xpose.msra.mxu2 %v9054_v35  ;;  %v9470_v14 = vor.u32 %v10660_v5, %v9467_v10 }
 0x53e   :  { %6148 = vmatpush.bf16.xpose.msra.mxu3 %v9058_v16  ;;  %v9474_v16 = vor.u32 %v10673_v19, %v9473_v11  ;;  %v9170_v19 = vor.u32 %v10585_v61, %v9167_v62  ;;  %v10790_v62 = vld [vmem:[%s16136_s2] sm:$0xf] }
 0x540   :  { %v6007_v57 = vpop.f32.mrf.mxu0 }
 0x541   :  { %v6008_v59 = vadd.f32 %v6007_v57, %v15017_v54  ;;  %v10672_v54 = vld [vmem:[%s16134_s1 + $0x1668] sm:$0xf0] }
 0x542   :  { %v9466_v35 = vor.u32 %v10672_v54, %v9465_v3  ;;  %v10584_v57 = vld [vmem:[%s16134_s1 + $0x13ac] sm:$0xf]  ;;  %v9173_v3 = vld [vmem:[%s16134_s1 + $0x13b8] sm:$0xf]  ;;  %v10598_v54 = vld [vmem:[%s16134_s1 + $0x1418] sm:$0xf0] }
 0x543   :  { %6110 = vmatmul.bf16.vlgmr.msra.gmra.mxu0 %v11275_v40  ;;  %v9559_v40 = vld [vmem:[%s16134_s1 + $0x172c] sm:$0xf0]  ;;  %v6020_v17 = vpop.f32.mrf.mxu1 }
 0x544   :  { %6154 = vmatpush.bf16.xpose.msrb.mxu0 %v9762_v18  ;;  %6136 = vmatmul.bf16.vlgmr.msra.gmra.mxu2 %v11283_v43  ;;  %v9565_v43 = vld [vmem:[%s16134_s1 + $0x16d0] sm:$0xf]  ;;  %v9562_v49 = vor.u32 %v10684_v25, %v9559_v40  ;;  %v6021_v58 = vadd.f32 %v6020_v17, %v6008_v59  ;;  %v9259_v25 = vld [vmem:[%s16134_s1 + $0x14d4] sm:$0xf0] }
 0x545   :  { %6167 = vmatpush.bf16.xpose.msrb.mxu1 %v9766_v23  ;;  %6180 = vmatpush.bf16.xpose.msrb.mxu2 %v9770_v21  ;;  %v10634_v21 = vld [vmem:[%s16134_s1 + $0x153c] sm:$0xf]  ;;  %v9265_v40 = vld [vmem:[%s16134_s1 + $0x1478] sm:$0xf]  ;;  %v9159_v59 = vld [vmem:[%s16134_s1 + $0x140c] sm:$0xf0] }
 0x546   :  { %6193 = vmatpush.bf16.xpose.msrb.mxu3 %v9774_v24  ;;  %6123 = vmatmul.bf16.vlgmr.msra.gmra.mxu1 %v11264_v36  ;;  %v10697_v36 = vld [vmem:[%s16134_s1 + $0x1730] sm:$0xf0]  ;;  %v9359_v24 = vld [vmem:[%s16134_s1 + $0x159c] sm:$0xf0]  ;;  %v9165_v17 = vld [vmem:[%s16134_s1 + $0x13b0] sm:$0xf]  ;;  %v9162_v5 = vor.u32 %v10584_v57, %v9159_v59 }
 0x547   :  { %6149 = vmatmul.bf16.vlgmr.msra.gmra.mxu3 %v11463_v20  ;;  %v10685_v20 = vld [vmem:[%s16134_s1 + $0x16d4] sm:$0xf]  ;;  %v9566_v50 = vor.u32 %v10697_v36, %v9565_v43  ;;  %v6033_v22 = vpop.f32.mrf.mxu2  ;;  %v9362_v13 = vor.u32 %v10634_v21, %v9359_v24  ;;  %v10622_v43 = vld [vmem:[%s16134_s1 + $0x14d8] sm:$0xf0]  ;;  %v9073_v21 = vld [vmem:[%s16134_s1 + $0x12f0] sm:$0xf] }
 0x548   :  { %v9570_v37 = vor.u32 %v10685_v20, %v9567_v51  ;;  %v15216_v47 = vadd.f32 %v6033_v22, %v6021_v58  ;;  %v6009_v18 = vpop.f32.mrf.mxu0  ;;  %v10610_v36 = vld [vmem:[%s16134_s1 + $0x147c] sm:$0xf]  ;;  %v9267_v20 = vld [vmem:[%s16134_s1 + $0x14dc] sm:$0xf0]  ;;  %v10597_v58 = vld [vmem:[%s16134_s1 + $0x1410] sm:$0xf0] }
 0x549   :  { %v9273_v51 = vld [vmem:[%s16134_s1 + $0x1480] sm:$0xf]  ;;  %v9166_v11 = vor.u32 %v10597_v58, %v9165_v17  ;;  %v10559_v22 = vld [vmem:[%s16134_s1 + $0x12e4] sm:$0xf]  ;;  %v10560_v18 = vld [vmem:[%s16134_s1 + $0x12ec] sm:$0xf] }
 0x54a   :  { %v10573_v24 = vld [vmem:[%s16134_s1 + $0x1350] sm:$0xf0] }
 0x54b   :  { %v6022_v23 = vpop.f32.mrf.mxu1  ;;  %v10725_v57 = vld [vmem:[%s16134_s1 + $0x1810] sm:$0xf0] }
 0x54c   :  { %6155 = vmatpush.bf16.xpose.msrb.mxu0 %v9662_v39  ;;  %v9370_v39 = vor.u32 %v10635_v30, %v9367_v32  ;;  %v9067_v23 = vld [vmem:[%s16134_s1 + $0x134c] sm:$0xf0] }
 0x54d   :  { %6168 = vmatpush.bf16.xpose.msrb.mxu1 %v9666_v42  ;;  %6181 = vmatpush.bf16.xpose.msrb.mxu2 %v9670_v63  ;;  %v9374_v63 = vor.u32 %v10648_v33, %v9373_v0  ;;  %v9781_v30 = vld [vmem:[%s16134_s1 + $0x1870] sm:$0xf]  ;;  %v10749_v0 = vld [vmem:[%s16134_s1 + $0x18d0] sm:$0xf0] }
 0x54e   :  { %6194 = vmatpush.bf16.xpose.msrb.mxu3 %v9674_v44  ;;  %v10609_v44 = vld [vmem:[%s16134_s1 + $0x1474] sm:$0xf] }
 0x54f   :  { %v6035_v42 = vpop.f32.mrf.mxu2  ;;  %v9262_v8 = vor.u32 %v10609_v44, %v9259_v25  ;;  %v10737_v33 = vld [vmem:[%s16134_s1 + $0x1874] sm:$0xf]  ;;  %v9074_v44 = vor.u32 %v10573_v24, %v9073_v21  ;;  %v9778_v25 = vor.u32 %v10736_v28, %v9775_v29  ;;  %v9475_v24 = vld [vmem:[%s16134_s1 + $0x1674] sm:$0xf0]  ;;  %v10674_v29 = vld [vmem:[%s16134_s1 + $0x1678] sm:$0xf0] }
 0x550   :  { %v9789_v42 = vld [vmem:[%s16134_s1 + $0x1878] sm:$0xf] }
 0x551   :  { %v9481_v28 = vld [vmem:[%s16134_s1 + $0x1618] sm:$0xf] }
 0x554   :  { %6156 = vmatpush.bf16.xpose.msrb.mxu0 %v9562_v49  ;;  %v15266_v49 = vpop.f32.mrf.mxu3 }
 0x555   :  { %6169 = vmatpush.bf16.xpose.msrb.mxu1 %v9566_v50  ;;  %6182 = vmatpush.bf16.xpose.msrb.mxu2 %v9570_v37  ;;  %v9266_v50 = vor.u32 %v10622_v43, %v9265_v40  ;;  %v9270_v37 = vor.u32 %v10610_v36, %v9267_v20  ;;  %v9782_v40 = vor.u32 %v10749_v0, %v9781_v30  ;;  %v10711_v20 = vld [vmem:[%s16134_s1 + $0x17a4] sm:$0xf]  ;;  %v10662_v30 = vld [vmem:[%s16134_s1 + $0x161c] sm:$0xf]  ;;  %v9489_v0 = vld [vmem:[%s16134_s1 + $0x1620] sm:$0xf] }
 0x556   :  { %6195 = vmatpush.bf16.xpose.msrb.mxu3 %v9574_v15  ;;  %v9274_v15 = vor.u32 %v10623_v4, %v9273_v51  ;;  %v9675_v51 = vld [vmem:[%s16134_s1 + $0x1804] sm:$0xf0] }
 0x557   :  { %v9681_v4 = vld [vmem:[%s16134_s1 + $0x17a8] sm:$0xf]  ;;  %v9678_v59 = vor.u32 %v10711_v20, %v9675_v51  ;;  %v10636_v20 = vld [vmem:[%s16134_s1 + $0x154c] sm:$0xf]  ;;  %v9375_v51 = vld [vmem:[%s16134_s1 + $0x15ac] sm:$0xf0] }
 0x55c   :  { %6157 = vmatpush.bf16.xpose.msrb.mxu0 %v9462_v9  ;;  %v6048_v10 = vpop.f32.mrf.mxu3  ;;  %v9174_v9 = vor.u32 %v10598_v54, %v9173_v3  ;;  %v870_v3 = vperm.slane %v10790_v62, 3  ;;  %v10687_v54 = vld [vmem:[%s16134_s1 + $0x16e4] sm:$0xf] }
 0x55d   :  { %6170 = vmatpush.bf16.xpose.msrb.mxu1 %v9466_v35  ;;  %6183 = vmatpush.bf16.xpose.msrb.mxu2 %v9470_v14  ;;  %v9059_v35 = vld [vmem:[%s16134_s1 + $0x1344] sm:$0xf0] }
 0x55e   :  { %6196 = vmatpush.bf16.xpose.msrb.mxu3 %v9474_v16  ;;  %v9065_v14 = vld [vmem:[%s16134_s1 + $0x12e8] sm:$0xf]  ;;  %v10572_v16 = vld [vmem:[%s16134_s1 + $0x1348] sm:$0xf0]  ;;  %v9062_v32 = vor.u32 %v10559_v22, %v9059_v35  ;;  %v6047_v10 = vadd.f32 %v15266_v49, %v870_v3  ;;  %v10661_v49 = vld [vmem:[%s16134_s1 + $0x1614] sm:$0xf] }
 0x564   :  { %6158 = vmatpush.bf16.xpose.msrb.mxu0 %v9362_v13  ;;  %v9783_v13 = vld [vmem:[%s16134_s1 + $0x18d4] sm:$0xf0] }
 0x565   :  { %6171 = vmatpush.bf16.xpose.msrb.mxu1 %v9366_v34  ;;  %6184 = vmatpush.bf16.xpose.msrb.mxu2 %v9370_v39  ;;  %v9066_v34 = vor.u32 %v10572_v16, %v9065_v14  ;;  %v9070_v39 = vor.u32 %v10560_v18, %v9067_v23  ;;  %v9786_v43 = vor.u32 %v10737_v33, %v9783_v13  ;;  %v10675_v33 = vld [vmem:[%s16134_s1 + $0x1680] sm:$0xf0] }
 0x566   :  { %6197 = vmatpush.bf16.xpose.msrb.mxu3 %v9374_v63  ;;  %v10750_v63 = vld [vmem:[%s16134_s1 + $0x18d8] sm:$0xf0]  ;;  %v9478_v13 = vor.u32 %v10661_v49, %v9475_v24  ;;  %v9183_v49 = vld [vmem:[%s16134_s1 + $0x1424] sm:$0xf0] }
 0x567   :  { %v9790_v36 = vor.u32 %v10750_v63, %v9789_v42  ;;  %v9490_v63 = vor.u32 %v10675_v33, %v9489_v0  ;;  %v9189_v24 = vld [vmem:[%s16134_s1 + $0x13c8] sm:$0xf]  ;;  %v10561_v33 = vld [vmem:[%s16134_s1 + $0x12f4] sm:$0xf] }
 0x56c   :  { %6159 = vmatpush.bf16.xpose.msrb.mxu0 %v9262_v8  ;;  %v10724_v8 = vld [vmem:[%s16134_s1 + $0x1808] sm:$0xf0] }
 0x56d   :  { %6172 = vmatpush.bf16.xpose.msrb.mxu1 %v9266_v50  ;;  %6185 = vmatpush.bf16.xpose.msrb.mxu2 %v9270_v37  ;;  %v10712_v50 = vld [vmem:[%s16134_s1 + $0x17ac] sm:$0xf]  ;;  %v9683_v37 = vld [vmem:[%s16134_s1 + $0x180c] sm:$0xf0]  ;;  %v9682_v17 = vor.u32 %v10724_v8, %v9681_v4  ;;  %v10649_v8 = vld [vmem:[%s16134_s1 + $0x15b0] sm:$0xf0] }
 0x56e   :  { %6198 = vmatpush.bf16.xpose.msrb.mxu3 %v9274_v15  ;;  %v9689_v15 = vld [vmem:[%s16134_s1 + $0x17b0] sm:$0xf]  ;;  %v9686_v58 = vor.u32 %v10712_v50, %v9683_v37  ;;  %v10637_v50 = vld [vmem:[%s16134_s1 + $0x1554] sm:$0xf]  ;;  %v9383_v37 = vld [vmem:[%s16134_s1 + $0x15b4] sm:$0xf0] }
 0x56f   :  { %v9690_v61 = vor.u32 %v10725_v57, %v9689_v15  ;;  %v9381_v4 = vld [vmem:[%s16134_s1 + $0x1550] sm:$0xf]  ;;  %v9389_v15 = vld [vmem:[%s16134_s1 + $0x1558] sm:$0xf]  ;;  %v10650_v57 = vld [vmem:[%s16134_s1 + $0x15b8] sm:$0xf0] }
 0x570   :  { %v9390_v62 = vor.u32 %v10650_v57, %v9389_v15  ;;  %v9805_v57 = vld [vmem:[%s16134_s1 + $0x1888] sm:$0xf] }
 0x574   :  { %6160 = vmatpush.bf16.xpose.msrb.mxu0 %v9162_v5  ;;  %v9583_v5 = vld [vmem:[%s16134_s1 + $0x1744] sm:$0xf0] }
 0x575   :  { %6173 = vmatpush.bf16.xpose.msrb.mxu1 %v9166_v11  ;;  %6186 = vmatpush.bf16.xpose.msrb.mxu2 %v9170_v19  ;;  %v9589_v11 = vld [vmem:[%s16134_s1 + $0x16e8] sm:$0xf]  ;;  %v10700_v19 = vld [vmem:[%s16134_s1 + $0x1748] sm:$0xf0]  ;;  %v9586_v35 = vor.u32 %v10687_v54, %v9583_v5  ;;  %v9283_v5 = vld [vmem:[%s16134_s1 + $0x14ec] sm:$0xf0] }
 0x576   :  { %6199 = vmatpush.bf16.xpose.msrb.mxu3 %v9174_v9  ;;  %v9590_v14 = vor.u32 %v10700_v19, %v9589_v11  ;;  %v10612_v54 = vld [vmem:[%s16134_s1 + $0x148c] sm:$0xf]  ;;  %v10625_v11 = vld [vmem:[%s16134_s1 + $0x14f0] sm:$0xf0] }
 0x57c   :  { %6161 = vmatpush.bf16.xpose.msrb.mxu0 %v9062_v32  ;;  %v9483_v32 = vld [vmem:[%s16134_s1 + $0x167c] sm:$0xf0] }
 0x57d   :  { %6174 = vmatpush.bf16.xpose.msrb.mxu1 %v9066_v34  ;;  %6187 = vmatpush.bf16.xpose.msrb.mxu2 %v9070_v39  ;;  %v9482_v34 = vor.u32 %v10674_v29, %v9481_v28  ;;  %v9486_v39 = vor.u32 %v10662_v30, %v9483_v32  ;;  %v10600_v28 = vld [vmem:[%s16134_s1 + $0x1428] sm:$0xf0] }
 0x57e   :  { %6200 = vmatpush.bf16.xpose.msrb.mxu3 %v9074_v44  ;;  %v9190_v0 = vor.u32 %v10600_v28, %v9189_v24 }
 0x580   :  { %v6059_v16 = vpop.f32.mrf.mxu0 }
 0x581   :  { %v6060_v18 = vadd.f32 %v6059_v16, %v6047_v10  ;;  %v9289_v10 = vld [vmem:[%s16134_s1 + $0x1490] sm:$0xf]  ;;  %v9175_v16 = vld [vmem:[%s16134_s1 + $0x141c] sm:$0xf0] }
 0x583   :  { %6162 = vmatmul.bf16.vlgmr.msrb.gmra.mxu0 %v11476_v27  ;;  %v10686_v27 = vld [vmem:[%s16134_s1 + $0x16dc] sm:$0xf]  ;;  %v6072_v23 = vpop.f32.mrf.mxu1 }
 0x584   :  { %6206 = vmatpush.bf16.xpose.msra.mxu0 %v9778_v25  ;;  %6188 = vmatmul.bf16.vlgmr.msrb.gmra.mxu2 %v11487_v31  ;;  %v9575_v31 = vld [vmem:[%s16134_s1 + $0x173c] sm:$0xf0]  ;;  %v6073_v21 = vadd.f32 %v6072_v23, %v6060_v18  ;;  %v10599_v23 = vld [vmem:[%s16134_s1 + $0x1420] sm:$0xf0] }
 0x585   :  { %6219 = vmatpush.bf16.xpose.msra.mxu1 %v9782_v40  ;;  %6232 = vmatpush.bf16.xpose.msra.mxu2 %v9786_v43  ;;  %v9578_v9 = vor.u32 %v10686_v27, %v9575_v31  ;;  %v10611_v27 = vld [vmem:[%s16134_s1 + $0x1484] sm:$0xf]  ;;  %v9275_v31 = vld [vmem:[%s16134_s1 + $0x14e4] sm:$0xf0]  ;;  %v9181_v18 = vld [vmem:[%s16134_s1 + $0x13c0] sm:$0xf] }
 0x586   :  { %6245 = vmatpush.bf16.xpose.msra.mxu3 %v9790_v36  ;;  %6175 = vmatmul.bf16.vlgmr.msrb.gmra.mxu1 %v11474_v26  ;;  %v9581_v26 = vld [vmem:[%s16134_s1 + $0x16e0] sm:$0xf]  ;;  %v9278_v19 = vor.u32 %v10611_v27, %v9275_v31  ;;  %v9182_v30 = vor.u32 %v10599_v23, %v9181_v18  ;;  %v10713_v27 = vld [vmem:[%s16134_s1 + $0x17b4] sm:$0xf]  ;;  %v9691_v31 = vld [vmem:[%s16134_s1 + $0x1814] sm:$0xf0] }
 0x587   :  { %6201 = vmatmul.bf16.vlgmr.msrb.gmra.mxu3 %v11678_v41  ;;  %v10699_v41 = vld [vmem:[%s16134_s1 + $0x1740] sm:$0xf0]  ;;  %v6085_v42 = vpop.f32.mrf.mxu2  ;;  %v9605_v18 = vld [vmem:[%s16134_s1 + $0x16f8] sm:$0xf]  ;;  %v10702_v23 = vld [vmem:[%s16134_s1 + $0x1758] sm:$0xf0] }
 0x588   :  { %v9582_v22 = vor.u32 %v10699_v41, %v9581_v26  ;;  %v6086_v44 = vadd.f32 %v6085_v42, %v6073_v21  ;;  %v6061_v40 = vpop.f32.mrf.mxu0  ;;  %v9281_v26 = vld [vmem:[%s16134_s1 + $0x1488] sm:$0xf]  ;;  %v10624_v41 = vld [vmem:[%s16134_s1 + $0x14e8] sm:$0xf0]  ;;  %v10587_v21 = vld [vmem:[%s16134_s1 + $0x13c4] sm:$0xf]  ;;  %v9606_v28 = vor.u32 %v10702_v23, %v9605_v18 }
 0x589   :  { %v9186_v32 = vor.u32 %v10587_v21, %v9183_v49  ;;  %v10562_v42 = vld [vmem:[%s16134_s1 + $0x12fc] sm:$0xf]  ;;  %v10588_v23 = vld [vmem:[%s16134_s1 + $0x13cc] sm:$0xf] }
 0x58a   :  { %v6098_v25 = vpop.f32.mrf.mxu3  ;;  %v10738_v40 = vld [vmem:[%s16134_s1 + $0x187c] sm:$0xf] }
 0x58b   :  { %v6074_v43 = vpop.f32.mrf.mxu1  ;;  %v15420_v36 = vadd.f32 %v6098_v25, %v6086_v44  ;;  %v9089_v44 = vld [vmem:[%s16134_s1 + $0x1300] sm:$0xf]  ;;  %v10575_v25 = vld [vmem:[%s16134_s1 + $0x1360] sm:$0xf0] }
 0x58c   :  { %6207 = vmatpush.bf16.xpose.msra.mxu0 %v9678_v59  ;;  %v9378_v59 = vor.u32 %v10636_v20, %v9375_v51  ;;  %v9791_v43 = vld [vmem:[%s16134_s1 + $0x18dc] sm:$0xf0] }
 0x58d   :  { %6220 = vmatpush.bf16.xpose.msra.mxu1 %v9682_v17  ;;  %6233 = vmatpush.bf16.xpose.msra.mxu2 %v9686_v58  ;;  %v9382_v17 = vor.u32 %v10649_v8, %v9381_v4  ;;  %v9386_v58 = vor.u32 %v10637_v50, %v9383_v37  ;;  %v9797_v20 = vld [vmem:[%s16134_s1 + $0x1880] sm:$0xf]  ;;  %v10751_v4 = vld [vmem:[%s16134_s1 + $0x18e0] sm:$0xf0]  ;;  %v9799_v50 = vld [vmem:[%s16134_s1 + $0x18e4] sm:$0xf0] }
 0x58e   :  { %6246 = vmatpush.bf16.xpose.msra.mxu3 %v9690_v61  ;;  %v10739_v8 = vld [vmem:[%s16134_s1 + $0x1884] sm:$0xf] }
 0x58f   :  { %v6087_v61 = vpop.f32.mrf.mxu2 }
 0x590   :  { %v9798_v61 = vor.u32 %v10751_v4, %v9797_v20 }
 0x592   :  { %v6100_v3 = vpop.f32.mrf.mxu3 }
 0x594   :  { %6208 = vmatpush.bf16.xpose.msra.mxu0 %v9578_v9  ;;  %v9282_v9 = vor.u32 %v10624_v41, %v9281_v26  ;;  %v9697_v26 = vld [vmem:[%s16134_s1 + $0x17b8] sm:$0xf]  ;;  %v10726_v41 = vld [vmem:[%s16134_s1 + $0x1818] sm:$0xf0] }
 0x595   :  { %6221 = vmatpush.bf16.xpose.msra.mxu1 %v9582_v22  ;;  %6234 = vmatpush.bf16.xpose.msra.mxu2 %v9586_v35  ;;  %v9286_v22 = vor.u32 %v10612_v54, %v9283_v5  ;;  %v9290_v35 = vor.u32 %v10625_v11, %v9289_v10  ;;  %v10714_v54 = vld [vmem:[%s16134_s1 + $0x17bc] sm:$0xf]  ;;  %v9699_v5 = vld [vmem:[%s16134_s1 + $0x181c] sm:$0xf0]  ;;  %v10727_v11 = vld [vmem:[%s16134_s1 + $0x1820] sm:$0xf0] }
 0x596   :  { %6247 = vmatpush.bf16.xpose.msra.mxu3 %v9590_v14  ;;  %v10586_v14 = vld [vmem:[%s16134_s1 + $0x13bc] sm:$0xf]  ;;  %v9705_v10 = vld [vmem:[%s16134_s1 + $0x17c0] sm:$0xf] }
 0x597   :  { %v9178_v29 = vor.u32 %v10586_v14, %v9175_v16  ;;  %v10688_v14 = vld [vmem:[%s16134_s1 + $0x16ec] sm:$0xf]  ;;  %v9599_v16 = vld [vmem:[%s16134_s1 + $0x1754] sm:$0xf0] }
 0x59c   :  { %6209 = vmatpush.bf16.xpose.msra.mxu0 %v9478_v13  ;;  %v9075_v13 = vld [vmem:[%s16134_s1 + $0x1354] sm:$0xf0] }
 0x59d   :  { %6222 = vmatpush.bf16.xpose.msra.mxu1 %v9482_v34  ;;  %6235 = vmatpush.bf16.xpose.msra.mxu2 %v9486_v39  ;;  %v9081_v34 = vld [vmem:[%s16134_s1 + $0x12f8] sm:$0xf]  ;;  %v10574_v39 = vld [vmem:[%s16134_s1 + $0x1358] sm:$0xf0]  ;;  %v9078_v51 = vor.u32 %v10561_v33, %v9075_v13  ;;  %v10663_v33 = vld [vmem:[%s16134_s1 + $0x1624] sm:$0xf] }
 0x59e   :  { %6248 = vmatpush.bf16.xpose.msra.mxu3 %v9490_v63  ;;  %v9083_v63 = vld [vmem:[%s16134_s1 + $0x135c] sm:$0xf0]  ;;  %v9082_v37 = vor.u32 %v10574_v39, %v9081_v34  ;;  %v9491_v13 = vld [vmem:[%s16134_s1 + $0x1684] sm:$0xf0]  ;;  %v10664_v39 = vld [vmem:[%s16134_s1 + $0x162c] sm:$0xf] }
 0x59f   :  { %v9086_v15 = vor.u32 %v10562_v42, %v9083_v63  ;;  %v9497_v34 = vld [vmem:[%s16134_s1 + $0x1628] sm:$0xf]  ;;  %v9499_v42 = vld [vmem:[%s16134_s1 + $0x168c] sm:$0xf0] }
 0x5a0   :  { %v9505_v63 = vld [vmem:[%s16134_s1 + $0x1630] sm:$0xf]  ;;  %v9502_v20 = vor.u32 %v10664_v39, %v9499_v42  ;;  %v9091_v39 = vld [vmem:[%s16134_s1 + $0x1364] sm:$0xf0] }
 0x5a1   :  { %v9097_v42 = vld [vmem:[%s16134_s1 + $0x1308] sm:$0xf] }
 0x5a4   :  { %6210 = vmatpush.bf16.xpose.msra.mxu0 %v9378_v59  ;;  %v10752_v59 = vld [vmem:[%s16134_s1 + $0x18e8] sm:$0xf0] }
 0x5a5   :  { %6223 = vmatpush.bf16.xpose.msra.mxu1 %v9382_v17  ;;  %6236 = vmatpush.bf16.xpose.msra.mxu2 %v9386_v58  ;;  %v9090_v17 = vor.u32 %v10575_v25, %v9089_v44  ;;  %v9794_v58 = vor.u32 %v10738_v40, %v9791_v43  ;;  %v9806_v3 = vor.u32 %v10752_v59, %v9805_v57  ;;  %v10677_v44 = vld [vmem:[%s16134_s1 + $0x1690] sm:$0xf0]  ;;  %v10638_v57 = vld [vmem:[%s16134_s1 + $0x155c] sm:$0xf]  ;;  %v9391_v59 = vld [vmem:[%s16134_s1 + $0x15bc] sm:$0xf0] }
 0x5a6   :  { %6249 = vmatpush.bf16.xpose.msra.mxu3 %v9390_v62  ;;  %v9802_v62 = vor.u32 %v10739_v8, %v9799_v50  ;;  %v9494_v25 = vor.u32 %v10663_v33, %v9491_v13  ;;  %v9506_v4 = vor.u32 %v10677_v44, %v9505_v63  ;;  %v10576_v63 = vld [vmem:[%s16134_s1 + $0x1368] sm:$0xf0] }
 0x5a7   :  { %v10564_v44 = vld [vmem:[%s16134_s1 + $0x130c] sm:$0xf] }
 0x5ac   :  { %6211 = vmatpush.bf16.xpose.msra.mxu0 %v9278_v19  ;;  %v9694_v19 = vor.u32 %v10713_v27, %v9691_v31  ;;  %v10652_v27 = vld [vmem:[%s16134_s1 + $0x15c8] sm:$0xf0]  ;;  %v9394_v31 = vor.u32 %v10638_v57, %v9391_v59  ;;  %v10753_v57 = vld [vmem:[%s16134_s1 + $0x18f0] sm:$0xf0] }
 0x5ad   :  { %6224 = vmatpush.bf16.xpose.msra.mxu1 %v9282_v9  ;;  %6237 = vmatpush.bf16.xpose.msra.mxu2 %v9286_v22  ;;  %v9698_v9 = vor.u32 %v10726_v41, %v9697_v26  ;;  %v9702_v22 = vor.u32 %v10714_v54, %v9699_v5  ;;  %v10741_v59 = vld [vmem:[%s16134_s1 + $0x1894] sm:$0xf] }
 0x5ae   :  { %6250 = vmatpush.bf16.xpose.msra.mxu3 %v9290_v35  ;;  %v9706_v35 = vor.u32 %v10727_v11, %v9705_v10  ;;  %v10613_v11 = vld [vmem:[%s16134_s1 + $0x1494] sm:$0xf] }
 0x5b4   :  { %6212 = vmatpush.bf16.xpose.msra.mxu0 %v9178_v29 }
 0x5b5   :  { %6225 = vmatpush.bf16.xpose.msra.mxu1 %v9182_v30  ;;  %6238 = vmatpush.bf16.xpose.msra.mxu2 %v9186_v32 }
 0x5b6   :  { %6251 = vmatpush.bf16.xpose.msra.mxu3 %v9190_v0 }
 0x5bc   :  { %6213 = vmatpush.bf16.xpose.msra.mxu0 %v9078_v51 }
 0x5bd   :  { %6226 = vmatpush.bf16.xpose.msra.mxu1 %v9082_v37  ;;  %6239 = vmatpush.bf16.xpose.msra.mxu2 %v9086_v15 }
 0x5be   :  { %6252 = vmatpush.bf16.xpose.msra.mxu3 %v9090_v17  ;;  %v9397_v17 = vld [vmem:[%s16134_s1 + $0x1560] sm:$0xf] }
 0x5c0   :  { %v6111_v29 = vpop.f32.mrf.mxu0 }
 0x5c1   :  { %v6112_v30 = vadd.f32 %v6111_v29, %v15420_v36  ;;  %v10676_v36 = vld [vmem:[%s16134_s1 + $0x1688] sm:$0xf0]  ;;  %v9199_v29 = vld [vmem:[%s16134_s1 + $0x1434] sm:$0xf0] }
 0x5c2   :  { %v9498_v43 = vor.u32 %v10676_v36, %v9497_v34  ;;  %v10563_v36 = vld [vmem:[%s16134_s1 + $0x1304] sm:$0xf] }
 0x5c3   :  { %6214 = vmatmul.bf16.vlgmr.msra.gmra.mxu0 %v11691_v48  ;;  %v9591_v48 = vld [vmem:[%s16134_s1 + $0x174c] sm:$0xf0]  ;;  %v6124_v32 = vpop.f32.mrf.mxu1 }
 0x5c4   :  { %6258 = vmatpush.bf16.xpose.msrb.mxu0 %v9794_v58  ;;  %6240 = vmatmul.bf16.vlgmr.msra.gmra.mxu2 %v11702_v52  ;;  %v9597_v52 = vld [vmem:[%s16134_s1 + $0x16f0] sm:$0xf]  ;;  %v9594_v21 = vor.u32 %v10688_v14, %v9591_v48  ;;  %v6125_v0 = vadd.f32 %v6124_v32, %v6112_v30  ;;  %v10651_v58 = vld [vmem:[%s16134_s1 + $0x15c0] sm:$0xf0]  ;;  %v9299_v14 = vld [vmem:[%s16134_s1 + $0x14fc] sm:$0xf0] }
 0x5c5   :  { %6271 = vmatpush.bf16.xpose.msrb.mxu1 %v9798_v61  ;;  %6284 = vmatpush.bf16.xpose.msrb.mxu2 %v9802_v62  ;;  %v10639_v61 = vld [vmem:[%s16134_s1 + $0x1564] sm:$0xf]  ;;  %v9399_v62 = vld [vmem:[%s16134_s1 + $0x15c4] sm:$0xf0]  ;;  %v9398_v26 = vor.u32 %v10651_v58, %v9397_v17  ;;  %v9305_v48 = vld [vmem:[%s16134_s1 + $0x14a0] sm:$0xf]  ;;  %v9098_v58 = vor.u32 %v10576_v63, %v9097_v42 }
 0x5c6   :  { %6297 = vmatpush.bf16.xpose.msrb.mxu3 %v9806_v3  ;;  %6227 = vmatmul.bf16.vlgmr.msra.gmra.mxu1 %v11689_v46  ;;  %v10701_v46 = vld [vmem:[%s16134_s1 + $0x1750] sm:$0xf0]  ;;  %v9405_v3 = vld [vmem:[%s16134_s1 + $0x1568] sm:$0xf]  ;;  %v9402_v41 = vor.u32 %v10639_v61, %v9399_v62  ;;  %v9205_v30 = vld [vmem:[%s16134_s1 + $0x13d8] sm:$0xf] }
 0x5c7   :  { %6253 = vmatmul.bf16.vlgmr.msra.gmra.mxu3 %v11891_v2  ;;  %v10689_v2 = vld [vmem:[%s16134_s1 + $0x16f4] sm:$0xf]  ;;  %v9598_v49 = vor.u32 %v10701_v46, %v9597_v52  ;;  %v6137_v40 = vpop.f32.mrf.mxu2  ;;  %v9406_v5 = vor.u32 %v10652_v27, %v9405_v3  ;;  %v10627_v52 = vld [vmem:[%s16134_s1 + $0x1500] sm:$0xf0]  ;;  %v10602_v32 = vld [vmem:[%s16134_s1 + $0x1438] sm:$0xf0] }
 0x5c8   :  { %v9602_v24 = vor.u32 %v10689_v2, %v9599_v16  ;;  %v6138_v51 = vadd.f32 %v6137_v40, %v6125_v0  ;;  %v6113_v50 = vpop.f32.mrf.mxu0  ;;  %v9306_v18 = vor.u32 %v10627_v52, %v9305_v48  ;;  %v9206_v34 = vor.u32 %v10602_v32, %v9205_v30  ;;  %v9105_v40 = vld [vmem:[%s16134_s1 + $0x1310] sm:$0xf]  ;;  %v9815_v17 = vld [vmem:[%s16134_s1 + $0x18f4] sm:$0xf0]  ;;  %v10678_v63 = vld [vmem:[%s16134_s1 + $0x1698] sm:$0xf0] }
 0x5c9   :  { %v9813_v50 = vld [vmem:[%s16134_s1 + $0x1890] sm:$0xf]  ;;  %v9513_v42 = vld [vmem:[%s16134_s1 + $0x1638] sm:$0xf] }
 0x5ca   :  { %v6150_v8 = vpop.f32.mrf.mxu3 }
 0x5cb   :  { %v6126_v37 = vpop.f32.mrf.mxu1  ;;  %v15619_v15 = vadd.f32 %v6150_v8, %v6138_v51  ;;  %v10754_v51 = vld [vmem:[%s16134_s1 + $0x18f8] sm:$0xf0]  ;;  %v9807_v8 = vld [vmem:[%s16134_s1 + $0x18ec] sm:$0xf0] }
 0x5cc   :  { %6259 = vmatpush.bf16.xpose.msrb.mxu0 %v9694_v19  ;;  %v9291_v19 = vld [vmem:[%s16134_s1 + $0x14f4] sm:$0xf0]  ;;  %v9094_v37 = vor.u32 %v10563_v36, %v9091_v39  ;;  %v10665_v39 = vld [vmem:[%s16134_s1 + $0x1634] sm:$0xf] }
 0x5cd   :  { %6272 = vmatpush.bf16.xpose.msrb.mxu1 %v9698_v9  ;;  %6285 = vmatpush.bf16.xpose.msrb.mxu2 %v9702_v22  ;;  %v9297_v9 = vld [vmem:[%s16134_s1 + $0x1498] sm:$0xf]  ;;  %v10626_v22 = vld [vmem:[%s16134_s1 + $0x14f8] sm:$0xf0]  ;;  %v9294_v46 = vor.u32 %v10613_v11, %v9291_v19  ;;  %v9707_v11 = vld [vmem:[%s16134_s1 + $0x1824] sm:$0xf0] }
 0x5ce   :  { %6298 = vmatpush.bf16.xpose.msrb.mxu3 %v9706_v35  ;;  %v10614_v35 = vld [vmem:[%s16134_s1 + $0x149c] sm:$0xf]  ;;  %v9298_v2 = vor.u32 %v10626_v22, %v9297_v9  ;;  %v9713_v19 = vld [vmem:[%s16134_s1 + $0x17c8] sm:$0xf]  ;;  %v10728_v9 = vld [vmem:[%s16134_s1 + $0x1828] sm:$0xf0] }
 0x5cf   :  { %v6139_v54 = vpop.f32.mrf.mxu2  ;;  %v9302_v16 = vor.u32 %v10614_v35, %v9299_v14  ;;  %v10716_v22 = vld [vmem:[%s16134_s1 + $0x17cc] sm:$0xf]  ;;  %v9715_v35 = vld [vmem:[%s16134_s1 + $0x182c] sm:$0xf0]  ;;  %v9714_v52 = vor.u32 %v10728_v9, %v9713_v19 }
 0x5d0   :  { %v9721_v54 = vld [vmem:[%s16134_s1 + $0x17d0] sm:$0xf] }
 0x5d2   :  { %v6152_v10 = vpop.f32.mrf.mxu3 }
 0x5d3   :  { %v10715_v10 = vld [vmem:[%s16134_s1 + $0x17c4] sm:$0xf] }
 0x5d4   :  { %6260 = vmatpush.bf16.xpose.msrb.mxu0 %v9594_v21  ;;  %v9191_v21 = vld [vmem:[%s16134_s1 + $0x142c] sm:$0xf0]  ;;  %v9710_v48 = vor.u32 %v10715_v10, %v9707_v11 }
 0x5d5   :  { %6273 = vmatpush.bf16.xpose.msrb.mxu1 %v9598_v49  ;;  %6286 = vmatpush.bf16.xpose.msrb.mxu2 %v9602_v24  ;;  %v9197_v49 = vld [vmem:[%s16134_s1 + $0x13d0] sm:$0xf]  ;;  %v10601_v24 = vld [vmem:[%s16134_s1 + $0x1430] sm:$0xf0]  ;;  %v9194_v0 = vor.u32 %v10588_v23, %v9191_v21  ;;  %v10691_v23 = vld [vmem:[%s16134_s1 + $0x1704] sm:$0xf] }
 0x5d6   :  { %6299 = vmatpush.bf16.xpose.msrb.mxu3 %v9606_v28  ;;  %v10589_v28 = vld [vmem:[%s16134_s1 + $0x13d4] sm:$0xf]  ;;  %v9198_v33 = vor.u32 %v10601_v24, %v9197_v49  ;;  %v9615_v21 = vld [vmem:[%s16134_s1 + $0x1764] sm:$0xf0] }
 0x5d7   :  { %v9202_v13 = vor.u32 %v10589_v28, %v9199_v29  ;;  %v9618_v29 = vor.u32 %v10691_v23, %v9615_v21  ;;  %v9221_v21 = vld [vmem:[%s16134_s1 + $0x13e8] sm:$0xf] }
 0x5dc   :  { %6261 = vmatpush.bf16.xpose.msrb.mxu0 %v9494_v25  ;;  %v9099_v25 = vld [vmem:[%s16134_s1 + $0x136c] sm:$0xf0] }
 0x5dd   :  { %6274 = vmatpush.bf16.xpose.msrb.mxu1 %v9498_v43  ;;  %6287 = vmatpush.bf16.xpose.msrb.mxu2 %v9502_v20  ;;  %v10577_v43 = vld [vmem:[%s16134_s1 + $0x1370] sm:$0xf0]  ;;  %v9821_v20 = vld [vmem:[%s16134_s1 + $0x1898] sm:$0xf]  ;;  %v9102_v61 = vor.u32 %v10564_v44, %v9099_v25  ;;  %v10666_v44 = vld [vmem:[%s16134_s1 + $0x163c] sm:$0xf] }
 0x5de   :  { %6300 = vmatpush.bf16.xpose.msrb.mxu3 %v9506_v4  ;;  %v10740_v4 = vld [vmem:[%s16134_s1 + $0x188c] sm:$0xf]  ;;  %v9822_v62 = vor.u32 %v10754_v51, %v9821_v20  ;;  %v9106_v3 = vor.u32 %v10577_v43, %v9105_v40  ;;  %v9515_v25 = vld [vmem:[%s16134_s1 + $0x169c] sm:$0xf0]  ;;  %v9514_v51 = vor.u32 %v10678_v63, %v9513_v42  ;;  %v10579_v42 = vld [vmem:[%s16134_s1 + $0x1380] sm:$0xf0] }
 0x5df   :  { %v9810_v27 = vor.u32 %v10740_v4, %v9807_v8  ;;  %v9518_v4 = vor.u32 %v10666_v44, %v9515_v25  ;;  %v10565_v63 = vld [vmem:[%s16134_s1 + $0x1314] sm:$0xf]  ;;  %v9107_v44 = vld [vmem:[%s16134_s1 + $0x1374] sm:$0xf0] }
 0x5e0   :  { %v9113_v25 = vld [vmem:[%s16134_s1 + $0x1318] sm:$0xf] }
 0x5e4   :  { %6262 = vmatpush.bf16.xpose.msrb.mxu0 %v9394_v31  ;;  %v9814_v31 = vor.u32 %v10753_v57, %v9813_v50 }
 0x5e5   :  { %6275 = vmatpush.bf16.xpose.msrb.mxu1 %v9398_v26  ;;  %6288 = vmatpush.bf16.xpose.msrb.mxu2 %v9402_v41  ;;  %v9818_v26 = vor.u32 %v10741_v59, %v9815_v17  ;;  %v5060_v41 = vsel %vm4962_vm0, %v9822_v62, 0  ;;  %v10640_v62 = vld [vmem:[%s16134_s1 + $0x156c] sm:$0xf] }
 0x5e6   :  { %6301 = vmatpush.bf16.xpose.msrb.mxu3 %v9406_v5  ;;  %v10729_v5 = vld [vmem:[%s16134_s1 + $0x1830] sm:$0xf0] }
 0x5e7   :  { %v9722_v14 = vor.u32 %v10729_v5, %v9721_v54 }
 0x5ec   :  { %6263 = vmatpush.bf16.xpose.msrb.mxu0 %v9294_v46  ;;  %v9718_v46 = vor.u32 %v10716_v22, %v9715_v35  ;;  %v9321_v35 = vld [vmem:[%s16134_s1 + $0x14b0] sm:$0xf] }
 0x5ed   :  { %6276 = vmatpush.bf16.xpose.msrb.mxu1 %v9298_v2  ;;  %6289 = vmatpush.bf16.xpose.msrb.mxu2 %v9302_v16  ;;  %v5057_v2 = vsel %vm4962_vm0, %v9722_v14, 0  ;;  %v9621_v16 = vld [vmem:[%s16134_s1 + $0x1708] sm:$0xf]  ;;  %v10629_v14 = vld [vmem:[%s16134_s1 + $0x1510] sm:$0xf0] }
 0x5ee   :  { %6302 = vmatpush.bf16.xpose.msrb.mxu3 %v9306_v18  ;;  %v10704_v18 = vld [vmem:[%s16134_s1 + $0x1768] sm:$0xf0] }
 0x5ef   :  { %v9622_v49 = vor.u32 %v10704_v18, %v9621_v16  ;;  %v10616_v16 = vld [vmem:[%s16134_s1 + $0x14ac] sm:$0xf]  ;;  %v9315_v18 = vld [vmem:[%s16134_s1 + $0x150c] sm:$0xf0] }
 0x5f1   :  { %v5054_v32 = vsel %vm4962_vm0, %v9622_v49, 0  ;;  %v10604_v49 = vld [vmem:[%s16134_s1 + $0x1448] sm:$0xf0] }
 0x5f4   :  { %6264 = vmatpush.bf16.xpose.msrb.mxu0 %v9194_v0 }
 0x5f5   :  { %6277 = vmatpush.bf16.xpose.msrb.mxu1 %v9198_v33  ;;  %6290 = vmatpush.bf16.xpose.msrb.mxu2 %v9202_v13  ;;  %v9521_v13 = vld [vmem:[%s16134_s1 + $0x1640] sm:$0xf] }
 0x5f6   :  { %6303 = vmatpush.bf16.xpose.msrb.mxu3 %v9206_v34  ;;  %v10679_v34 = vld [vmem:[%s16134_s1 + $0x16a0] sm:$0xf0] }
 0x5f7   :  { %v9522_v40 = vor.u32 %v10679_v34, %v9521_v13 }
 0x5f9   :  { %v5051_v57 = vsel %vm4962_vm0, %v9522_v40, 0  ;;  %v10578_v40 = vld [vmem:[%s16134_s1 + $0x1378] sm:$0xf0] }
 0x5fc   :  { %6265 = vmatpush.bf16.xpose.msrb.mxu0 %v9094_v37 }
 0x5fd   :  { %6278 = vmatpush.bf16.xpose.msrb.mxu1 %v9098_v58  ;;  %6291 = vmatpush.bf16.xpose.msrb.mxu2 %v9102_v61  ;;  %v9421_v58 = vld [vmem:[%s16134_s1 + $0x1578] sm:$0xf]  ;;  %v10654_v61 = vld [vmem:[%s16134_s1 + $0x15d8] sm:$0xf0] }
 0x5fe   :  { %6304 = vmatpush.bf16.xpose.msrb.mxu3 %v9106_v3  ;;  %v9407_v3 = vld [vmem:[%s16134_s1 + $0x15cc] sm:$0xf0]  ;;  %v9422_v54 = vor.u32 %v10654_v61, %v9421_v58  ;;  %v10786_v58 = vld [vmem:[%s16137_s3 + $0xf4] sm:$0xf0]  ;;  %v9114_v61 = vor.u32 %v10578_v40, %v9113_v25 }
 0x5ff   :  { %v9410_v5 = vor.u32 %v10640_v62, %v9407_v3 }
 0x600   :  { %v6163_v30 = vpop.f32.mrf.mxu0  ;;  %v5048_v22 = vsel %vm4962_vm0, %v9422_v54, 0  ;;  %v10781_v54 = vld [vmem:[%s16137_s3 + $0xcc] sm:$0xf0] }
 0x601   :  { %v6164_v0 = vadd.f32 %v6163_v30, %v15619_v15  ;;  %v9507_v15 = vld [vmem:[%s16134_s1 + $0x1694] sm:$0xf0]  ;;  %v10603_v30 = vld [vmem:[%s16134_s1 + $0x1440] sm:$0xf0] }
 0x602   :  { %v9510_v43 = vor.u32 %v10665_v39, %v9507_v15  ;;  %v9121_v15 = vld [vmem:[%s16134_s1 + $0x1320] sm:$0xf] }
 0x603   :  { %6266 = vmatmul.bf16.vlgmr.msrb.gmra.mxu0 %v11904_v7  ;;  %v10690_v7 = vld [vmem:[%s16134_s1 + $0x16fc] sm:$0xf]  ;;  %v6176_v33 = vpop.f32.mrf.mxu1 }
 0x604   :  { %6310 = vmatpush.bf16.xpose.msra.mxu0 %v9810_v27  ;;  %6292 = vmatmul.bf16.vlgmr.msrb.gmra.mxu2 %v11915_v12  ;;  %v9613_v12 = vld [vmem:[%s16134_s1 + $0x1700] sm:$0xf]  ;;  %v6177_v36 = vadd.f32 %v6176_v33, %v6164_v0  ;;  %v9413_v27 = vld [vmem:[%s16134_s1 + $0x1570] sm:$0xf]  ;;  %v9215_v0 = vld [vmem:[%s16134_s1 + $0x1444] sm:$0xf0]  ;;  %v9222_v33 = vor.u32 %v10604_v49, %v9221_v21 }
 0x605   :  { %6323 = vmatpush.bf16.xpose.msra.mxu1 %v9814_v31  ;;  %6336 = vmatpush.bf16.xpose.msra.mxu2 %v9818_v26  ;;  %v10653_v31 = vld [vmem:[%s16134_s1 + $0x15d0] sm:$0xf0]  ;;  %v9901_v21 = vld [vmem:[%s16137_s3 + $0x88] sm:$0xf]  ;;  %v10774_v49 = vld [vmem:[%s16137_s3 + $0x94] sm:$0xf0] }
 0x606   :  { %6349 = vmatpush.bf16.xpose.msra.mxu3 %v5060_v41  ;;  %6279 = vmatmul.bf16.vlgmr.msrb.gmra.mxu1 %v11902_v6  ;;  %v9607_v6 = vld [vmem:[%s16134_s1 + $0x175c] sm:$0xf0]  ;;  %v10641_v26 = vld [vmem:[%s16134_s1 + $0x1574] sm:$0xf]  ;;  %v9415_v41 = vld [vmem:[%s16134_s1 + $0x15d4] sm:$0xf0]  ;;  %v9414_v10 = vor.u32 %v10653_v31, %v9413_v27 }
 0x607   :  { %6305 = vmatmul.bf16.vlgmr.msrb.gmra.mxu3 %v12111_v53  ;;  %v10703_v53 = vld [vmem:[%s16134_s1 + $0x1760] sm:$0xf0]  ;;  %v9610_v24 = vor.u32 %v10690_v7, %v9607_v6  ;;  %v6189_v20 = vpop.f32.mrf.mxu2  ;;  %v9418_v11 = vor.u32 %v10641_v26, %v9415_v41  ;;  %v9322_v7 = vor.u32 %v10629_v14, %v9321_v35  ;;  %v5042_v39 = vsel %vm4962_vm0, %v9222_v33, 0  ;;  %v9925_v41 = vld [vmem:[%s16137_s3 + $0xc0] sm:$0xf] }
 0x608   :  { %v9614_v28 = vor.u32 %v10703_v53, %v9613_v12  ;;  %v6190_v8 = vadd.f32 %v6189_v20, %v6177_v36  ;;  %v6165_v37 = vpop.f32.mrf.mxu0  ;;  %v9318_v53 = vor.u32 %v10616_v16, %v9315_v18  ;;  %v9115_v20 = vld [vmem:[%s16134_s1 + $0x137c] sm:$0xf0] }
 0x609   :  { %v5045_v23 = vsel %vm4962_vm0, %v9322_v7, 0  ;;  %v9110_v37 = vor.u32 %v10565_v63, %v9107_v44  ;;  %v9909_v14 = vld [vmem:[%s16137_s3 + $0xa0] sm:$0xf]  ;;  %v9885_v63 = vld [vmem:[%s16137_s3 + $0x68] sm:$0xf] }
 0x60a   :  { %v6202_v50 = vpop.f32.mrf.mxu3  ;;  %v10770_v44 = vld [vmem:[%s16137_s3 + $0x74] sm:$0xf0] }
 0x60b   :  { %v6178_v59 = vpop.f32.mrf.mxu1  ;;  %v15822_v17 = vadd.f32 %v6202_v50, %v6190_v8  ;;  %v10785_v8 = vld [vmem:[%s16137_s3 + $0xec] sm:$0xf0]  ;;  %v10783_v50 = vld [vmem:[%s16137_s3 + $0xe4] sm:$0xf] }
 0x60c   :  { %6311 = vmatpush.bf16.xpose.msra.mxu0 %v9710_v48  ;;  %v10615_v48 = vld [vmem:[%s16134_s1 + $0x14a4] sm:$0xf]  ;;  %v9949_v59 = vld [vmem:[%s16137_s3 + $0xe8] sm:$0xf] }
 0x60d   :  { %6324 = vmatpush.bf16.xpose.msra.mxu1 %v9714_v52  ;;  %6337 = vmatpush.bf16.xpose.msra.mxu2 %v9718_v46  ;;  %v9307_v52 = vld [vmem:[%s16134_s1 + $0x1504] sm:$0xf0]  ;;  %v9950_v26 = vor.u32 %v10786_v58, %v9949_v59  ;;  %v10766_v59 = vld [vmem:[%s16137_s3 + $0x54] sm:$0xf0] }
 0x60e   :  { %6350 = vmatpush.bf16.xpose.msra.mxu3 %v5057_v2  ;;  %v9313_v46 = vld [vmem:[%s16134_s1 + $0x14a8] sm:$0xf]  ;;  %v10628_v2 = vld [vmem:[%s16134_s1 + $0x1508] sm:$0xf0]  ;;  %v9310_v6 = vor.u32 %v10615_v48, %v9307_v52  ;;  %v10778_v48 = vld [vmem:[%s16137_s3 + $0xb4] sm:$0xf0] }
 0x60f   :  { %v6191_v19 = vpop.f32.mrf.mxu2  ;;  %v9314_v12 = vor.u32 %v10628_v2, %v9313_v46 }
 0x610   :  { %v10782_v19 = vld [vmem:[%s16137_s3 + $0xd4] sm:$0xf0] }
 0x612   :  { %v6204_v9 = vpop.f32.mrf.mxu3 }
 0x613   :  { %v9926_v9 = vor.u32 %v10781_v54, %v9925_v41  ;;  %v9853_v41 = vld [vmem:[%s16137_s3 + $0x28] sm:$0xf]  ;;  %v10762_v54 = vld [vmem:[%s16137_s3 + $0x34] sm:$0xf0] }
 0x614   :  { %6312 = vmatpush.bf16.xpose.msra.mxu0 %v9610_v24  ;;  %v10590_v24 = vld [vmem:[%s16134_s1 + $0x13dc] sm:$0xf] }
 0x615   :  { %6325 = vmatpush.bf16.xpose.msra.mxu1 %v9614_v28  ;;  %6338 = vmatpush.bf16.xpose.msra.mxu2 %v9618_v29  ;;  %v9207_v28 = vld [vmem:[%s16134_s1 + $0x143c] sm:$0xf0] }
 0x616   :  { %6351 = vmatpush.bf16.xpose.msra.mxu3 %v5054_v32  ;;  %v9213_v29 = vld [vmem:[%s16134_s1 + $0x13e0] sm:$0xf]  ;;  %v10591_v32 = vld [vmem:[%s16134_s1 + $0x13e4] sm:$0xf]  ;;  %v9210_v13 = vor.u32 %v10590_v24, %v9207_v28 }
 0x617   :  { %v9214_v34 = vor.u32 %v10603_v30, %v9213_v29  ;;  %v9218_v36 = vor.u32 %v10591_v32, %v9215_v0  ;;  %v9902_v30 = vor.u32 %v10774_v49, %v9901_v21 }
 0x61c   :  { %6313 = vmatpush.bf16.xpose.msra.mxu0 %v9510_v43  ;;  %v10566_v43 = vld [vmem:[%s16134_s1 + $0x131c] sm:$0xf] }
 0x61d   :  { %6326 = vmatpush.bf16.xpose.msra.mxu1 %v9514_v51  ;;  %6339 = vmatpush.bf16.xpose.msra.mxu2 %v9518_v4  ;;  %v9122_v51 = vor.u32 %v10579_v42, %v9121_v15  ;;  %v9941_v4 = vld [vmem:[%s16137_s3 + $0xe0] sm:$0xf]  ;;  %v9118_v62 = vor.u32 %v10566_v43, %v9115_v20  ;;  %v10767_v15 = vld [vmem:[%s16137_s3 + $0x64] sm:$0xf]  ;;  %v9879_v42 = vld [vmem:[%s16137_s3 + $0x70] sm:$0xf0]  ;;  %v9886_v43 = vor.u32 %v10770_v44, %v9885_v63 }
 0x61e   :  { %6352 = vmatpush.bf16.xpose.msra.mxu3 %v5051_v57  ;;  %v9943_v57 = vld [vmem:[%s16137_s3 + $0xf0] sm:$0xf0]  ;;  %v9942_v3 = vor.u32 %v10785_v8, %v9941_v4  ;;  %v9882_v40 = vor.u32 %v10767_v15, %v9879_v42  ;;  %v9861_v4 = vld [vmem:[%s16137_s3 + $0x40] sm:$0xf]  ;;  %v10765_v8 = vld [vmem:[%s16137_s3 + $0x4c] sm:$0xf0] }
 0x61f   :  { %v5039_v27 = vsel %vm4962_vm0, %v9122_v51, 0  ;;  %v9946_v31 = vor.u32 %v10783_v50, %v9943_v57  ;;  %v10763_v50 = vld [vmem:[%s16137_s3 + $0x44] sm:$0xf]  ;;  %v9869_v57 = vld [vmem:[%s16137_s3 + $0x48] sm:$0xf]  ;;  %v9862_v58 = vor.u32 %v10765_v8, %v9861_v4 }
 0x620   :  { %v10764_v15 = vld [vmem:[%s16137_s3 + $0x4c] sm:$0xf]  ;;  %v9871_v42 = vld [vmem:[%s16137_s3 + $0x58] sm:$0xf0] }
 0x621   :  { %v9839_v4 = vld [vmem:[%s16137_s3 + $0x18] sm:$0xf0] }
 0x624   :  { %6314 = vmatpush.bf16.xpose.msra.mxu0 %v9410_v5  ;;  %v10779_v5 = vld [vmem:[%s16137_s3 + $0xc4] sm:$0xf] }
 0x625   :  { %6327 = vmatpush.bf16.xpose.msra.mxu1 %v9414_v10  ;;  %6340 = vmatpush.bf16.xpose.msra.mxu2 %v9418_v11  ;;  %v9927_v10 = vld [vmem:[%s16137_s3 + $0xd0] sm:$0xf0]  ;;  %v9933_v11 = vld [vmem:[%s16137_s3 + $0xc8] sm:$0xf] }
 0x626   :  { %6353 = vmatpush.bf16.xpose.msra.mxu3 %v5048_v22  ;;  %v9930_v22 = vor.u32 %v10779_v5, %v9927_v10  ;;  %v9934_v35 = vor.u32 %v10782_v19, %v9933_v11  ;;  %v9854_v11 = vor.u32 %v10762_v54, %v9853_v41  ;;  %v9829_v19 = vld [vmem:[%s16137_s3] sm:$0xf] }
 0x62c   :  { %6315 = vmatpush.bf16.xpose.msra.mxu0 %v9310_v6 }
 0x62d   :  { %6328 = vmatpush.bf16.xpose.msra.mxu1 %v9314_v12  ;;  %6341 = vmatpush.bf16.xpose.msra.mxu2 %v9318_v53  ;;  %v9893_v12 = vld [vmem:[%s16137_s3 + $0x80] sm:$0xf]  ;;  %v10773_v53 = vld [vmem:[%s16137_s3 + $0x8c] sm:$0xf0] }
 0x62e   :  { %6354 = vmatpush.bf16.xpose.msra.mxu3 %v5045_v23  ;;  %v10771_v23 = vld [vmem:[%s16137_s3 + $0x84] sm:$0xf]  ;;  %v9894_v24 = vor.u32 %v10773_v53, %v9893_v12  ;;  %v6364_v12 = vmax.f32 %v15216_v47, 0.0  ;;  %v9903_v47 = vld [vmem:[%s16137_s3 + $0x98] sm:$0xf0] }
 0x630   :  { %v6368_v49 = vpack.c.bf16 %v6364_v12, %v6364_v12 }
 0x634   :  { %6316 = vmatpush.bf16.xpose.msra.mxu0 %v9210_v13 }
 0x635   :  { %6329 = vmatpush.bf16.xpose.msra.mxu1 %v9214_v34  ;;  %6342 = vmatpush.bf16.xpose.msra.mxu2 %v9218_v36  ;;  %v9877_v36 = vld [vmem:[%s16137_s3 + $0x60] sm:$0xf] }
 0x636   :  { %6355 = vmatpush.bf16.xpose.msra.mxu3 %v5042_v39  ;;  %v10769_v39 = vld [vmem:[%s16137_s3 + $0x6c] sm:$0xf0] }
 0x637   :  { %v9878_v25 = vor.u32 %v10769_v39, %v9877_v36 }
 0x63c   :  { %6317 = vmatpush.bf16.xpose.msra.mxu0 %v9110_v37  ;;  %v9863_v37 = vld [vmem:[%s16137_s3 + $0x50] sm:$0xf0] }
 0x63d   :  { %6330 = vmatpush.bf16.xpose.msra.mxu1 %v9114_v61  ;;  %6343 = vmatpush.bf16.xpose.msra.mxu2 %v9118_v62  ;;  %v9866_v61 = vor.u32 %v10763_v50, %v9863_v37  ;;  %v9870_v62 = vor.u32 %v10766_v59, %v9869_v57 }
 0x63e   :  { %6356 = vmatpush.bf16.xpose.msra.mxu3 %v5039_v27  ;;  %v10761_v27 = vld [vmem:[%s16137_s3 + $0x2c] sm:$0xf0] }
 0x640   :  { %v6215_v16 = vpop.f32.mrf.mxu0 }
 0x641   :  { %v6216_v18 = vadd.f32 %v6215_v16, %v15822_v17  ;;  %v9895_v17 = vld [vmem:[%s16137_s3 + $0x90] sm:$0xf0]  ;;  %v9935_v16 = vld [vmem:[%s16137_s3 + $0xd8] sm:$0xf0] }
 0x642   :  { %v9898_v29 = vor.u32 %v10771_v23, %v9895_v17  ;;  %v10776_v23 = vld [vmem:[%s16137_s3 + $0xac] sm:$0xf]  ;;  %v9919_v17 = vld [vmem:[%s16137_s3 + $0xb8] sm:$0xf0] }
 0x643   :  { %6318 = vmatmul.bf16.vlgmr.msra.gmra.mxu0 %v12118_v56  ;;  %v10777_v56 = vld [vmem:[%s16137_s3 + $0xac] sm:$0xf0]  ;;  %v6228_v7 = vpop.f32.mrf.mxu1 }
 0x644   :  { %6566 = vmatpush.bf16.xpose.msrb.mxu0 %v9942_v3  ;;  %6331 = vmatmul.bf16.vlgmr.msra.gmra.mxu1 %v12116_v55  ;;  %v10775_v55 = vld [vmem:[%s16137_s3 + $0xa4] sm:$0xf]  ;;  %v9910_v52 = vor.u32 %v10777_v56, %v9909_v14  ;;  %v6229_v6 = vadd.f32 %v6228_v7, %v6216_v18  ;;  %v9845_v3 = vld [vmem:[%s16137_s3 + $0x20] sm:$0xf]  ;;  %v9951_v14 = vld [vmem:[%s16137_s3 + $0xf8] sm:$0xf0] }
 0x645   :  { %6579 = vmatpush.bf16.xpose.msrb.mxu1 %v9946_v31  ;;  %6592 = vmatpush.bf16.xpose.msrb.mxu2 %v9950_v26  ;;  %v10759_v31 = vld [vmem:[%s16137_s3 + $0x24] sm:$0xf]  ;;  %v9847_v26 = vld [vmem:[%s16137_s3 + $0x30] sm:$0xf0]  ;;  %v9846_v5 = vor.u32 %v10761_v27, %v9845_v3  ;;  %v6362_v7 = vmax.f32 %v12776_v1, 0.0  ;;  %v9922_v1 = vor.u32 %v10776_v23, %v9919_v17 }
 0x646   :  { %6344 = vmatmul.bf16.vlgmr.msra.gmra.mxu2 %v12129_v60  ;;  %9826 = vmatmul.msk.bf16.vlgmr.msra.gmra.mxu3 %vm4962_vm0, %v12322_v45  ;;  %v9911_v60 = vld [vmem:[%s16137_s3 + $0xb0] sm:$0xf0]  ;;  %v9917_v45 = vld [vmem:[%s16137_s3 + $0xa8] sm:$0xf]  ;;  %v9850_v10 = vor.u32 %v10759_v31, %v9847_v26 }
 0x647   :  { %v9914_v46 = vor.u32 %v10775_v55, %v9911_v60  ;;  %v9918_v2 = vor.u32 %v10778_v48, %v9917_v45  ;;  %v6241_v28 = vpop.f32.mrf.mxu2  ;;  %v9831_v56 = vld [vmem:[%s16137_s3 + $0x10] sm:$0xf0]  ;;  %v9837_v55 = vld [vmem:[%s16137_s3 + $0x8] sm:$0xf]  ;;  %v10758_v60 = vld [vmem:[%s16137_s3 + $0x14] sm:$0xf0]  ;;  %v6366_v53 = vpack.c.bf16 %v6362_v7, %v6362_v7 }
 0x648   :  { %v6242_v32 = vadd.f32 %v6241_v28, %v6229_v6  ;;  %v6217_v33 = vpop.f32.mrf.mxu0  ;;  %v6363_v6 = vmax.f32 %v13984_v38, 0.0  ;;  %v10772_v38 = vld [vmem:[%s16137_s3 + $0x8c] sm:$0xf] }
 0x649   :  { %v9906_v28 = vor.u32 %v10772_v38, %v9903_v47 }
 0x64a   :  { %v6254_v0 = vpop.f32.mrf.mxu3  ;;  %v6367_v21 = vpack.c.bf16 %v6363_v6, %v6363_v6 }
 0x64b   :  { %v6230_v13 = vpop.f32.mrf.mxu1  ;;  %v16002_v34 = vadd.f32 %v6254_v0, %v6242_v32  ;;  %v9887_v32 = vld [vmem:[%s16137_s3 + $0x78] sm:$0xf0] }
 0x64c   :  { %6567 = vmatpush.bf16.xpose.msrb.mxu0 %v9926_v9  ;;  %v10757_v9 = vld [vmem:[%s16137_s3 + $0xc] sm:$0xf0] }
 0x64d   :  { %6580 = vmatpush.bf16.xpose.msrb.mxu1 %v9930_v22  ;;  %6593 = vmatpush.bf16.xpose.msrb.mxu2 %v9934_v35  ;;  %v10755_v22 = vld [vmem:[%s16137_s3 + $0x4] sm:$0xf]  ;;  %v10784_v35 = vld [vmem:[%s16137_s3 + $0xec] sm:$0xf]  ;;  %v9830_v48 = vor.u32 %v10757_v9, %v9829_v19 }
 0x64e   :  { %v9954_v45 = vor.u32 %v10784_v35, %v9951_v14 }
 0x64f   :  { %v6243_v20 = vpop.f32.mrf.mxu2 }
 0x650   :  { %6605 = vmatpush.bf16.xpose.msrb.mxu3 %v9954_v45 }
 0x652   :  { %v6256_v51 = vpop.f32.mrf.mxu3 }
 0x653   :  { %v10756_v51 = vld [vmem:[%s16137_s3 + $0xc] sm:$0xf] }
 0x654   :  { %6568 = vmatpush.bf16.xpose.msrb.mxu0 %v9910_v52  ;;  %v9834_v52 = vor.u32 %v10755_v22, %v9831_v56  ;;  %v9842_v8 = vor.u32 %v10756_v51, %v9839_v4 }
 0x655   :  { %6581 = vmatpush.bf16.xpose.msrb.mxu1 %v9914_v46  ;;  %6594 = vmatpush.bf16.xpose.msrb.mxu2 %v9918_v2  ;;  %v9838_v46 = vor.u32 %v10758_v60, %v9837_v55  ;;  %v10780_v2 = vld [vmem:[%s16137_s3 + $0xcc] sm:$0xf] }
 0x656   :  { %v9938_v18 = vor.u32 %v10780_v2, %v9935_v16 }
 0x658   :  { %6606 = vmatpush.bf16.xpose.msrb.mxu3 %v9938_v18 }
 0x65c   :  { %6569 = vmatpush.bf16.xpose.msrb.mxu0 %v9894_v24 }
 0x65d   :  { %6582 = vmatpush.bf16.xpose.msrb.mxu1 %v9898_v29  ;;  %6595 = vmatpush.bf16.xpose.msrb.mxu2 %v9902_v30  ;;  %v10768_v30 = vld [vmem:[%s16137_s3 + $0x6c] sm:$0xf] }
 0x65e   :  { %v9890_v13 = vor.u32 %v10768_v30, %v9887_v32 }
 0x660   :  { %6607 = vmatpush.bf16.xpose.msrb.mxu3 %v9922_v1 }
 0x664   :  { %6570 = vmatpush.bf16.xpose.msrb.mxu0 %v9878_v25  ;;  %v9874_v25 = vor.u32 %v10764_v15, %v9871_v42 }
 0x665   :  { %6583 = vmatpush.bf16.xpose.msrb.mxu1 %v9882_v40  ;;  %6596 = vmatpush.bf16.xpose.msrb.mxu2 %v9886_v43  ;;  %v10760_v40 = vld [vmem:[%s16137_s3 + $0x2c] sm:$0xf]  ;;  %v9855_v43 = vld [vmem:[%s16137_s3 + $0x38] sm:$0xf0] }
 0x666   :  { %v9858_v20 = vor.u32 %v10760_v40, %v9855_v43 }
 0x668   :  { %6608 = vmatpush.bf16.xpose.msrb.mxu3 %v9906_v28 }
 0x66c   :  { %6571 = vmatpush.bf16.xpose.msrb.mxu0 %v9862_v58 }
 0x66d   :  { %6584 = vmatpush.bf16.xpose.msrb.mxu1 %v9866_v61  ;;  %6597 = vmatpush.bf16.xpose.msrb.mxu2 %v9870_v62 }
 0x670   :  { %6609 = vmatpush.bf16.xpose.msrb.mxu3 %v9890_v13 }
 0x674   :  { %6572 = vmatpush.bf16.xpose.msrb.mxu0 %v9846_v5 }
 0x675   :  { %6585 = vmatpush.bf16.xpose.msrb.mxu1 %v9850_v10  ;;  %6598 = vmatpush.bf16.xpose.msrb.mxu2 %v9854_v11 }
 0x678   :  { %6610 = vmatpush.bf16.xpose.msrb.mxu3 %v9874_v25 }
 0x67c   :  { %6573 = vmatpush.bf16.xpose.msrb.mxu0 %v9830_v48 }
 0x67d   :  { %6586 = vmatpush.bf16.xpose.msrb.mxu1 %v9834_v52  ;;  %6599 = vmatpush.bf16.xpose.msrb.mxu2 %v9838_v46 }
 0x680   :  { %v6267_v24 = vpop.f32.mrf.mxu0  ;;  %6611 = vmatpush.bf16.xpose.msrb.mxu3 %v9858_v20 }
 0x681   :  { %v6268_v50 = vadd.f32 %v6267_v24, %v16002_v34  ;;  %v10787_v34 = vld [vmem:[%s16138_s4] ss:$0 sm:$0xff] }
 0x683   :  { %6574 = vmatmul.bf16.vlgmr.msrb.gmra.mxu0 %v6366_v53  ;;  %v6280_v29 = vpop.f32.mrf.mxu1 }
 0x684   :  { %6587 = vmatmul.bf16.vlgmr.msrb.gmra.mxu1 %v6367_v21  ;;  %6600 = vmatmul.bf16.vlgmr.msrb.gmra.mxu2 %v6368_v49  ;;  %v6281_v37 = vadd.f32 %v6280_v29, %v6268_v50 }
 0x687   :  { %v6293_v0 = vpop.f32.mrf.mxu2 }
 0x688   :  { %v6269_v36 = vpop.f32.mrf.mxu0  ;;  %6612 = vmatpush.bf16.xpose.msrb.mxu3 %v9842_v8  ;;  %v6294_v57 = vadd.f32 %v6293_v0, %v6281_v37 }
 0x68a   :  { %v6306_v33 = vpop.f32.mrf.mxu3 }
 0x68b   :  { %v6282_v39 = vpop.f32.mrf.mxu1  ;;  %v6307_v59 = vadd.f32 %v6306_v33, %v6294_v57 }
 0x68f   :  { %v6295_v63 = vpop.f32.mrf.mxu2 }
 0x692   :  { %v6308_v44 = vpop.f32.mrf.mxu3 }
 0x6c0   :  { %v6319_v58 = vpop.f32.mrf.mxu0 }
 0x6c1   :  { %v6332_v61 = vpop.f32.mrf.mxu1  ;;  %v6320_v62 = vadd.f32 %v6319_v58, %v6307_v59 }
 0x6c3   :  { %v6333_v3 = vadd.f32 %v6332_v61, %v6320_v62 }
 0x6c8   :  { %v6321_v41 = vpop.f32.mrf.mxu0 }
 0x6c9   :  { %v6345_v27 = vpop.f32.mrf.mxu2  ;;  %v6358_v26 = vpop.f32.mrf.mxu3 }
 0x6ca   :  { %v6346_v31 = vadd.f32 %v6345_v27, %v6333_v3  ;;  %v6334_v54 = vpop.f32.mrf.mxu1 }
 0x6cc   :  { %v6359_v5 = vadd.f32 %v6358_v26, %v6346_v31 }
 0x6ce   :  { %v6365_v10 = vmax.f32 %v6359_v5, 0.0 }
 0x6d0   :  { %v6369_v11 = vpack.c.bf16 %v6365_v10, %v6365_v10 }
 0x6d1   :  { %v6347_v19 = vpop.f32.mrf.mxu2  ;;  %v6360_v9 = vpop.f32.mrf.mxu3 }
 0x6d2   :  { %6613 = vmatmul.bf16.vlgmr.msrb.gmra.mxu3 %v6369_v11 }
 0x700   :  { %v6575_v22 = vpop.f32.mrf.mxu0 }
 0x701   :  { %v6576_v35 = vadd.f32 %v10787_v34, %v6575_v22  ;;  %v6588_v14 = vpop.f32.mrf.mxu1 }
 0x703   :  { %v6589_v56 = vadd.f32 %v6588_v14, %v6576_v35 }
 0x707   :  { %v6601_v55 = vpop.f32.mrf.mxu2 }
 0x708   :  { %v6602_v60 = vadd.f32 %v6601_v55, %v6589_v56  ;;  %v6577_v45 = vpop.f32.mrf.mxu0 }
 0x709   :  { %v6590_v48 = vpop.f32.mrf.mxu1 }
 0x70f   :  { %v6603_v52 = vpop.f32.mrf.mxu2 }
 0x755   :  { %v6614_v46 = vpop.f32.mrf.mxu3 }
 0x756   :  { %v6615_v2 = vadd.f32 %v6614_v46, %v6602_v60 }
 0x758   :  { %6618 = vst [vmem:[%s16139_s5] sm:$0xff] %v6615_v2 }
 0x75d   :  { %v6616_v16 = vpop.f32.mrf.mxu3 }

</bundles_post_ra>
